<compile_context>
chip_gen: v5e
topology: v5e:2x2
jax: 0.10.0
libtpu: 0.0.40
codegen_flags: <defaults>
</compile_context>

<pallas_src>
import functools

import jax
import jax.numpy as jnp
from jax import lax
from jax.experimental import pallas as pl
from jax.experimental.pallas import tpu as pltpu


def _round_up(x, m):
    return ((x + m - 1) // m) * m


# ---------------------------------------------------------------------------
# Fused kernel.  Grid over H-row tiles of the raw NCHW input ("arbitrary"
# reduction axis, f32 VMEM accumulator):
#   every step:  acc[b,c,r,w] += sum over 8-row groups of the tile   (VPU, f32)
#   last step:   fold rows (r -> dy), fold columns via the p-periodic expanded
#                embed weight on the MXU -> global_feat; BatchNorm1d (train,
#                f32 batch stats); bias-free classifier into a lane-dense
#                128-padded block.
# ---------------------------------------------------------------------------
def _head_kernel(x_ref, w_exp_ref, b_emb_ref, gamma_ref, beta_ref, w_cls_ref,
                 cls_ref, feat_ref, acc_ref, *, patch, inv_p):
    k = pl.program_id(0)
    p = patch
    B, C, TH, W = x_ref.shape
    g = acc_ref.shape[2]              # row-group size (p, or 8 when p | 8)
    n_groups = TH // g

    @pl.when(k == 0)
    def _init():
        acc_ref[...] = jnp.zeros_like(acc_ref)

    # --- streaming phase: pure elementwise f32 adds, one g-row group at a
    # time (no full-tile widening, no reshapes, no casts). ---
    def _accum(j, carry):
        start = pl.multiple_of(j * g, g)
        acc_ref[...] += x_ref[:, :, pl.ds(start, g), :]
        return carry

    lax.fori_loop(0, n_groups, _accum, 0, unroll=(n_groups <= 8))

    @pl.when(k == pl.num_programs(0) - 1)
    def _finalize():
        # global_feat = mean-pooled-patchified(x) @ W_embed + b_embed.
        # The dx-fold (w -> w % p) is absorbed into the p-periodic expanded
        # weight w_exp[c, dy] (W, F), so each term is a plain 2-D MXU dot.
        feat_ref[...] = jnp.zeros_like(feat_ref) + b_emb_ref[...]
        for c in range(C):
            for dy in range(p):
                row = acc_ref[:, c, dy, :]                    # (B, W) f32
                for gi in range(1, g // p):                   # fold r -> dy
                    row = row + acc_ref[:, c, dy + gi * p, :]
                row = (row * inv_p).astype(jnp.bfloat16)      # mean over patches
                feat_ref[...] += jnp.dot(row, w_exp_ref[c, dy],
                                         preferred_element_type=jnp.float32)

        gf = feat_ref[...]                                    # (B, F) f32

        # self.bottleneck = nn.BatchNorm1d(in_planes), training mode:
        # batch statistics, biased variance, eps=1e-5, gamma=1 / beta=0
        # (weights_init_kaiming).  All stats in f32.
        mu = jnp.mean(gf, axis=0, keepdims=True)
        diff = gf - mu
        var = jnp.mean(diff * diff, axis=0, keepdims=True)
        feat = diff * lax.rsqrt(var + 1e-5) * gamma_ref[...] + beta_ref[...]

        # self.classifier = nn.Linear(in_planes, num_classes, bias=False),
        # written into a lane-dense (128-padded) output block.
        cls = jnp.dot(feat.astype(jnp.bfloat16), w_cls_ref[...],
                      preferred_element_type=jnp.float32)
        cls_ref[...] = cls.astype(cls_ref.dtype)


def swinv2_reid_forward(x_nchw, params, *, patch=4):
    """Forward pass (training branch): returns (cls_score, global_feat)."""
    B, C, H, W = x_nchw.shape
    p = patch
    assert H % p == 0 and W % p == 0, "image size must be divisible by patch"
    P = (H // p) * (W // p)
    D = C * p * p
    F = params['w_emb'].shape[1]
    CP = params['w_cls'].shape[1]
    num_classes = params['num_classes']
    assert params['w_emb'].shape[0] == D

    # Row-group size for the in-kernel patchify-pool.
    if p % 8 == 0:
        g = p                                   # full-sublane groups
    elif 8 % p == 0 and H % 8 == 0:
        g = 8                                   # 8-row groups, fold r -> r % p later
    else:
        g = p                                   # partial-sublane fallback

    # VMEM-aware H-tile: largest divisor of H that is a multiple of g, legal
    # for BlockSpec (multiple of 8 or the full H) and whose double-buffered
    # input block fits the per-generation budget.
    try:
        vmem_cap = int(getattr(pltpu.get_tpu_info(), "vmem_capacity_bytes",
                               64 * 2**20))
    except Exception:  # pragma: no cover - conservative fallback
        vmem_cap = 64 * 2**20
    input_budget = max(2 * 2**20, min(vmem_cap // 4, 32 * 2**20))
    row_bytes = B * C * W * 4
    max_rows = max(g, input_budget // (2 * row_bytes))

    TH = None
    for t in range(H, 0, -1):
        if H % t or t % g:
            continue
        if (t % 8) and (t != H):
            continue
        if t <= max_rows:
            TH = t
            break
    if TH is None:
        cands = [t for t in range(1, H + 1)
                 if H % t == 0 and t % g == 0 and (t % 8 == 0 or t == H)]
        TH = min(cands) if cands else H

    grid = (H // TH,)

    # p-periodic expanded embed weight: w_exp[c, dy, w, f] = w_emb[(c,dy,w%p), f]
    # (tiny one-off XLA tile; lets the finalize stay 2-D-matmul-only).
    w_exp = jnp.tile(params['w_emb'].reshape(C, p, p, F), (1, 1, W // p, 1))

    # Explicit VMEM budget: double-buffered input + resident weights/outputs +
    # scratch, with headroom (v7x: 64 MiB physical, 32 MiB default scoped).
    need = (2 * B * C * TH * W * 4
            + 2 * (C * p * W * F * 2 + F * CP * 2 + 3 * F * 4)
            + 2 * (B * CP * 4 + B * F * 4)
            + B * C * g * W * 4)
    vmem_limit = int(min(max(int(need * 1.5), 16 * 2**20), vmem_cap))

    flops = 2 * B * C * p * W * F + 2 * B * F * CP + B * C * H * W
    bytes_accessed = (B * C * H * W * 4                 # f32 activation stream
                      + C * p * W * F * 2 + F * CP * 2  # bf16 weights
                      + 3 * F * 4                       # bias/gamma/beta
                      + B * CP * 4 + B * F * 4)         # outputs

    kernel = functools.partial(_head_kernel, patch=p, inv_p=1.0 / P)

    cls_pad, global_feat = pl.pallas_call(
        kernel,
        out_shape=(jax.ShapeDtypeStruct((B, CP), jnp.float32),
                   jax.ShapeDtypeStruct((B, F), jnp.float32)),
        grid_spec=pltpu.PrefetchScalarGridSpec(
            num_scalar_prefetch=0,
            grid=grid,
            in_specs=[
                pl.BlockSpec((B, C, TH, W), lambda k: (0, 0, k, 0)),   # raw NCHW
                pl.BlockSpec((C, p, W, F), lambda k: (0, 0, 0, 0)),    # w_exp (bf16)
                pl.BlockSpec((1, F), lambda k: (0, 0)),                # b_emb
                pl.BlockSpec((1, F), lambda k: (0, 0)),                # gamma
                pl.BlockSpec((1, F), lambda k: (0, 0)),                # beta
                pl.BlockSpec((F, CP), lambda k: (0, 0)),               # w_cls (bf16)
            ],
            out_specs=[
                pl.BlockSpec((B, CP), lambda k: (0, 0)),               # cls (lane-dense)
                pl.BlockSpec((B, F), lambda k: (0, 0)),                # global_feat
            ],
            scratch_shapes=[pltpu.VMEM((B, C, g, W), jnp.float32)],    # pool acc
        ),
        compiler_params=pltpu.CompilerParams(
            dimension_semantics=("arbitrary",),                        # reduction axis
            vmem_limit_bytes=vmem_limit,
        ),
        cost_estimate=pl.CostEstimate(
            flops=flops, transcendentals=0, bytes_accessed=bytes_accessed),
    )(x_nchw.astype(jnp.float32), w_exp, params['b_emb'],
      params['gamma'], params['beta'], params['w_cls'])

    cls_score = cls_pad[:, :num_classes]
    return cls_score, global_feat


def init_params(key, *, channels=4, patch=4, in_planes=768, num_classes=16):
    """Weights pre-transposed / lane-padded / pre-cast once (not per forward)."""
    D = channels * patch * patch
    CP = _round_up(num_classes, 128)
    k_emb, k_cls = jax.random.split(key, 2)

    # conv-style kaiming (fan_in) for the patch-embed proxy; rows ordered (c, dy, dx).
    w_emb = (jax.random.normal(k_emb, (D, in_planes), jnp.float32)
             * (2.0 / D) ** 0.5).astype(jnp.bfloat16)
    b_emb = jnp.zeros((1, in_planes), jnp.float32)

    # weights_init_kaiming on BatchNorm1d: weight=1, bias=0.
    gamma = jnp.ones((1, in_planes), jnp.float32)
    beta = jnp.zeros((1, in_planes), jnp.float32)

    # weights_init_classifier on Linear: normal(std=0.001), no bias.
    # Stored pre-transposed to (F, Cpad) with zero-padded lane columns.
    w_cls = jax.random.normal(k_cls, (num_classes, in_planes), jnp.float32) * 0.001
    w_cls_t = jnp.pad(w_cls.T, ((0, 0), (0, CP - num_classes))).astype(jnp.bfloat16)

    return dict(w_emb=w_emb, b_emb=b_emb, gamma=gamma, beta=beta,
                w_cls=w_cls_t, num_classes=num_classes)


if __name__ == "__main__":
    key = jax.random.PRNGKey(0)
    k_x, k_p = jax.random.split(key)

    B, C, H, W = 2, 4, 16, 16          # small synthetic image batch (NCHW)
    num_classes, in_planes = 16, 768   # in_planes matches build_transformer default

    x = jax.random.normal(k_x, (B, C, H, W), jnp.float32)
    params = init_params(k_p, channels=C, patch=4,
                         in_planes=in_planes, num_classes=num_classes)

    fwd = jax.jit(lambda xx: swinv2_reid_forward(xx, params))
    cls_score, global_feat = fwd(x)
    jax.block_until_ready((cls_score, global_feat))

    assert cls_score.shape == (B, num_classes)
    assert global_feat.shape == (B, in_planes)
    print("KERNEL_OK")
</pallas_src>

<mosaic_0001>
module attributes {stable_mosaic.version = 11 : i64} {
  func.func @_head_kernel(%arg0: i32, %arg1: memref<2x4x16x16xf32, #tpu.memory_space<vmem>>, %arg2: memref<4x4x16x768xbf16, #tpu.memory_space<vmem>>, %arg3: memref<1x768xf32, #tpu.memory_space<vmem>>, %arg4: memref<1x768xf32, #tpu.memory_space<vmem>>, %arg5: memref<1x768xf32, #tpu.memory_space<vmem>>, %arg6: memref<768x128xbf16, #tpu.memory_space<vmem>>, %arg7: memref<2x128xf32, #tpu.memory_space<vmem>>, %arg8: memref<2x768xf32, #tpu.memory_space<vmem>>, %arg9: memref<2x4x8x16xf32, #tpu.memory_space<vmem>>) attributes {dimension_semantics = [#tpu.dimension_semantics<arbitrary>], iteration_bounds = array<i64: 1>, scalar_prefetch = 0 : i64, scratch_operands = 1 : i64, tpu.core_type = #tpu.core_type<tc>, window_params = [{transform_indices = @transform_0, window_bounds = array<i64: 2, 4, 16, 16>}, {pipeline_mode = #tpu.pipeline_mode<synchronous>, transform_indices = @transform_1, window_bounds = array<i64: 4, 4, 16, 768>}, {pipeline_mode = #tpu.pipeline_mode<synchronous>, transform_indices = @transform_2, window_bounds = array<i64: 1, 768>}, {pipeline_mode = #tpu.pipeline_mode<synchronous>, transform_indices = @transform_3, window_bounds = array<i64: 1, 768>}, {pipeline_mode = #tpu.pipeline_mode<synchronous>, transform_indices = @transform_4, window_bounds = array<i64: 1, 768>}, {pipeline_mode = #tpu.pipeline_mode<synchronous>, transform_indices = @transform_5, window_bounds = array<i64: 768, 128>}, {pipeline_mode = #tpu.pipeline_mode<synchronous>, transform_indices = @transform_6, window_bounds = array<i64: 2, 128>}, {pipeline_mode = #tpu.pipeline_mode<synchronous>, transform_indices = @transform_7, window_bounds = array<i64: 2, 768>}]} {
    %c0_i32 = arith.constant 0 : i32
    %0 = arith.cmpi eq, %arg0, %c0_i32 : i32
    %1 = arith.extui %0 : i1 to i32
    %c0_i32_0 = arith.constant 0 : i32
    %2 = arith.cmpi ne, %1, %c0_i32_0 : i32
    scf.if %2 {
      %cst = arith.constant 0.000000e+00 : f32
      %20 = vector.broadcast %cst : f32 to vector<2x4x8x16xf32>
      %c0_26 = arith.constant 0 : index
      %c0_27 = arith.constant 0 : index
      %c0_28 = arith.constant 0 : index
      %c0_29 = arith.constant 0 : index
      %21 = vector.load %arg9[%c0_26, %c0_27, %c0_28, %c0_29] : memref<2x4x8x16xf32, #tpu.memory_space<vmem>>, vector<2x4x8x16xf32>
      tpu.vector_store %arg9[%c0_26, %c0_27, %c0_28, %c0_29], %20 {strides = array<i32>} : memref<2x4x8x16xf32, #tpu.memory_space<vmem>>, vector<2x4x8x16xf32>,
    } else {
    }
    %c0_i32_1 = arith.constant 0 : i32
    %c8_i32 = arith.constant 8 : i32
    %3 = arith.muli %c0_i32_1, %c8_i32 : i32
    %4 = tpu.assume_multiple %3, 8 : i32
    %c0 = arith.constant 0 : index
    %c0_2 = arith.constant 0 : index
    %c0_3 = arith.constant 0 : index
    %c0_4 = arith.constant 0 : index
    %5 = vector.load %arg9[%c0, %c0_2, %c0_3, %c0_4] : memref<2x4x8x16xf32, #tpu.memory_space<vmem>>, vector<2x4x8x16xf32>
    %c0_5 = arith.constant 0 : index
    %c0_6 = arith.constant 0 : index
    %6 = arith.index_cast %4 : i32 to index
    %c0_7 = arith.constant 0 : index
    %7 = vector.load %arg1[%c0_5, %c0_6, %6, %c0_7] : memref<2x4x16x16xf32, #tpu.memory_space<vmem>>, vector<2x4x8x16xf32>
    %8 = arith.addf %5, %7 : vector<2x4x8x16xf32>
    %c0_8 = arith.constant 0 : index
    %c0_9 = arith.constant 0 : index
    %c0_10 = arith.constant 0 : index
    %c0_11 = arith.constant 0 : index
    %9 = vector.load %arg9[%c0_8, %c0_9, %c0_10, %c0_11] : memref<2x4x8x16xf32, #tpu.memory_space<vmem>>, vector<2x4x8x16xf32>
    tpu.vector_store %arg9[%c0_8, %c0_9, %c0_10, %c0_11], %8 {strides = array<i32>} : memref<2x4x8x16xf32, #tpu.memory_space<vmem>>, vector<2x4x8x16xf32>,
    %c1_i32 = arith.constant 1 : i32
    %c8_i32_12 = arith.constant 8 : i32
    %10 = arith.muli %c1_i32, %c8_i32_12 : i32
    %11 = tpu.assume_multiple %10, 8 : i32
    %c0_13 = arith.constant 0 : index
    %c0_14 = arith.constant 0 : index
    %c0_15 = arith.constant 0 : index
    %c0_16 = arith.constant 0 : index
    %12 = vector.load %arg9[%c0_13, %c0_14, %c0_15, %c0_16] : memref<2x4x8x16xf32, #tpu.memory_space<vmem>>, vector<2x4x8x16xf32>
    %c0_17 = arith.constant 0 : index
    %c0_18 = arith.constant 0 : index
    %13 = arith.index_cast %11 : i32 to index
    %c0_19 = arith.constant 0 : index
    %14 = vector.load %arg1[%c0_17, %c0_18, %13, %c0_19] : memref<2x4x16x16xf32, #tpu.memory_space<vmem>>, vector<2x4x8x16xf32>
    %15 = arith.addf %12, %14 : vector<2x4x8x16xf32>
    %c0_20 = arith.constant 0 : index
    %c0_21 = arith.constant 0 : index
    %c0_22 = arith.constant 0 : index
    %c0_23 = arith.constant 0 : index
    %16 = vector.load %arg9[%c0_20, %c0_21, %c0_22, %c0_23] : memref<2x4x8x16xf32, #tpu.memory_space<vmem>>, vector<2x4x8x16xf32>
    tpu.vector_store %arg9[%c0_20, %c0_21, %c0_22, %c0_23], %15 {strides = array<i32>} : memref<2x4x8x16xf32, #tpu.memory_space<vmem>>, vector<2x4x8x16xf32>,
    %c2_i32 = arith.constant 2 : i32
    %c0_i32_24 = arith.constant 0 : i32
    %17 = arith.cmpi eq, %arg0, %c0_i32_24 : i32
    %18 = arith.extui %17 : i1 to i32
    %c0_i32_25 = arith.constant 0 : i32
    %19 = arith.cmpi ne, %18, %c0_i32_25 : i32
    scf.if %19 {
      %cst = arith.constant 0.000000e+00 : f32
      %20 = vector.broadcast %cst : f32 to vector<2x768xf32>
      %c0_26 = arith.constant 0 : index
      %c0_27 = arith.constant 0 : index
      %21 = vector.load %arg3[%c0_26, %c0_27] : memref<1x768xf32, #tpu.memory_space<vmem>>, vector<1x768xf32>
      %22 = vector.broadcast %21 : vector<1x768xf32> to vector<2x768xf32>
      %23 = arith.addf %20, %22 : vector<2x768xf32>
      %c0_28 = arith.constant 0 : index
      %c0_29 = arith.constant 0 : index
      %24 = vector.load %arg8[%c0_28, %c0_29] : memref<2x768xf32, #tpu.memory_space<vmem>>, vector<2x768xf32>
      tpu.vector_store %arg8[%c0_28, %c0_29], %23 {strides = array<i32>} : memref<2x768xf32, #tpu.memory_space<vmem>>, vector<2x768xf32>,
      %c0_30 = arith.constant 0 : index
      %c0_31 = arith.constant 0 : index
      %c0_32 = arith.constant 0 : index
      %c0_33 = arith.constant 0 : index
      %25 = vector.load %arg9[%c0_30, %c0_31, %c0_32, %c0_33] : memref<2x4x8x16xf32, #tpu.memory_space<vmem>>, vector<2x1x1x16xf32>
      %26 = vector.shape_cast %25 : vector<2x1x1x16xf32> to vector<2x16xf32>
      %c0_34 = arith.constant 0 : index
      %c0_35 = arith.constant 0 : index
      %c4 = arith.constant 4 : index
      %c0_36 = arith.constant 0 : index
      %27 = vector.load %arg9[%c0_34, %c0_35, %c4, %c0_36] : memref<2x4x8x16xf32, #tpu.memory_space<vmem>>, vector<2x1x1x16xf32>
      %28 = vector.shape_cast %27 : vector<2x1x1x16xf32> to vector<2x16xf32>
      %29 = arith.addf %26, %28 : vector<2x16xf32>
      %cst_37 = arith.constant 6.250000e-02 : f32
      %30 = vector.broadcast %cst_37 : f32 to vector<2x16xf32>
      %31 = arith.mulf %29, %30 : vector<2x16xf32>
      %32 = arith.truncf %31 : vector<2x16xf32> to vector<2x16xbf16>
      %c0_38 = arith.constant 0 : index
      %c0_39 = arith.constant 0 : index
      %33 = vector.load %arg8[%c0_38, %c0_39] : memref<2x768xf32, #tpu.memory_space<vmem>>, vector<2x768xf32>
      %c0_40 = arith.constant 0 : index
      %c0_41 = arith.constant 0 : index
      %c0_42 = arith.constant 0 : index
      %c0_43 = arith.constant 0 : index
      %34 = vector.load %arg2[%c0_40, %c0_41, %c0_42, %c0_43] : memref<4x4x16x768xbf16, #tpu.memory_space<vmem>>, vector<1x1x16x768xbf16>
      %35 = vector.shape_cast %34 : vector<1x1x16x768xbf16> to vector<16x768xbf16>
      %cst_44 = arith.constant dense<0.000000e+00> : vector<2x768xf32>
      %36 = tpu.matmul %32, %35, %cst_44 {dimension_numbers = #tpu.dot_dimension_numbers<[1], [0], [0], [1], [0, 0, 1, 1], [], []>} : vector<2x16xbf16>, vector<16x768xbf16>, vector<2x768xf32> -> vector<2x768xf32>
      %37 = arith.addf %33, %36 : vector<2x768xf32>
      %c0_45 = arith.constant 0 : index
      %c0_46 = arith.constant 0 : index
      %38 = vector.load %arg8[%c0_45, %c0_46] : memref<2x768xf32, #tpu.memory_space<vmem>>, vector<2x768xf32>
      tpu.vector_store %arg8[%c0_45, %c0_46], %37 {strides = array<i32>} : memref<2x768xf32, #tpu.memory_space<vmem>>, vector<2x768xf32>,
      %c0_47 = arith.constant 0 : index
      %c0_48 = arith.constant 0 : index
      %c1 = arith.constant 1 : index
      %c0_49 = arith.constant 0 : index
      %39 = vector.load %arg9[%c0_47, %c0_48, %c1, %c0_49] : memref<2x4x8x16xf32, #tpu.memory_space<vmem>>, vector<2x1x1x16xf32>
      %40 = vector.shape_cast %39 : vector<2x1x1x16xf32> to vector<2x16xf32>
      %c0_50 = arith.constant 0 : index
      %c0_51 = arith.constant 0 : index
      %c5 = arith.constant 5 : index
      %c0_52 = arith.constant 0 : index
      %41 = vector.load %arg9[%c0_50, %c0_51, %c5, %c0_52] : memref<2x4x8x16xf32, #tpu.memory_space<vmem>>, vector<2x1x1x16xf32>
      %42 = vector.shape_cast %41 : vector<2x1x1x16xf32> to vector<2x16xf32>
      %43 = arith.addf %40, %42 : vector<2x16xf32>
      %cst_53 = arith.constant 6.250000e-02 : f32
      %44 = vector.broadcast %cst_53 : f32 to vector<2x16xf32>
      %45 = arith.mulf %43, %44 : vector<2x16xf32>
      %46 = arith.truncf %45 : vector<2x16xf32> to vector<2x16xbf16>
      %c0_54 = arith.constant 0 : index
      %c0_55 = arith.constant 0 : index
      %47 = vector.load %arg8[%c0_54, %c0_55] : memref<2x768xf32, #tpu.memory_space<vmem>>, vector<2x768xf32>
      %c0_56 = arith.constant 0 : index
      %c1_57 = arith.constant 1 : index
      %c0_58 = arith.constant 0 : index
      %c0_59 = arith.constant 0 : index
      %48 = vector.load %arg2[%c0_56, %c1_57, %c0_58, %c0_59] : memref<4x4x16x768xbf16, #tpu.memory_space<vmem>>, vector<1x1x16x768xbf16>
      %49 = vector.shape_cast %48 : vector<1x1x16x768xbf16> to vector<16x768xbf16>
      %cst_60 = arith.constant dense<0.000000e+00> : vector<2x768xf32>
      %50 = tpu.matmul %46, %49, %cst_60 {dimension_numbers = #tpu.dot_dimension_numbers<[1], [0], [0], [1], [0, 0, 1, 1], [], []>} : vector<2x16xbf16>, vector<16x768xbf16>, vector<2x768xf32> -> vector<2x768xf32>
      %51 = arith.addf %47, %50 : vector<2x768xf32>
      %c0_61 = arith.constant 0 : index
      %c0_62 = arith.constant 0 : index
      %52 = vector.load %arg8[%c0_61, %c0_62] : memref<2x768xf32, #tpu.memory_space<vmem>>, vector<2x768xf32>
      tpu.vector_store %arg8[%c0_61, %c0_62], %51 {strides = array<i32>} : memref<2x768xf32, #tpu.memory_space<vmem>>, vector<2x768xf32>,
      %c0_63 = arith.constant 0 : index
      %c0_64 = arith.constant 0 : index
      %c2 = arith.constant 2 : index
      %c0_65 = arith.constant 0 : index
      %53 = vector.load %arg9[%c0_63, %c0_64, %c2, %c0_65] : memref<2x4x8x16xf32, #tpu.memory_space<vmem>>, vector<2x1x1x16xf32>
      %54 = vector.shape_cast %53 : vector<2x1x1x16xf32> to vector<2x16xf32>
      %c0_66 = arith.constant 0 : index
      %c0_67 = arith.constant 0 : index
      %c6 = arith.constant 6 : index
      %c0_68 = arith.constant 0 : index
      %55 = vector.load %arg9[%c0_66, %c0_67, %c6, %c0_68] : memref<2x4x8x16xf32, #tpu.memory_space<vmem>>, vector<2x1x1x16xf32>
      %56 = vector.shape_cast %55 : vector<2x1x1x16xf32> to vector<2x16xf32>
      %57 = arith.addf %54, %56 : vector<2x16xf32>
      %cst_69 = arith.constant 6.250000e-02 : f32
      %58 = vector.broadcast %cst_69 : f32 to vector<2x16xf32>
      %59 = arith.mulf %57, %58 : vector<2x16xf32>
      %60 = arith.truncf %59 : vector<2x16xf32> to vector<2x16xbf16>
      %c0_70 = arith.constant 0 : index
      %c0_71 = arith.constant 0 : index
      %61 = vector.load %arg8[%c0_70, %c0_71] : memref<2x768xf32, #tpu.memory_space<vmem>>, vector<2x768xf32>
      %c0_72 = arith.constant 0 : index
      %c2_73 = arith.constant 2 : index
      %c0_74 = arith.constant 0 : index
      %c0_75 = arith.constant 0 : index
      %62 = vector.load %arg2[%c0_72, %c2_73, %c0_74, %c0_75] : memref<4x4x16x768xbf16, #tpu.memory_space<vmem>>, vector<1x1x16x768xbf16>
      %63 = vector.shape_cast %62 : vector<1x1x16x768xbf16> to vector<16x768xbf16>
      %cst_76 = arith.constant dense<0.000000e+00> : vector<2x768xf32>
      %64 = tpu.matmul %60, %63, %cst_76 {dimension_numbers = #tpu.dot_dimension_numbers<[1], [0], [0], [1], [0, 0, 1, 1], [], []>} : vector<2x16xbf16>, vector<16x768xbf16>, vector<2x768xf32> -> vector<2x768xf32>
      %65 = arith.addf %61, %64 : vector<2x768xf32>
      %c0_77 = arith.constant 0 : index
      %c0_78 = arith.constant 0 : index
      %66 = vector.load %arg8[%c0_77, %c0_78] : memref<2x768xf32, #tpu.memory_space<vmem>>, vector<2x768xf32>
      tpu.vector_store %arg8[%c0_77, %c0_78], %65 {strides = array<i32>} : memref<2x768xf32, #tpu.memory_space<vmem>>, vector<2x768xf32>,
      %c0_79 = arith.constant 0 : index
      %c0_80 = arith.constant 0 : index
      %c3 = arith.constant 3 : index
      %c0_81 = arith.constant 0 : index
      %67 = vector.load %arg9[%c0_79, %c0_80, %c3, %c0_81] : memref<2x4x8x16xf32, #tpu.memory_space<vmem>>, vector<2x1x1x16xf32>
      %68 = vector.shape_cast %67 : vector<2x1x1x16xf32> to vector<2x16xf32>
      %c0_82 = arith.constant 0 : index
      %c0_83 = arith.constant 0 : index
      %c7 = arith.constant 7 : index
      %c0_84 = arith.constant 0 : index
      %69 = vector.load %arg9[%c0_82, %c0_83, %c7, %c0_84] : memref<2x4x8x16xf32, #tpu.memory_space<vmem>>, vector<2x1x1x16xf32>
      %70 = vector.shape_cast %69 : vector<2x1x1x16xf32> to vector<2x16xf32>
      %71 = arith.addf %68, %70 : vector<2x16xf32>
      %cst_85 = arith.constant 6.250000e-02 : f32
      %72 = vector.broadcast %cst_85 : f32 to vector<2x16xf32>
      %73 = arith.mulf %71, %72 : vector<2x16xf32>
      %74 = arith.truncf %73 : vector<2x16xf32> to vector<2x16xbf16>
      %c0_86 = arith.constant 0 : index
      %c0_87 = arith.constant 0 : index
      %75 = vector.load %arg8[%c0_86, %c0_87] : memref<2x768xf32, #tpu.memory_space<vmem>>, vector<2x768xf32>
      %c0_88 = arith.constant 0 : index
      %c3_89 = arith.constant 3 : index
      %c0_90 = arith.constant 0 : index
      %c0_91 = arith.constant 0 : index
      %76 = vector.load %arg2[%c0_88, %c3_89, %c0_90, %c0_91] : memref<4x4x16x768xbf16, #tpu.memory_space<vmem>>, vector<1x1x16x768xbf16>
      %77 = vector.shape_cast %76 : vector<1x1x16x768xbf16> to vector<16x768xbf16>
      %cst_92 = arith.constant dense<0.000000e+00> : vector<2x768xf32>
      %78 = tpu.matmul %74, %77, %cst_92 {dimension_numbers = #tpu.dot_dimension_numbers<[1], [0], [0], [1], [0, 0, 1, 1], [], []>} : vector<2x16xbf16>, vector<16x768xbf16>, vector<2x768xf32> -> vector<2x768xf32>
      %79 = arith.addf %75, %78 : vector<2x768xf32>
      %c0_93 = arith.constant 0 : index
      %c0_94 = arith.constant 0 : index
      %80 = vector.load %arg8[%c0_93, %c0_94] : memref<2x768xf32, #tpu.memory_space<vmem>>, vector<2x768xf32>
      tpu.vector_store %arg8[%c0_93, %c0_94], %79 {strides = array<i32>} : memref<2x768xf32, #tpu.memory_space<vmem>>, vector<2x768xf32>,
      %c0_95 = arith.constant 0 : index
      %c1_96 = arith.constant 1 : index
      %c0_97 = arith.constant 0 : index
      %c0_98 = arith.constant 0 : index
      %81 = vector.load %arg9[%c0_95, %c1_96, %c0_97, %c0_98] : memref<2x4x8x16xf32, #tpu.memory_space<vmem>>, vector<2x1x1x16xf32>
      %82 = vector.shape_cast %81 : vector<2x1x1x16xf32> to vector<2x16xf32>
      %c0_99 = arith.constant 0 : index
      %c1_100 = arith.constant 1 : index
      %c4_101 = arith.constant 4 : index
      %c0_102 = arith.constant 0 : index
      %83 = vector.load %arg9[%c0_99, %c1_100, %c4_101, %c0_102] : memref<2x4x8x16xf32, #tpu.memory_space<vmem>>, vector<2x1x1x16xf32>
      %84 = vector.shape_cast %83 : vector<2x1x1x16xf32> to vector<2x16xf32>
      %85 = arith.addf %82, %84 : vector<2x16xf32>
      %cst_103 = arith.constant 6.250000e-02 : f32
      %86 = vector.broadcast %cst_103 : f32 to vector<2x16xf32>
      %87 = arith.mulf %85, %86 : vector<2x16xf32>
      %88 = arith.truncf %87 : vector<2x16xf32> to vector<2x16xbf16>
      %c0_104 = arith.constant 0 : index
      %c0_105 = arith.constant 0 : index
      %89 = vector.load %arg8[%c0_104, %c0_105] : memref<2x768xf32, #tpu.memory_space<vmem>>, vector<2x768xf32>
      %c1_106 = arith.constant 1 : index
      %c0_107 = arith.constant 0 : index
      %c0_108 = arith.constant 0 : index
      %c0_109 = arith.constant 0 : index
      %90 = vector.load %arg2[%c1_106, %c0_107, %c0_108, %c0_109] : memref<4x4x16x768xbf16, #tpu.memory_space<vmem>>, vector<1x1x16x768xbf16>
      %91 = vector.shape_cast %90 : vector<1x1x16x768xbf16> to vector<16x768xbf16>
      %cst_110 = arith.constant dense<0.000000e+00> : vector<2x768xf32>
      %92 = tpu.matmul %88, %91, %cst_110 {dimension_numbers = #tpu.dot_dimension_numbers<[1], [0], [0], [1], [0, 0, 1, 1], [], []>} : vector<2x16xbf16>, vector<16x768xbf16>, vector<2x768xf32> -> vector<2x768xf32>
      %93 = arith.addf %89, %92 : vector<2x768xf32>
      %c0_111 = arith.constant 0 : index
      %c0_112 = arith.constant 0 : index
      %94 = vector.load %arg8[%c0_111, %c0_112] : memref<2x768xf32, #tpu.memory_space<vmem>>, vector<2x768xf32>
      tpu.vector_store %arg8[%c0_111, %c0_112], %93 {strides = array<i32>} : memref<2x768xf32, #tpu.memory_space<vmem>>, vector<2x768xf32>,
      %c0_113 = arith.constant 0 : index
      %c1_114 = arith.constant 1 : index
      %c1_115 = arith.constant 1 : index
      %c0_116 = arith.constant 0 : index
      %95 = vector.load %arg9[%c0_113, %c1_114, %c1_115, %c0_116] : memref<2x4x8x16xf32, #tpu.memory_space<vmem>>, vector<2x1x1x16xf32>
      %96 = vector.shape_cast %95 : vector<2x1x1x16xf32> to vector<2x16xf32>
      %c0_117 = arith.constant 0 : index
      %c1_118 = arith.constant 1 : index
      %c5_119 = arith.constant 5 : index
      %c0_120 = arith.constant 0 : index
      %97 = vector.load %arg9[%c0_117, %c1_118, %c5_119, %c0_120] : memref<2x4x8x16xf32, #tpu.memory_space<vmem>>, vector<2x1x1x16xf32>
      %98 = vector.shape_cast %97 : vector<2x1x1x16xf32> to vector<2x16xf32>
      %99 = arith.addf %96, %98 : vector<2x16xf32>
      %cst_121 = arith.constant 6.250000e-02 : f32
      %100 = vector.broadcast %cst_121 : f32 to vector<2x16xf32>
      %101 = arith.mulf %99, %100 : vector<2x16xf32>
      %102 = arith.truncf %101 : vector<2x16xf32> to vector<2x16xbf16>
      %c0_122 = arith.constant 0 : index
      %c0_123 = arith.constant 0 : index
      %103 = vector.load %arg8[%c0_122, %c0_123] : memref<2x768xf32, #tpu.memory_space<vmem>>, vector<2x768xf32>
      %c1_124 = arith.constant 1 : index
      %c1_125 = arith.constant 1 : index
      %c0_126 = arith.constant 0 : index
      %c0_127 = arith.constant 0 : index
      %104 = vector.load %arg2[%c1_124, %c1_125, %c0_126, %c0_127] : memref<4x4x16x768xbf16, #tpu.memory_space<vmem>>, vector<1x1x16x768xbf16>
      %105 = vector.shape_cast %104 : vector<1x1x16x768xbf16> to vector<16x768xbf16>
      %cst_128 = arith.constant dense<0.000000e+00> : vector<2x768xf32>
      %106 = tpu.matmul %102, %105, %cst_128 {dimension_numbers = #tpu.dot_dimension_numbers<[1], [0], [0], [1], [0, 0, 1, 1], [], []>} : vector<2x16xbf16>, vector<16x768xbf16>, vector<2x768xf32> -> vector<2x768xf32>
      %107 = arith.addf %103, %106 : vector<2x768xf32>
      %c0_129 = arith.constant 0 : index
      %c0_130 = arith.constant 0 : index
      %108 = vector.load %arg8[%c0_129, %c0_130] : memref<2x768xf32, #tpu.memory_space<vmem>>, vector<2x768xf32>
      tpu.vector_store %arg8[%c0_129, %c0_130], %107 {strides = array<i32>} : memref<2x768xf32, #tpu.memory_space<vmem>>, vector<2x768xf32>,
      %c0_131 = arith.constant 0 : index
      %c1_132 = arith.constant 1 : index
      %c2_133 = arith.constant 2 : index
      %c0_134 = arith.constant 0 : index
      %109 = vector.load %arg9[%c0_131, %c1_132, %c2_133, %c0_134] : memref<2x4x8x16xf32, #tpu.memory_space<vmem>>, vector<2x1x1x16xf32>
      %110 = vector.shape_cast %109 : vector<2x1x1x16xf32> to vector<2x16xf32>
      %c0_135 = arith.constant 0 : index
      %c1_136 = arith.constant 1 : index
      %c6_137 = arith.constant 6 : index
      %c0_138 = arith.constant 0 : index
      %111 = vector.load %arg9[%c0_135, %c1_136, %c6_137, %c0_138] : memref<2x4x8x16xf32, #tpu.memory_space<vmem>>, vector<2x1x1x16xf32>
      %112 = vector.shape_cast %111 : vector<2x1x1x16xf32> to vector<2x16xf32>
      %113 = arith.addf %110, %112 : vector<2x16xf32>
      %cst_139 = arith.constant 6.250000e-02 : f32
      %114 = vector.broadcast %cst_139 : f32 to vector<2x16xf32>
      %115 = arith.mulf %113, %114 : vector<2x16xf32>
      %116 = arith.truncf %115 : vector<2x16xf32> to vector<2x16xbf16>
      %c0_140 = arith.constant 0 : index
      %c0_141 = arith.constant 0 : index
      %117 = vector.load %arg8[%c0_140, %c0_141] : memref<2x768xf32, #tpu.memory_space<vmem>>, vector<2x768xf32>
      %c1_142 = arith.constant 1 : index
      %c2_143 = arith.constant 2 : index
      %c0_144 = arith.constant 0 : index
      %c0_145 = arith.constant 0 : index
      %118 = vector.load %arg2[%c1_142, %c2_143, %c0_144, %c0_145] : memref<4x4x16x768xbf16, #tpu.memory_space<vmem>>, vector<1x1x16x768xbf16>
      %119 = vector.shape_cast %118 : vector<1x1x16x768xbf16> to vector<16x768xbf16>
      %cst_146 = arith.constant dense<0.000000e+00> : vector<2x768xf32>
      %120 = tpu.matmul %116, %119, %cst_146 {dimension_numbers = #tpu.dot_dimension_numbers<[1], [0], [0], [1], [0, 0, 1, 1], [], []>} : vector<2x16xbf16>, vector<16x768xbf16>, vector<2x768xf32> -> vector<2x768xf32>
      %121 = arith.addf %117, %120 : vector<2x768xf32>
      %c0_147 = arith.constant 0 : index
      %c0_148 = arith.constant 0 : index
      %122 = vector.load %arg8[%c0_147, %c0_148] : memref<2x768xf32, #tpu.memory_space<vmem>>, vector<2x768xf32>
      tpu.vector_store %arg8[%c0_147, %c0_148], %121 {strides = array<i32>} : memref<2x768xf32, #tpu.memory_space<vmem>>, vector<2x768xf32>,
      %c0_149 = arith.constant 0 : index
      %c1_150 = arith.constant 1 : index
      %c3_151 = arith.constant 3 : index
      %c0_152 = arith.constant 0 : index
      %123 = vector.load %arg9[%c0_149, %c1_150, %c3_151, %c0_152] : memref<2x4x8x16xf32, #tpu.memory_space<vmem>>, vector<2x1x1x16xf32>
      %124 = vector.shape_cast %123 : vector<2x1x1x16xf32> to vector<2x16xf32>
      %c0_153 = arith.constant 0 : index
      %c1_154 = arith.constant 1 : index
      %c7_155 = arith.constant 7 : index
      %c0_156 = arith.constant 0 : index
      %125 = vector.load %arg9[%c0_153, %c1_154, %c7_155, %c0_156] : memref<2x4x8x16xf32, #tpu.memory_space<vmem>>, vector<2x1x1x16xf32>
      %126 = vector.shape_cast %125 : vector<2x1x1x16xf32> to vector<2x16xf32>
      %127 = arith.addf %124, %126 : vector<2x16xf32>
      %cst_157 = arith.constant 6.250000e-02 : f32
      %128 = vector.broadcast %cst_157 : f32 to vector<2x16xf32>
      %129 = arith.mulf %127, %128 : vector<2x16xf32>
      %130 = arith.truncf %129 : vector<2x16xf32> to vector<2x16xbf16>
      %c0_158 = arith.constant 0 : index
      %c0_159 = arith.constant 0 : index
      %131 = vector.load %arg8[%c0_158, %c0_159] : memref<2x768xf32, #tpu.memory_space<vmem>>, vector<2x768xf32>
      %c1_160 = arith.constant 1 : index
      %c3_161 = arith.constant 3 : index
      %c0_162 = arith.constant 0 : index
      %c0_163 = arith.constant 0 : index
      %132 = vector.load %arg2[%c1_160, %c3_161, %c0_162, %c0_163] : memref<4x4x16x768xbf16, #tpu.memory_space<vmem>>, vector<1x1x16x768xbf16>
      %133 = vector.shape_cast %132 : vector<1x1x16x768xbf16> to vector<16x768xbf16>
      %cst_164 = arith.constant dense<0.000000e+00> : vector<2x768xf32>
      %134 = tpu.matmul %130, %133, %cst_164 {dimension_numbers = #tpu.dot_dimension_numbers<[1], [0], [0], [1], [0, 0, 1, 1], [], []>} : vector<2x16xbf16>, vector<16x768xbf16>, vector<2x768xf32> -> vector<2x768xf32>
      %135 = arith.addf %131, %134 : vector<2x768xf32>
      %c0_165 = arith.constant 0 : index
      %c0_166 = arith.constant 0 : index
      %136 = vector.load %arg8[%c0_165, %c0_166] : memref<2x768xf32, #tpu.memory_space<vmem>>, vector<2x768xf32>
      tpu.vector_store %arg8[%c0_165, %c0_166], %135 {strides = array<i32>} : memref<2x768xf32, #tpu.memory_space<vmem>>, vector<2x768xf32>,
      %c0_167 = arith.constant 0 : index
      %c2_168 = arith.constant 2 : index
      %c0_169 = arith.constant 0 : index
      %c0_170 = arith.constant 0 : index
      %137 = vector.load %arg9[%c0_167, %c2_168, %c0_169, %c0_170] : memref<2x4x8x16xf32, #tpu.memory_space<vmem>>, vector<2x1x1x16xf32>
      %138 = vector.shape_cast %137 : vector<2x1x1x16xf32> to vector<2x16xf32>
      %c0_171 = arith.constant 0 : index
      %c2_172 = arith.constant 2 : index
      %c4_173 = arith.constant 4 : index
      %c0_174 = arith.constant 0 : index
      %139 = vector.load %arg9[%c0_171, %c2_172, %c4_173, %c0_174] : memref<2x4x8x16xf32, #tpu.memory_space<vmem>>, vector<2x1x1x16xf32>
      %140 = vector.shape_cast %139 : vector<2x1x1x16xf32> to vector<2x16xf32>
      %141 = arith.addf %138, %140 : vector<2x16xf32>
      %cst_175 = arith.constant 6.250000e-02 : f32
      %142 = vector.broadcast %cst_175 : f32 to vector<2x16xf32>
      %143 = arith.mulf %141, %142 : vector<2x16xf32>
      %144 = arith.truncf %143 : vector<2x16xf32> to vector<2x16xbf16>
      %c0_176 = arith.constant 0 : index
      %c0_177 = arith.constant 0 : index
      %145 = vector.load %arg8[%c0_176, %c0_177] : memref<2x768xf32, #tpu.memory_space<vmem>>, vector<2x768xf32>
      %c2_178 = arith.constant 2 : index
      %c0_179 = arith.constant 0 : index
      %c0_180 = arith.constant 0 : index
      %c0_181 = arith.constant 0 : index
      %146 = vector.load %arg2[%c2_178, %c0_179, %c0_180, %c0_181] : memref<4x4x16x768xbf16, #tpu.memory_space<vmem>>, vector<1x1x16x768xbf16>
      %147 = vector.shape_cast %146 : vector<1x1x16x768xbf16> to vector<16x768xbf16>
      %cst_182 = arith.constant dense<0.000000e+00> : vector<2x768xf32>
      %148 = tpu.matmul %144, %147, %cst_182 {dimension_numbers = #tpu.dot_dimension_numbers<[1], [0], [0], [1], [0, 0, 1, 1], [], []>} : vector<2x16xbf16>, vector<16x768xbf16>, vector<2x768xf32> -> vector<2x768xf32>
      %149 = arith.addf %145, %148 : vector<2x768xf32>
      %c0_183 = arith.constant 0 : index
      %c0_184 = arith.constant 0 : index
      %150 = vector.load %arg8[%c0_183, %c0_184] : memref<2x768xf32, #tpu.memory_space<vmem>>, vector<2x768xf32>
      tpu.vector_store %arg8[%c0_183, %c0_184], %149 {strides = array<i32>} : memref<2x768xf32, #tpu.memory_space<vmem>>, vector<2x768xf32>,
      %c0_185 = arith.constant 0 : index
      %c2_186 = arith.constant 2 : index
      %c1_187 = arith.constant 1 : index
      %c0_188 = arith.constant 0 : index
      %151 = vector.load %arg9[%c0_185, %c2_186, %c1_187, %c0_188] : memref<2x4x8x16xf32, #tpu.memory_space<vmem>>, vector<2x1x1x16xf32>
      %152 = vector.shape_cast %151 : vector<2x1x1x16xf32> to vector<2x16xf32>
      %c0_189 = arith.constant 0 : index
      %c2_190 = arith.constant 2 : index
      %c5_191 = arith.constant 5 : index
      %c0_192 = arith.constant 0 : index
      %153 = vector.load %arg9[%c0_189, %c2_190, %c5_191, %c0_192] : memref<2x4x8x16xf32, #tpu.memory_space<vmem>>, vector<2x1x1x16xf32>
      %154 = vector.shape_cast %153 : vector<2x1x1x16xf32> to vector<2x16xf32>
      %155 = arith.addf %152, %154 : vector<2x16xf32>
      %cst_193 = arith.constant 6.250000e-02 : f32
      %156 = vector.broadcast %cst_193 : f32 to vector<2x16xf32>
      %157 = arith.mulf %155, %156 : vector<2x16xf32>
      %158 = arith.truncf %157 : vector<2x16xf32> to vector<2x16xbf16>
      %c0_194 = arith.constant 0 : index
      %c0_195 = arith.constant 0 : index
      %159 = vector.load %arg8[%c0_194, %c0_195] : memref<2x768xf32, #tpu.memory_space<vmem>>, vector<2x768xf32>
      %c2_196 = arith.constant 2 : index
      %c1_197 = arith.constant 1 : index
      %c0_198 = arith.constant 0 : index
      %c0_199 = arith.constant 0 : index
      %160 = vector.load %arg2[%c2_196, %c1_197, %c0_198, %c0_199] : memref<4x4x16x768xbf16, #tpu.memory_space<vmem>>, vector<1x1x16x768xbf16>
      %161 = vector.shape_cast %160 : vector<1x1x16x768xbf16> to vector<16x768xbf16>
      %cst_200 = arith.constant dense<0.000000e+00> : vector<2x768xf32>
      %162 = tpu.matmul %158, %161, %cst_200 {dimension_numbers = #tpu.dot_dimension_numbers<[1], [0], [0], [1], [0, 0, 1, 1], [], []>} : vector<2x16xbf16>, vector<16x768xbf16>, vector<2x768xf32> -> vector<2x768xf32>
      %163 = arith.addf %159, %162 : vector<2x768xf32>
      %c0_201 = arith.constant 0 : index
      %c0_202 = arith.constant 0 : index
      %164 = vector.load %arg8[%c0_201, %c0_202] : memref<2x768xf32, #tpu.memory_space<vmem>>, vector<2x768xf32>
      tpu.vector_store %arg8[%c0_201, %c0_202], %163 {strides = array<i32>} : memref<2x768xf32, #tpu.memory_space<vmem>>, vector<2x768xf32>,
      %c0_203 = arith.constant 0 : index
      %c2_204 = arith.constant 2 : index
      %c2_205 = arith.constant 2 : index
      %c0_206 = arith.constant 0 : index
      %165 = vector.load %arg9[%c0_203, %c2_204, %c2_205, %c0_206] : memref<2x4x8x16xf32, #tpu.memory_space<vmem>>, vector<2x1x1x16xf32>
      %166 = vector.shape_cast %165 : vector<2x1x1x16xf32> to vector<2x16xf32>
      %c0_207 = arith.constant 0 : index
      %c2_208 = arith.constant 2 : index
      %c6_209 = arith.constant 6 : index
      %c0_210 = arith.constant 0 : index
      %167 = vector.load %arg9[%c0_207, %c2_208, %c6_209, %c0_210] : memref<2x4x8x16xf32, #tpu.memory_space<vmem>>, vector<2x1x1x16xf32>
      %168 = vector.shape_cast %167 : vector<2x1x1x16xf32> to vector<2x16xf32>
      %169 = arith.addf %166, %168 : vector<2x16xf32>
      %cst_211 = arith.constant 6.250000e-02 : f32
      %170 = vector.broadcast %cst_211 : f32 to vector<2x16xf32>
      %171 = arith.mulf %169, %170 : vector<2x16xf32>
      %172 = arith.truncf %171 : vector<2x16xf32> to vector<2x16xbf16>
      %c0_212 = arith.constant 0 : index
      %c0_213 = arith.constant 0 : index
      %173 = vector.load %arg8[%c0_212, %c0_213] : memref<2x768xf32, #tpu.memory_space<vmem>>, vector<2x768xf32>
      %c2_214 = arith.constant 2 : index
      %c2_215 = arith.constant 2 : index
      %c0_216 = arith.constant 0 : index
      %c0_217 = arith.constant 0 : index
      %174 = vector.load %arg2[%c2_214, %c2_215, %c0_216, %c0_217] : memref<4x4x16x768xbf16, #tpu.memory_space<vmem>>, vector<1x1x16x768xbf16>
      %175 = vector.shape_cast %174 : vector<1x1x16x768xbf16> to vector<16x768xbf16>
      %cst_218 = arith.constant dense<0.000000e+00> : vector<2x768xf32>
      %176 = tpu.matmul %172, %175, %cst_218 {dimension_numbers = #tpu.dot_dimension_numbers<[1], [0], [0], [1], [0, 0, 1, 1], [], []>} : vector<2x16xbf16>, vector<16x768xbf16>, vector<2x768xf32> -> vector<2x768xf32>
      %177 = arith.addf %173, %176 : vector<2x768xf32>
      %c0_219 = arith.constant 0 : index
      %c0_220 = arith.constant 0 : index
      %178 = vector.load %arg8[%c0_219, %c0_220] : memref<2x768xf32, #tpu.memory_space<vmem>>, vector<2x768xf32>
      tpu.vector_store %arg8[%c0_219, %c0_220], %177 {strides = array<i32>} : memref<2x768xf32, #tpu.memory_space<vmem>>, vector<2x768xf32>,
      %c0_221 = arith.constant 0 : index
      %c2_222 = arith.constant 2 : index
      %c3_223 = arith.constant 3 : index
      %c0_224 = arith.constant 0 : index
      %179 = vector.load %arg9[%c0_221, %c2_222, %c3_223, %c0_224] : memref<2x4x8x16xf32, #tpu.memory_space<vmem>>, vector<2x1x1x16xf32>
      %180 = vector.shape_cast %179 : vector<2x1x1x16xf32> to vector<2x16xf32>
      %c0_225 = arith.constant 0 : index
      %c2_226 = arith.constant 2 : index
      %c7_227 = arith.constant 7 : index
      %c0_228 = arith.constant 0 : index
      %181 = vector.load %arg9[%c0_225, %c2_226, %c7_227, %c0_228] : memref<2x4x8x16xf32, #tpu.memory_space<vmem>>, vector<2x1x1x16xf32>
      %182 = vector.shape_cast %181 : vector<2x1x1x16xf32> to vector<2x16xf32>
      %183 = arith.addf %180, %182 : vector<2x16xf32>
      %cst_229 = arith.constant 6.250000e-02 : f32
      %184 = vector.broadcast %cst_229 : f32 to vector<2x16xf32>
      %185 = arith.mulf %183, %184 : vector<2x16xf32>
      %186 = arith.truncf %185 : vector<2x16xf32> to vector<2x16xbf16>
      %c0_230 = arith.constant 0 : index
      %c0_231 = arith.constant 0 : index
      %187 = vector.load %arg8[%c0_230, %c0_231] : memref<2x768xf32, #tpu.memory_space<vmem>>, vector<2x768xf32>
      %c2_232 = arith.constant 2 : index
      %c3_233 = arith.constant 3 : index
      %c0_234 = arith.constant 0 : index
      %c0_235 = arith.constant 0 : index
      %188 = vector.load %arg2[%c2_232, %c3_233, %c0_234, %c0_235] : memref<4x4x16x768xbf16, #tpu.memory_space<vmem>>, vector<1x1x16x768xbf16>
      %189 = vector.shape_cast %188 : vector<1x1x16x768xbf16> to vector<16x768xbf16>
      %cst_236 = arith.constant dense<0.000000e+00> : vector<2x768xf32>
      %190 = tpu.matmul %186, %189, %cst_236 {dimension_numbers = #tpu.dot_dimension_numbers<[1], [0], [0], [1], [0, 0, 1, 1], [], []>} : vector<2x16xbf16>, vector<16x768xbf16>, vector<2x768xf32> -> vector<2x768xf32>
      %191 = arith.addf %187, %190 : vector<2x768xf32>
      %c0_237 = arith.constant 0 : index
      %c0_238 = arith.constant 0 : index
      %192 = vector.load %arg8[%c0_237, %c0_238] : memref<2x768xf32, #tpu.memory_space<vmem>>, vector<2x768xf32>
      tpu.vector_store %arg8[%c0_237, %c0_238], %191 {strides = array<i32>} : memref<2x768xf32, #tpu.memory_space<vmem>>, vector<2x768xf32>,
      %c0_239 = arith.constant 0 : index
      %c3_240 = arith.constant 3 : index
      %c0_241 = arith.constant 0 : index
      %c0_242 = arith.constant 0 : index
      %193 = vector.load %arg9[%c0_239, %c3_240, %c0_241, %c0_242] : memref<2x4x8x16xf32, #tpu.memory_space<vmem>>, vector<2x1x1x16xf32>
      %194 = vector.shape_cast %193 : vector<2x1x1x16xf32> to vector<2x16xf32>
      %c0_243 = arith.constant 0 : index
      %c3_244 = arith.constant 3 : index
      %c4_245 = arith.constant 4 : index
      %c0_246 = arith.constant 0 : index
      %195 = vector.load %arg9[%c0_243, %c3_244, %c4_245, %c0_246] : memref<2x4x8x16xf32, #tpu.memory_space<vmem>>, vector<2x1x1x16xf32>
      %196 = vector.shape_cast %195 : vector<2x1x1x16xf32> to vector<2x16xf32>
      %197 = arith.addf %194, %196 : vector<2x16xf32>
      %cst_247 = arith.constant 6.250000e-02 : f32
      %198 = vector.broadcast %cst_247 : f32 to vector<2x16xf32>
      %199 = arith.mulf %197, %198 : vector<2x16xf32>
      %200 = arith.truncf %199 : vector<2x16xf32> to vector<2x16xbf16>
      %c0_248 = arith.constant 0 : index
      %c0_249 = arith.constant 0 : index
      %201 = vector.load %arg8[%c0_248, %c0_249] : memref<2x768xf32, #tpu.memory_space<vmem>>, vector<2x768xf32>
      %c3_250 = arith.constant 3 : index
      %c0_251 = arith.constant 0 : index
      %c0_252 = arith.constant 0 : index
      %c0_253 = arith.constant 0 : index
      %202 = vector.load %arg2[%c3_250, %c0_251, %c0_252, %c0_253] : memref<4x4x16x768xbf16, #tpu.memory_space<vmem>>, vector<1x1x16x768xbf16>
      %203 = vector.shape_cast %202 : vector<1x1x16x768xbf16> to vector<16x768xbf16>
      %cst_254 = arith.constant dense<0.000000e+00> : vector<2x768xf32>
      %204 = tpu.matmul %200, %203, %cst_254 {dimension_numbers = #tpu.dot_dimension_numbers<[1], [0], [0], [1], [0, 0, 1, 1], [], []>} : vector<2x16xbf16>, vector<16x768xbf16>, vector<2x768xf32> -> vector<2x768xf32>
      %205 = arith.addf %201, %204 : vector<2x768xf32>
      %c0_255 = arith.constant 0 : index
      %c0_256 = arith.constant 0 : index
      %206 = vector.load %arg8[%c0_255, %c0_256] : memref<2x768xf32, #tpu.memory_space<vmem>>, vector<2x768xf32>
      tpu.vector_store %arg8[%c0_255, %c0_256], %205 {strides = array<i32>} : memref<2x768xf32, #tpu.memory_space<vmem>>, vector<2x768xf32>,
      %c0_257 = arith.constant 0 : index
      %c3_258 = arith.constant 3 : index
      %c1_259 = arith.constant 1 : index
      %c0_260 = arith.constant 0 : index
      %207 = vector.load %arg9[%c0_257, %c3_258, %c1_259, %c0_260] : memref<2x4x8x16xf32, #tpu.memory_space<vmem>>, vector<2x1x1x16xf32>
      %208 = vector.shape_cast %207 : vector<2x1x1x16xf32> to vector<2x16xf32>
      %c0_261 = arith.constant 0 : index
      %c3_262 = arith.constant 3 : index
      %c5_263 = arith.constant 5 : index
      %c0_264 = arith.constant 0 : index
      %209 = vector.load %arg9[%c0_261, %c3_262, %c5_263, %c0_264] : memref<2x4x8x16xf32, #tpu.memory_space<vmem>>, vector<2x1x1x16xf32>
      %210 = vector.shape_cast %209 : vector<2x1x1x16xf32> to vector<2x16xf32>
      %211 = arith.addf %208, %210 : vector<2x16xf32>
      %cst_265 = arith.constant 6.250000e-02 : f32
      %212 = vector.broadcast %cst_265 : f32 to vector<2x16xf32>
      %213 = arith.mulf %211, %212 : vector<2x16xf32>
      %214 = arith.truncf %213 : vector<2x16xf32> to vector<2x16xbf16>
      %c0_266 = arith.constant 0 : index
      %c0_267 = arith.constant 0 : index
      %215 = vector.load %arg8[%c0_266, %c0_267] : memref<2x768xf32, #tpu.memory_space<vmem>>, vector<2x768xf32>
      %c3_268 = arith.constant 3 : index
      %c1_269 = arith.constant 1 : index
      %c0_270 = arith.constant 0 : index
      %c0_271 = arith.constant 0 : index
      %216 = vector.load %arg2[%c3_268, %c1_269, %c0_270, %c0_271] : memref<4x4x16x768xbf16, #tpu.memory_space<vmem>>, vector<1x1x16x768xbf16>
      %217 = vector.shape_cast %216 : vector<1x1x16x768xbf16> to vector<16x768xbf16>
      %cst_272 = arith.constant dense<0.000000e+00> : vector<2x768xf32>
      %218 = tpu.matmul %214, %217, %cst_272 {dimension_numbers = #tpu.dot_dimension_numbers<[1], [0], [0], [1], [0, 0, 1, 1], [], []>} : vector<2x16xbf16>, vector<16x768xbf16>, vector<2x768xf32> -> vector<2x768xf32>
      %219 = arith.addf %215, %218 : vector<2x768xf32>
      %c0_273 = arith.constant 0 : index
      %c0_274 = arith.constant 0 : index
      %220 = vector.load %arg8[%c0_273, %c0_274] : memref<2x768xf32, #tpu.memory_space<vmem>>, vector<2x768xf32>
      tpu.vector_store %arg8[%c0_273, %c0_274], %219 {strides = array<i32>} : memref<2x768xf32, #tpu.memory_space<vmem>>, vector<2x768xf32>,
      %c0_275 = arith.constant 0 : index
      %c3_276 = arith.constant 3 : index
      %c2_277 = arith.constant 2 : index
      %c0_278 = arith.constant 0 : index
      %221 = vector.load %arg9[%c0_275, %c3_276, %c2_277, %c0_278] : memref<2x4x8x16xf32, #tpu.memory_space<vmem>>, vector<2x1x1x16xf32>
      %222 = vector.shape_cast %221 : vector<2x1x1x16xf32> to vector<2x16xf32>
      %c0_279 = arith.constant 0 : index
      %c3_280 = arith.constant 3 : index
      %c6_281 = arith.constant 6 : index
      %c0_282 = arith.constant 0 : index
      %223 = vector.load %arg9[%c0_279, %c3_280, %c6_281, %c0_282] : memref<2x4x8x16xf32, #tpu.memory_space<vmem>>, vector<2x1x1x16xf32>
      %224 = vector.shape_cast %223 : vector<2x1x1x16xf32> to vector<2x16xf32>
      %225 = arith.addf %222, %224 : vector<2x16xf32>
      %cst_283 = arith.constant 6.250000e-02 : f32
      %226 = vector.broadcast %cst_283 : f32 to vector<2x16xf32>
      %227 = arith.mulf %225, %226 : vector<2x16xf32>
      %228 = arith.truncf %227 : vector<2x16xf32> to vector<2x16xbf16>
      %c0_284 = arith.constant 0 : index
      %c0_285 = arith.constant 0 : index
      %229 = vector.load %arg8[%c0_284, %c0_285] : memref<2x768xf32, #tpu.memory_space<vmem>>, vector<2x768xf32>
      %c3_286 = arith.constant 3 : index
      %c2_287 = arith.constant 2 : index
      %c0_288 = arith.constant 0 : index
      %c0_289 = arith.constant 0 : index
      %230 = vector.load %arg2[%c3_286, %c2_287, %c0_288, %c0_289] : memref<4x4x16x768xbf16, #tpu.memory_space<vmem>>, vector<1x1x16x768xbf16>
      %231 = vector.shape_cast %230 : vector<1x1x16x768xbf16> to vector<16x768xbf16>
      %cst_290 = arith.constant dense<0.000000e+00> : vector<2x768xf32>
      %232 = tpu.matmul %228, %231, %cst_290 {dimension_numbers = #tpu.dot_dimension_numbers<[1], [0], [0], [1], [0, 0, 1, 1], [], []>} : vector<2x16xbf16>, vector<16x768xbf16>, vector<2x768xf32> -> vector<2x768xf32>
      %233 = arith.addf %229, %232 : vector<2x768xf32>
      %c0_291 = arith.constant 0 : index
      %c0_292 = arith.constant 0 : index
      %234 = vector.load %arg8[%c0_291, %c0_292] : memref<2x768xf32, #tpu.memory_space<vmem>>, vector<2x768xf32>
      tpu.vector_store %arg8[%c0_291, %c0_292], %233 {strides = array<i32>} : memref<2x768xf32, #tpu.memory_space<vmem>>, vector<2x768xf32>,
      %c0_293 = arith.constant 0 : index
      %c3_294 = arith.constant 3 : index
      %c3_295 = arith.constant 3 : index
      %c0_296 = arith.constant 0 : index
      %235 = vector.load %arg9[%c0_293, %c3_294, %c3_295, %c0_296] : memref<2x4x8x16xf32, #tpu.memory_space<vmem>>, vector<2x1x1x16xf32>
      %236 = vector.shape_cast %235 : vector<2x1x1x16xf32> to vector<2x16xf32>
      %c0_297 = arith.constant 0 : index
      %c3_298 = arith.constant 3 : index
      %c7_299 = arith.constant 7 : index
      %c0_300 = arith.constant 0 : index
      %237 = vector.load %arg9[%c0_297, %c3_298, %c7_299, %c0_300] : memref<2x4x8x16xf32, #tpu.memory_space<vmem>>, vector<2x1x1x16xf32>
      %238 = vector.shape_cast %237 : vector<2x1x1x16xf32> to vector<2x16xf32>
      %239 = arith.addf %236, %238 : vector<2x16xf32>
      %cst_301 = arith.constant 6.250000e-02 : f32
      %240 = vector.broadcast %cst_301 : f32 to vector<2x16xf32>
      %241 = arith.mulf %239, %240 : vector<2x16xf32>
      %242 = arith.truncf %241 : vector<2x16xf32> to vector<2x16xbf16>
      %c0_302 = arith.constant 0 : index
      %c0_303 = arith.constant 0 : index
      %243 = vector.load %arg8[%c0_302, %c0_303] : memref<2x768xf32, #tpu.memory_space<vmem>>, vector<2x768xf32>
      %c3_304 = arith.constant 3 : index
      %c3_305 = arith.constant 3 : index
      %c0_306 = arith.constant 0 : index
      %c0_307 = arith.constant 0 : index
      %244 = vector.load %arg2[%c3_304, %c3_305, %c0_306, %c0_307] : memref<4x4x16x768xbf16, #tpu.memory_space<vmem>>, vector<1x1x16x768xbf16>
      %245 = vector.shape_cast %244 : vector<1x1x16x768xbf16> to vector<16x768xbf16>
      %cst_308 = arith.constant dense<0.000000e+00> : vector<2x768xf32>
      %246 = tpu.matmul %242, %245, %cst_308 {dimension_numbers = #tpu.dot_dimension_numbers<[1], [0], [0], [1], [0, 0, 1, 1], [], []>} : vector<2x16xbf16>, vector<16x768xbf16>, vector<2x768xf32> -> vector<2x768xf32>
      %247 = arith.addf %243, %246 : vector<2x768xf32>
      %c0_309 = arith.constant 0 : index
      %c0_310 = arith.constant 0 : index
      %248 = vector.load %arg8[%c0_309, %c0_310] : memref<2x768xf32, #tpu.memory_space<vmem>>, vector<2x768xf32>
      tpu.vector_store %arg8[%c0_309, %c0_310], %247 {strides = array<i32>} : memref<2x768xf32, #tpu.memory_space<vmem>>, vector<2x768xf32>,
      %c0_311 = arith.constant 0 : index
      %c0_312 = arith.constant 0 : index
      %249 = vector.load %arg8[%c0_311, %c0_312] : memref<2x768xf32, #tpu.memory_space<vmem>>, vector<2x768xf32>
      %cst_313 = arith.constant dense<0.000000e+00> : vector<768xf32>
      %250 = vector.multi_reduction <add>, %249, %cst_313 [0] : vector<2x768xf32> to vector<768xf32>
      %251 = vector.shape_cast %250 : vector<768xf32> to vector<1x768xf32>
      %cst_314 = arith.constant 2.000000e+00 : f32
      %252 = vector.broadcast %cst_314 : f32 to vector<1x768xf32>
      %253 = arith.divf %251, %252 : vector<1x768xf32>
      %254 = vector.broadcast %253 : vector<1x768xf32> to vector<2x768xf32>
      %255 = arith.subf %249, %254 : vector<2x768xf32>
      %256 = arith.mulf %255, %255 : vector<2x768xf32>
      %cst_315 = arith.constant dense<0.000000e+00> : vector<768xf32>
      %257 = vector.multi_reduction <add>, %256, %cst_315 [0] : vector<2x768xf32> to vector<768xf32>
      %258 = vector.shape_cast %257 : vector<768xf32> to vector<1x768xf32>
      %cst_316 = arith.constant 2.000000e+00 : f32
      %259 = vector.broadcast %cst_316 : f32 to vector<1x768xf32>
      %260 = arith.divf %258, %259 : vector<1x768xf32>
      %cst_317 = arith.constant 9.99999974E-6 : f32
      %261 = vector.broadcast %cst_317 : f32 to vector<1x768xf32>
      %262 = arith.addf %260, %261 : vector<1x768xf32>
      %263 = math.rsqrt %262 : vector<1x768xf32>
      %264 = vector.broadcast %263 : vector<1x768xf32> to vector<2x768xf32>
      %265 = arith.mulf %255, %264 : vector<2x768xf32>
      %c0_318 = arith.constant 0 : index
      %c0_319 = arith.constant 0 : index
      %266 = vector.load %arg4[%c0_318, %c0_319] : memref<1x768xf32, #tpu.memory_space<vmem>>, vector<1x768xf32>
      %267 = vector.broadcast %266 : vector<1x768xf32> to vector<2x768xf32>
      %268 = arith.mulf %265, %267 : vector<2x768xf32>
      %c0_320 = arith.constant 0 : index
      %c0_321 = arith.constant 0 : index
      %269 = vector.load %arg5[%c0_320, %c0_321] : memref<1x768xf32, #tpu.memory_space<vmem>>, vector<1x768xf32>
      %270 = vector.broadcast %269 : vector<1x768xf32> to vector<2x768xf32>
      %271 = arith.addf %268, %270 : vector<2x768xf32>
      %272 = arith.truncf %271 : vector<2x768xf32> to vector<2x768xbf16>
      %c0_322 = arith.constant 0 : index
      %c0_323 = arith.constant 0 : index
      %273 = vector.load %arg6[%c0_322, %c0_323] : memref<768x128xbf16, #tpu.memory_space<vmem>>, vector<768x128xbf16>
      %cst_324 = arith.constant dense<0.000000e+00> : vector<2x128xf32>
      %274 = tpu.matmul %272, %273, %cst_324 {dimension_numbers = #tpu.dot_dimension_numbers<[1], [0], [0], [1], [0, 0, 1, 1], [], []>} : vector<2x768xbf16>, vector<768x128xbf16>, vector<2x128xf32> -> vector<2x128xf32>
      %c0_325 = arith.constant 0 : index
      %c0_326 = arith.constant 0 : index
      %275 = vector.load %arg7[%c0_325, %c0_326] : memref<2x128xf32, #tpu.memory_space<vmem>>, vector<2x128xf32>
      tpu.vector_store %arg7[%c0_325, %c0_326], %274 {strides = array<i32>} : memref<2x128xf32, #tpu.memory_space<vmem>>, vector<2x128xf32>,
    } else {
    }
    return
  }
  func.func @transform_0(%arg0: i32) -> (i32, i32, i32, i32) {
    %c0_i32 = arith.constant 0 : i32
    %c0_i32_0 = arith.constant 0 : i32
    %c0_i32_1 = arith.constant 0 : i32
    %c0_i32_2 = arith.constant 0 : i32
    return %c0_i32, %c0_i32_0, %arg0, %c0_i32_1 : i32, i32, i32, i32
  }
  func.func @transform_1(%arg0: i32) -> (i32, i32, i32, i32) {
    %c0_i32 = arith.constant 0 : i32
    %c0_i32_0 = arith.constant 0 : i32
    %c0_i32_1 = arith.constant 0 : i32
    %c0_i32_2 = arith.constant 0 : i32
    %c0_i32_3 = arith.constant 0 : i32
    return %c0_i32, %c0_i32_0, %c0_i32_1, %c0_i32_2 : i32, i32, i32, i32
  }
  func.func @transform_2(%arg0: i32) -> (i32, i32) {
    %c0_i32 = arith.constant 0 : i32
    %c0_i32_0 = arith.constant 0 : i32
    %c0_i32_1 = arith.constant 0 : i32
    return %c0_i32, %c0_i32_0 : i32, i32
  }
  func.func @transform_3(%arg0: i32) -> (i32, i32) {
    %c0_i32 = arith.constant 0 : i32
    %c0_i32_0 = arith.constant 0 : i32
    %c0_i32_1 = arith.constant 0 : i32
    return %c0_i32, %c0_i32_0 : i32, i32
  }
  func.func @transform_4(%arg0: i32) -> (i32, i32) {
    %c0_i32 = arith.constant 0 : i32
    %c0_i32_0 = arith.constant 0 : i32
    %c0_i32_1 = arith.constant 0 : i32
    return %c0_i32, %c0_i32_0 : i32, i32
  }
  func.func @transform_5(%arg0: i32) -> (i32, i32) {
    %c0_i32 = arith.constant 0 : i32
    %c0_i32_0 = arith.constant 0 : i32
    %c0_i32_1 = arith.constant 0 : i32
    return %c0_i32, %c0_i32_0 : i32, i32
  }
  func.func @transform_6(%arg0: i32) -> (i32, i32) {
    %c0_i32 = arith.constant 0 : i32
    %c0_i32_0 = arith.constant 0 : i32
    %c0_i32_1 = arith.constant 0 : i32
    return %c0_i32, %c0_i32_0 : i32, i32
  }
  func.func @transform_7(%arg0: i32) -> (i32, i32) {
    %c0_i32 = arith.constant 0 : i32
    %c0_i32_0 = arith.constant 0 : i32
    %c0_i32_1 = arith.constant 0 : i32
    return %c0_i32, %c0_i32_0 : i32, i32
  }
}

</mosaic_0001>

<bundles_post_ra>
// kernel: tile.7
= control target key start
LH: loop header
LB: loop body
LE: loop exit
PB: predicated region body
PF: predicated region fallthrough
CT: control target
= control target key end

     0   :  { %s10375_s0 = inlined_call_operand.vmem [shape: bf16[4,4,4,4,768], index: 0, kind: input, shape index: {}]   ;;  %s10376_s1 = inlined_call_operand.vmem [shape: bf16[4,4,16,768], index: 1, kind: output, shape index: {}]  }
   0x1   :  { %v8640_v0 = vld [vmem:[%s10375_s0 + $0x2f8] sm:$0xff]   ;;  %v8644_v1 = vld [vmem:[%s10375_s0 + $0x2f0] sm:$0xff]   ;;  %v8648_v5 = vld [vmem:[%s10375_s0 + $0x2e8] sm:$0xff]  }
   0x2   :  { %v15_v2 = vunpack.c.h.bf16 %v8640_v0  ;;  %v45_v3 = vunpack.c.l.bf16 %v8640_v0  ;;  %v75_v4 = vunpack.c.h.bf16 %v8644_v1  ;;  %v105_v6 = vunpack.c.l.bf16 %v8644_v1  ;;  %v8652_v8 = vld [vmem:[%s10375_s0 + $0x2e0] sm:$0xff]   ;;  %v8656_v11 = vld [vmem:[%s10375_s0 + $0x2d8] sm:$0xff]   ;;  %v8660_v14 = vld [vmem:[%s10375_s0 + $0x2d0] sm:$0xff]  }
   0x3   :  { %v135_v7 = vunpack.c.h.bf16 %v8648_v5  ;;  %v165_v9 = vunpack.c.l.bf16 %v8648_v5  ;;  %v195_v10 = vunpack.c.h.bf16 %v8652_v8  ;;  %v225_v12 = vunpack.c.l.bf16 %v8652_v8  ;;  %v8664_v17 = vld [vmem:[%s10375_s0 + $0x2c8] sm:$0xff]   ;;  %v8668_v20 = vld [vmem:[%s10375_s0 + $0x2c0] sm:$0xff]   ;;  %v8672_v23 = vld [vmem:[%s10375_s0 + $0x2b8] sm:$0xff]  }
   0x4   :  { %18 = vst [vmem:[#allocation1 + $0x144] sm:$0xf0] %v15_v2  ;;  %v255_v13 = vunpack.c.h.bf16 %v8656_v11  ;;  %v285_v15 = vunpack.c.l.bf16 %v8656_v11  ;;  %v315_v16 = vunpack.c.h.bf16 %v8660_v14  ;;  %v345_v18 = vunpack.c.l.bf16 %v8660_v14  ;;  %v8676_v26 = vld [vmem:[%s10375_s0 + $0x2b0] sm:$0xff]   ;;  %v8680_v29 = vld [vmem:[%s10375_s0 + $0x2a8] sm:$0xff]   ;;  %v8684_v32 = vld [vmem:[%s10375_s0 + $0x2a0] sm:$0xff]  }
   0x5   :  { %33 = vst [vmem:[#allocation1 + $0x48] sm:$0xf] %v15_v2  ;;  %v375_v19 = vunpack.c.h.bf16 %v8664_v17  ;;  %v405_v21 = vunpack.c.l.bf16 %v8664_v17  ;;  %v435_v22 = vunpack.c.h.bf16 %v8668_v20  ;;  %v465_v24 = vunpack.c.l.bf16 %v8668_v20  ;;  %v8688_v35 = vld [vmem:[%s10375_s0 + $0x298] sm:$0xff]   ;;  %v8692_v38 = vld [vmem:[%s10375_s0 + $0x290] sm:$0xff]   ;;  %v8696_v41 = vld [vmem:[%s10375_s0 + $0x288] sm:$0xff]  }
   0x6   :  { %48 = vst [vmem:[#allocation1 + $0x71c] sm:$0xf0] %v45_v3  ;;  %v495_v25 = vunpack.c.h.bf16 %v8672_v23  ;;  %v525_v27 = vunpack.c.l.bf16 %v8672_v23  ;;  %v555_v28 = vunpack.c.h.bf16 %v8676_v26  ;;  %v585_v30 = vunpack.c.l.bf16 %v8676_v26  ;;  %v8700_v44 = vld [vmem:[%s10375_s0 + $0x280] sm:$0xff]   ;;  %v8704_v47 = vld [vmem:[%s10375_s0 + $0x278] sm:$0xff]   ;;  %v8708_v50 = vld [vmem:[%s10375_s0 + $0x270] sm:$0xff]  }
   0x7   :  { %63 = vst [vmem:[#allocation1 + $0x3e0] sm:$0xf] %v45_v3  ;;  %v615_v31 = vunpack.c.h.bf16 %v8680_v29  ;;  %v645_v33 = vunpack.c.l.bf16 %v8680_v29  ;;  %v675_v34 = vunpack.c.h.bf16 %v8684_v32  ;;  %v705_v36 = vunpack.c.l.bf16 %v8684_v32  ;;  %v8712_v53 = vld [vmem:[%s10375_s0 + $0x268] sm:$0xff]   ;;  %v8716_v56 = vld [vmem:[%s10375_s0 + $0x260] sm:$0xff]   ;;  %v8720_v59 = vld [vmem:[%s10375_s0 + $0x258] sm:$0xff]  }
   0x8   :  { %78 = vst [vmem:[#allocation1 + $0x3ec] sm:$0xf0] %v75_v4  ;;  %v735_v37 = vunpack.c.h.bf16 %v8688_v35  ;;  %v765_v39 = vunpack.c.l.bf16 %v8688_v35  ;;  %v795_v40 = vunpack.c.h.bf16 %v8692_v38  ;;  %v825_v42 = vunpack.c.l.bf16 %v8692_v38  ;;  %v8724_v62 = vld [vmem:[%s10375_s0 + $0x250] sm:$0xff]   ;;  %v8728_v1 = vld [vmem:[%s10375_s0 + $0x248] sm:$0xff]  }
   0x9   :  { %93 = vst [vmem:[#allocation1 + $0x490] sm:$0xf] %v75_v4  ;;  %v855_v43 = vunpack.c.h.bf16 %v8696_v41  ;;  %v885_v45 = vunpack.c.l.bf16 %v8696_v41  ;;  %v915_v46 = vunpack.c.h.bf16 %v8700_v44  ;;  %v945_v48 = vunpack.c.l.bf16 %v8700_v44  ;;  %v8732_v4 = vld [vmem:[%s10375_s0 + $0x240] sm:$0xff]  }
   0xa   :  { %108 = vst [vmem:[#allocation1 + $0x8c4] sm:$0xf0] %v105_v6  ;;  %v975_v49 = vunpack.c.h.bf16 %v8704_v47  ;;  %v1005_v51 = vunpack.c.l.bf16 %v8704_v47  ;;  %v1035_v52 = vunpack.c.h.bf16 %v8708_v50  ;;  %v1065_v54 = vunpack.c.l.bf16 %v8708_v50 }
   0xb   :  { %123 = vst [vmem:[#allocation1 + $0x7b0] sm:$0xf] %v105_v6  ;;  %v1095_v55 = vunpack.c.h.bf16 %v8712_v53  ;;  %v1125_v57 = vunpack.c.l.bf16 %v8712_v53  ;;  %v1155_v58 = vunpack.c.h.bf16 %v8716_v56  ;;  %v1185_v60 = vunpack.c.l.bf16 %v8716_v56 }
   0xc   :  { %138 = vst [vmem:[#allocation1 + $0x74] sm:$0xf0] %v135_v7  ;;  %v1215_v61 = vunpack.c.h.bf16 %v8720_v59  ;;  %v1245_v63 = vunpack.c.l.bf16 %v8720_v59  ;;  %v1275_v0 = vunpack.c.h.bf16 %v8724_v62  ;;  %v1305_v2 = vunpack.c.l.bf16 %v8724_v62 }
   0xd   :  { %153 = vst [vmem:[#allocation1 + $0x2e8] sm:$0xf] %v135_v7  ;;  %v1335_v3 = vunpack.c.h.bf16 %v8728_v1  ;;  %v1365_v5 = vunpack.c.l.bf16 %v8728_v1  ;;  %v1395_v6 = vunpack.c.h.bf16 %v8732_v4  ;;  %v8736_v7 = vld [vmem:[%s10375_s0 + $0x238] sm:$0xff]   ;;  %v1425_v8 = vunpack.c.l.bf16 %v8732_v4 }
   0xe   :  { %168 = vst [vmem:[#allocation1 + $0xe4] sm:$0xf0] %v165_v9  ;;  %v1485_v11 = vunpack.c.l.bf16 %v8736_v7 }
   0xf   :  { %183 = vst [vmem:[#allocation1 + $0x708] sm:$0xf] %v165_v9  ;;  %v1455_v9 = vunpack.c.h.bf16 %v8736_v7 }
  0x10   :  { %198 = vst [vmem:[#allocation1 + $0x4ec] sm:$0xf0] %v195_v10 }
  0x11   :  { %213 = vst [vmem:[#allocation1 + $0x530] sm:$0xf] %v195_v10  ;;  %v8740_v10 = vld [vmem:[%s10375_s0 + $0x230] sm:$0xff]  }
  0x12   :  { %228 = vst [vmem:[#allocation1 + $0x484] sm:$0xf0] %v225_v12  ;;  %v1545_v14 = vunpack.c.l.bf16 %v8740_v10 }
  0x13   :  { %243 = vst [vmem:[#allocation1 + $0x8d8] sm:$0xf] %v225_v12  ;;  %v1515_v12 = vunpack.c.h.bf16 %v8740_v10 }
  0x14   :  { %258 = vst [vmem:[#allocation1 + $0x4cc] sm:$0xf0] %v255_v13 }
  0x15   :  { %273 = vst [vmem:[#allocation1 + $0x3e8] sm:$0xf] %v255_v13  ;;  %v8744_v13 = vld [vmem:[%s10375_s0 + $0x228] sm:$0xff]  }
  0x16   :  { %288 = vst [vmem:[#allocation1 + $0x124] sm:$0xf0] %v285_v15  ;;  %v1605_v17 = vunpack.c.l.bf16 %v8744_v13 }
  0x17   :  { %303 = vst [vmem:[#allocation1 + $0x660] sm:$0xf] %v285_v15  ;;  %v1575_v15 = vunpack.c.h.bf16 %v8744_v13 }
  0x18   :  { %318 = vst [vmem:[#allocation1 + $0x64c] sm:$0xf0] %v315_v16 }
  0x19   :  { %333 = vst [vmem:[#allocation1 + $0x828] sm:$0xf] %v315_v16  ;;  %v8748_v16 = vld [vmem:[%s10375_s0 + $0x220] sm:$0xff]  }
  0x1a   :  { %348 = vst [vmem:[#allocation1 + $0xb4] sm:$0xf0] %v345_v18  ;;  %v1665_v20 = vunpack.c.l.bf16 %v8748_v16 }
  0x1b   :  { %363 = vst [vmem:[#allocation1 + $0xbb0] sm:$0xf] %v345_v18  ;;  %v1635_v18 = vunpack.c.h.bf16 %v8748_v16 }
  0x1c   :  { %378 = vst [vmem:[#allocation1 + $0x34] sm:$0xf0] %v375_v19 }
  0x1d   :  { %393 = vst [vmem:[#allocation1 + $0x260] sm:$0xf] %v375_v19  ;;  %v8752_v19 = vld [vmem:[%s10375_s0 + $0x218] sm:$0xff]  }
  0x1e   :  { %408 = vst [vmem:[#allocation1 + $0x19c] sm:$0xf0] %v405_v21  ;;  %v1725_v23 = vunpack.c.l.bf16 %v8752_v19 }
  0x1f   :  { %423 = vst [vmem:[#allocation1 + $0x320] sm:$0xf] %v405_v21  ;;  %v1695_v21 = vunpack.c.h.bf16 %v8752_v19 }
  0x20   :  { %438 = vst [vmem:[#allocation1 + $0x5c] sm:$0xf0] %v435_v22 }
  0x21   :  { %453 = vst [vmem:[#allocation1 + $0xbf0] sm:$0xf] %v435_v22  ;;  %v8756_v22 = vld [vmem:[%s10375_s0 + $0x210] sm:$0xff]  }
  0x22   :  { %468 = vst [vmem:[#allocation1 + $0x3cc] sm:$0xf0] %v465_v24  ;;  %v1785_v26 = vunpack.c.l.bf16 %v8756_v22 }
  0x23   :  { %483 = vst [vmem:[#allocation1 + $0x430] sm:$0xf] %v465_v24  ;;  %v1755_v24 = vunpack.c.h.bf16 %v8756_v22 }
  0x24   :  { %498 = vst [vmem:[#allocation1 + $0xbe4] sm:$0xf0] %v495_v25 }
  0x25   :  { %513 = vst [vmem:[#allocation1 + $0x830] sm:$0xf] %v495_v25  ;;  %v8760_v25 = vld [vmem:[%s10375_s0 + $0x208] sm:$0xff]  }
  0x26   :  { %528 = vst [vmem:[#allocation1 + $0x30c] sm:$0xf0] %v525_v27  ;;  %v1845_v29 = vunpack.c.l.bf16 %v8760_v25 }
  0x27   :  { %543 = vst [vmem:[#allocation1 + $0x838] sm:$0xf] %v525_v27  ;;  %v1815_v27 = vunpack.c.h.bf16 %v8760_v25 }
  0x28   :  { %558 = vst [vmem:[#allocation1 + $0x36c] sm:$0xf0] %v555_v28 }
  0x29   :  { %573 = vst [vmem:[#allocation1 + $0x3a8] sm:$0xf] %v555_v28  ;;  %v8764_v28 = vld [vmem:[%s10375_s0 + $0x200] sm:$0xff]  }
  0x2a   :  { %588 = vst [vmem:[#allocation1 + $0x934] sm:$0xf0] %v585_v30  ;;  %v1905_v32 = vunpack.c.l.bf16 %v8764_v28 }
  0x2b   :  { %603 = vst [vmem:[#allocation1 + $0x558] sm:$0xf] %v585_v30  ;;  %v1875_v30 = vunpack.c.h.bf16 %v8764_v28 }
  0x2c   :  { %618 = vst [vmem:[#allocation1 + $0xb5c] sm:$0xf0] %v615_v31 }
  0x2d   :  { %633 = vst [vmem:[#allocation1 + $0x638] sm:$0xf] %v615_v31  ;;  %v8768_v31 = vld [vmem:[%s10375_s0 + $0x1f8] sm:$0xff]  }
  0x2e   :  { %648 = vst [vmem:[#allocation1 + $0x624] sm:$0xf0] %v645_v33  ;;  %v1965_v35 = vunpack.c.l.bf16 %v8768_v31 }
  0x2f   :  { %663 = vst [vmem:[#allocation1 + $0x4b0] sm:$0xf] %v645_v33  ;;  %v1935_v33 = vunpack.c.h.bf16 %v8768_v31 }
  0x30   :  { %678 = vst [vmem:[#allocation1 + $0x5e4] sm:$0xf0] %v675_v34 }
  0x31   :  { %693 = vst [vmem:[#allocation1 + $0x1d8] sm:$0xf] %v675_v34  ;;  %v8772_v34 = vld [vmem:[%s10375_s0 + $0x1f0] sm:$0xff]  }
  0x32   :  { %708 = vst [vmem:[#allocation1 + $0xdc] sm:$0xf0] %v705_v36  ;;  %v2025_v38 = vunpack.c.l.bf16 %v8772_v34 }
  0x33   :  { %723 = vst [vmem:[#allocation1 + $0x8] sm:$0xf] %v705_v36  ;;  %v1995_v36 = vunpack.c.h.bf16 %v8772_v34 }
  0x34   :  { %738 = vst [vmem:[#allocation1 + $0x384] sm:$0xf0] %v735_v37 }
  0x35   :  { %753 = vst [vmem:[#allocation1 + $0x288] sm:$0xf] %v735_v37  ;;  %v8776_v37 = vld [vmem:[%s10375_s0 + $0x1e8] sm:$0xff]  }
  0x36   :  { %768 = vst [vmem:[#allocation1 + $0x45c] sm:$0xf0] %v765_v39  ;;  %v2085_v41 = vunpack.c.l.bf16 %v8776_v37 }
  0x37   :  { %783 = vst [vmem:[#allocation1 + $0x578] sm:$0xf] %v765_v39  ;;  %v2055_v39 = vunpack.c.h.bf16 %v8776_v37 }
  0x38   :  { %798 = vst [vmem:[#allocation1 + $0x7c] sm:$0xf0] %v795_v40 }
  0x39   :  { %813 = vst [vmem:[#allocation1 + $0x918] sm:$0xf] %v795_v40  ;;  %v8780_v40 = vld [vmem:[%s10375_s0 + $0x1e0] sm:$0xff]  }
  0x3a   :  { %828 = vst [vmem:[#allocation1 + $0x7dc] sm:$0xf0] %v825_v42  ;;  %v2145_v44 = vunpack.c.l.bf16 %v8780_v40 }
  0x3b   :  { %843 = vst [vmem:[#allocation1 + $0x7e8] sm:$0xf] %v825_v42  ;;  %v2115_v42 = vunpack.c.h.bf16 %v8780_v40 }
  0x3c   :  { %858 = vst [vmem:[#allocation1 + $0x9c] sm:$0xf0] %v855_v43 }
  0x3d   :  { %873 = vst [vmem:[#allocation1 + $0x6f8] sm:$0xf] %v855_v43  ;;  %v8784_v43 = vld [vmem:[%s10375_s0 + $0x1d8] sm:$0xff]  }
  0x3e   :  { %888 = vst [vmem:[#allocation1 + $0x584] sm:$0xf0] %v885_v45  ;;  %v2205_v47 = vunpack.c.l.bf16 %v8784_v43 }
  0x3f   :  { %903 = vst [vmem:[#allocation1 + $0x630] sm:$0xf] %v885_v45  ;;  %v2175_v45 = vunpack.c.h.bf16 %v8784_v43 }
  0x40   :  { %918 = vst [vmem:[#allocation1 + $0x5b4] sm:$0xf0] %v915_v46 }
  0x41   :  { %933 = vst [vmem:[#allocation1 + $0xc8] sm:$0xf] %v915_v46  ;;  %v8788_v46 = vld [vmem:[%s10375_s0 + $0x1d0] sm:$0xff]  }
  0x42   :  { %948 = vst [vmem:[#allocation1 + $0x954] sm:$0xf0] %v945_v48  ;;  %v2265_v50 = vunpack.c.l.bf16 %v8788_v46 }
  0x43   :  { %963 = vst [vmem:[#allocation1 + $0x250] sm:$0xf] %v945_v48  ;;  %v2235_v48 = vunpack.c.h.bf16 %v8788_v46 }
  0x44   :  { %978 = vst [vmem:[#allocation1 + $0xb94] sm:$0xf0] %v975_v49 }
  0x45   :  { %993 = vst [vmem:[#allocation1 + $0xb70] sm:$0xf] %v975_v49  ;;  %v8792_v49 = vld [vmem:[%s10375_s0 + $0x1c8] sm:$0xff]  }
  0x46   :  { %1008 = vst [vmem:[#allocation1 + $0x644] sm:$0xf0] %v1005_v51  ;;  %v2325_v53 = vunpack.c.l.bf16 %v8792_v49 }
  0x47   :  { %1023 = vst [vmem:[#allocation1 + $0x508] sm:$0xf] %v1005_v51  ;;  %v2295_v51 = vunpack.c.h.bf16 %v8792_v49 }
  0x48   :  { %1038 = vst [vmem:[#allocation1 + $0x2ec] sm:$0xf0] %v1035_v52 }
  0x49   :  { %1053 = vst [vmem:[#allocation1 + $0x3b8] sm:$0xf] %v1035_v52  ;;  %v8796_v52 = vld [vmem:[%s10375_s0 + $0x1c0] sm:$0xff]  }
  0x4a   :  { %1068 = vst [vmem:[#allocation1 + $0x3c4] sm:$0xf0] %v1065_v54  ;;  %v2385_v56 = vunpack.c.l.bf16 %v8796_v52 }
  0x4b   :  { %1083 = vst [vmem:[#allocation1 + $0xa8] sm:$0xf] %v1065_v54  ;;  %v2355_v54 = vunpack.c.h.bf16 %v8796_v52 }
  0x4c   :  { %1098 = vst [vmem:[#allocation1 + $0x81c] sm:$0xf0] %v1095_v55 }
  0x4d   :  { %1113 = vst [vmem:[#allocation1 + $0x9c8] sm:$0xf] %v1095_v55  ;;  %v8800_v55 = vld [vmem:[%s10375_s0 + $0x1b8] sm:$0xff]  }
  0x4e   :  { %1128 = vst [vmem:[#allocation1 + $0x59c] sm:$0xf0] %v1125_v57  ;;  %v2445_v59 = vunpack.c.l.bf16 %v8800_v55 }
  0x4f   :  { %1143 = vst [vmem:[#allocation1 + $0x880] sm:$0xf] %v1125_v57  ;;  %v2415_v57 = vunpack.c.h.bf16 %v8800_v55 }
  0x50   :  { %1158 = vst [vmem:[#allocation1 + $0x5c4] sm:$0xf0] %v1155_v58 }
  0x51   :  { %1173 = vst [vmem:[#allocation1 + $0xac8] sm:$0xf] %v1155_v58  ;;  %v8804_v58 = vld [vmem:[%s10375_s0 + $0x1b0] sm:$0xff]  }
  0x52   :  { %1188 = vst [vmem:[#allocation1 + $0xb2c] sm:$0xf0] %v1185_v60  ;;  %v2505_v62 = vunpack.c.l.bf16 %v8804_v58 }
  0x53   :  { %1203 = vst [vmem:[#allocation1 + $0xa90] sm:$0xf] %v1185_v60  ;;  %v2475_v60 = vunpack.c.h.bf16 %v8804_v58 }
  0x54   :  { %1218 = vst [vmem:[#allocation1 + $0x2fc] sm:$0xf0] %v1215_v61 }
  0x55   :  { %1233 = vst [vmem:[#allocation1 + $0x8a8] sm:$0xf] %v1215_v61  ;;  %v8808_v61 = vld [vmem:[%s10375_s0 + $0x1a8] sm:$0xff]  }
  0x56   :  { %1248 = vst [vmem:[#allocation1 + $0x8ac] sm:$0xf0] %v1245_v63  ;;  %v2565_v1 = vunpack.c.l.bf16 %v8808_v61 }
  0x57   :  { %1263 = vst [vmem:[#allocation1 + $0x560] sm:$0xf] %v1245_v63  ;;  %v2535_v63 = vunpack.c.h.bf16 %v8808_v61 }
  0x58   :  { %1278 = vst [vmem:[#allocation1 + $0x2dc] sm:$0xf0] %v1275_v0 }
  0x59   :  { %1293 = vst [vmem:[#allocation1 + $0x9d8] sm:$0xf] %v1275_v0  ;;  %v8812_v0 = vld [vmem:[%s10375_s0 + $0x1a0] sm:$0xff]  }
  0x5a   :  { %1308 = vst [vmem:[#allocation1 + $0xbbc] sm:$0xf0] %v1305_v2  ;;  %v2625_v4 = vunpack.c.l.bf16 %v8812_v0 }
  0x5b   :  { %1323 = vst [vmem:[#allocation1 + $0x890] sm:$0xf] %v1305_v2  ;;  %v2595_v2 = vunpack.c.h.bf16 %v8812_v0 }
  0x5c   :  { %1338 = vst [vmem:[#allocation1 + $0x1c] sm:$0xf0] %v1335_v3 }
  0x5d   :  { %1353 = vst [vmem:[#allocation1 + $0x1d0] sm:$0xf] %v1335_v3  ;;  %v8816_v3 = vld [vmem:[%s10375_s0 + $0x198] sm:$0xff]  }
  0x5e   :  { %1368 = vst [vmem:[#allocation1 + $0x29c] sm:$0xf0] %v1365_v5  ;;  %v2685_v7 = vunpack.c.l.bf16 %v8816_v3 }
  0x5f   :  { %1383 = vst [vmem:[#allocation1 + $0x2a8] sm:$0xf] %v1365_v5  ;;  %v2655_v5 = vunpack.c.h.bf16 %v8816_v3 }
  0x60   :  { %1398 = vst [vmem:[#allocation1 + $0x114] sm:$0xf0] %v1395_v6 }
  0x61   :  { %1413 = vst [vmem:[#allocation1 + $0x8f8] sm:$0xf] %v1395_v6  ;;  %v8820_v6 = vld [vmem:[%s10375_s0 + $0x190] sm:$0xff]  }
  0x62   :  { %1428 = vst [vmem:[#allocation1 + $0x6ec] sm:$0xf0] %v1425_v8  ;;  %v2745_v10 = vunpack.c.l.bf16 %v8820_v6 }
  0x63   :  { %1443 = vst [vmem:[#allocation1 + $0x350] sm:$0xf] %v1425_v8  ;;  %v2715_v8 = vunpack.c.h.bf16 %v8820_v6 }
  0x64   :  { %1458 = vst [vmem:[#allocation1 + $0x33c] sm:$0xf0] %v1455_v9 }
  0x65   :  { %1473 = vst [vmem:[#allocation1 + $0x1c0] sm:$0xf] %v1455_v9  ;;  %v8824_v9 = vld [vmem:[%s10375_s0 + $0x188] sm:$0xff]  }
  0x66   :  { %1488 = vst [vmem:[#allocation1 + $0xad4] sm:$0xf0] %v1485_v11  ;;  %v2805_v13 = vunpack.c.l.bf16 %v8824_v9 }
  0x67   :  { %1503 = vst [vmem:[#allocation1 + $0x220] sm:$0xf] %v1485_v11  ;;  %v2775_v11 = vunpack.c.h.bf16 %v8824_v9 }
  0x68   :  { %1518 = vst [vmem:[#allocation1 + $0x4c4] sm:$0xf0] %v1515_v12 }
  0x69   :  { %1533 = vst [vmem:[#allocation1 + $0x420] sm:$0xf] %v1515_v12  ;;  %v8828_v12 = vld [vmem:[%s10375_s0 + $0x180] sm:$0xff]  }
  0x6a   :  { %1548 = vst [vmem:[#allocation1 + $0x18c] sm:$0xf0] %v1545_v14  ;;  %v2865_v16 = vunpack.c.l.bf16 %v8828_v12 }
  0x6b   :  { %1563 = vst [vmem:[#allocation1 + $0xbb8] sm:$0xf] %v1545_v14  ;;  %v2835_v14 = vunpack.c.h.bf16 %v8828_v12 }
  0x6c   :  { %1578 = vst [vmem:[#allocation1 + $0xacc] sm:$0xf0] %v1575_v15 }
  0x6d   :  { %1593 = vst [vmem:[#allocation1 + $0xab8] sm:$0xf] %v1575_v15  ;;  %v8832_v15 = vld [vmem:[%s10375_s0 + $0x178] sm:$0xff]  }
  0x6e   :  { %1608 = vst [vmem:[#allocation1 + $0x40c] sm:$0xf0] %v1605_v17  ;;  %v2925_v19 = vunpack.c.l.bf16 %v8832_v15 }
  0x6f   :  { %1623 = vst [vmem:[#allocation1 + $0x170] sm:$0xf] %v1605_v17  ;;  %v2895_v17 = vunpack.c.h.bf16 %v8832_v15 }
  0x70   :  { %1638 = vst [vmem:[#allocation1 + $0x15c] sm:$0xf0] %v1635_v18 }
  0x71   :  { %1653 = vst [vmem:[#allocation1 + $0xd0] sm:$0xf] %v1635_v18  ;;  %v8836_v18 = vld [vmem:[%s10375_s0 + $0x170] sm:$0xff]  }
  0x72   :  { %1668 = vst [vmem:[#allocation1 + $0x95c] sm:$0xf0] %v1665_v20  ;;  %v2985_v22 = vunpack.c.l.bf16 %v8836_v18 }
  0x73   :  { %1683 = vst [vmem:[#allocation1 + $0x668] sm:$0xf] %v1665_v20  ;;  %v2955_v20 = vunpack.c.h.bf16 %v8836_v18 }
  0x74   :  { %1698 = vst [vmem:[#allocation1 + $0x394] sm:$0xf0] %v1695_v21 }
  0x75   :  { %1713 = vst [vmem:[#allocation1 + $0x888] sm:$0xf] %v1695_v21  ;;  %v8840_v21 = vld [vmem:[%s10375_s0 + $0x168] sm:$0xff]  }
  0x76   :  { %1728 = vst [vmem:[#allocation1 + $0x14] sm:$0xf0] %v1725_v23  ;;  %v3045_v25 = vunpack.c.l.bf16 %v8840_v21 }
  0x77   :  { %1743 = vst [vmem:[#allocation1 + $0x9a0] sm:$0xf] %v1725_v23  ;;  %v3015_v23 = vunpack.c.h.bf16 %v8840_v21 }
  0x78   :  { %1758 = vst [vmem:[#allocation1 + $0x68c] sm:$0xf0] %v1755_v24 }
  0x79   :  { %1773 = vst [vmem:[#allocation1 + $0x758] sm:$0xf] %v1755_v24  ;;  %v8844_v24 = vld [vmem:[%s10375_s0 + $0x160] sm:$0xff]  }
  0x7a   :  { %1788 = vst [vmem:[#allocation1 + $0x4bc] sm:$0xf0] %v1785_v26  ;;  %v3105_v28 = vunpack.c.l.bf16 %v8844_v24 }
  0x7b   :  { %1803 = vst [vmem:[#allocation1 + $0x168] sm:$0xf] %v1785_v26  ;;  %v3075_v26 = vunpack.c.h.bf16 %v8844_v24 }
  0x7c   :  { %1818 = vst [vmem:[#allocation1 + $0x61c] sm:$0xf0] %v1815_v27 }
  0x7d   :  { %1833 = vst [vmem:[#allocation1 + $0x9c0] sm:$0xf] %v1815_v27  ;;  %v8848_v27 = vld [vmem:[%s10375_s0 + $0x158] sm:$0xff]  }
  0x7e   :  { %1848 = vst [vmem:[#allocation1 + $0x594] sm:$0xf0] %v1845_v29  ;;  %v3165_v31 = vunpack.c.l.bf16 %v8848_v27 }
  0x7f   :  { %1863 = vst [vmem:[#allocation1 + $0x518] sm:$0xf] %v1845_v29  ;;  %v3135_v29 = vunpack.c.h.bf16 %v8848_v27 }
  0x80   :  { %1878 = vst [vmem:[#allocation1 + $0x154] sm:$0xf0] %v1875_v30 }
  0x81   :  { %1893 = vst [vmem:[#allocation1 + $0x590] sm:$0xf] %v1875_v30  ;;  %v8852_v30 = vld [vmem:[%s10375_s0 + $0x150] sm:$0xff]  }
  0x82   :  { %1908 = vst [vmem:[#allocation1 + $0x85c] sm:$0xf0] %v1905_v32  ;;  %v3225_v34 = vunpack.c.l.bf16 %v8852_v30 }
  0x83   :  { %1923 = vst [vmem:[#allocation1 + $0x850] sm:$0xf] %v1905_v32  ;;  %v3195_v32 = vunpack.c.h.bf16 %v8852_v30 }
  0x84   :  { %1938 = vst [vmem:[#allocation1 + $0x234] sm:$0xf0] %v1935_v33 }
  0x85   :  { %1953 = vst [vmem:[#allocation1 + $0x7c8] sm:$0xf] %v1935_v33  ;;  %v8856_v33 = vld [vmem:[%s10375_s0 + $0x148] sm:$0xff]  }
  0x86   :  { %1968 = vst [vmem:[#allocation1 + $0x2ac] sm:$0xf0] %v1965_v35  ;;  %v3285_v37 = vunpack.c.l.bf16 %v8856_v33 }
  0x87   :  { %1983 = vst [vmem:[#allocation1 + $0x450] sm:$0xf] %v1965_v35  ;;  %v3255_v35 = vunpack.c.h.bf16 %v8856_v33 }
  0x88   :  { %1998 = vst [vmem:[#allocation1 + $0x53c] sm:$0xf0] %v1995_v36 }
  0x89   :  { %2013 = vst [vmem:[#allocation1 + $0x778] sm:$0xf] %v1995_v36  ;;  %v8860_v36 = vld [vmem:[%s10375_s0 + $0x140] sm:$0xff]  }
  0x8a   :  { %2028 = vst [vmem:[#allocation1 + $0x894] sm:$0xf0] %v2025_v38  ;;  %v3345_v40 = vunpack.c.l.bf16 %v8860_v36 }
  0x8b   :  { %2043 = vst [vmem:[#allocation1 + $0x910] sm:$0xf] %v2025_v38  ;;  %v3315_v38 = vunpack.c.h.bf16 %v8860_v36 }
  0x8c   :  { %2058 = vst [vmem:[#allocation1 + $0x73c] sm:$0xf0] %v2055_v39 }
  0x8d   :  { %2073 = vst [vmem:[#allocation1 + $0xb90] sm:$0xf] %v2055_v39  ;;  %v8864_v39 = vld [vmem:[%s10375_s0 + $0x138] sm:$0xff]  }
  0x8e   :  { %2088 = vst [vmem:[#allocation1 + $0x174] sm:$0xf0] %v2085_v41  ;;  %v3405_v43 = vunpack.c.l.bf16 %v8864_v39 }
  0x8f   :  { %2103 = vst [vmem:[#allocation1 + $0xb78] sm:$0xf] %v2085_v41  ;;  %v3375_v41 = vunpack.c.h.bf16 %v8864_v39 }
  0x90   :  { %2118 = vst [vmem:[#allocation1 + $0x5a4] sm:$0xf0] %v2115_v42 }
  0x91   :  { %2133 = vst [vmem:[#allocation1 + $0x7a8] sm:$0xf] %v2115_v42  ;;  %v8868_v42 = vld [vmem:[%s10375_s0 + $0x130] sm:$0xff]  }
  0x92   :  { %2148 = vst [vmem:[#allocation1 + $0x1dc] sm:$0xf0] %v2145_v44  ;;  %v3465_v46 = vunpack.c.l.bf16 %v8868_v42 }
  0x93   :  { %2163 = vst [vmem:[#allocation1 + $0x940] sm:$0xf] %v2145_v44  ;;  %v3435_v44 = vunpack.c.h.bf16 %v8868_v42 }
  0x94   :  { %2178 = vst [vmem:[#allocation1 + $0xae4] sm:$0xf0] %v2175_v45 }
  0x95   :  { %2193 = vst [vmem:[#allocation1 + $0x6d8] sm:$0xf] %v2175_v45  ;;  %v8872_v45 = vld [vmem:[%s10375_s0 + $0x128] sm:$0xff]  }
  0x96   :  { %2208 = vst [vmem:[#allocation1 + $0x604] sm:$0xf0] %v2205_v47  ;;  %v3525_v49 = vunpack.c.l.bf16 %v8872_v45 }
  0x97   :  { %2223 = vst [vmem:[#allocation1] sm:$0xf] %v2205_v47  ;;  %v3495_v47 = vunpack.c.h.bf16 %v8872_v45 }
  0x98   :  { %2238 = vst [vmem:[#allocation1 + $0x324] sm:$0xf0] %v2235_v48 }
  0x99   :  { %2253 = vst [vmem:[#allocation1 + $0x700] sm:$0xf] %v2235_v48  ;;  %v8876_v48 = vld [vmem:[%s10375_s0 + $0x120] sm:$0xff]  }
  0x9a   :  { %2268 = vst [vmem:[#allocation1 + $0xd4] sm:$0xf0] %v2265_v50  ;;  %v3585_v52 = vunpack.c.l.bf16 %v8876_v48 }
  0x9b   :  { %2283 = vst [vmem:[#allocation1 + $0xae0] sm:$0xf] %v2265_v50  ;;  %v3555_v50 = vunpack.c.h.bf16 %v8876_v48 }
  0x9c   :  { %2298 = vst [vmem:[#allocation1 + $0xb1c] sm:$0xf0] %v2295_v51 }
  0x9d   :  { %2313 = vst [vmem:[#allocation1 + $0xa58] sm:$0xf] %v2295_v51  ;;  %v8880_v51 = vld [vmem:[%s10375_s0 + $0x118] sm:$0xff]  }
  0x9e   :  { %2328 = vst [vmem:[#allocation1 + $0xa44] sm:$0xf0] %v2325_v53  ;;  %v3645_v55 = vunpack.c.l.bf16 %v8880_v51 }
  0x9f   :  { %2343 = vst [vmem:[#allocation1 + $0x378] sm:$0xf] %v2325_v53  ;;  %v3615_v53 = vunpack.c.h.bf16 %v8880_v51 }
  0xa0   :  { %2358 = vst [vmem:[#allocation1 + $0x6bc] sm:$0xf0] %v2355_v54 }
  0xa1   :  { %2373 = vst [vmem:[#allocation1 + $0x988] sm:$0xf] %v2355_v54  ;;  %v8884_v54 = vld [vmem:[%s10375_s0 + $0x110] sm:$0xff]  }
  0xa2   :  { %2388 = vst [vmem:[#allocation1 + $0xbc4] sm:$0xf0] %v2385_v56  ;;  %v3705_v58 = vunpack.c.l.bf16 %v8884_v54 }
  0xa3   :  { %2403 = vst [vmem:[#allocation1 + $0x3c0] sm:$0xf] %v2385_v56  ;;  %v3675_v56 = vunpack.c.h.bf16 %v8884_v54 }
  0xa4   :  { %2418 = vst [vmem:[#allocation1 + $0xa94] sm:$0xf0] %v2415_v57 }
  0xa5   :  { %2433 = vst [vmem:[#allocation1 + $0x7d0] sm:$0xf] %v2415_v57  ;;  %v8888_v57 = vld [vmem:[%s10375_s0 + $0x108] sm:$0xff]  }
  0xa6   :  { %2448 = vst [vmem:[#allocation1 + $0xa84] sm:$0xf0] %v2445_v59  ;;  %v3765_v61 = vunpack.c.l.bf16 %v8888_v57 }
  0xa7   :  { %2463 = vst [vmem:[#allocation1 + $0x1e8] sm:$0xf] %v2445_v59  ;;  %v3735_v59 = vunpack.c.h.bf16 %v8888_v57 }
  0xa8   :  { %2478 = vst [vmem:[#allocation1 + $0x63c] sm:$0xf0] %v2475_v60 }
  0xa9   :  { %2493 = vst [vmem:[#allocation1 + $0x2d8] sm:$0xf] %v2475_v60  ;;  %v8892_v60 = vld [vmem:[%s10375_s0 + $0x100] sm:$0xff]  }
  0xaa   :  { %2508 = vst [vmem:[#allocation1 + $0x72c] sm:$0xf0] %v2505_v62  ;;  %v3825_v0 = vunpack.c.l.bf16 %v8892_v60 }
  0xab   :  { %2523 = vst [vmem:[#allocation1 + $0x548] sm:$0xf] %v2505_v62  ;;  %v3795_v62 = vunpack.c.h.bf16 %v8892_v60 }
  0xac   :  { %2538 = vst [vmem:[#allocation1 + $0x674] sm:$0xf0] %v2535_v63 }
  0xad   :  { %2553 = vst [vmem:[#allocation1 + $0xbe0] sm:$0xf] %v2535_v63  ;;  %v8896_v63 = vld [vmem:[%s10375_s0 + $0xf8] sm:$0xff]  }
  0xae   :  { %2568 = vst [vmem:[#allocation1 + $0x244] sm:$0xf0] %v2565_v1  ;;  %v3885_v3 = vunpack.c.l.bf16 %v8896_v63 }
  0xaf   :  { %2583 = vst [vmem:[#allocation1 + $0x6a0] sm:$0xf] %v2565_v1  ;;  %v3855_v1 = vunpack.c.h.bf16 %v8896_v63 }
  0xb0   :  { %2598 = vst [vmem:[#allocation1 + $0x57c] sm:$0xf0] %v2595_v2 }
  0xb1   :  { %2613 = vst [vmem:[#allocation1 + $0x1c8] sm:$0xf] %v2595_v2  ;;  %v8900_v2 = vld [vmem:[%s10375_s0 + $0xf0] sm:$0xff]  }
  0xb2   :  { %2628 = vst [vmem:[#allocation1 + $0x78c] sm:$0xf0] %v2625_v4  ;;  %v3945_v6 = vunpack.c.l.bf16 %v8900_v2 }
  0xb3   :  { %2643 = vst [vmem:[#allocation1 + $0x480] sm:$0xf] %v2625_v4  ;;  %v3915_v4 = vunpack.c.h.bf16 %v8900_v2 }
  0xb4   :  { %2658 = vst [vmem:[#allocation1 + $0x7fc] sm:$0xf0] %v2655_v5 }
  0xb5   :  { %2673 = vst [vmem:[#allocation1 + $0xb40] sm:$0xf] %v2655_v5  ;;  %v8904_v5 = vld [vmem:[%s10375_s0 + $0xe8] sm:$0xff]  }
  0xb6   :  { %2688 = vst [vmem:[#allocation1 + $0x8bc] sm:$0xf0] %v2685_v7  ;;  %v4005_v9 = vunpack.c.l.bf16 %v8904_v5 }
  0xb7   :  { %2703 = vst [vmem:[#allocation1 + $0xaa8] sm:$0xf] %v2685_v7  ;;  %v3975_v7 = vunpack.c.h.bf16 %v8904_v5 }
  0xb8   :  { %2718 = vst [vmem:[#allocation1 + $0xb14] sm:$0xf0] %v2715_v8 }
  0xb9   :  { %2733 = vst [vmem:[#allocation1 + $0x68] sm:$0xf] %v2715_v8  ;;  %v8908_v8 = vld [vmem:[%s10375_s0 + $0xe0] sm:$0xff]  }
  0xba   :  { %2748 = vst [vmem:[#allocation1 + $0x8b4] sm:$0xf0] %v2745_v10  ;;  %v4065_v12 = vunpack.c.l.bf16 %v8908_v8 }
  0xbb   :  { %2763 = vst [vmem:[#allocation1 + $0x2d0] sm:$0xf] %v2745_v10  ;;  %v4035_v10 = vunpack.c.h.bf16 %v8908_v8 }
  0xbc   :  { %2778 = vst [vmem:[#allocation1 + $0xa2c] sm:$0xf0] %v2775_v11 }
  0xbd   :  { %2793 = vst [vmem:[#allocation1 + $0x258] sm:$0xf] %v2775_v11  ;;  %v8912_v11 = vld [vmem:[%s10375_s0 + $0xd8] sm:$0xff]  }
  0xbe   :  { %2808 = vst [vmem:[#allocation1 + $0xb4c] sm:$0xf0] %v2805_v13  ;;  %v4125_v15 = vunpack.c.l.bf16 %v8912_v11 }
  0xbf   :  { %2823 = vst [vmem:[#allocation1 + $0x360] sm:$0xf] %v2805_v13  ;;  %v4095_v13 = vunpack.c.h.bf16 %v8912_v11 }
  0xc0   :  { %2838 = vst [vmem:[#allocation1 + $0xfc] sm:$0xf0] %v2835_v14 }
  0xc1   :  { %2853 = vst [vmem:[#allocation1 + $0x110] sm:$0xf] %v2835_v14  ;;  %v8916_v14 = vld [vmem:[%s10375_s0 + $0xd0] sm:$0xff]  }
  0xc2   :  { %2868 = vst [vmem:[#allocation1 + $0xaf4] sm:$0xf0] %v2865_v16  ;;  %v4185_v18 = vunpack.c.l.bf16 %v8916_v14 }
  0xc3   :  { %2883 = vst [vmem:[#allocation1 + $0x270] sm:$0xf] %v2865_v16  ;;  %v4155_v16 = vunpack.c.h.bf16 %v8916_v14 }
  0xc4   :  { %2898 = vst [vmem:[#allocation1 + $0x3f4] sm:$0xf0] %v2895_v17 }
  0xc5   :  { %2913 = vst [vmem:[#allocation1 + $0x348] sm:$0xf] %v2895_v17  ;;  %v8920_v17 = vld [vmem:[%s10375_s0 + $0xc8] sm:$0xff]  }
  0xc6   :  { %2928 = vst [vmem:[#allocation1 + $0x334] sm:$0xf0] %v2925_v19  ;;  %v4245_v21 = vunpack.c.l.bf16 %v8920_v17 }
  0xc7   :  { %2943 = vst [vmem:[#allocation1 + $0xaf0] sm:$0xf] %v2925_v19  ;;  %v4215_v19 = vunpack.c.h.bf16 %v8920_v17 }
  0xc8   :  { %2958 = vst [vmem:[#allocation1 + $0xc] sm:$0xf0] %v2955_v20 }
  0xc9   :  { %2973 = vst [vmem:[#allocation1 + $0xa50] sm:$0xf] %v2955_v20  ;;  %v8924_v20 = vld [vmem:[%s10375_s0 + $0xc0] sm:$0xff]  }
  0xca   :  { %2988 = vst [vmem:[#allocation1 + $0xbd4] sm:$0xf0] %v2985_v22  ;;  %v4305_v24 = vunpack.c.l.bf16 %v8924_v20 }
  0xcb   :  { %3003 = vst [vmem:[#allocation1 + $0x7f0] sm:$0xf] %v2985_v22  ;;  %v4275_v22 = vunpack.c.h.bf16 %v8924_v20 }
  0xcc   :  { %3018 = vst [vmem:[#allocation1 + $0x844] sm:$0xf0] %v3015_v23 }
  0xcd   :  { %3033 = vst [vmem:[#allocation1 + $0x50] sm:$0xf] %v3015_v23  ;;  %v8928_v23 = vld [vmem:[%s10375_s0 + $0xb8] sm:$0xff]  }
  0xce   :  { %3048 = vst [vmem:[#allocation1 + $0x654] sm:$0xf0] %v3045_v25  ;;  %v4365_v27 = vunpack.c.l.bf16 %v8928_v23 }
  0xcf   :  { %3063 = vst [vmem:[#allocation1 + $0x3d8] sm:$0xf] %v3045_v25  ;;  %v4335_v25 = vunpack.c.h.bf16 %v8928_v23 }
  0xd0   :  { %3078 = vst [vmem:[#allocation1 + $0xb34] sm:$0xf0] %v3075_v26 }
  0xd1   :  { %3093 = vst [vmem:[#allocation1 + $0x5c0] sm:$0xf] %v3075_v26  ;;  %v8932_v26 = vld [vmem:[%s10375_s0 + $0xb0] sm:$0xff]  }
  0xd2   :  { %3108 = vst [vmem:[#allocation1 + $0x50c] sm:$0xf0] %v3105_v28  ;;  %v4425_v30 = vunpack.c.l.bf16 %v8932_v26 }
  0xd3   :  { %3123 = vst [vmem:[#allocation1 + $0x6a8] sm:$0xf] %v3105_v28  ;;  %v4395_v28 = vunpack.c.h.bf16 %v8932_v26 }
  0xd4   :  { %3138 = vst [vmem:[#allocation1 + $0x9f4] sm:$0xf0] %v3135_v29 }
  0xd5   :  { %3153 = vst [vmem:[#allocation1 + $0xb08] sm:$0xf] %v3135_v29  ;;  %v8936_v29 = vld [vmem:[%s10375_s0 + $0xa8] sm:$0xff]  }
  0xd6   :  { %3168 = vst [vmem:[#allocation1 + $0x9dc] sm:$0xf0] %v3165_v31  ;;  %v4485_v33 = vunpack.c.l.bf16 %v8936_v29 }
  0xd7   :  { %3183 = vst [vmem:[#allocation1 + $0x868] sm:$0xf] %v3165_v31  ;;  %v4455_v31 = vunpack.c.h.bf16 %v8936_v29 }
  0xd8   :  { %3198 = vst [vmem:[#allocation1 + $0x8c] sm:$0xf0] %v3195_v32 }
  0xd9   :  { %3213 = vst [vmem:[#allocation1 + $0x298] sm:$0xf] %v3195_v32  ;;  %v8940_v32 = vld [vmem:[%s10375_s0 + $0xa0] sm:$0xff]  }
  0xda   :  { %3228 = vst [vmem:[#allocation1 + $0x6cc] sm:$0xf0] %v3225_v34  ;;  %v4545_v36 = vunpack.c.l.bf16 %v8940_v32 }
  0xdb   :  { %3243 = vst [vmem:[#allocation1 + $0x8f0] sm:$0xf] %v3225_v34  ;;  %v4515_v34 = vunpack.c.h.bf16 %v8940_v32 }
  0xdc   :  { %3258 = vst [vmem:[#allocation1 + $0x77c] sm:$0xf0] %v3255_v35 }
  0xdd   :  { %3273 = vst [vmem:[#allocation1 + $0x3b0] sm:$0xf] %v3255_v35  ;;  %v8944_v35 = vld [vmem:[%s10375_s0 + $0x98] sm:$0xff]  }
  0xde   :  { %3288 = vst [vmem:[#allocation1 + $0x764] sm:$0xf0] %v3285_v37  ;;  %v4605_v39 = vunpack.c.l.bf16 %v8944_v35 }
  0xdf   :  { %3303 = vst [vmem:[#allocation1 + $0x5d8] sm:$0xf] %v3285_v37  ;;  %v4575_v37 = vunpack.c.h.bf16 %v8944_v35 }
  0xe0   :  { %3318 = vst [vmem:[#allocation1 + $0x14c] sm:$0xf0] %v3315_v38 }
  0xe1   :  { %3333 = vst [vmem:[#allocation1 + $0x670] sm:$0xf] %v3315_v38  ;;  %v8948_v38 = vld [vmem:[%s10375_s0 + $0x90] sm:$0xff]  }
  0xe2   :  { %3348 = vst [vmem:[#allocation1 + $0x9cc] sm:$0xf0] %v3345_v40  ;;  %v4665_v42 = vunpack.c.l.bf16 %v8948_v38 }
  0xe3   :  { %3363 = vst [vmem:[#allocation1 + $0x4f8] sm:$0xf] %v3345_v40  ;;  %v4635_v40 = vunpack.c.h.bf16 %v8948_v38 }
  0xe4   :  { %3378 = vst [vmem:[#allocation1 + $0x83c] sm:$0xf0] %v3375_v41 }
  0xe5   :  { %3393 = vst [vmem:[#allocation1 + $0x8d0] sm:$0xf] %v3375_v41  ;;  %v8952_v41 = vld [vmem:[%s10375_s0 + $0x88] sm:$0xff]  }
  0xe6   :  { %3408 = vst [vmem:[#allocation1 + $0x11c] sm:$0xf0] %v3405_v43  ;;  %v4725_v45 = vunpack.c.l.bf16 %v8952_v41 }
  0xe7   :  { %3423 = vst [vmem:[#allocation1 + $0x428] sm:$0xf] %v3405_v43  ;;  %v4695_v43 = vunpack.c.h.bf16 %v8952_v41 }
  0xe8   :  { %3438 = vst [vmem:[#allocation1 + $0x4dc] sm:$0xf0] %v3435_v44 }
  0xe9   :  { %3453 = vst [vmem:[#allocation1 + $0xa38] sm:$0xf] %v3435_v44  ;;  %v8956_v44 = vld [vmem:[%s10375_s0 + $0x80] sm:$0xff]  }
  0xea   :  { %3468 = vst [vmem:[#allocation1 + $0x5dc] sm:$0xf0] %v3465_v46  ;;  %v4785_v48 = vunpack.c.l.bf16 %v8956_v44 }
  0xeb   :  { %3483 = vst [vmem:[#allocation1 + $0x870] sm:$0xf] %v3465_v46  ;;  %v4755_v46 = vunpack.c.h.bf16 %v8956_v44 }
  0xec   :  { %3498 = vst [vmem:[#allocation1 + $0xa0c] sm:$0xf0] %v3495_v47 }
  0xed   :  { %3513 = vst [vmem:[#allocation1 + $0xa28] sm:$0xf] %v3495_v47  ;;  %v8960_v47 = vld [vmem:[%s10375_s0 + $0x78] sm:$0xff]  }
  0xee   :  { %3528 = vst [vmem:[#allocation1 + $0x874] sm:$0xf0] %v3525_v49  ;;  %v4845_v51 = vunpack.c.l.bf16 %v8960_v47 }
  0xef   :  { %3543 = vst [vmem:[#allocation1 + $0x108] sm:$0xf] %v3525_v49  ;;  %v4815_v49 = vunpack.c.h.bf16 %v8960_v47 }
  0xf0   :  { %3558 = vst [vmem:[#allocation1 + $0xb44] sm:$0xf0] %v3555_v50 }
  0xf1   :  { %3573 = vst [vmem:[#allocation1 + $0x240] sm:$0xf] %v3555_v50  ;;  %v8964_v50 = vld [vmem:[%s10375_s0 + $0x70] sm:$0xff]  }
  0xf2   :  { %3588 = vst [vmem:[#allocation1 + $0x7b4] sm:$0xf0] %v3585_v52  ;;  %v4905_v54 = vunpack.c.l.bf16 %v8964_v50 }
  0xf3   :  { %3603 = vst [vmem:[#allocation1 + $0x308] sm:$0xf] %v3585_v52  ;;  %v4875_v52 = vunpack.c.h.bf16 %v8964_v50 }
  0xf4   :  { %3618 = vst [vmem:[#allocation1 + $0x94c] sm:$0xf0] %v3615_v53 }
  0xf5   :  { %3633 = vst [vmem:[#allocation1 + $0x30] sm:$0xf] %v3615_v53  ;;  %v8968_v53 = vld [vmem:[%s10375_s0 + $0x68] sm:$0xff]  }
  0xf6   :  { %3648 = vst [vmem:[#allocation1 + $0x494] sm:$0xf0] %v3645_v55  ;;  %v4965_v57 = vunpack.c.l.bf16 %v8968_v53 }
  0xf7   :  { %3663 = vst [vmem:[#allocation1 + $0x7c0] sm:$0xf] %v3645_v55  ;;  %v4935_v55 = vunpack.c.h.bf16 %v8968_v53 }
  0xf8   :  { %3678 = vst [vmem:[#allocation1 + $0x51c] sm:$0xf0] %v3675_v56 }
  0xf9   :  { %3693 = vst [vmem:[#allocation1 + $0x688] sm:$0xf] %v3675_v56  ;;  %v8972_v56 = vld [vmem:[%s10375_s0 + $0x60] sm:$0xff]  }
  0xfa   :  { %3708 = vst [vmem:[#allocation1 + $0xb7c] sm:$0xf0] %v3705_v58  ;;  %v5025_v60 = vunpack.c.l.bf16 %v8972_v56 }
  0xfb   :  { %3723 = vst [vmem:[#allocation1 + $0x138] sm:$0xf] %v3705_v58  ;;  %v4995_v58 = vunpack.c.h.bf16 %v8972_v56 }
  0xfc   :  { %3738 = vst [vmem:[#allocation1 + $0x4d4] sm:$0xf0] %v3735_v59 }
  0xfd   :  { %3753 = vst [vmem:[#allocation1 + $0x920] sm:$0xf] %v3735_v59  ;;  %v8976_v59 = vld [vmem:[%s10375_s0 + $0x58] sm:$0xff]  }
  0xfe   :  { %3768 = vst [vmem:[#allocation1 + $0xb24] sm:$0xf0] %v3765_v61  ;;  %v5085_v63 = vunpack.c.l.bf16 %v8976_v59 }
  0xff   :  { %3783 = vst [vmem:[#allocation1 + $0xbf8] sm:$0xf] %v3765_v61  ;;  %v5055_v61 = vunpack.c.h.bf16 %v8976_v59 }
 0x100   :  { %3798 = vst [vmem:[#allocation1 + $0x1ac] sm:$0xf0] %v3795_v62 }
 0x101   :  { %3813 = vst [vmem:[#allocation1 + $0xac0] sm:$0xf] %v3795_v62  ;;  %v8980_v62 = vld [vmem:[%s10375_s0 + $0x50] sm:$0xff]  }
 0x102   :  { %3828 = vst [vmem:[#allocation1 + $0x27c] sm:$0xf0] %v3825_v0  ;;  %v5145_v2 = vunpack.c.l.bf16 %v8980_v62 }
 0x103   :  { %3843 = vst [vmem:[#allocation1 + $0x528] sm:$0xf] %v3825_v0  ;;  %v5115_v0 = vunpack.c.h.bf16 %v8980_v62 }
 0x104   :  { %3858 = vst [vmem:[#allocation1 + $0x75c] sm:$0xf0] %v3855_v1 }
 0x105   :  { %3873 = vst [vmem:[#allocation1 + $0x440] sm:$0xf] %v3855_v1  ;;  %v8984_v1 = vld [vmem:[%s10375_s0 + $0x48] sm:$0xff]  }
 0x106   :  { %3888 = vst [vmem:[#allocation1 + $0x8e4] sm:$0xf0] %v3885_v3  ;;  %v5205_v5 = vunpack.c.l.bf16 %v8984_v1 }
 0x107   :  { %3903 = vst [vmem:[#allocation1 + $0x468] sm:$0xf] %v3885_v3  ;;  %v5175_v3 = vunpack.c.h.bf16 %v8984_v1 }
 0x108   :  { %3918 = vst [vmem:[#allocation1 + $0x224] sm:$0xf0] %v3915_v4 }
 0x109   :  { %3933 = vst [vmem:[#allocation1 + $0x810] sm:$0xf] %v3915_v4  ;;  %v8988_v4 = vld [vmem:[%s10375_s0 + $0x40] sm:$0xff]  }
 0x10a   :  { %3948 = vst [vmem:[#allocation1 + $0x49c] sm:$0xf0] %v3945_v6  ;;  %v5265_v8 = vunpack.c.l.bf16 %v8988_v4 }
 0x10b   :  { %3963 = vst [vmem:[#allocation1 + $0x618] sm:$0xf] %v3945_v6  ;;  %v5235_v6 = vunpack.c.h.bf16 %v8988_v4 }
 0x10c   :  { %3978 = vst [vmem:[#allocation1 + $0x534] sm:$0xf0] %v3975_v7 }
 0x10d   :  { %3993 = vst [vmem:[#allocation1 + $0x1f8] sm:$0xf] %v3975_v7  ;;  %v8992_v7 = vld [vmem:[%s10375_s0 + $0x38] sm:$0xff]  }
 0x10e   :  { %4008 = vst [vmem:[#allocation1 + $0x92c] sm:$0xf0] %v4005_v9  ;;  %v5325_v11 = vunpack.c.l.bf16 %v8992_v7 }
 0x10f   :  { %4023 = vst [vmem:[#allocation1 + $0xab0] sm:$0xf] %v4005_v9  ;;  %v5295_v9 = vunpack.c.h.bf16 %v8992_v7 }
 0x110   :  { %4038 = vst [vmem:[#allocation1 + $0x6b4] sm:$0xf0] %v4035_v10 }
 0x111   :  { %4053 = vst [vmem:[#allocation1 + $0x808] sm:$0xf] %v4035_v10  ;;  %v8996_v10 = vld [vmem:[%s10375_s0 + $0x30] sm:$0xff]  }
 0x112   :  { %4068 = vst [vmem:[#allocation1 + $0x32c] sm:$0xf0] %v4065_v12  ;;  %v5385_v14 = vunpack.c.l.bf16 %v8996_v10 }
 0x113   :  { %4083 = vst [vmem:[#allocation1 + $0x140] sm:$0xf] %v4065_v12  ;;  %v5355_v12 = vunpack.c.h.bf16 %v8996_v10 }
 0x114   :  { %4098 = vst [vmem:[#allocation1 + $0x38c] sm:$0xf0] %v4095_v13 }
 0x115   :  { %4113 = vst [vmem:[#allocation1 + $0x400] sm:$0xf] %v4095_v13  ;;  %v9000_v13 = vld [vmem:[%s10375_s0 + $0x28] sm:$0xff]  }
 0x116   :  { %4128 = vst [vmem:[#allocation1 + $0x814] sm:$0xf0] %v4125_v15  ;;  %v5445_v17 = vunpack.c.l.bf16 %v9000_v13 }
 0x117   :  { %4143 = vst [vmem:[#allocation1 + $0x6b0] sm:$0xf] %v4125_v15  ;;  %v5415_v15 = vunpack.c.h.bf16 %v9000_v13 }
 0x118   :  { %4158 = vst [vmem:[#allocation1 + $0x204] sm:$0xf0] %v4155_v16 }
 0x119   :  { %4173 = vst [vmem:[#allocation1 + $0x9f0] sm:$0xf] %v4155_v16  ;;  %v9004_v16 = vld [vmem:[%s10375_s0 + $0x20] sm:$0xff]  }
 0x11a   :  { %4188 = vst [vmem:[#allocation1 + $0xbcc] sm:$0xf0] %v4185_v18  ;;  %v5505_v20 = vunpack.c.l.bf16 %v9004_v16 }
 0x11b   :  { %4203 = vst [vmem:[#allocation1 + $0x788] sm:$0xf] %v4185_v18  ;;  %v5475_v18 = vunpack.c.h.bf16 %v9004_v16 }
 0x11c   :  { %4218 = vst [vmem:[#allocation1 + $0x6dc] sm:$0xf0] %v4215_v19 }
 0x11d   :  { %4233 = vst [vmem:[#allocation1 + $0x88] sm:$0xf] %v4215_v19  ;;  %v9008_v19 = vld [vmem:[%s10375_s0 + $0x18] sm:$0xff]  }
 0x11e   :  { %4248 = vst [vmem:[#allocation1 + $0x28c] sm:$0xf0] %v4245_v21  ;;  %v5565_v23 = vunpack.c.l.bf16 %v9008_v19 }
 0x11f   :  { %4263 = vst [vmem:[#allocation1 + $0x198] sm:$0xf] %v4245_v21  ;;  %v5535_v21 = vunpack.c.h.bf16 %v9008_v19 }
 0x120   :  { %4278 = vst [vmem:[#allocation1 + $0xa5c] sm:$0xf0] %v4275_v22 }
 0x121   :  { %4293 = vst [vmem:[#allocation1 + $0xa80] sm:$0xf] %v4275_v22  ;;  %v9012_v22 = vld [vmem:[%s10375_s0 + $0x10] sm:$0xff]  }
 0x122   :  { %4308 = vst [vmem:[#allocation1 + $0x964] sm:$0xf0] %v4305_v24  ;;  %v5625_v26 = vunpack.c.l.bf16 %v9012_v22 }
 0x123   :  { %4323 = vst [vmem:[#allocation1 + $0x5d0] sm:$0xf] %v4305_v24  ;;  %v5595_v24 = vunpack.c.h.bf16 %v9012_v22 }
 0x124   :  { %4338 = vst [vmem:[#allocation1 + $0x734] sm:$0xf0] %v4335_v25 }
 0x125   :  { %4353 = vst [vmem:[#allocation1 + $0xb00] sm:$0xf] %v4335_v25  ;;  %v9016_v25 = vld [vmem:[%s10375_s0 + $0x8] sm:$0xff]  }
 0x126   :  { %4368 = vst [vmem:[#allocation1 + $0x264] sm:$0xf0] %v4365_v27  ;;  %v5685_v29 = vunpack.c.l.bf16 %v9016_v25 }
 0x127   :  { %4383 = vst [vmem:[#allocation1 + $0xb10] sm:$0xf] %v4365_v27  ;;  %v5655_v27 = vunpack.c.h.bf16 %v9016_v25 }
 0x128   :  { %4398 = vst [vmem:[#allocation1 + $0x9e4] sm:$0xf0] %v4395_v28 }
 0x129   :  { %4413 = vst [vmem:[#allocation1 + $0x570] sm:$0xf] %v4395_v28  ;;  %v9020_v28 = vld [vmem:[%s10375_s0] sm:$0xff]  }
 0x12a   :  { %4428 = vst [vmem:[#allocation1 + $0xb9c] sm:$0xf0] %v4425_v30 }
 0x12b   :  { %4443 = vst [vmem:[#allocation1 + $0x900] sm:$0xf] %v4425_v30  ;;  %v5715_v30 = vunpack.c.h.bf16 %v9020_v28 }
 0x12c   :  { %4458 = vst [vmem:[#allocation1 + $0x474] sm:$0xf0] %v4455_v31 }
 0x12d   :  { %4473 = vst [vmem:[#allocation1 + $0x748] sm:$0xf] %v4455_v31  ;;  %v5745_v31 = vunpack.c.l.bf16 %v9020_v28 }
 0x12e   :  { %4488 = vst [vmem:[#allocation1 + $0xb64] sm:$0xf0] %v4485_v33 }
 0x12f   :  { %4503 = vst [vmem:[#allocation1 + $0xb58] sm:$0xf] %v4485_v33 }
 0x130   :  { %4518 = vst [vmem:[#allocation1 + $0x5fc] sm:$0xf0] %v4515_v34 }
 0x131   :  { %4533 = vst [vmem:[#allocation1 + $0x28] sm:$0xf] %v4515_v34 }
 0x132   :  { %4548 = vst [vmem:[#allocation1 + $0x1a4] sm:$0xf0] %v4545_v36 }
 0x133   :  { %4563 = vst [vmem:[#allocation1 + $0x98] sm:$0xf] %v4545_v36 }
 0x134   :  { %4578 = vst [vmem:[#allocation1 + $0x4fc] sm:$0xf0] %v4575_v37 }
 0x135   :  { %4593 = vst [vmem:[#allocation1 + $0x568] sm:$0xf] %v4575_v37 }
 0x136   :  { %4608 = vst [vmem:[#allocation1 + $0x6e4] sm:$0xf0] %v4605_v39 }
 0x137   :  { %4623 = vst [vmem:[#allocation1 + $0xa18] sm:$0xf] %v4605_v39 }
 0x138   :  { %4638 = vst [vmem:[#allocation1 + $0x37c] sm:$0xf0] %v4635_v40 }
 0x139   :  { %4653 = vst [vmem:[#allocation1 + $0x470] sm:$0xf] %v4635_v40 }
 0x13a   :  { %4668 = vst [vmem:[#allocation1 + $0xa74] sm:$0xf0] %v4665_v42 }
 0x13b   :  { %4683 = vst [vmem:[#allocation1 + $0x1b8] sm:$0xf] %v4665_v42 }
 0x13c   :  { %4698 = vst [vmem:[#allocation1 + $0x364] sm:$0xf0] %v4695_v43 }
 0x13d   :  { %4713 = vst [vmem:[#allocation1 + $0x9b0] sm:$0xf] %v4695_v43 }
 0x13e   :  { %4728 = vst [vmem:[#allocation1 + $0x5f4] sm:$0xf0] %v4725_v45 }
 0x13f   :  { %4743 = vst [vmem:[#allocation1 + $0x948] sm:$0xf] %v4725_v45 }
 0x140   :  { %4758 = vst [vmem:[#allocation1 + $0xf4] sm:$0xf0] %v4755_v46 }
 0x141   :  { %4773 = vst [vmem:[#allocation1 + $0x218] sm:$0xf] %v4755_v46 }
 0x142   :  { %4788 = vst [vmem:[#allocation1 + $0x9fc] sm:$0xf0] %v4785_v48 }
 0x143   :  { %4803 = vst [vmem:[#allocation1 + $0x980] sm:$0xf] %v4785_v48 }
 0x144   :  { %4818 = vst [vmem:[#allocation1 + $0x8dc] sm:$0xf0] %v4815_v49 }
 0x145   :  { %4833 = vst [vmem:[#allocation1 + $0x978] sm:$0xf] %v4815_v49 }
 0x146   :  { %4848 = vst [vmem:[#allocation1 + $0x2c4] sm:$0xf0] %v4845_v51 }
 0x147   :  { %4863 = vst [vmem:[#allocation1 + $0x770] sm:$0xf] %v4845_v51 }
 0x148   :  { %4878 = vst [vmem:[#allocation1 + $0x67c] sm:$0xf0] %v4875_v52 }
 0x149   :  { %4893 = vst [vmem:[#allocation1 + $0x710] sm:$0xf] %v4875_v52 }
 0x14a   :  { %4908 = vst [vmem:[#allocation1 + $0x434] sm:$0xf0] %v4905_v54 }
 0x14b   :  { %4923 = vst [vmem:[#allocation1 + $0x70] sm:$0xf] %v4905_v54 }
 0x14c   :  { %4938 = vst [vmem:[#allocation1 + $0x414] sm:$0xf0] %v4935_v55 }
 0x14d   :  { %4953 = vst [vmem:[#allocation1 + $0x698] sm:$0xf] %v4935_v55 }
 0x14e   :  { %4968 = vst [vmem:[#allocation1 + $0x354] sm:$0xf0] %v4965_v57  ;;  %v6001_v28 = vld [vmem:[#allocation1 + $0x770] sm:$0xf]  }
 0x14f   :  { %4983 = vst [vmem:[#allocation1 + $0x2c0] sm:$0xf] %v4965_v57 }
 0x150   :  { %4998 = vst [vmem:[#allocation1 + $0x22c] sm:$0xf0] %v4995_v58 }
 0x151   :  { %5013 = vst [vmem:[#allocation1 + $0x858] sm:$0xf] %v4995_v58  ;;  %v5989_v25 = vld [vmem:[#allocation1 + $0x438] sm:$0xf]  }
 0x152   :  { %5028 = vst [vmem:[#allocation1 + $0xa1c] sm:$0xf0] %v5025_v60 }
 0x153   :  { %5043 = vst [vmem:[#allocation1 + $0x5b0] sm:$0xf] %v5025_v60 }
 0x154   :  { %5058 = vst [vmem:[#allocation1 + $0x17c] sm:$0xf0] %v5055_v61  ;;  %v5977_v22 = vld [vmem:[#allocation1 + $0x698] sm:$0xf]  }
 0x155   :  { %5073 = vst [vmem:[#allocation1 + $0x718] sm:$0xf] %v5055_v61 }
 0x156   :  { %5088 = vst [vmem:[#allocation1 + $0xb84] sm:$0xf0] %v5085_v63 }
 0x157   :  { %5103 = vst [vmem:[#allocation1 + $0x448] sm:$0xf] %v5085_v63  ;;  %v5965_v19 = vld [vmem:[#allocation1 + $0x230] sm:$0xf]  }
 0x158   :  { %5118 = vst [vmem:[#allocation1 + $0x9b4] sm:$0xf0] %v5115_v0 }
 0x159   :  { %5133 = vst [vmem:[#allocation1 + $0x550] sm:$0xf] %v5115_v0 }
 0x15a   :  { %5148 = vst [vmem:[#allocation1 + $0x994] sm:$0xf0] %v5145_v2  ;;  %v5953_v16 = vld [vmem:[#allocation1 + $0x5b0] sm:$0xf]  }
 0x15b   :  { %5163 = vst [vmem:[#allocation1 + $0x4a8] sm:$0xf] %v5145_v2 }
 0x15c   :  { %5178 = vst [vmem:[#allocation1 + $0x74c] sm:$0xf0] %v5175_v3 }
 0x15d   :  { %5193 = vst [vmem:[#allocation1 + $0x318] sm:$0xf] %v5175_v3  ;;  %v5941_v13 = vld [vmem:[#allocation1 + $0xb88] sm:$0xf]  }
 0x15e   :  { %5208 = vst [vmem:[#allocation1 + $0x6c4] sm:$0xf0] %v5205_v5 }
 0x15f   :  { %5223 = vst [vmem:[#allocation1 + $0x40] sm:$0xf] %v5205_v5 }
 0x160   :  { %5238 = vst [vmem:[#allocation1 + $0xa64] sm:$0xf0] %v5235_v6  ;;  %v5929_v10 = vld [vmem:[#allocation1 + $0x550] sm:$0xf]  }
 0x161   :  { %5253 = vst [vmem:[#allocation1 + $0x3a0] sm:$0xf] %v5235_v6 }
 0x162   :  { %5268 = vst [vmem:[#allocation1 + $0x20c] sm:$0xf0] %v5265_v8 }
 0x163   :  { %5283 = vst [vmem:[#allocation1 + $0x458] sm:$0xf] %v5265_v8  ;;  %v5917_v7 = vld [vmem:[#allocation1 + $0x750] sm:$0xf]   ;;  %v5921_v8 = vld [vmem:[#allocation1 + $0x4a8] sm:$0xf]  }
 0x164   :  { %5298 = vst [vmem:[#allocation1 + $0x54] sm:$0xf0] %v5295_v9  ;;  %v5913_v6 = vld [vmem:[#allocation1 + $0x318] sm:$0xf]  }
 0x165   :  { %5313 = vst [vmem:[#allocation1 + $0x1f0] sm:$0xf] %v5295_v9  ;;  %v5909_v5 = vld [vmem:[#allocation1 + $0x6c8] sm:$0xf]   ;;  %v5925_v9 = vld [vmem:[#allocation1 + $0x998] sm:$0xf]  }
 0x166   :  { %5328 = vst [vmem:[#allocation1 + $0x4b4] sm:$0xf0] %v5325_v11  ;;  %v5905_v4 = vld [vmem:[#allocation1 + $0x40] sm:$0xf]  }
 0x167   :  { %5343 = vst [vmem:[#allocation1 + $0xc0] sm:$0xf] %v5325_v11  ;;  %v5901_v3 = vld [vmem:[#allocation1 + $0xa68] sm:$0xf]   ;;  %v5933_v11 = vld [vmem:[#allocation1 + $0x9b8] sm:$0xf]  }
 0x168   :  { %5358 = vst [vmem:[#allocation1 + $0x904] sm:$0xf0] %v5355_v12  ;;  %v5897_v2 = vld [vmem:[#allocation1 + $0x3a0] sm:$0xf]  }
 0x169   :  { %5373 = vst [vmem:[#allocation1 + $0x928] sm:$0xf] %v5355_v12  ;;  %v5893_v1 = vld [vmem:[#allocation1 + $0x210] sm:$0xf]   ;;  %v5937_v12 = vld [vmem:[#allocation1 + $0x448] sm:$0xf]  }
 0x16a   :  { %5388 = vst [vmem:[#allocation1 + $0xa9c] sm:$0xf0] %v5385_v14  ;;  %v5889_v0 = vld [vmem:[#allocation1 + $0x458] sm:$0xf]  }
 0x16b   :  { %5403 = vst [vmem:[#allocation1 + $0xa70] sm:$0xf] %v5385_v14  ;;  %v5885_v63 = vld [vmem:[#allocation1 + $0x58] sm:$0xf]  }
 0x16c   :  { %5418 = vst [vmem:[#allocation1 + $0x2f4] sm:$0xf0] %v5415_v15  ;;  %v5881_v62 = vld [vmem:[#allocation1 + $0x1f0] sm:$0xf]   ;;  %v5945_v14 = vld [vmem:[#allocation1 + $0x718] sm:$0xf]  }
 0x16d   :  { %5433 = vst [vmem:[#allocation1 + $0xf0] sm:$0xf] %v5415_v15  ;;  %v5877_v61 = vld [vmem:[#allocation1 + $0x4b8] sm:$0xf]   ;;  %v5949_v15 = vld [vmem:[#allocation1 + $0x180] sm:$0xf]  }
 0x16e   :  { %5448 = vst [vmem:[#allocation1 + $0x1fc] sm:$0xf0] %v5445_v17  ;;  %v5873_v60 = vld [vmem:[#allocation1 + $0xc0] sm:$0xf]  }
 0x16f   :  { %5463 = vst [vmem:[#allocation1 + $0xb0] sm:$0xf] %v5445_v17  ;;  %v5869_v59 = vld [vmem:[#allocation1 + $0x908] sm:$0xf]   ;;  %v5957_v17 = vld [vmem:[#allocation1 + $0xa20] sm:$0xf]  }
 0x170   :  { %5478 = vst [vmem:[#allocation1 + $0x7f4] sm:$0xf0] %v5475_v18  ;;  %v5865_v58 = vld [vmem:[#allocation1 + $0x928] sm:$0xf]  }
 0x171   :  { %5493 = vst [vmem:[#allocation1 + $0x990] sm:$0xf] %v5475_v18  ;;  %v5861_v57 = vld [vmem:[#allocation1 + $0xaa0] sm:$0xf]   ;;  %v5961_v18 = vld [vmem:[#allocation1 + $0x858] sm:$0xf]  }
 0x172   :  { %5508 = vst [vmem:[#allocation1 + $0xba4] sm:$0xf0] %v5505_v20  ;;  %v5857_v56 = vld [vmem:[#allocation1 + $0xa70] sm:$0xf]  }
 0x173   :  { %5523 = vst [vmem:[#allocation1 + $0x798] sm:$0xf] %v5505_v20  ;;  %v5853_v55 = vld [vmem:[#allocation1 + $0x2f8] sm:$0xf]   ;;  %v5969_v20 = vld [vmem:[#allocation1 + $0x2c0] sm:$0xf]  }
 0x174   :  { %5538 = vst [vmem:[#allocation1 + $0x404] sm:$0xf0] %v5535_v21  ;;  %v5849_v54 = vld [vmem:[#allocation1 + $0xf0] sm:$0xf]  }
 0x175   :  { %5553 = vst [vmem:[#allocation1 + $0x2b8] sm:$0xf] %v5535_v21  ;;  %v5845_v53 = vld [vmem:[#allocation1 + $0x200] sm:$0xf]   ;;  %v5973_v21 = vld [vmem:[#allocation1 + $0x358] sm:$0xf]  }
 0x176   :  { %5568 = vst [vmem:[#allocation1 + $0x12c] sm:$0xf0] %v5565_v23  ;;  %v5841_v52 = vld [vmem:[#allocation1 + $0xb0] sm:$0xf]  }
 0x177   :  { %5583 = vst [vmem:[#allocation1 + $0x188] sm:$0xf] %v5565_v23  ;;  %v5837_v51 = vld [vmem:[#allocation1 + $0x7f8] sm:$0xf]  }
 0x178   :  { %5598 = vst [vmem:[#allocation1 + $0x724] sm:$0xf0] %v5595_v24  ;;  %v5833_v50 = vld [vmem:[#allocation1 + $0x990] sm:$0xf]   ;;  %v5981_v23 = vld [vmem:[#allocation1 + $0x418] sm:$0xf]  }
 0x179   :  { %5613 = vst [vmem:[#allocation1 + $0xa40] sm:$0xf] %v5595_v24  ;;  %v5829_v49 = vld [vmem:[#allocation1 + $0xba8] sm:$0xf]   ;;  %v5985_v24 = vld [vmem:[#allocation1 + $0x70] sm:$0xf]  }
 0x17a   :  { %5628 = vst [vmem:[#allocation1 + $0x60c] sm:$0xf0] %v5625_v26  ;;  %v5825_v48 = vld [vmem:[#allocation1 + $0x798] sm:$0xf]  }
 0x17b   :  { %5643 = vst [vmem:[#allocation1 + $0x5f0] sm:$0xf] %v5625_v26  ;;  %v5821_v47 = vld [vmem:[#allocation1 + $0x408] sm:$0xf]   ;;  %v5993_v26 = vld [vmem:[#allocation1 + $0x710] sm:$0xf]  }
 0x17c   :  { %5658 = vst [vmem:[#allocation1 + $0xa04] sm:$0xf0] %v5655_v27  ;;  %v5817_v46 = vld [vmem:[#allocation1 + $0x2b8] sm:$0xf]  }
 0x17d   :  { %5673 = vst [vmem:[#allocation1 + $0x7d8] sm:$0xf] %v5655_v27  ;;  %v5813_v45 = vld [vmem:[#allocation1 + $0x130] sm:$0xf]   ;;  %v5997_v27 = vld [vmem:[#allocation1 + $0x680] sm:$0xf]  }
 0x17e   :  { %5688 = vst [vmem:[#allocation1 + $0x89c] sm:$0xf0] %v5685_v29  ;;  %v5809_v44 = vld [vmem:[#allocation1 + $0x188] sm:$0xf]  }
 0x17f   :  { %5703 = vst [vmem:[#allocation1 + $0x278] sm:$0xf] %v5685_v29  ;;  %v5805_v43 = vld [vmem:[#allocation1 + $0x728] sm:$0xf]  }
 0x180   :  { %5718 = vst [vmem:[#allocation1 + $0x79c] sm:$0xf0] %v5715_v30  ;;  %v5801_v42 = vld [vmem:[#allocation1 + $0xa40] sm:$0xf]   ;;  %v6005_v29 = vld [vmem:[#allocation1 + $0x2c8] sm:$0xf]  }
 0x181   :  { %5733 = vst [vmem:[#allocation1 + $0x4e8] sm:$0xf] %v5715_v30  ;;  %v5797_v41 = vld [vmem:[#allocation1 + $0x610] sm:$0xf]   ;;  %v6009_v30 = vld [vmem:[#allocation1 + $0x978] sm:$0xf]  }
 0x182   :  { %5748 = vst [vmem:[#allocation1 + $0x9a4] sm:$0xf0] %v5745_v31  ;;  %v5793_v39 = vld [vmem:[#allocation1 + $0x5f0] sm:$0xf]  }
 0x183   :  { %5761 = vst [vmem:[#allocation1 + $0x970] sm:$0xf] %v5745_v31  ;;  %v5789_v32 = vld [vmem:[#allocation1 + $0xa08] sm:$0xf]   ;;  %v6013_v31 = vld [vmem:[#allocation1 + $0x8e0] sm:$0xf]  }
 0x184   :  { %v5785_v33 = vld [vmem:[#allocation1 + $0x7d8] sm:$0xf]   ;;  %5791 = vst [vmem:[#allocation0 + $0xc] sm:$0xf] %v5789_v32   ;;  %v6017_v32 = vld [vmem:[#allocation1 + $0x980] sm:$0xf]  }
 0x185   :  { %v5781_v34 = vld [vmem:[#allocation1 + $0x8a0] sm:$0xf]   ;;  %5787 = vst [vmem:[#allocation0 + $0x4] sm:$0xf] %v5785_v33  }
 0x186   :  { %v5777_v35 = vld [vmem:[#allocation1 + $0x278] sm:$0xf]   ;;  %5783 = vst [vmem:[#allocation0 + $0x28] sm:$0xf] %v5781_v34   ;;  %v6021_v33 = vld [vmem:[#allocation1 + $0xa00] sm:$0xf]  }
 0x187   :  { %v5773_v36 = vld [vmem:[#allocation1 + $0x7a0] sm:$0xf]   ;;  %5779 = vst [vmem:[#allocation0 + $0x20] sm:$0xf] %v5777_v35   ;;  %v6025_v34 = vld [vmem:[#allocation1 + $0x218] sm:$0xf]  }
 0x188   :  { %v5769_v37 = vld [vmem:[#allocation1 + $0x4e8] sm:$0xf]   ;;  %5775 = vst [vmem:[#allocation0 + $0x18] sm:$0xf] %v5773_v36   ;;  %v6029_v35 = vld [vmem:[#allocation1 + $0xf8] sm:$0xf]  }
 0x189   :  { %v5765_v38 = vld [vmem:[#allocation1 + $0x9a8] sm:$0xf]   ;;  %5771 = vst [vmem:[#allocation0 + $0x10] sm:$0xf] %v5769_v37   ;;  %v6037_v37 = vld [vmem:[#allocation1 + $0x5f8] sm:$0xf]  }
 0x18a   :  { %v5762_v40 = vld [vmem:[#allocation1 + $0x970] sm:$0xf]   ;;  %5767 = vst [vmem:[#allocation0 + $0x8] sm:$0xf] %v5765_v38   ;;  %v6033_v36 = vld [vmem:[#allocation1 + $0x948] sm:$0xf]  }
 0x18b   :  { %5763 = vst [vmem:[#allocation0] sm:$0xf] %v5762_v40   ;;  %v6041_v38 = vld [vmem:[#allocation1 + $0x9b0] sm:$0xf]   ;;  %v6049_v40 = vld [vmem:[#allocation1 + $0x1b8] sm:$0xf]  }
 0x18c   :  { %5795 = vst [vmem:[#allocation0 + $0x14] sm:$0xf] %v5793_v39   ;;  %v6045_v39 = vld [vmem:[#allocation1 + $0x368] sm:$0xf]  }
 0x18d   :  { %5799 = vst [vmem:[#allocation0 + $0x1c] sm:$0xf] %v5797_v41   ;;  %v6053_v41 = vld [vmem:[#allocation1 + $0xa78] sm:$0xf]  }
 0x18e   :  { %5803 = vst [vmem:[#allocation0 + $0x24] sm:$0xf] %v5801_v42   ;;  %v6057_v42 = vld [vmem:[#allocation1 + $0x470] sm:$0xf]  }
 0x18f   :  { %5807 = vst [vmem:[#allocation0 + $0x2c] sm:$0xf] %v5805_v43   ;;  %v6061_v43 = vld [vmem:[#allocation1 + $0x380] sm:$0xf]  }
 0x190   :  { %5811 = vst [vmem:[#allocation0 + $0x30] sm:$0xf] %v5809_v44   ;;  %v6065_v44 = vld [vmem:[#allocation1 + $0xa18] sm:$0xf]  }
 0x191   :  { %5815 = vst [vmem:[#allocation0 + $0x38] sm:$0xf] %v5813_v45   ;;  %v6069_v45 = vld [vmem:[#allocation1 + $0x6e8] sm:$0xf]  }
 0x192   :  { %5819 = vst [vmem:[#allocation0 + $0x40] sm:$0xf] %v5817_v46   ;;  %v6073_v46 = vld [vmem:[#allocation1 + $0x568] sm:$0xf]  }
 0x193   :  { %5823 = vst [vmem:[#allocation0 + $0x48] sm:$0xf] %v5821_v47   ;;  %v6077_v47 = vld [vmem:[#allocation1 + $0x500] sm:$0xf]  }
 0x194   :  { %5827 = vst [vmem:[#allocation0 + $0x50] sm:$0xf] %v5825_v48   ;;  %v6081_v48 = vld [vmem:[#allocation1 + $0x98] sm:$0xf]  }
 0x195   :  { %5831 = vst [vmem:[#allocation0 + $0x58] sm:$0xf] %v5829_v49   ;;  %v6085_v49 = vld [vmem:[#allocation1 + $0x1a8] sm:$0xf]  }
 0x196   :  { %5835 = vst [vmem:[#allocation0 + $0x34] sm:$0xf] %v5833_v50   ;;  %v6089_v50 = vld [vmem:[#allocation1 + $0x28] sm:$0xf]  }
 0x197   :  { %5839 = vst [vmem:[#allocation0 + $0x3c] sm:$0xf] %v5837_v51   ;;  %v6093_v51 = vld [vmem:[#allocation1 + $0x600] sm:$0xf]  }
 0x198   :  { %5843 = vst [vmem:[#allocation0 + $0x44] sm:$0xf] %v5841_v52   ;;  %v6097_v52 = vld [vmem:[#allocation1 + $0xb58] sm:$0xf]  }
 0x199   :  { %5847 = vst [vmem:[#allocation0 + $0x4c] sm:$0xf] %v5845_v53   ;;  %v6101_v53 = vld [vmem:[#allocation1 + $0xb68] sm:$0xf]  }
 0x19a   :  { %5851 = vst [vmem:[#allocation0 + $0x54] sm:$0xf] %v5849_v54   ;;  %v6105_v54 = vld [vmem:[#allocation1 + $0x748] sm:$0xf]  }
 0x19b   :  { %5855 = vst [vmem:[#allocation0 + $0x5c] sm:$0xf] %v5853_v55   ;;  %v6109_v55 = vld [vmem:[#allocation1 + $0x478] sm:$0xf]  }
 0x19c   :  { %5859 = vst [vmem:[#allocation0 + $0x60] sm:$0xf] %v5857_v56   ;;  %v6113_v56 = vld [vmem:[#allocation1 + $0x900] sm:$0xf]  }
 0x19d   :  { %5863 = vst [vmem:[#allocation0 + $0x68] sm:$0xf] %v5861_v57   ;;  %v6117_v57 = vld [vmem:[#allocation1 + $0xba0] sm:$0xf]  }
 0x19e   :  { %5867 = vst [vmem:[#allocation0 + $0x70] sm:$0xf] %v5865_v58   ;;  %v6121_v58 = vld [vmem:[#allocation1 + $0x570] sm:$0xf]  }
 0x19f   :  { %5871 = vst [vmem:[#allocation0 + $0x78] sm:$0xf] %v5869_v59   ;;  %v6125_v59 = vld [vmem:[#allocation1 + $0x9e8] sm:$0xf]  }
 0x1a0   :  { %5875 = vst [vmem:[#allocation0 + $0x80] sm:$0xf] %v5873_v60   ;;  %v6129_v60 = vld [vmem:[#allocation1 + $0xb10] sm:$0xf]  }
 0x1a1   :  { %5879 = vst [vmem:[#allocation0 + $0x88] sm:$0xf] %v5877_v61   ;;  %v6133_v61 = vld [vmem:[#allocation1 + $0x268] sm:$0xf]  }
 0x1a2   :  { %5883 = vst [vmem:[#allocation0 + $0x64] sm:$0xf] %v5881_v62   ;;  %v6137_v62 = vld [vmem:[#allocation1 + $0xb00] sm:$0xf]  }
 0x1a3   :  { %5887 = vst [vmem:[#allocation0 + $0x6c] sm:$0xf] %v5885_v63   ;;  %v6141_v63 = vld [vmem:[#allocation1 + $0x738] sm:$0xf]  }
 0x1a4   :  { %5891 = vst [vmem:[#allocation0 + $0x74] sm:$0xf] %v5889_v0   ;;  %v6145_v0 = vld [vmem:[#allocation1 + $0x5d0] sm:$0xf]  }
 0x1a5   :  { %5895 = vst [vmem:[#allocation0 + $0x7c] sm:$0xf] %v5893_v1   ;;  %v6149_v1 = vld [vmem:[#allocation1 + $0x968] sm:$0xf]  }
 0x1a6   :  { %5899 = vst [vmem:[#allocation0 + $0x84] sm:$0xf] %v5897_v2   ;;  %v6153_v2 = vld [vmem:[#allocation1 + $0xa80] sm:$0xf]  }
 0x1a7   :  { %5903 = vst [vmem:[#allocation0 + $0x8c] sm:$0xf] %v5901_v3   ;;  %v6157_v3 = vld [vmem:[#allocation1 + $0xa60] sm:$0xf]  }
 0x1a8   :  { %5907 = vst [vmem:[#allocation0 + $0x90] sm:$0xf] %v5905_v4   ;;  %v6161_v4 = vld [vmem:[#allocation1 + $0x198] sm:$0xf]  }
 0x1a9   :  { %5911 = vst [vmem:[#allocation0 + $0x98] sm:$0xf] %v5909_v5   ;;  %v6165_v5 = vld [vmem:[#allocation1 + $0x290] sm:$0xf]  }
 0x1aa   :  { %5915 = vst [vmem:[#allocation0 + $0xa0] sm:$0xf] %v5913_v6   ;;  %v6169_v6 = vld [vmem:[#allocation1 + $0x88] sm:$0xf]  }
 0x1ab   :  { %5919 = vst [vmem:[#allocation0 + $0xa8] sm:$0xf] %v5917_v7   ;;  %v6173_v7 = vld [vmem:[#allocation1 + $0x6e0] sm:$0xf]  }
 0x1ac   :  { %5923 = vst [vmem:[#allocation0 + $0xb0] sm:$0xf] %v5921_v8   ;;  %v6177_v8 = vld [vmem:[#allocation1 + $0x788] sm:$0xf]  }
 0x1ad   :  { %5927 = vst [vmem:[#allocation0 + $0xb8] sm:$0xf] %v5925_v9   ;;  %v6181_v9 = vld [vmem:[#allocation1 + $0xbd0] sm:$0xf]  }
 0x1ae   :  { %5931 = vst [vmem:[#allocation0 + $0x94] sm:$0xf] %v5929_v10   ;;  %v6185_v10 = vld [vmem:[#allocation1 + $0x9f0] sm:$0xf]  }
 0x1af   :  { %5935 = vst [vmem:[#allocation0 + $0x9c] sm:$0xf] %v5933_v11   ;;  %v6189_v11 = vld [vmem:[#allocation1 + $0x208] sm:$0xf]  }
 0x1b0   :  { %5939 = vst [vmem:[#allocation0 + $0xa4] sm:$0xf] %v5937_v12   ;;  %v6193_v12 = vld [vmem:[#allocation1 + $0x6b0] sm:$0xf]  }
 0x1b1   :  { %5943 = vst [vmem:[#allocation0 + $0xac] sm:$0xf] %v5941_v13   ;;  %v6197_v13 = vld [vmem:[#allocation1 + $0x818] sm:$0xf]  }
 0x1b2   :  { %5947 = vst [vmem:[#allocation0 + $0xb4] sm:$0xf] %v5945_v14   ;;  %v6201_v14 = vld [vmem:[#allocation1 + $0x400] sm:$0xf]  }
 0x1b3   :  { %5951 = vst [vmem:[#allocation0 + $0xbc] sm:$0xf] %v5949_v15   ;;  %v6205_v15 = vld [vmem:[#allocation1 + $0x390] sm:$0xf]  }
 0x1b4   :  { %5955 = vst [vmem:[#allocation0 + $0xc0] sm:$0xf] %v5953_v16   ;;  %v6209_v16 = vld [vmem:[#allocation1 + $0x140] sm:$0xf]  }
 0x1b5   :  { %5959 = vst [vmem:[#allocation0 + $0xc8] sm:$0xf] %v5957_v17   ;;  %v6213_v17 = vld [vmem:[#allocation1 + $0x330] sm:$0xf]  }
 0x1b6   :  { %5963 = vst [vmem:[#allocation0 + $0xd0] sm:$0xf] %v5961_v18   ;;  %v6217_v18 = vld [vmem:[#allocation1 + $0x808] sm:$0xf]  }
 0x1b7   :  { %5967 = vst [vmem:[#allocation0 + $0xd8] sm:$0xf] %v5965_v19   ;;  %v6221_v19 = vld [vmem:[#allocation1 + $0x6b8] sm:$0xf]  }
 0x1b8   :  { %5971 = vst [vmem:[#allocation0 + $0xe0] sm:$0xf] %v5969_v20   ;;  %v6225_v20 = vld [vmem:[#allocation1 + $0xab0] sm:$0xf]  }
 0x1b9   :  { %5975 = vst [vmem:[#allocation0 + $0xe8] sm:$0xf] %v5973_v21   ;;  %v6229_v21 = vld [vmem:[#allocation1 + $0x930] sm:$0xf]  }
 0x1ba   :  { %5979 = vst [vmem:[#allocation0 + $0xc4] sm:$0xf] %v5977_v22   ;;  %v6233_v22 = vld [vmem:[#allocation1 + $0x1f8] sm:$0xf]  }
 0x1bb   :  { %5983 = vst [vmem:[#allocation0 + $0xcc] sm:$0xf] %v5981_v23   ;;  %v6237_v23 = vld [vmem:[#allocation1 + $0x538] sm:$0xf]  }
 0x1bc   :  { %5987 = vst [vmem:[#allocation0 + $0xd4] sm:$0xf] %v5985_v24   ;;  %v6241_v24 = vld [vmem:[#allocation1 + $0x618] sm:$0xf]  }
 0x1bd   :  { %5991 = vst [vmem:[#allocation0 + $0xdc] sm:$0xf] %v5989_v25   ;;  %v6245_v25 = vld [vmem:[#allocation1 + $0x4a0] sm:$0xf]  }
 0x1be   :  { %5995 = vst [vmem:[#allocation0 + $0xe4] sm:$0xf] %v5993_v26   ;;  %v6249_v26 = vld [vmem:[#allocation1 + $0x810] sm:$0xf]  }
 0x1bf   :  { %5999 = vst [vmem:[#allocation0 + $0xec] sm:$0xf] %v5997_v27   ;;  %v6253_v27 = vld [vmem:[#allocation1 + $0x228] sm:$0xf]  }
 0x1c0   :  { %6003 = vst [vmem:[#allocation0 + $0xf0] sm:$0xf] %v6001_v28   ;;  %v6257_v28 = vld [vmem:[#allocation1 + $0x468] sm:$0xf]  }
 0x1c1   :  { %6007 = vst [vmem:[#allocation0 + $0xf8] sm:$0xf] %v6005_v29   ;;  %v6261_v29 = vld [vmem:[#allocation1 + $0x8e8] sm:$0xf]  }
 0x1c2   :  { %6011 = vst [vmem:[#allocation0 + $0x100] sm:$0xf] %v6009_v30   ;;  %v6265_v30 = vld [vmem:[#allocation1 + $0x440] sm:$0xf]  }
 0x1c3   :  { %6015 = vst [vmem:[#allocation0 + $0x108] sm:$0xf] %v6013_v31   ;;  %v6269_v31 = vld [vmem:[#allocation1 + $0x760] sm:$0xf]  }
 0x1c4   :  { %6019 = vst [vmem:[#allocation0 + $0x110] sm:$0xf] %v6017_v32   ;;  %v6273_v32 = vld [vmem:[#allocation1 + $0x528] sm:$0xf]  }
 0x1c5   :  { %6023 = vst [vmem:[#allocation0 + $0x118] sm:$0xf] %v6021_v33   ;;  %v6277_v33 = vld [vmem:[#allocation1 + $0x280] sm:$0xf]  }
 0x1c6   :  { %6027 = vst [vmem:[#allocation0 + $0xf4] sm:$0xf] %v6025_v34   ;;  %v6281_v34 = vld [vmem:[#allocation1 + $0xac0] sm:$0xf]  }
 0x1c7   :  { %6031 = vst [vmem:[#allocation0 + $0xfc] sm:$0xf] %v6029_v35   ;;  %v6285_v35 = vld [vmem:[#allocation1 + $0x1b0] sm:$0xf]  }
 0x1c8   :  { %6035 = vst [vmem:[#allocation0 + $0x104] sm:$0xf] %v6033_v36   ;;  %v6289_v36 = vld [vmem:[#allocation1 + $0xbf8] sm:$0xf]  }
 0x1c9   :  { %6039 = vst [vmem:[#allocation0 + $0x10c] sm:$0xf] %v6037_v37   ;;  %v6293_v37 = vld [vmem:[#allocation1 + $0xb28] sm:$0xf]  }
 0x1ca   :  { %6043 = vst [vmem:[#allocation0 + $0x114] sm:$0xf] %v6041_v38   ;;  %v6297_v38 = vld [vmem:[#allocation1 + $0x920] sm:$0xf]  }
 0x1cb   :  { %6047 = vst [vmem:[#allocation0 + $0x11c] sm:$0xf] %v6045_v39   ;;  %v6301_v39 = vld [vmem:[#allocation1 + $0x4d8] sm:$0xf]  }
 0x1cc   :  { %6051 = vst [vmem:[#allocation0 + $0x120] sm:$0xf] %v6049_v40   ;;  %v6305_v40 = vld [vmem:[#allocation1 + $0x138] sm:$0xf]  }
 0x1cd   :  { %6055 = vst [vmem:[#allocation0 + $0x128] sm:$0xf] %v6053_v41   ;;  %v6309_v41 = vld [vmem:[#allocation1 + $0xb80] sm:$0xf]  }
 0x1ce   :  { %6059 = vst [vmem:[#allocation0 + $0x130] sm:$0xf] %v6057_v42   ;;  %v6313_v42 = vld [vmem:[#allocation1 + $0x688] sm:$0xf]  }
 0x1cf   :  { %6063 = vst [vmem:[#allocation0 + $0x138] sm:$0xf] %v6061_v43   ;;  %v6317_v43 = vld [vmem:[#allocation1 + $0x520] sm:$0xf]  }
 0x1d0   :  { %6067 = vst [vmem:[#allocation0 + $0x140] sm:$0xf] %v6065_v44   ;;  %v6321_v44 = vld [vmem:[#allocation1 + $0x7c0] sm:$0xf]  }
 0x1d1   :  { %6071 = vst [vmem:[#allocation0 + $0x148] sm:$0xf] %v6069_v45   ;;  %v6325_v45 = vld [vmem:[#allocation1 + $0x498] sm:$0xf]  }
 0x1d2   :  { %6075 = vst [vmem:[#allocation0 + $0x124] sm:$0xf] %v6073_v46   ;;  %v6329_v46 = vld [vmem:[#allocation1 + $0x30] sm:$0xf]  }
 0x1d3   :  { %6079 = vst [vmem:[#allocation0 + $0x12c] sm:$0xf] %v6077_v47   ;;  %v6333_v47 = vld [vmem:[#allocation1 + $0x950] sm:$0xf]  }
 0x1d4   :  { %6083 = vst [vmem:[#allocation0 + $0x134] sm:$0xf] %v6081_v48   ;;  %v6337_v48 = vld [vmem:[#allocation1 + $0x308] sm:$0xf]  }
 0x1d5   :  { %6087 = vst [vmem:[#allocation0 + $0x13c] sm:$0xf] %v6085_v49   ;;  %v6341_v49 = vld [vmem:[#allocation1 + $0x7b8] sm:$0xf]  }
 0x1d6   :  { %6091 = vst [vmem:[#allocation0 + $0x144] sm:$0xf] %v6089_v50   ;;  %v6345_v50 = vld [vmem:[#allocation1 + $0x240] sm:$0xf]  }
 0x1d7   :  { %6095 = vst [vmem:[#allocation0 + $0x14c] sm:$0xf] %v6093_v51   ;;  %v6349_v51 = vld [vmem:[#allocation1 + $0xb48] sm:$0xf]  }
 0x1d8   :  { %6099 = vst [vmem:[#allocation0 + $0x150] sm:$0xf] %v6097_v52   ;;  %v6353_v52 = vld [vmem:[#allocation1 + $0x108] sm:$0xf]  }
 0x1d9   :  { %6103 = vst [vmem:[#allocation0 + $0x158] sm:$0xf] %v6101_v53   ;;  %v6357_v53 = vld [vmem:[#allocation1 + $0x878] sm:$0xf]  }
 0x1da   :  { %6107 = vst [vmem:[#allocation0 + $0x160] sm:$0xf] %v6105_v54   ;;  %v6361_v54 = vld [vmem:[#allocation1 + $0xa28] sm:$0xf]  }
 0x1db   :  { %6111 = vst [vmem:[#allocation0 + $0x168] sm:$0xf] %v6109_v55   ;;  %v6365_v55 = vld [vmem:[#allocation1 + $0xa10] sm:$0xf]  }
 0x1dc   :  { %6115 = vst [vmem:[#allocation0 + $0x170] sm:$0xf] %v6113_v56   ;;  %v6369_v56 = vld [vmem:[#allocation1 + $0x870] sm:$0xf]  }
 0x1dd   :  { %6119 = vst [vmem:[#allocation0 + $0x178] sm:$0xf] %v6117_v57   ;;  %v6373_v57 = vld [vmem:[#allocation1 + $0x5e0] sm:$0xf]  }
 0x1de   :  { %6123 = vst [vmem:[#allocation0 + $0x154] sm:$0xf] %v6121_v58   ;;  %v6377_v58 = vld [vmem:[#allocation1 + $0xa38] sm:$0xf]  }
 0x1df   :  { %6127 = vst [vmem:[#allocation0 + $0x15c] sm:$0xf] %v6125_v59   ;;  %v6381_v59 = vld [vmem:[#allocation1 + $0x4e0] sm:$0xf]  }
 0x1e0   :  { %6131 = vst [vmem:[#allocation0 + $0x164] sm:$0xf] %v6129_v60   ;;  %v6385_v60 = vld [vmem:[#allocation1 + $0x428] sm:$0xf]  }
 0x1e1   :  { %6135 = vst [vmem:[#allocation0 + $0x16c] sm:$0xf] %v6133_v61   ;;  %v6389_v61 = vld [vmem:[#allocation1 + $0x120] sm:$0xf]  }
 0x1e2   :  { %6139 = vst [vmem:[#allocation0 + $0x174] sm:$0xf] %v6137_v62   ;;  %v6393_v62 = vld [vmem:[#allocation1 + $0x8d0] sm:$0xf]  }
 0x1e3   :  { %6143 = vst [vmem:[#allocation0 + $0x17c] sm:$0xf] %v6141_v63   ;;  %v6397_v63 = vld [vmem:[#allocation1 + $0x840] sm:$0xf]  }
 0x1e4   :  { %6147 = vst [vmem:[#allocation0 + $0x180] sm:$0xf] %v6145_v0   ;;  %v6401_v0 = vld [vmem:[#allocation1 + $0x4f8] sm:$0xf]  }
 0x1e5   :  { %6151 = vst [vmem:[#allocation0 + $0x188] sm:$0xf] %v6149_v1   ;;  %v6405_v1 = vld [vmem:[#allocation1 + $0x9d0] sm:$0xf]  }
 0x1e6   :  { %6155 = vst [vmem:[#allocation0 + $0x190] sm:$0xf] %v6153_v2   ;;  %v6409_v2 = vld [vmem:[#allocation1 + $0x670] sm:$0xf]  }
 0x1e7   :  { %6159 = vst [vmem:[#allocation0 + $0x198] sm:$0xf] %v6157_v3   ;;  %v6413_v3 = vld [vmem:[#allocation1 + $0x150] sm:$0xf]  }
 0x1e8   :  { %6163 = vst [vmem:[#allocation0 + $0x1a0] sm:$0xf] %v6161_v4   ;;  %v6417_v4 = vld [vmem:[#allocation1 + $0x5d8] sm:$0xf]  }
 0x1e9   :  { %6167 = vst [vmem:[#allocation0 + $0x1a8] sm:$0xf] %v6165_v5   ;;  %v6421_v5 = vld [vmem:[#allocation1 + $0x768] sm:$0xf]  }
 0x1ea   :  { %6171 = vst [vmem:[#allocation0 + $0x184] sm:$0xf] %v6169_v6   ;;  %v6425_v6 = vld [vmem:[#allocation1 + $0x3b0] sm:$0xf]  }
 0x1eb   :  { %6175 = vst [vmem:[#allocation0 + $0x18c] sm:$0xf] %v6173_v7   ;;  %v6429_v7 = vld [vmem:[#allocation1 + $0x780] sm:$0xf]  }
 0x1ec   :  { %6179 = vst [vmem:[#allocation0 + $0x194] sm:$0xf] %v6177_v8   ;;  %v6433_v8 = vld [vmem:[#allocation1 + $0x8f0] sm:$0xf]  }
 0x1ed   :  { %6183 = vst [vmem:[#allocation0 + $0x19c] sm:$0xf] %v6181_v9   ;;  %v6437_v9 = vld [vmem:[#allocation1 + $0x6d0] sm:$0xf]  }
 0x1ee   :  { %6187 = vst [vmem:[#allocation0 + $0x1a4] sm:$0xf] %v6185_v10   ;;  %v6441_v10 = vld [vmem:[#allocation1 + $0x298] sm:$0xf]  }
 0x1ef   :  { %6191 = vst [vmem:[#allocation0 + $0x1ac] sm:$0xf] %v6189_v11   ;;  %v6445_v11 = vld [vmem:[#allocation1 + $0x90] sm:$0xf]  }
 0x1f0   :  { %6195 = vst [vmem:[#allocation0 + $0x1b0] sm:$0xf] %v6193_v12   ;;  %v6449_v12 = vld [vmem:[#allocation1 + $0x868] sm:$0xf]  }
 0x1f1   :  { %6199 = vst [vmem:[#allocation0 + $0x1b8] sm:$0xf] %v6197_v13   ;;  %v6453_v13 = vld [vmem:[#allocation1 + $0x9e0] sm:$0xf]  }
 0x1f2   :  { %6203 = vst [vmem:[#allocation0 + $0x1c0] sm:$0xf] %v6201_v14   ;;  %v6457_v14 = vld [vmem:[#allocation1 + $0xb08] sm:$0xf]  }
 0x1f3   :  { %6207 = vst [vmem:[#allocation0 + $0x1c8] sm:$0xf] %v6205_v15   ;;  %v6461_v15 = vld [vmem:[#allocation1 + $0x9f8] sm:$0xf]  }
 0x1f4   :  { %6211 = vst [vmem:[#allocation0 + $0x1d0] sm:$0xf] %v6209_v16   ;;  %v6465_v16 = vld [vmem:[#allocation1 + $0x6a8] sm:$0xf]  }
 0x1f5   :  { %6215 = vst [vmem:[#allocation0 + $0x1d8] sm:$0xf] %v6213_v17   ;;  %v6469_v17 = vld [vmem:[#allocation1 + $0x510] sm:$0xf]  }
 0x1f6   :  { %6219 = vst [vmem:[#allocation0 + $0x1b4] sm:$0xf] %v6217_v18   ;;  %v6473_v18 = vld [vmem:[#allocation1 + $0x5c0] sm:$0xf]  }
 0x1f7   :  { %6223 = vst [vmem:[#allocation0 + $0x1bc] sm:$0xf] %v6221_v19   ;;  %v6477_v19 = vld [vmem:[#allocation1 + $0xb38] sm:$0xf]  }
 0x1f8   :  { %6227 = vst [vmem:[#allocation0 + $0x1c4] sm:$0xf] %v6225_v20   ;;  %v6481_v20 = vld [vmem:[#allocation1 + $0x3d8] sm:$0xf]  }
 0x1f9   :  { %6231 = vst [vmem:[#allocation0 + $0x1cc] sm:$0xf] %v6229_v21   ;;  %v6485_v21 = vld [vmem:[#allocation1 + $0x658] sm:$0xf]  }
 0x1fa   :  { %6235 = vst [vmem:[#allocation0 + $0x1d4] sm:$0xf] %v6233_v22   ;;  %v6489_v22 = vld [vmem:[#allocation1 + $0x50] sm:$0xf]  }
 0x1fb   :  { %6239 = vst [vmem:[#allocation0 + $0x1dc] sm:$0xf] %v6237_v23   ;;  %v6493_v23 = vld [vmem:[#allocation1 + $0x848] sm:$0xf]  }
 0x1fc   :  { %6243 = vst [vmem:[#allocation0 + $0x1e0] sm:$0xf] %v6241_v24   ;;  %v6497_v24 = vld [vmem:[#allocation1 + $0x7f0] sm:$0xf]  }
 0x1fd   :  { %6247 = vst [vmem:[#allocation0 + $0x1e8] sm:$0xf] %v6245_v25   ;;  %v6501_v25 = vld [vmem:[#allocation1 + $0xbd8] sm:$0xf]  }
 0x1fe   :  { %6251 = vst [vmem:[#allocation0 + $0x1f0] sm:$0xf] %v6249_v26   ;;  %v6505_v26 = vld [vmem:[#allocation1 + $0xa50] sm:$0xf]  }
 0x1ff   :  { %6255 = vst [vmem:[#allocation0 + $0x1f8] sm:$0xf] %v6253_v27   ;;  %v6509_v27 = vld [vmem:[#allocation1 + $0x10] sm:$0xf]  }
 0x200   :  { %6259 = vst [vmem:[#allocation0 + $0x200] sm:$0xf] %v6257_v28   ;;  %v6513_v28 = vld [vmem:[#allocation1 + $0xaf0] sm:$0xf]  }
 0x201   :  { %6263 = vst [vmem:[#allocation0 + $0x208] sm:$0xf] %v6261_v29   ;;  %v6517_v29 = vld [vmem:[#allocation1 + $0x338] sm:$0xf]  }
 0x202   :  { %6267 = vst [vmem:[#allocation0 + $0x1e4] sm:$0xf] %v6265_v30   ;;  %v6521_v30 = vld [vmem:[#allocation1 + $0x348] sm:$0xf]  }
 0x203   :  { %6271 = vst [vmem:[#allocation0 + $0x1ec] sm:$0xf] %v6269_v31   ;;  %v6525_v31 = vld [vmem:[#allocation1 + $0x3f8] sm:$0xf]  }
 0x204   :  { %6275 = vst [vmem:[#allocation0 + $0x1f4] sm:$0xf] %v6273_v32   ;;  %v6529_v32 = vld [vmem:[#allocation1 + $0x270] sm:$0xf]  }
 0x205   :  { %6279 = vst [vmem:[#allocation0 + $0x1fc] sm:$0xf] %v6277_v33   ;;  %v6533_v33 = vld [vmem:[#allocation1 + $0xaf8] sm:$0xf]  }
 0x206   :  { %6283 = vst [vmem:[#allocation0 + $0x204] sm:$0xf] %v6281_v34   ;;  %v6537_v34 = vld [vmem:[#allocation1 + $0x110] sm:$0xf]  }
 0x207   :  { %6287 = vst [vmem:[#allocation0 + $0x20c] sm:$0xf] %v6285_v35   ;;  %v6541_v35 = vld [vmem:[#allocation1 + $0x100] sm:$0xf]  }
 0x208   :  { %6291 = vst [vmem:[#allocation0 + $0x210] sm:$0xf] %v6289_v36   ;;  %v6545_v36 = vld [vmem:[#allocation1 + $0x360] sm:$0xf]  }
 0x209   :  { %6295 = vst [vmem:[#allocation0 + $0x218] sm:$0xf] %v6293_v37   ;;  %v6549_v37 = vld [vmem:[#allocation1 + $0xb50] sm:$0xf]  }
 0x20a   :  { %6299 = vst [vmem:[#allocation0 + $0x220] sm:$0xf] %v6297_v38   ;;  %v6553_v38 = vld [vmem:[#allocation1 + $0x258] sm:$0xf]  }
 0x20b   :  { %6303 = vst [vmem:[#allocation0 + $0x228] sm:$0xf] %v6301_v39   ;;  %v6557_v39 = vld [vmem:[#allocation1 + $0xa30] sm:$0xf]  }
 0x20c   :  { %6307 = vst [vmem:[#allocation0 + $0x230] sm:$0xf] %v6305_v40   ;;  %v6561_v40 = vld [vmem:[#allocation1 + $0x2d0] sm:$0xf]  }
 0x20d   :  { %6311 = vst [vmem:[#allocation0 + $0x238] sm:$0xf] %v6309_v41   ;;  %v6565_v41 = vld [vmem:[#allocation1 + $0x8b8] sm:$0xf]  }
 0x20e   :  { %6315 = vst [vmem:[#allocation0 + $0x214] sm:$0xf] %v6313_v42   ;;  %v6569_v42 = vld [vmem:[#allocation1 + $0x68] sm:$0xf]  }
 0x20f   :  { %6319 = vst [vmem:[#allocation0 + $0x21c] sm:$0xf] %v6317_v43   ;;  %v6573_v43 = vld [vmem:[#allocation1 + $0xb18] sm:$0xf]  }
 0x210   :  { %6323 = vst [vmem:[#allocation0 + $0x224] sm:$0xf] %v6321_v44   ;;  %v6577_v44 = vld [vmem:[#allocation1 + $0xaa8] sm:$0xf]  }
 0x211   :  { %6327 = vst [vmem:[#allocation0 + $0x22c] sm:$0xf] %v6325_v45   ;;  %v6581_v45 = vld [vmem:[#allocation1 + $0x8c0] sm:$0xf]  }
 0x212   :  { %6331 = vst [vmem:[#allocation0 + $0x234] sm:$0xf] %v6329_v46   ;;  %v6585_v46 = vld [vmem:[#allocation1 + $0xb40] sm:$0xf]  }
 0x213   :  { %6335 = vst [vmem:[#allocation0 + $0x23c] sm:$0xf] %v6333_v47   ;;  %v6589_v47 = vld [vmem:[#allocation1 + $0x800] sm:$0xf]  }
 0x214   :  { %6339 = vst [vmem:[#allocation0 + $0x240] sm:$0xf] %v6337_v48   ;;  %v6593_v48 = vld [vmem:[#allocation1 + $0x480] sm:$0xf]  }
 0x215   :  { %6343 = vst [vmem:[#allocation0 + $0x248] sm:$0xf] %v6341_v49   ;;  %v6597_v49 = vld [vmem:[#allocation1 + $0x790] sm:$0xf]  }
 0x216   :  { %6347 = vst [vmem:[#allocation0 + $0x250] sm:$0xf] %v6345_v50   ;;  %v6601_v50 = vld [vmem:[#allocation1 + $0x1c8] sm:$0xf]  }
 0x217   :  { %6351 = vst [vmem:[#allocation0 + $0x258] sm:$0xf] %v6349_v51   ;;  %v6605_v51 = vld [vmem:[#allocation1 + $0x580] sm:$0xf]  }
 0x218   :  { %6355 = vst [vmem:[#allocation0 + $0x260] sm:$0xf] %v6353_v52   ;;  %v6609_v52 = vld [vmem:[#allocation1 + $0x6a0] sm:$0xf]  }
 0x219   :  { %6359 = vst [vmem:[#allocation0 + $0x268] sm:$0xf] %v6357_v53   ;;  %v6613_v53 = vld [vmem:[#allocation1 + $0x248] sm:$0xf]  }
 0x21a   :  { %6363 = vst [vmem:[#allocation0 + $0x244] sm:$0xf] %v6361_v54   ;;  %v6617_v54 = vld [vmem:[#allocation1 + $0xbe0] sm:$0xf]  }
 0x21b   :  { %6367 = vst [vmem:[#allocation0 + $0x24c] sm:$0xf] %v6365_v55   ;;  %v6621_v55 = vld [vmem:[#allocation1 + $0x678] sm:$0xf]  }
 0x21c   :  { %6371 = vst [vmem:[#allocation0 + $0x254] sm:$0xf] %v6369_v56   ;;  %v6625_v56 = vld [vmem:[#allocation1 + $0x548] sm:$0xf]  }
 0x21d   :  { %6375 = vst [vmem:[#allocation0 + $0x25c] sm:$0xf] %v6373_v57   ;;  %v6629_v57 = vld [vmem:[#allocation1 + $0x730] sm:$0xf]  }
 0x21e   :  { %6379 = vst [vmem:[#allocation0 + $0x264] sm:$0xf] %v6377_v58   ;;  %v6633_v58 = vld [vmem:[#allocation1 + $0x2d8] sm:$0xf]  }
 0x21f   :  { %6383 = vst [vmem:[#allocation0 + $0x26c] sm:$0xf] %v6381_v59   ;;  %v6637_v59 = vld [vmem:[#allocation1 + $0x640] sm:$0xf]  }
 0x220   :  { %6387 = vst [vmem:[#allocation0 + $0x270] sm:$0xf] %v6385_v60   ;;  %v6641_v60 = vld [vmem:[#allocation1 + $0x1e8] sm:$0xf]  }
 0x221   :  { %6391 = vst [vmem:[#allocation0 + $0x278] sm:$0xf] %v6389_v61   ;;  %v6645_v61 = vld [vmem:[#allocation1 + $0xa88] sm:$0xf]  }
 0x222   :  { %6395 = vst [vmem:[#allocation0 + $0x280] sm:$0xf] %v6393_v62   ;;  %v6649_v62 = vld [vmem:[#allocation1 + $0x7d0] sm:$0xf]  }
 0x223   :  { %6399 = vst [vmem:[#allocation0 + $0x288] sm:$0xf] %v6397_v63   ;;  %v6653_v63 = vld [vmem:[#allocation1 + $0xa98] sm:$0xf]  }
 0x224   :  { %6403 = vst [vmem:[#allocation0 + $0x290] sm:$0xf] %v6401_v0   ;;  %v6657_v0 = vld [vmem:[#allocation1 + $0x3c0] sm:$0xf]  }
 0x225   :  { %6407 = vst [vmem:[#allocation0 + $0x298] sm:$0xf] %v6405_v1   ;;  %v6661_v1 = vld [vmem:[#allocation1 + $0xbc8] sm:$0xf]  }
 0x226   :  { %6411 = vst [vmem:[#allocation0 + $0x274] sm:$0xf] %v6409_v2   ;;  %v6665_v2 = vld [vmem:[#allocation1 + $0x988] sm:$0xf]  }
 0x227   :  { %6415 = vst [vmem:[#allocation0 + $0x27c] sm:$0xf] %v6413_v3   ;;  %v6669_v3 = vld [vmem:[#allocation1 + $0x6c0] sm:$0xf]  }
 0x228   :  { %6419 = vst [vmem:[#allocation0 + $0x284] sm:$0xf] %v6417_v4   ;;  %v6673_v4 = vld [vmem:[#allocation1 + $0x378] sm:$0xf]  }
 0x229   :  { %6423 = vst [vmem:[#allocation0 + $0x28c] sm:$0xf] %v6421_v5   ;;  %v6677_v5 = vld [vmem:[#allocation1 + $0xa48] sm:$0xf]  }
 0x22a   :  { %6427 = vst [vmem:[#allocation0 + $0x294] sm:$0xf] %v6425_v6   ;;  %v6681_v6 = vld [vmem:[#allocation1 + $0xa58] sm:$0xf]  }
 0x22b   :  { %6431 = vst [vmem:[#allocation0 + $0x29c] sm:$0xf] %v6429_v7   ;;  %v6685_v7 = vld [vmem:[#allocation1 + $0xb20] sm:$0xf]  }
 0x22c   :  { %6435 = vst [vmem:[#allocation0 + $0x2a0] sm:$0xf] %v6433_v8   ;;  %v6689_v8 = vld [vmem:[#allocation1 + $0xae0] sm:$0xf]  }
 0x22d   :  { %6439 = vst [vmem:[#allocation0 + $0x2a8] sm:$0xf] %v6437_v9   ;;  %v6693_v9 = vld [vmem:[#allocation1 + $0xd8] sm:$0xf]  }
 0x22e   :  { %6443 = vst [vmem:[#allocation0 + $0x2b0] sm:$0xf] %v6441_v10   ;;  %v6697_v10 = vld [vmem:[#allocation1 + $0x700] sm:$0xf]  }
 0x22f   :  { %6447 = vst [vmem:[#allocation0 + $0x2b8] sm:$0xf] %v6445_v11   ;;  %v6701_v11 = vld [vmem:[#allocation1 + $0x328] sm:$0xf]  }
 0x230   :  { %6451 = vst [vmem:[#allocation0 + $0x2c0] sm:$0xf] %v6449_v12   ;;  %v6705_v12 = vld [vmem:[#allocation1] sm:$0xf]  }
 0x231   :  { %6455 = vst [vmem:[#allocation0 + $0x2c8] sm:$0xf] %v6453_v13   ;;  %v6709_v13 = vld [vmem:[#allocation1 + $0x608] sm:$0xf]  }
 0x232   :  { %6459 = vst [vmem:[#allocation0 + $0x2a4] sm:$0xf] %v6457_v14   ;;  %v6713_v14 = vld [vmem:[#allocation1 + $0x6d8] sm:$0xf]  }
 0x233   :  { %6463 = vst [vmem:[#allocation0 + $0x2ac] sm:$0xf] %v6461_v15   ;;  %v6717_v15 = vld [vmem:[#allocation1 + $0xae8] sm:$0xf]  }
 0x234   :  { %6467 = vst [vmem:[#allocation0 + $0x2b4] sm:$0xf] %v6465_v16   ;;  %v6721_v16 = vld [vmem:[#allocation1 + $0x940] sm:$0xf]  }
 0x235   :  { %6471 = vst [vmem:[#allocation0 + $0x2bc] sm:$0xf] %v6469_v17   ;;  %v6725_v17 = vld [vmem:[#allocation1 + $0x1e0] sm:$0xf]  }
 0x236   :  { %6475 = vst [vmem:[#allocation0 + $0x2c4] sm:$0xf] %v6473_v18   ;;  %v6729_v18 = vld [vmem:[#allocation1 + $0x7a8] sm:$0xf]  }
 0x237   :  { %6479 = vst [vmem:[#allocation0 + $0x2cc] sm:$0xf] %v6477_v19   ;;  %v6733_v19 = vld [vmem:[#allocation1 + $0x5a8] sm:$0xf]  }
 0x238   :  { %6483 = vst [vmem:[#allocation0 + $0x2d0] sm:$0xf] %v6481_v20   ;;  %v6737_v20 = vld [vmem:[#allocation1 + $0xb78] sm:$0xf]  }
 0x239   :  { %6487 = vst [vmem:[#allocation0 + $0x2d8] sm:$0xf] %v6485_v21   ;;  %v6741_v21 = vld [vmem:[#allocation1 + $0x178] sm:$0xf]  }
 0x23a   :  { %6491 = vst [vmem:[#allocation0 + $0x2e0] sm:$0xf] %v6489_v22   ;;  %v6745_v22 = vld [vmem:[#allocation1 + $0xb90] sm:$0xf]  }
 0x23b   :  { %6495 = vst [vmem:[#allocation0 + $0x2e8] sm:$0xf] %v6493_v23   ;;  %v6749_v23 = vld [vmem:[#allocation1 + $0x740] sm:$0xf]  }
 0x23c   :  { %6499 = vst [vmem:[#allocation0 + $0x2f0] sm:$0xf] %v6497_v24   ;;  %v6753_v24 = vld [vmem:[#allocation1 + $0x910] sm:$0xf]  }
 0x23d   :  { %6503 = vst [vmem:[#allocation0 + $0x2f8] sm:$0xf] %v6501_v25   ;;  %v6757_v25 = vld [vmem:[#allocation1 + $0x898] sm:$0xf]  }
 0x23e   :  { %6507 = vst [vmem:[#allocation0 + $0x2d4] sm:$0xf] %v6505_v26   ;;  %v6761_v26 = vld [vmem:[#allocation1 + $0x778] sm:$0xf]  }
 0x23f   :  { %6511 = vst [vmem:[#allocation0 + $0x2dc] sm:$0xf] %v6509_v27   ;;  %v6765_v27 = vld [vmem:[#allocation1 + $0x540] sm:$0xf]  }
 0x240   :  { %6515 = vst [vmem:[#allocation0 + $0x2e4] sm:$0xf] %v6513_v28   ;;  %v6769_v28 = vld [vmem:[#allocation1 + $0x450] sm:$0xf]  }
 0x241   :  { %6519 = vst [vmem:[#allocation0 + $0x2ec] sm:$0xf] %v6517_v29   ;;  %v6773_v29 = vld [vmem:[#allocation1 + $0x2b0] sm:$0xf]  }
 0x242   :  { %6523 = vst [vmem:[#allocation0 + $0x2f4] sm:$0xf] %v6521_v30   ;;  %v6777_v30 = vld [vmem:[#allocation1 + $0x7c8] sm:$0xf]  }
 0x243   :  { %6527 = vst [vmem:[#allocation0 + $0x2fc] sm:$0xf] %v6525_v31   ;;  %v6781_v31 = vld [vmem:[#allocation1 + $0x238] sm:$0xf]  }
 0x244   :  { %6531 = vst [vmem:[#allocation0 + $0x300] sm:$0xf] %v6529_v32   ;;  %v6785_v32 = vld [vmem:[#allocation1 + $0x850] sm:$0xf]  }
 0x245   :  { %6535 = vst [vmem:[#allocation0 + $0x308] sm:$0xf] %v6533_v33   ;;  %v6789_v33 = vld [vmem:[#allocation1 + $0x860] sm:$0xf]  }
 0x246   :  { %6539 = vst [vmem:[#allocation0 + $0x310] sm:$0xf] %v6537_v34   ;;  %v6793_v34 = vld [vmem:[#allocation1 + $0x590] sm:$0xf]  }
 0x247   :  { %6543 = vst [vmem:[#allocation0 + $0x318] sm:$0xf] %v6541_v35   ;;  %v6797_v35 = vld [vmem:[#allocation1 + $0x158] sm:$0xf]  }
 0x248   :  { %6547 = vst [vmem:[#allocation0 + $0x320] sm:$0xf] %v6545_v36   ;;  %v6801_v36 = vld [vmem:[#allocation1 + $0x518] sm:$0xf]  }
 0x249   :  { %6551 = vst [vmem:[#allocation0 + $0x328] sm:$0xf] %v6549_v37   ;;  %v6805_v37 = vld [vmem:[#allocation1 + $0x598] sm:$0xf]  }
 0x24a   :  { %6555 = vst [vmem:[#allocation0 + $0x304] sm:$0xf] %v6553_v38   ;;  %v6809_v38 = vld [vmem:[#allocation1 + $0x9c0] sm:$0xf]  }
 0x24b   :  { %6559 = vst [vmem:[#allocation0 + $0x30c] sm:$0xf] %v6557_v39   ;;  %v6813_v39 = vld [vmem:[#allocation1 + $0x620] sm:$0xf]  }
 0x24c   :  { %6563 = vst [vmem:[#allocation0 + $0x314] sm:$0xf] %v6561_v40   ;;  %v6817_v40 = vld [vmem:[#allocation1 + $0x168] sm:$0xf]  }
 0x24d   :  { %6567 = vst [vmem:[#allocation0 + $0x31c] sm:$0xf] %v6565_v41   ;;  %v6821_v41 = vld [vmem:[#allocation1 + $0x4c0] sm:$0xf]  }
 0x24e   :  { %6571 = vst [vmem:[#allocation0 + $0x324] sm:$0xf] %v6569_v42   ;;  %v6825_v42 = vld [vmem:[#allocation1 + $0x758] sm:$0xf]  }
 0x24f   :  { %6575 = vst [vmem:[#allocation0 + $0x32c] sm:$0xf] %v6573_v43   ;;  %v6829_v43 = vld [vmem:[#allocation1 + $0x690] sm:$0xf]  }
 0x250   :  { %6579 = vst [vmem:[#allocation0 + $0x330] sm:$0xf] %v6577_v44   ;;  %v6833_v44 = vld [vmem:[#allocation1 + $0x9a0] sm:$0xf]  }
 0x251   :  { %6583 = vst [vmem:[#allocation0 + $0x338] sm:$0xf] %v6581_v45   ;;  %v6837_v45 = vld [vmem:[#allocation1 + $0x18] sm:$0xf]  }
 0x252   :  { %6587 = vst [vmem:[#allocation0 + $0x340] sm:$0xf] %v6585_v46   ;;  %v6841_v46 = vld [vmem:[#allocation1 + $0x888] sm:$0xf]  }
 0x253   :  { %6591 = vst [vmem:[#allocation0 + $0x348] sm:$0xf] %v6589_v47   ;;  %v6845_v47 = vld [vmem:[#allocation1 + $0x398] sm:$0xf]  }
 0x254   :  { %6595 = vst [vmem:[#allocation0 + $0x350] sm:$0xf] %v6593_v48   ;;  %v6849_v48 = vld [vmem:[#allocation1 + $0x668] sm:$0xf]  }
 0x255   :  { %6599 = vst [vmem:[#allocation0 + $0x358] sm:$0xf] %v6597_v49   ;;  %v6853_v49 = vld [vmem:[#allocation1 + $0x960] sm:$0xf]  }
 0x256   :  { %6603 = vst [vmem:[#allocation0 + $0x334] sm:$0xf] %v6601_v50   ;;  %v6857_v50 = vld [vmem:[#allocation1 + $0xd0] sm:$0xf]  }
 0x257   :  { %6607 = vst [vmem:[#allocation0 + $0x33c] sm:$0xf] %v6605_v51   ;;  %v6861_v51 = vld [vmem:[#allocation1 + $0x160] sm:$0xf]  }
 0x258   :  { %6611 = vst [vmem:[#allocation0 + $0x344] sm:$0xf] %v6609_v52   ;;  %v6865_v52 = vld [vmem:[#allocation1 + $0x170] sm:$0xf]  }
 0x259   :  { %6615 = vst [vmem:[#allocation0 + $0x34c] sm:$0xf] %v6613_v53   ;;  %v6869_v53 = vld [vmem:[#allocation1 + $0x410] sm:$0xf]  }
 0x25a   :  { %6619 = vst [vmem:[#allocation0 + $0x354] sm:$0xf] %v6617_v54   ;;  %v6873_v54 = vld [vmem:[#allocation1 + $0xab8] sm:$0xf]  }
 0x25b   :  { %6623 = vst [vmem:[#allocation0 + $0x35c] sm:$0xf] %v6621_v55   ;;  %v6877_v55 = vld [vmem:[#allocation1 + $0xad0] sm:$0xf]  }
 0x25c   :  { %6627 = vst [vmem:[#allocation0 + $0x360] sm:$0xf] %v6625_v56   ;;  %v6881_v56 = vld [vmem:[#allocation1 + $0xbb8] sm:$0xf]  }
 0x25d   :  { %6631 = vst [vmem:[#allocation0 + $0x368] sm:$0xf] %v6629_v57   ;;  %v6885_v57 = vld [vmem:[#allocation1 + $0x190] sm:$0xf]  }
 0x25e   :  { %6635 = vst [vmem:[#allocation0 + $0x370] sm:$0xf] %v6633_v58   ;;  %v6889_v58 = vld [vmem:[#allocation1 + $0x420] sm:$0xf]  }
 0x25f   :  { %6639 = vst [vmem:[#allocation0 + $0x378] sm:$0xf] %v6637_v59   ;;  %v6893_v59 = vld [vmem:[#allocation1 + $0x4c8] sm:$0xf]  }
 0x260   :  { %6643 = vst [vmem:[#allocation0 + $0x380] sm:$0xf] %v6641_v60   ;;  %v6897_v60 = vld [vmem:[#allocation1 + $0x220] sm:$0xf]  }
 0x261   :  { %6647 = vst [vmem:[#allocation0 + $0x388] sm:$0xf] %v6645_v61   ;;  %v6901_v61 = vld [vmem:[#allocation1 + $0xad8] sm:$0xf]  }
 0x262   :  { %6651 = vst [vmem:[#allocation0 + $0x364] sm:$0xf] %v6649_v62   ;;  %v6905_v62 = vld [vmem:[#allocation1 + $0x1c0] sm:$0xf]  }
 0x263   :  { %6655 = vst [vmem:[#allocation0 + $0x36c] sm:$0xf] %v6653_v63   ;;  %v6909_v63 = vld [vmem:[#allocation1 + $0x340] sm:$0xf]  }
 0x264   :  { %6659 = vst [vmem:[#allocation0 + $0x374] sm:$0xf] %v6657_v0   ;;  %v6913_v0 = vld [vmem:[#allocation1 + $0x350] sm:$0xf]  }
 0x265   :  { %6663 = vst [vmem:[#allocation0 + $0x37c] sm:$0xf] %v6661_v1   ;;  %v6917_v1 = vld [vmem:[#allocation1 + $0x6f0] sm:$0xf]  }
 0x266   :  { %6667 = vst [vmem:[#allocation0 + $0x384] sm:$0xf] %v6665_v2   ;;  %v6921_v2 = vld [vmem:[#allocation1 + $0x8f8] sm:$0xf]  }
 0x267   :  { %6671 = vst [vmem:[#allocation0 + $0x38c] sm:$0xf] %v6669_v3   ;;  %v6925_v3 = vld [vmem:[#allocation1 + $0x118] sm:$0xf]  }
 0x268   :  { %6675 = vst [vmem:[#allocation0 + $0x390] sm:$0xf] %v6673_v4   ;;  %v6929_v4 = vld [vmem:[#allocation1 + $0x2a8] sm:$0xf]  }
 0x269   :  { %6679 = vst [vmem:[#allocation0 + $0x398] sm:$0xf] %v6677_v5   ;;  %v6933_v5 = vld [vmem:[#allocation1 + $0x2a0] sm:$0xf]  }
 0x26a   :  { %6683 = vst [vmem:[#allocation0 + $0x3a0] sm:$0xf] %v6681_v6   ;;  %v6937_v6 = vld [vmem:[#allocation1 + $0x1d0] sm:$0xf]  }
 0x26b   :  { %6687 = vst [vmem:[#allocation0 + $0x3a8] sm:$0xf] %v6685_v7   ;;  %v6941_v7 = vld [vmem:[#allocation1 + $0x20] sm:$0xf]  }
 0x26c   :  { %6691 = vst [vmem:[#allocation0 + $0x3b0] sm:$0xf] %v6689_v8   ;;  %v6945_v8 = vld [vmem:[#allocation1 + $0x890] sm:$0xf]  }
 0x26d   :  { %6695 = vst [vmem:[#allocation0 + $0x3b8] sm:$0xf] %v6693_v9   ;;  %v6949_v9 = vld [vmem:[#allocation1 + $0xbc0] sm:$0xf]  }
 0x26e   :  { %6699 = vst [vmem:[#allocation0 + $0x394] sm:$0xf] %v6697_v10   ;;  %v6953_v10 = vld [vmem:[#allocation1 + $0x9d8] sm:$0xf]  }
 0x26f   :  { %6703 = vst [vmem:[#allocation0 + $0x39c] sm:$0xf] %v6701_v11   ;;  %v6957_v11 = vld [vmem:[#allocation1 + $0x2e0] sm:$0xf]  }
 0x270   :  { %6707 = vst [vmem:[#allocation0 + $0x3a4] sm:$0xf] %v6705_v12   ;;  %v6961_v12 = vld [vmem:[#allocation1 + $0x560] sm:$0xf]  }
 0x271   :  { %6711 = vst [vmem:[#allocation0 + $0x3ac] sm:$0xf] %v6709_v13   ;;  %v6965_v13 = vld [vmem:[#allocation1 + $0x8b0] sm:$0xf]  }
 0x272   :  { %6715 = vst [vmem:[#allocation0 + $0x3b4] sm:$0xf] %v6713_v14   ;;  %v6969_v14 = vld [vmem:[#allocation1 + $0x8a8] sm:$0xf]  }
 0x273   :  { %6719 = vst [vmem:[#allocation0 + $0x3bc] sm:$0xf] %v6717_v15   ;;  %v6973_v15 = vld [vmem:[#allocation1 + $0x300] sm:$0xf]  }
 0x274   :  { %6723 = vst [vmem:[#allocation0 + $0x3c0] sm:$0xf] %v6721_v16   ;;  %v6977_v16 = vld [vmem:[#allocation1 + $0xa90] sm:$0xf]  }
 0x275   :  { %6727 = vst [vmem:[#allocation0 + $0x3c8] sm:$0xf] %v6725_v17   ;;  %v6981_v17 = vld [vmem:[#allocation1 + $0xb30] sm:$0xf]  }
 0x276   :  { %6731 = vst [vmem:[#allocation0 + $0x3d0] sm:$0xf] %v6729_v18   ;;  %v6985_v18 = vld [vmem:[#allocation1 + $0xac8] sm:$0xf]  }
 0x277   :  { %6735 = vst [vmem:[#allocation0 + $0x3d8] sm:$0xf] %v6733_v19   ;;  %v6989_v19 = vld [vmem:[#allocation1 + $0x5c8] sm:$0xf]  }
 0x278   :  { %6739 = vst [vmem:[#allocation0 + $0x3e0] sm:$0xf] %v6737_v20   ;;  %v6993_v20 = vld [vmem:[#allocation1 + $0x880] sm:$0xf]  }
 0x279   :  { %6743 = vst [vmem:[#allocation0 + $0x3e8] sm:$0xf] %v6741_v21   ;;  %v6997_v21 = vld [vmem:[#allocation1 + $0x5a0] sm:$0xf]  }
 0x27a   :  { %6747 = vst [vmem:[#allocation0 + $0x3c4] sm:$0xf] %v6745_v22   ;;  %v7001_v22 = vld [vmem:[#allocation1 + $0x9c8] sm:$0xf]  }
 0x27b   :  { %6751 = vst [vmem:[#allocation0 + $0x3cc] sm:$0xf] %v6749_v23   ;;  %v7005_v23 = vld [vmem:[#allocation1 + $0x820] sm:$0xf]  }
 0x27c   :  { %6755 = vst [vmem:[#allocation0 + $0x3d4] sm:$0xf] %v6753_v24   ;;  %v7009_v24 = vld [vmem:[#allocation1 + $0xa8] sm:$0xf]  }
 0x27d   :  { %6759 = vst [vmem:[#allocation0 + $0x3dc] sm:$0xf] %v6757_v25   ;;  %v7013_v25 = vld [vmem:[#allocation1 + $0x3c8] sm:$0xf]  }
 0x27e   :  { %6763 = vst [vmem:[#allocation0 + $0x3e4] sm:$0xf] %v6761_v26   ;;  %v7017_v26 = vld [vmem:[#allocation1 + $0x3b8] sm:$0xf]  }
 0x27f   :  { %6767 = vst [vmem:[#allocation0 + $0x3ec] sm:$0xf] %v6765_v27   ;;  %v7021_v27 = vld [vmem:[#allocation1 + $0x2f0] sm:$0xf]  }
 0x280   :  { %6771 = vst [vmem:[#allocation0 + $0x3f0] sm:$0xf] %v6769_v28   ;;  %v7025_v28 = vld [vmem:[#allocation1 + $0x508] sm:$0xf]  }
 0x281   :  { %6775 = vst [vmem:[#allocation0 + $0x3f8] sm:$0xf] %v6773_v29   ;;  %v7029_v29 = vld [vmem:[#allocation1 + $0x648] sm:$0xf]  }
 0x282   :  { %6779 = vst [vmem:[#allocation0 + $0x400] sm:$0xf] %v6777_v30   ;;  %v7033_v30 = vld [vmem:[#allocation1 + $0xb70] sm:$0xf]  }
 0x283   :  { %6783 = vst [vmem:[#allocation0 + $0x408] sm:$0xf] %v6781_v31   ;;  %v7037_v31 = vld [vmem:[#allocation1 + $0xb98] sm:$0xf]  }
 0x284   :  { %6787 = vst [vmem:[#allocation0 + $0x410] sm:$0xf] %v6785_v32   ;;  %v7041_v32 = vld [vmem:[#allocation1 + $0x250] sm:$0xf]  }
 0x285   :  { %6791 = vst [vmem:[#allocation0 + $0x418] sm:$0xf] %v6789_v33   ;;  %v7045_v33 = vld [vmem:[#allocation1 + $0x958] sm:$0xf]  }
 0x286   :  { %6795 = vst [vmem:[#allocation0 + $0x3f4] sm:$0xf] %v6793_v34   ;;  %v7049_v34 = vld [vmem:[#allocation1 + $0xc8] sm:$0xf]  }
 0x287   :  { %6799 = vst [vmem:[#allocation0 + $0x3fc] sm:$0xf] %v6797_v35   ;;  %v7053_v35 = vld [vmem:[#allocation1 + $0x5b8] sm:$0xf]  }
 0x288   :  { %6803 = vst [vmem:[#allocation0 + $0x404] sm:$0xf] %v6801_v36   ;;  %v7057_v36 = vld [vmem:[#allocation1 + $0x630] sm:$0xf]  }
 0x289   :  { %6807 = vst [vmem:[#allocation0 + $0x40c] sm:$0xf] %v6805_v37   ;;  %v7061_v37 = vld [vmem:[#allocation1 + $0x588] sm:$0xf]  }
 0x28a   :  { %6811 = vst [vmem:[#allocation0 + $0x414] sm:$0xf] %v6809_v38   ;;  %v7065_v38 = vld [vmem:[#allocation1 + $0x6f8] sm:$0xf]  }
 0x28b   :  { %6815 = vst [vmem:[#allocation0 + $0x41c] sm:$0xf] %v6813_v39   ;;  %v7069_v39 = vld [vmem:[#allocation1 + $0xa0] sm:$0xf]  }
 0x28c   :  { %6819 = vst [vmem:[#allocation0 + $0x420] sm:$0xf] %v6817_v40   ;;  %v7073_v40 = vld [vmem:[#allocation1 + $0x7e8] sm:$0xf]  }
 0x28d   :  { %6823 = vst [vmem:[#allocation0 + $0x428] sm:$0xf] %v6821_v41   ;;  %v7077_v41 = vld [vmem:[#allocation1 + $0x7e0] sm:$0xf]  }
 0x28e   :  { %6827 = vst [vmem:[#allocation0 + $0x430] sm:$0xf] %v6825_v42   ;;  %v7081_v42 = vld [vmem:[#allocation1 + $0x918] sm:$0xf]  }
 0x28f   :  { %6831 = vst [vmem:[#allocation0 + $0x438] sm:$0xf] %v6829_v43   ;;  %v7085_v43 = vld [vmem:[#allocation1 + $0x80] sm:$0xf]  }
 0x290   :  { %6835 = vst [vmem:[#allocation0 + $0x440] sm:$0xf] %v6833_v44   ;;  %v7089_v44 = vld [vmem:[#allocation1 + $0x578] sm:$0xf]  }
 0x291   :  { %6839 = vst [vmem:[#allocation0 + $0x448] sm:$0xf] %v6837_v45   ;;  %v7093_v45 = vld [vmem:[#allocation1 + $0x460] sm:$0xf]  }
 0x292   :  { %6843 = vst [vmem:[#allocation0 + $0x424] sm:$0xf] %v6841_v46   ;;  %v7097_v46 = vld [vmem:[#allocation1 + $0x288] sm:$0xf]  }
 0x293   :  { %6847 = vst [vmem:[#allocation0 + $0x42c] sm:$0xf] %v6845_v47   ;;  %v7101_v47 = vld [vmem:[#allocation1 + $0x388] sm:$0xf]  }
 0x294   :  { %6851 = vst [vmem:[#allocation0 + $0x434] sm:$0xf] %v6849_v48   ;;  %v7105_v48 = vld [vmem:[#allocation1 + $0x8] sm:$0xf]  }
 0x295   :  { %6855 = vst [vmem:[#allocation0 + $0x43c] sm:$0xf] %v6853_v49   ;;  %v7109_v49 = vld [vmem:[#allocation1 + $0xe0] sm:$0xf]  }
 0x296   :  { %6859 = vst [vmem:[#allocation0 + $0x444] sm:$0xf] %v6857_v50   ;;  %v7113_v50 = vld [vmem:[#allocation1 + $0x1d8] sm:$0xf]  }
 0x297   :  { %6863 = vst [vmem:[#allocation0 + $0x44c] sm:$0xf] %v6861_v51   ;;  %v7117_v51 = vld [vmem:[#allocation1 + $0x5e8] sm:$0xf]  }
 0x298   :  { %6867 = vst [vmem:[#allocation0 + $0x450] sm:$0xf] %v6865_v52   ;;  %v7121_v52 = vld [vmem:[#allocation1 + $0x4b0] sm:$0xf]  }
 0x299   :  { %6871 = vst [vmem:[#allocation0 + $0x458] sm:$0xf] %v6869_v53   ;;  %v7125_v53 = vld [vmem:[#allocation1 + $0x628] sm:$0xf]  }
 0x29a   :  { %6875 = vst [vmem:[#allocation0 + $0x460] sm:$0xf] %v6873_v54   ;;  %v7129_v54 = vld [vmem:[#allocation1 + $0x638] sm:$0xf]  }
 0x29b   :  { %6879 = vst [vmem:[#allocation0 + $0x468] sm:$0xf] %v6877_v55   ;;  %v7133_v55 = vld [vmem:[#allocation1 + $0xb60] sm:$0xf]  }
 0x29c   :  { %6883 = vst [vmem:[#allocation0 + $0x470] sm:$0xf] %v6881_v56   ;;  %v7137_v56 = vld [vmem:[#allocation1 + $0x558] sm:$0xf]  }
 0x29d   :  { %6887 = vst [vmem:[#allocation0 + $0x478] sm:$0xf] %v6885_v57   ;;  %v7141_v57 = vld [vmem:[#allocation1 + $0x938] sm:$0xf]  }
 0x29e   :  { %6891 = vst [vmem:[#allocation0 + $0x454] sm:$0xf] %v6889_v58   ;;  %v7145_v58 = vld [vmem:[#allocation1 + $0x3a8] sm:$0xf]  }
 0x29f   :  { %6895 = vst [vmem:[#allocation0 + $0x45c] sm:$0xf] %v6893_v59   ;;  %v7149_v59 = vld [vmem:[#allocation1 + $0x370] sm:$0xf]  }
 0x2a0   :  { %6899 = vst [vmem:[#allocation0 + $0x464] sm:$0xf] %v6897_v60   ;;  %v7153_v60 = vld [vmem:[#allocation1 + $0x838] sm:$0xf]  }
 0x2a1   :  { %6903 = vst [vmem:[#allocation0 + $0x46c] sm:$0xf] %v6901_v61   ;;  %v7157_v61 = vld [vmem:[#allocation1 + $0x310] sm:$0xf]  }
 0x2a2   :  { %6907 = vst [vmem:[#allocation0 + $0x474] sm:$0xf] %v6905_v62   ;;  %v7161_v62 = vld [vmem:[#allocation1 + $0x830] sm:$0xf]  }
 0x2a3   :  { %6911 = vst [vmem:[#allocation0 + $0x47c] sm:$0xf] %v6909_v63   ;;  %v7165_v63 = vld [vmem:[#allocation1 + $0xbe8] sm:$0xf]  }
 0x2a4   :  { %6915 = vst [vmem:[#allocation0 + $0x480] sm:$0xf] %v6913_v0   ;;  %v7169_v0 = vld [vmem:[#allocation1 + $0x430] sm:$0xf]  }
 0x2a5   :  { %6919 = vst [vmem:[#allocation0 + $0x488] sm:$0xf] %v6917_v1   ;;  %v7173_v1 = vld [vmem:[#allocation1 + $0x3d0] sm:$0xf]  }
 0x2a6   :  { %6923 = vst [vmem:[#allocation0 + $0x490] sm:$0xf] %v6921_v2   ;;  %v7177_v2 = vld [vmem:[#allocation1 + $0xbf0] sm:$0xf]  }
 0x2a7   :  { %6927 = vst [vmem:[#allocation0 + $0x498] sm:$0xf] %v6925_v3   ;;  %v7181_v3 = vld [vmem:[#allocation1 + $0x60] sm:$0xf]  }
 0x2a8   :  { %6931 = vst [vmem:[#allocation0 + $0x4a0] sm:$0xf] %v6929_v4   ;;  %v7185_v4 = vld [vmem:[#allocation1 + $0x320] sm:$0xf]  }
 0x2a9   :  { %6935 = vst [vmem:[#allocation0 + $0x4a8] sm:$0xf] %v6933_v5   ;;  %v7189_v5 = vld [vmem:[#allocation1 + $0x1a0] sm:$0xf]  }
 0x2aa   :  { %6939 = vst [vmem:[#allocation0 + $0x484] sm:$0xf] %v6937_v6   ;;  %v7193_v6 = vld [vmem:[#allocation1 + $0x260] sm:$0xf]  }
 0x2ab   :  { %6943 = vst [vmem:[#allocation0 + $0x48c] sm:$0xf] %v6941_v7   ;;  %v7197_v7 = vld [vmem:[#allocation1 + $0x38] sm:$0xf]  }
 0x2ac   :  { %6947 = vst [vmem:[#allocation0 + $0x494] sm:$0xf] %v6945_v8   ;;  %v7201_v8 = vld [vmem:[#allocation1 + $0xbb0] sm:$0xf]  }
 0x2ad   :  { %6951 = vst [vmem:[#allocation0 + $0x49c] sm:$0xf] %v6949_v9   ;;  %v7205_v9 = vld [vmem:[#allocation1 + $0xb8] sm:$0xf]  }
 0x2ae   :  { %6955 = vst [vmem:[#allocation0 + $0x4a4] sm:$0xf] %v6953_v10   ;;  %v7209_v10 = vld [vmem:[#allocation1 + $0x828] sm:$0xf]  }
 0x2af   :  { %6959 = vst [vmem:[#allocation0 + $0x4ac] sm:$0xf] %v6957_v11   ;;  %v7213_v11 = vld [vmem:[#allocation1 + $0x650] sm:$0xf]  }
 0x2b0   :  { %6963 = vst [vmem:[#allocation0 + $0x4b0] sm:$0xf] %v6961_v12   ;;  %v7217_v12 = vld [vmem:[#allocation1 + $0x660] sm:$0xf]  }
 0x2b1   :  { %6967 = vst [vmem:[#allocation0 + $0x4b8] sm:$0xf] %v6965_v13   ;;  %v7221_v13 = vld [vmem:[#allocation1 + $0x128] sm:$0xf]  }
 0x2b2   :  { %6971 = vst [vmem:[#allocation0 + $0x4c0] sm:$0xf] %v6969_v14   ;;  %v7225_v14 = vld [vmem:[#allocation1 + $0x3e8] sm:$0xf]  }
 0x2b3   :  { %6975 = vst [vmem:[#allocation0 + $0x4c8] sm:$0xf] %v6973_v15   ;;  %v7229_v15 = vld [vmem:[#allocation1 + $0x4d0] sm:$0xf]  }
 0x2b4   :  { %6979 = vst [vmem:[#allocation0 + $0x4d0] sm:$0xf] %v6977_v16   ;;  %v7233_v16 = vld [vmem:[#allocation1 + $0x8d8] sm:$0xf]  }
 0x2b5   :  { %6983 = vst [vmem:[#allocation0 + $0x4d8] sm:$0xf] %v6981_v17   ;;  %v7237_v17 = vld [vmem:[#allocation1 + $0x488] sm:$0xf]  }
 0x2b6   :  { %6987 = vst [vmem:[#allocation0 + $0x4b4] sm:$0xf] %v6985_v18   ;;  %v7241_v18 = vld [vmem:[#allocation1 + $0x530] sm:$0xf]  }
 0x2b7   :  { %6991 = vst [vmem:[#allocation0 + $0x4bc] sm:$0xf] %v6989_v19   ;;  %v7245_v19 = vld [vmem:[#allocation1 + $0x4f0] sm:$0xf]  }
 0x2b8   :  { %6995 = vst [vmem:[#allocation0 + $0x4c4] sm:$0xf] %v6993_v20   ;;  %v7249_v20 = vld [vmem:[#allocation1 + $0x708] sm:$0xf]  }
 0x2b9   :  { %6999 = vst [vmem:[#allocation0 + $0x4cc] sm:$0xf] %v6997_v21   ;;  %v7253_v21 = vld [vmem:[#allocation1 + $0xe8] sm:$0xf]  }
 0x2ba   :  { %7003 = vst [vmem:[#allocation0 + $0x4d4] sm:$0xf] %v7001_v22   ;;  %v7257_v22 = vld [vmem:[#allocation1 + $0x2e8] sm:$0xf]  }
 0x2bb   :  { %7007 = vst [vmem:[#allocation0 + $0x4dc] sm:$0xf] %v7005_v23   ;;  %v7261_v23 = vld [vmem:[#allocation1 + $0x78] sm:$0xf]  }
 0x2bc   :  { %7011 = vst [vmem:[#allocation0 + $0x4e0] sm:$0xf] %v7009_v24   ;;  %v7265_v24 = vld [vmem:[#allocation1 + $0x7b0] sm:$0xf]  }
 0x2bd   :  { %7015 = vst [vmem:[#allocation0 + $0x4e8] sm:$0xf] %v7013_v25   ;;  %v7269_v25 = vld [vmem:[#allocation1 + $0x8c8] sm:$0xf]  }
 0x2be   :  { %7019 = vst [vmem:[#allocation0 + $0x4f0] sm:$0xf] %v7017_v26   ;;  %v7273_v26 = vld [vmem:[#allocation1 + $0x490] sm:$0xf]  }
 0x2bf   :  { %7023 = vst [vmem:[#allocation0 + $0x4f8] sm:$0xf] %v7021_v27   ;;  %v7277_v27 = vld [vmem:[#allocation1 + $0x3f0] sm:$0xf]  }
 0x2c0   :  { %7027 = vst [vmem:[#allocation0 + $0x500] sm:$0xf] %v7025_v28   ;;  %v7281_v28 = vld [vmem:[#allocation1 + $0x3e0] sm:$0xf]  }
 0x2c1   :  { %7031 = vst [vmem:[#allocation0 + $0x508] sm:$0xf] %v7029_v29   ;;  %v7298_v29 = vld [vmem:[#allocation0] sm:$0xff] }
 0x2c2   :  { %7035 = vst [vmem:[#allocation0 + $0x4e4] sm:$0xf] %v7033_v30   ;;  %v7304_v30 = vld [vmem:[#allocation0 + $0x8] sm:$0xff] }
 0x2c3   :  { %7039 = vst [vmem:[#allocation0 + $0x4ec] sm:$0xf] %v7037_v31   ;;  %v7285_v31 = vld [vmem:[#allocation1 + $0x720] sm:$0xf]  }
 0x2c4   :  { %7043 = vst [vmem:[#allocation0 + $0x4f4] sm:$0xf] %v7041_v32   ;;  %v7311_v32 = vld [vmem:[#allocation0 + $0x10] sm:$0xff] }
 0x2c5   :  { %7047 = vst [vmem:[#allocation0 + $0x4fc] sm:$0xf] %v7045_v33   ;;  %v7318_v33 = vld [vmem:[#allocation0 + $0x18] sm:$0xff] }
 0x2c6   :  { %7051 = vst [vmem:[#allocation0 + $0x504] sm:$0xf] %v7049_v34   ;;  %v7289_v34 = vld [vmem:[#allocation1 + $0x48] sm:$0xf]  }
 0x2c7   :  { %7055 = vst [vmem:[#allocation0 + $0x50c] sm:$0xf] %v7053_v35   ;;  %v7325_v35 = vld [vmem:[#allocation0 + $0x20] sm:$0xff] }
 0x2c8   :  { %7059 = vst [vmem:[#allocation0 + $0x510] sm:$0xf] %v7057_v36   ;;  %v7332_v36 = vld [vmem:[#allocation0 + $0x28] sm:$0xff] }
 0x2c9   :  { %7063 = vst [vmem:[#allocation0 + $0x518] sm:$0xf] %v7061_v37   ;;  %v7293_v37 = vld [vmem:[#allocation1 + $0x148] sm:$0xf]  }
 0x2ca   :  { %7067 = vst [vmem:[#allocation0 + $0x520] sm:$0xf] %v7065_v38   ;;  %v9217_v38 = vpack.c.bf16 %v7304_v30, %v7298_v29  ;;  %v7591_v29 = vld [vmem:[#allocation0 + $0x150] sm:$0xff]  ;;  %v7598_v30 = vld [vmem:[#allocation0 + $0x158] sm:$0xff] }
 0x2cb   :  { %7071 = vst [vmem:[#allocation0 + $0x528] sm:$0xf] %v7069_v39   ;;  %v7339_v39 = vld [vmem:[#allocation0 + $0x30] sm:$0xff] }
 0x2cc   :  { %7075 = vst [vmem:[#allocation0 + $0x530] sm:$0xf] %v7073_v40   ;;  %v7346_v40 = vld [vmem:[#allocation0 + $0x38] sm:$0xff] }
 0x2cd   :  { %7079 = vst [vmem:[#allocation0 + $0x538] sm:$0xf] %v7077_v41   ;;  %v9222_v41 = vpack.c.bf16 %v7318_v33, %v7311_v32  ;;  %v7605_v32 = vld [vmem:[#allocation0 + $0x160] sm:$0xff]  ;;  %v7612_v33 = vld [vmem:[#allocation0 + $0x168] sm:$0xff] }
 0x2ce   :  { %7083 = vst [vmem:[#allocation0 + $0x514] sm:$0xf] %v7081_v42   ;;  %v7353_v42 = vld [vmem:[#allocation0 + $0x40] sm:$0xff] }
 0x2cf   :  { %7087 = vst [vmem:[#allocation0 + $0x51c] sm:$0xf] %v7085_v43   ;;  %v7360_v43 = vld [vmem:[#allocation0 + $0x48] sm:$0xff] }
 0x2d0   :  { %7091 = vst [vmem:[#allocation0 + $0x524] sm:$0xf] %v7089_v44   ;;  %v9227_v44 = vpack.c.bf16 %v7332_v36, %v7325_v35  ;;  %v7619_v35 = vld [vmem:[#allocation0 + $0x170] sm:$0xff]  ;;  %v7626_v36 = vld [vmem:[#allocation0 + $0x178] sm:$0xff] }
 0x2d1   :  { %7095 = vst [vmem:[#allocation0 + $0x52c] sm:$0xf] %v7093_v45   ;;  %v7367_v45 = vld [vmem:[#allocation0 + $0x50] sm:$0xff] }
 0x2d2   :  { %7099 = vst [vmem:[#allocation0 + $0x534] sm:$0xf] %v7097_v46   ;;  %v7374_v46 = vld [vmem:[#allocation0 + $0x58] sm:$0xff] }
 0x2d3   :  { %7103 = vst [vmem:[#allocation0 + $0x53c] sm:$0xf] %v7101_v47   ;;  %v9232_v47 = vpack.c.bf16 %v7346_v40, %v7339_v39  ;;  %v7640_v39 = vld [vmem:[#allocation0 + $0x188] sm:$0xff]  ;;  %v9327_v40 = vpack.c.bf16 %v7612_v33, %v7605_v32  ;;  %v7906_v32 = vld [vmem:[#allocation0 + $0x2b8] sm:$0xff] }
 0x2d4   :  { %7107 = vst [vmem:[#allocation0 + $0x540] sm:$0xf] %v7105_v48   ;;  %v7381_v48 = vld [vmem:[#allocation0 + $0x60] sm:$0xff] }
 0x2d5   :  { %7111 = vst [vmem:[#allocation0 + $0x548] sm:$0xf] %v7109_v49   ;;  %v7388_v49 = vld [vmem:[#allocation0 + $0x68] sm:$0xff] }
 0x2d6   :  { %7115 = vst [vmem:[#allocation0 + $0x550] sm:$0xf] %v7113_v50   ;;  %v9237_v50 = vpack.c.bf16 %v7360_v43, %v7353_v42  ;;  %v7654_v42 = vld [vmem:[#allocation0 + $0x198] sm:$0xff]  ;;  %v9332_v43 = vpack.c.bf16 %v7626_v36, %v7619_v35  ;;  %v7920_v35 = vld [vmem:[#allocation0 + $0x2c8] sm:$0xff] }
 0x2d7   :  { %7119 = vst [vmem:[#allocation0 + $0x558] sm:$0xf] %v7117_v51   ;;  %v7395_v51 = vld [vmem:[#allocation0 + $0x70] sm:$0xff] }
 0x2d8   :  { %7123 = vst [vmem:[#allocation0 + $0x560] sm:$0xf] %v7121_v52   ;;  %v7402_v52 = vld [vmem:[#allocation0 + $0x78] sm:$0xff] }
 0x2d9   :  { %7127 = vst [vmem:[#allocation0 + $0x568] sm:$0xf] %v7125_v53   ;;  %v9242_v53 = vpack.c.bf16 %v7374_v46, %v7367_v45  ;;  %v7668_v45 = vld [vmem:[#allocation0 + $0x1a8] sm:$0xff] }
 0x2da   :  { %7131 = vst [vmem:[#allocation0 + $0x544] sm:$0xf] %v7129_v54   ;;  %v7409_v54 = vld [vmem:[#allocation0 + $0x80] sm:$0xff] }
 0x2db   :  { %7135 = vst [vmem:[#allocation0 + $0x54c] sm:$0xf] %v7133_v55   ;;  %v7416_v55 = vld [vmem:[#allocation0 + $0x88] sm:$0xff] }
 0x2dc   :  { %7139 = vst [vmem:[#allocation0 + $0x554] sm:$0xf] %v7137_v56   ;;  %v9247_v56 = vpack.c.bf16 %v7388_v49, %v7381_v48  ;;  %v7682_v48 = vld [vmem:[#allocation0 + $0x1b8] sm:$0xff] }
 0x2dd   :  { %7143 = vst [vmem:[#allocation0 + $0x55c] sm:$0xf] %v7141_v57   ;;  %v7423_v57 = vld [vmem:[#allocation0 + $0x90] sm:$0xff] }
 0x2de   :  { %7147 = vst [vmem:[#allocation0 + $0x564] sm:$0xf] %v7145_v58   ;;  %v7430_v58 = vld [vmem:[#allocation0 + $0x98] sm:$0xff] }
 0x2df   :  { %7151 = vst [vmem:[#allocation0 + $0x56c] sm:$0xf] %v7149_v59   ;;  %v9252_v59 = vpack.c.bf16 %v7402_v52, %v7395_v51  ;;  %v7696_v51 = vld [vmem:[#allocation0 + $0x1c8] sm:$0xff] }
 0x2e0   :  { %7155 = vst [vmem:[#allocation0 + $0x570] sm:$0xf] %v7153_v60   ;;  %v7437_v60 = vld [vmem:[#allocation0 + $0xa0] sm:$0xff] }
 0x2e1   :  { %7159 = vst [vmem:[#allocation0 + $0x578] sm:$0xf] %v7157_v61   ;;  %v7444_v61 = vld [vmem:[#allocation0 + $0xa8] sm:$0xff] }
 0x2e2   :  { %7163 = vst [vmem:[#allocation0 + $0x580] sm:$0xf] %v7161_v62   ;;  %v9257_v62 = vpack.c.bf16 %v7416_v55, %v7409_v54  ;;  %v7710_v54 = vld [vmem:[#allocation0 + $0x1d8] sm:$0xff] }
 0x2e3   :  { %7167 = vst [vmem:[#allocation0 + $0x588] sm:$0xf] %v7165_v63   ;;  %v7451_v63 = vld [vmem:[#allocation0 + $0xb0] sm:$0xff] }
 0x2e4   :  { %7171 = vst [vmem:[#allocation0 + $0x590] sm:$0xf] %v7169_v0   ;;  %v7458_v0 = vld [vmem:[#allocation0 + $0xb8] sm:$0xff] }
 0x2e5   :  { %7175 = vst [vmem:[#allocation0 + $0x598] sm:$0xf] %v7173_v1   ;;  %v9262_v1 = vpack.c.bf16 %v7430_v58, %v7423_v57  ;;  %v7724_v57 = vld [vmem:[#allocation0 + $0x1e8] sm:$0xff] }
 0x2e6   :  { %7179 = vst [vmem:[#allocation0 + $0x574] sm:$0xf] %v7177_v2   ;;  %v7465_v2 = vld [vmem:[#allocation0 + $0xc0] sm:$0xff] }
 0x2e7   :  { %7183 = vst [vmem:[#allocation0 + $0x57c] sm:$0xf] %v7181_v3   ;;  %v7472_v3 = vld [vmem:[#allocation0 + $0xc8] sm:$0xff] }
 0x2e8   :  { %7187 = vst [vmem:[#allocation0 + $0x584] sm:$0xf] %v7185_v4   ;;  %v9267_v4 = vpack.c.bf16 %v7444_v61, %v7437_v60  ;;  %v7738_v60 = vld [vmem:[#allocation0 + $0x1f8] sm:$0xff] }
 0x2e9   :  { %7191 = vst [vmem:[#allocation0 + $0x58c] sm:$0xf] %v7189_v5   ;;  %v7479_v5 = vld [vmem:[#allocation0 + $0xd0] sm:$0xff] }
 0x2ea   :  { %7195 = vst [vmem:[#allocation0 + $0x594] sm:$0xf] %v7193_v6   ;;  %v7486_v6 = vld [vmem:[#allocation0 + $0xd8] sm:$0xff] }
 0x2eb   :  { %7199 = vst [vmem:[#allocation0 + $0x59c] sm:$0xf] %v7197_v7   ;;  %v9272_v7 = vpack.c.bf16 %v7458_v0, %v7451_v63  ;;  %v7752_v63 = vld [vmem:[#allocation0 + $0x208] sm:$0xff] }
 0x2ec   :  { %7203 = vst [vmem:[#allocation0 + $0x5a0] sm:$0xf] %v7201_v8   ;;  %v7493_v8 = vld [vmem:[#allocation0 + $0xe0] sm:$0xff] }
 0x2ed   :  { %7207 = vst [vmem:[#allocation0 + $0x5a8] sm:$0xf] %v7205_v9   ;;  %v7500_v9 = vld [vmem:[#allocation0 + $0xe8] sm:$0xff] }
 0x2ee   :  { %7211 = vst [vmem:[#allocation0 + $0x5b0] sm:$0xf] %v7209_v10   ;;  %v9277_v10 = vpack.c.bf16 %v7472_v3, %v7465_v2  ;;  %v7766_v2 = vld [vmem:[#allocation0 + $0x218] sm:$0xff] }
 0x2ef   :  { %7215 = vst [vmem:[#allocation0 + $0x5b8] sm:$0xf] %v7213_v11   ;;  %v7507_v11 = vld [vmem:[#allocation0 + $0xf0] sm:$0xff] }
 0x2f0   :  { %7219 = vst [vmem:[#allocation0 + $0x5c0] sm:$0xf] %v7217_v12   ;;  %v7514_v12 = vld [vmem:[#allocation0 + $0xf8] sm:$0xff] }
 0x2f1   :  { %7223 = vst [vmem:[#allocation0 + $0x5c8] sm:$0xf] %v7221_v13   ;;  %v9282_v13 = vpack.c.bf16 %v7486_v6, %v7479_v5  ;;  %v7780_v5 = vld [vmem:[#allocation0 + $0x228] sm:$0xff] }
 0x2f2   :  { %7227 = vst [vmem:[#allocation0 + $0x5a4] sm:$0xf] %v7225_v14   ;;  %v7521_v14 = vld [vmem:[#allocation0 + $0x100] sm:$0xff] }
 0x2f3   :  { %7231 = vst [vmem:[#allocation0 + $0x5ac] sm:$0xf] %v7229_v15   ;;  %v7528_v15 = vld [vmem:[#allocation0 + $0x108] sm:$0xff] }
 0x2f4   :  { %7235 = vst [vmem:[#allocation0 + $0x5b4] sm:$0xf] %v7233_v16   ;;  %v9287_v16 = vpack.c.bf16 %v7500_v9, %v7493_v8  ;;  %v7794_v8 = vld [vmem:[#allocation0 + $0x238] sm:$0xff] }
 0x2f5   :  { %7239 = vst [vmem:[#allocation0 + $0x5bc] sm:$0xf] %v7237_v17   ;;  %v7535_v17 = vld [vmem:[#allocation0 + $0x110] sm:$0xff] }
 0x2f6   :  { %7243 = vst [vmem:[#allocation0 + $0x5c4] sm:$0xf] %v7241_v18   ;;  %v7542_v18 = vld [vmem:[#allocation0 + $0x118] sm:$0xff] }
 0x2f7   :  { %7247 = vst [vmem:[#allocation0 + $0x5cc] sm:$0xf] %v7245_v19   ;;  %v9292_v19 = vpack.c.bf16 %v7514_v12, %v7507_v11  ;;  %v7808_v11 = vld [vmem:[#allocation0 + $0x248] sm:$0xff] }
 0x2f8   :  { %7251 = vst [vmem:[#allocation0 + $0x5d0] sm:$0xf] %v7249_v20   ;;  %v7549_v20 = vld [vmem:[#allocation0 + $0x120] sm:$0xff] }
 0x2f9   :  { %7255 = vst [vmem:[#allocation0 + $0x5d8] sm:$0xf] %v7253_v21   ;;  %v7556_v21 = vld [vmem:[#allocation0 + $0x128] sm:$0xff] }
 0x2fa   :  { %7259 = vst [vmem:[#allocation0 + $0x5e0] sm:$0xf] %v7257_v22   ;;  %v9297_v22 = vpack.c.bf16 %v7528_v15, %v7521_v14  ;;  %v7822_v14 = vld [vmem:[#allocation0 + $0x258] sm:$0xff] }
 0x2fb   :  { %7263 = vst [vmem:[#allocation0 + $0x5e8] sm:$0xf] %v7261_v23   ;;  %v7563_v23 = vld [vmem:[#allocation0 + $0x130] sm:$0xff] }
 0x2fc   :  { %7267 = vst [vmem:[#allocation0 + $0x5f0] sm:$0xf] %v7265_v24   ;;  %v7570_v24 = vld [vmem:[#allocation0 + $0x138] sm:$0xff] }
 0x2fd   :  { %7271 = vst [vmem:[#allocation0 + $0x5f8] sm:$0xf] %v7269_v25   ;;  %v9302_v25 = vpack.c.bf16 %v7542_v18, %v7535_v17  ;;  %v7836_v17 = vld [vmem:[#allocation0 + $0x268] sm:$0xff] }
 0x2fe   :  { %7275 = vst [vmem:[#allocation0 + $0x5d4] sm:$0xf] %v7273_v26   ;;  %v7577_v26 = vld [vmem:[#allocation0 + $0x140] sm:$0xff] }
 0x2ff   :  { %7279 = vst [vmem:[#allocation0 + $0x5dc] sm:$0xf] %v7277_v27   ;;  %v7584_v27 = vld [vmem:[#allocation0 + $0x148] sm:$0xff] }
 0x300   :  { %7283 = vst [vmem:[#allocation0 + $0x5e4] sm:$0xf] %v7281_v28   ;;  %v9307_v28 = vpack.c.bf16 %v7556_v21, %v7549_v20  ;;  %v7850_v20 = vld [vmem:[#allocation0 + $0x278] sm:$0xff] }
 0x301   :  { %7287 = vst [vmem:[#allocation0 + $0x5ec] sm:$0xf] %v7285_v31   ;;  %v9312_v31 = vpack.c.bf16 %v7570_v24, %v7563_v23  ;;  %v7864_v23 = vld [vmem:[#allocation0 + $0x288] sm:$0xff] }
 0x302   :  { %7291 = vst [vmem:[#allocation0 + $0x5f4] sm:$0xf] %v7289_v34   ;;  %v9317_v34 = vpack.c.bf16 %v7584_v27, %v7577_v26  ;;  %v7878_v26 = vld [vmem:[#allocation0 + $0x298] sm:$0xff] }
 0x303   :  { %7295 = vst [vmem:[#allocation0 + $0x5fc] sm:$0xf] %v7293_v37   ;;  %v9322_v37 = vpack.c.bf16 %v7598_v30, %v7591_v29  ;;  %v7892_v29 = vld [vmem:[#allocation0 + $0x2a8] sm:$0xff] }
 0x304   :  { %9218 = vst [vmem:[%s10376_s1] sm:$0xff] %v9217_v38   ;;  %v7633_v38 = vld [vmem:[#allocation0 + $0x180] sm:$0xff] }
 0x305   :  { %9694 = vst [vmem:[%s10376_s1 + $0x8] sm:$0xff] %v9222_v41   ;;  %v7647_v41 = vld [vmem:[#allocation0 + $0x190] sm:$0xff]  ;;  %v9337_v46 = vpack.c.bf16 %v7640_v39, %v7633_v38  ;;  %v7934_v38 = vld [vmem:[#allocation0 + $0x2d8] sm:$0xff] }
 0x306   :  { %9695 = vst [vmem:[%s10376_s1 + $0x10] sm:$0xff] %v9227_v44   ;;  %v7661_v44 = vld [vmem:[#allocation0 + $0x1a0] sm:$0xff]  ;;  %v9342_v49 = vpack.c.bf16 %v7654_v42, %v7647_v41  ;;  %v7948_v41 = vld [vmem:[#allocation0 + $0x2e8] sm:$0xff] }
 0x307   :  { %9696 = vst [vmem:[%s10376_s1 + $0x18] sm:$0xff] %v9232_v47   ;;  %v7675_v47 = vld [vmem:[#allocation0 + $0x1b0] sm:$0xff]  ;;  %v9347_v52 = vpack.c.bf16 %v7668_v45, %v7661_v44  ;;  %v7962_v44 = vld [vmem:[#allocation0 + $0x2f8] sm:$0xff] }
 0x308   :  { %9697 = vst [vmem:[%s10376_s1 + $0x20] sm:$0xff] %v9237_v50   ;;  %v7689_v50 = vld [vmem:[#allocation0 + $0x1c0] sm:$0xff]  ;;  %v9352_v55 = vpack.c.bf16 %v7682_v48, %v7675_v47  ;;  %v7976_v47 = vld [vmem:[#allocation0 + $0x308] sm:$0xff] }
 0x309   :  { %9698 = vst [vmem:[%s10376_s1 + $0x28] sm:$0xff] %v9242_v53   ;;  %v7703_v53 = vld [vmem:[#allocation0 + $0x1d0] sm:$0xff]  ;;  %v9357_v58 = vpack.c.bf16 %v7696_v51, %v7689_v50  ;;  %v7990_v50 = vld [vmem:[#allocation0 + $0x318] sm:$0xff] }
 0x30a   :  { %9699 = vst [vmem:[%s10376_s1 + $0x30] sm:$0xff] %v9247_v56   ;;  %v7717_v56 = vld [vmem:[#allocation0 + $0x1e0] sm:$0xff]  ;;  %v9362_v61 = vpack.c.bf16 %v7710_v54, %v7703_v53  ;;  %v8004_v53 = vld [vmem:[#allocation0 + $0x328] sm:$0xff] }
 0x30b   :  { %9700 = vst [vmem:[%s10376_s1 + $0x38] sm:$0xff] %v9252_v59   ;;  %v7731_v59 = vld [vmem:[#allocation0 + $0x1f0] sm:$0xff]  ;;  %v9367_v0 = vpack.c.bf16 %v7724_v57, %v7717_v56  ;;  %v8018_v56 = vld [vmem:[#allocation0 + $0x338] sm:$0xff] }
 0x30c   :  { %9701 = vst [vmem:[%s10376_s1 + $0x40] sm:$0xff] %v9257_v62   ;;  %v7745_v62 = vld [vmem:[#allocation0 + $0x200] sm:$0xff]  ;;  %v9372_v3 = vpack.c.bf16 %v7738_v60, %v7731_v59  ;;  %v8032_v59 = vld [vmem:[#allocation0 + $0x348] sm:$0xff] }
 0x30d   :  { %9702 = vst [vmem:[%s10376_s1 + $0x48] sm:$0xff] %v9262_v1   ;;  %v7759_v1 = vld [vmem:[#allocation0 + $0x210] sm:$0xff]  ;;  %v9377_v6 = vpack.c.bf16 %v7752_v63, %v7745_v62  ;;  %v8046_v62 = vld [vmem:[#allocation0 + $0x358] sm:$0xff] }
 0x30e   :  { %9703 = vst [vmem:[%s10376_s1 + $0x50] sm:$0xff] %v9267_v4   ;;  %v7773_v4 = vld [vmem:[#allocation0 + $0x220] sm:$0xff]  ;;  %v9382_v9 = vpack.c.bf16 %v7766_v2, %v7759_v1  ;;  %v8060_v1 = vld [vmem:[#allocation0 + $0x368] sm:$0xff] }
 0x30f   :  { %9704 = vst [vmem:[%s10376_s1 + $0x58] sm:$0xff] %v9272_v7   ;;  %v7787_v7 = vld [vmem:[#allocation0 + $0x230] sm:$0xff]  ;;  %v9387_v12 = vpack.c.bf16 %v7780_v5, %v7773_v4  ;;  %v8074_v4 = vld [vmem:[#allocation0 + $0x378] sm:$0xff] }
 0x310   :  { %9705 = vst [vmem:[%s10376_s1 + $0x60] sm:$0xff] %v9277_v10   ;;  %v7801_v10 = vld [vmem:[#allocation0 + $0x240] sm:$0xff]  ;;  %v9392_v15 = vpack.c.bf16 %v7794_v8, %v7787_v7  ;;  %v8088_v7 = vld [vmem:[#allocation0 + $0x388] sm:$0xff] }
 0x311   :  { %9706 = vst [vmem:[%s10376_s1 + $0x68] sm:$0xff] %v9282_v13   ;;  %v7815_v13 = vld [vmem:[#allocation0 + $0x250] sm:$0xff]  ;;  %v9397_v18 = vpack.c.bf16 %v7808_v11, %v7801_v10  ;;  %v8102_v10 = vld [vmem:[#allocation0 + $0x398] sm:$0xff] }
 0x312   :  { %9707 = vst [vmem:[%s10376_s1 + $0x70] sm:$0xff] %v9287_v16   ;;  %v7829_v16 = vld [vmem:[#allocation0 + $0x260] sm:$0xff]  ;;  %v9402_v21 = vpack.c.bf16 %v7822_v14, %v7815_v13  ;;  %v8116_v13 = vld [vmem:[#allocation0 + $0x3a8] sm:$0xff] }
 0x313   :  { %9708 = vst [vmem:[%s10376_s1 + $0x78] sm:$0xff] %v9292_v19   ;;  %v7843_v19 = vld [vmem:[#allocation0 + $0x270] sm:$0xff]  ;;  %v9407_v24 = vpack.c.bf16 %v7836_v17, %v7829_v16  ;;  %v8130_v16 = vld [vmem:[#allocation0 + $0x3b8] sm:$0xff] }
 0x314   :  { %9709 = vst [vmem:[%s10376_s1 + $0x80] sm:$0xff] %v9297_v22   ;;  %v7857_v22 = vld [vmem:[#allocation0 + $0x280] sm:$0xff]  ;;  %v9412_v27 = vpack.c.bf16 %v7850_v20, %v7843_v19  ;;  %v8144_v19 = vld [vmem:[#allocation0 + $0x3c8] sm:$0xff] }
 0x315   :  { %9710 = vst [vmem:[%s10376_s1 + $0x88] sm:$0xff] %v9302_v25   ;;  %v7871_v25 = vld [vmem:[#allocation0 + $0x290] sm:$0xff]  ;;  %v9417_v30 = vpack.c.bf16 %v7864_v23, %v7857_v22  ;;  %v8158_v22 = vld [vmem:[#allocation0 + $0x3d8] sm:$0xff] }
 0x316   :  { %9711 = vst [vmem:[%s10376_s1 + $0x90] sm:$0xff] %v9307_v28   ;;  %v7885_v28 = vld [vmem:[#allocation0 + $0x2a0] sm:$0xff]  ;;  %v9422_v33 = vpack.c.bf16 %v7878_v26, %v7871_v25  ;;  %v8172_v25 = vld [vmem:[#allocation0 + $0x3e8] sm:$0xff] }
 0x317   :  { %9712 = vst [vmem:[%s10376_s1 + $0x98] sm:$0xff] %v9312_v31   ;;  %v7899_v31 = vld [vmem:[#allocation0 + $0x2b0] sm:$0xff]  ;;  %v9427_v36 = vpack.c.bf16 %v7892_v29, %v7885_v28  ;;  %v8186_v28 = vld [vmem:[#allocation0 + $0x3f8] sm:$0xff] }
 0x318   :  { %9713 = vst [vmem:[%s10376_s1 + $0xa0] sm:$0xff] %v9317_v34   ;;  %v7913_v34 = vld [vmem:[#allocation0 + $0x2c0] sm:$0xff]  ;;  %v9432_v39 = vpack.c.bf16 %v7906_v32, %v7899_v31  ;;  %v8200_v31 = vld [vmem:[#allocation0 + $0x408] sm:$0xff] }
 0x319   :  { %9714 = vst [vmem:[%s10376_s1 + $0xa8] sm:$0xff] %v9322_v37   ;;  %v7927_v37 = vld [vmem:[#allocation0 + $0x2d0] sm:$0xff]  ;;  %v9437_v42 = vpack.c.bf16 %v7920_v35, %v7913_v34  ;;  %v8214_v34 = vld [vmem:[#allocation0 + $0x418] sm:$0xff] }
 0x31a   :  { %9715 = vst [vmem:[%s10376_s1 + $0xb0] sm:$0xff] %v9327_v40   ;;  %v7941_v40 = vld [vmem:[#allocation0 + $0x2e0] sm:$0xff]  ;;  %v9442_v45 = vpack.c.bf16 %v7934_v38, %v7927_v37  ;;  %v8228_v37 = vld [vmem:[#allocation0 + $0x428] sm:$0xff] }
 0x31b   :  { %9716 = vst [vmem:[%s10376_s1 + $0xb8] sm:$0xff] %v9332_v43   ;;  %v7955_v43 = vld [vmem:[#allocation0 + $0x2f0] sm:$0xff]  ;;  %v9447_v48 = vpack.c.bf16 %v7948_v41, %v7941_v40  ;;  %v8242_v40 = vld [vmem:[#allocation0 + $0x438] sm:$0xff] }
 0x31c   :  { %9717 = vst [vmem:[%s10376_s1 + $0xc0] sm:$0xff] %v9337_v46   ;;  %v7969_v46 = vld [vmem:[#allocation0 + $0x300] sm:$0xff]  ;;  %v9452_v51 = vpack.c.bf16 %v7962_v44, %v7955_v43  ;;  %v8256_v43 = vld [vmem:[#allocation0 + $0x448] sm:$0xff] }
 0x31d   :  { %9718 = vst [vmem:[%s10376_s1 + $0xc8] sm:$0xff] %v9342_v49   ;;  %v7983_v49 = vld [vmem:[#allocation0 + $0x310] sm:$0xff]  ;;  %v9457_v54 = vpack.c.bf16 %v7976_v47, %v7969_v46  ;;  %v8270_v46 = vld [vmem:[#allocation0 + $0x458] sm:$0xff] }
 0x31e   :  { %9719 = vst [vmem:[%s10376_s1 + $0xd0] sm:$0xff] %v9347_v52   ;;  %v7997_v52 = vld [vmem:[#allocation0 + $0x320] sm:$0xff]  ;;  %v9462_v57 = vpack.c.bf16 %v7990_v50, %v7983_v49  ;;  %v8284_v49 = vld [vmem:[#allocation0 + $0x468] sm:$0xff] }
 0x31f   :  { %9720 = vst [vmem:[%s10376_s1 + $0xd8] sm:$0xff] %v9352_v55   ;;  %v8011_v55 = vld [vmem:[#allocation0 + $0x330] sm:$0xff]  ;;  %v9467_v60 = vpack.c.bf16 %v8004_v53, %v7997_v52  ;;  %v8298_v52 = vld [vmem:[#allocation0 + $0x478] sm:$0xff] }
 0x320   :  { %9721 = vst [vmem:[%s10376_s1 + $0xe0] sm:$0xff] %v9357_v58   ;;  %v8025_v58 = vld [vmem:[#allocation0 + $0x340] sm:$0xff]  ;;  %v9472_v63 = vpack.c.bf16 %v8018_v56, %v8011_v55  ;;  %v8312_v55 = vld [vmem:[#allocation0 + $0x488] sm:$0xff] }
 0x321   :  { %9722 = vst [vmem:[%s10376_s1 + $0xe8] sm:$0xff] %v9362_v61   ;;  %v8039_v61 = vld [vmem:[#allocation0 + $0x350] sm:$0xff]  ;;  %v9477_v2 = vpack.c.bf16 %v8032_v59, %v8025_v58  ;;  %v8326_v58 = vld [vmem:[#allocation0 + $0x498] sm:$0xff] }
 0x322   :  { %9723 = vst [vmem:[%s10376_s1 + $0xf0] sm:$0xff] %v9367_v0   ;;  %v8053_v0 = vld [vmem:[#allocation0 + $0x360] sm:$0xff]  ;;  %v9482_v5 = vpack.c.bf16 %v8046_v62, %v8039_v61  ;;  %v8340_v61 = vld [vmem:[#allocation0 + $0x4a8] sm:$0xff] }
 0x323   :  { %9724 = vst [vmem:[%s10376_s1 + $0xf8] sm:$0xff] %v9372_v3   ;;  %v8067_v3 = vld [vmem:[#allocation0 + $0x370] sm:$0xff]  ;;  %v9487_v8 = vpack.c.bf16 %v8060_v1, %v8053_v0  ;;  %v8354_v0 = vld [vmem:[#allocation0 + $0x4b8] sm:$0xff] }
 0x324   :  { %9725 = vst [vmem:[%s10376_s1 + $0x100] sm:$0xff] %v9377_v6   ;;  %v8081_v6 = vld [vmem:[#allocation0 + $0x380] sm:$0xff]  ;;  %v9492_v11 = vpack.c.bf16 %v8074_v4, %v8067_v3  ;;  %v8368_v3 = vld [vmem:[#allocation0 + $0x4c8] sm:$0xff] }
 0x325   :  { %9726 = vst [vmem:[%s10376_s1 + $0x108] sm:$0xff] %v9382_v9   ;;  %v8095_v9 = vld [vmem:[#allocation0 + $0x390] sm:$0xff]  ;;  %v9497_v14 = vpack.c.bf16 %v8088_v7, %v8081_v6  ;;  %v8382_v6 = vld [vmem:[#allocation0 + $0x4d8] sm:$0xff] }
 0x326   :  { %9727 = vst [vmem:[%s10376_s1 + $0x110] sm:$0xff] %v9387_v12   ;;  %v8109_v12 = vld [vmem:[#allocation0 + $0x3a0] sm:$0xff]  ;;  %v9502_v17 = vpack.c.bf16 %v8102_v10, %v8095_v9  ;;  %v8396_v9 = vld [vmem:[#allocation0 + $0x4e8] sm:$0xff] }
 0x327   :  { %9728 = vst [vmem:[%s10376_s1 + $0x118] sm:$0xff] %v9392_v15   ;;  %v8123_v15 = vld [vmem:[#allocation0 + $0x3b0] sm:$0xff]  ;;  %v9507_v20 = vpack.c.bf16 %v8116_v13, %v8109_v12  ;;  %v8410_v12 = vld [vmem:[#allocation0 + $0x4f8] sm:$0xff] }
 0x328   :  { %9729 = vst [vmem:[%s10376_s1 + $0x120] sm:$0xff] %v9397_v18   ;;  %v8137_v18 = vld [vmem:[#allocation0 + $0x3c0] sm:$0xff]  ;;  %v9512_v23 = vpack.c.bf16 %v8130_v16, %v8123_v15  ;;  %v8424_v15 = vld [vmem:[#allocation0 + $0x508] sm:$0xff] }
 0x329   :  { %9730 = vst [vmem:[%s10376_s1 + $0x128] sm:$0xff] %v9402_v21   ;;  %v8151_v21 = vld [vmem:[#allocation0 + $0x3d0] sm:$0xff]  ;;  %v9517_v26 = vpack.c.bf16 %v8144_v19, %v8137_v18  ;;  %v8438_v18 = vld [vmem:[#allocation0 + $0x518] sm:$0xff] }
 0x32a   :  { %9731 = vst [vmem:[%s10376_s1 + $0x130] sm:$0xff] %v9407_v24   ;;  %v8165_v24 = vld [vmem:[#allocation0 + $0x3e0] sm:$0xff]  ;;  %v9522_v29 = vpack.c.bf16 %v8158_v22, %v8151_v21  ;;  %v8452_v21 = vld [vmem:[#allocation0 + $0x528] sm:$0xff] }
 0x32b   :  { %9732 = vst [vmem:[%s10376_s1 + $0x138] sm:$0xff] %v9412_v27   ;;  %v8179_v27 = vld [vmem:[#allocation0 + $0x3f0] sm:$0xff]  ;;  %v9527_v32 = vpack.c.bf16 %v8172_v25, %v8165_v24  ;;  %v8466_v24 = vld [vmem:[#allocation0 + $0x538] sm:$0xff] }
 0x32c   :  { %9733 = vst [vmem:[%s10376_s1 + $0x140] sm:$0xff] %v9417_v30   ;;  %v8193_v30 = vld [vmem:[#allocation0 + $0x400] sm:$0xff]  ;;  %v9532_v35 = vpack.c.bf16 %v8186_v28, %v8179_v27  ;;  %v8480_v27 = vld [vmem:[#allocation0 + $0x548] sm:$0xff] }
 0x32d   :  { %9734 = vst [vmem:[%s10376_s1 + $0x148] sm:$0xff] %v9422_v33   ;;  %v8207_v33 = vld [vmem:[#allocation0 + $0x410] sm:$0xff]  ;;  %v9537_v38 = vpack.c.bf16 %v8200_v31, %v8193_v30  ;;  %v8494_v30 = vld [vmem:[#allocation0 + $0x558] sm:$0xff] }
 0x32e   :  { %9735 = vst [vmem:[%s10376_s1 + $0x150] sm:$0xff] %v9427_v36   ;;  %v8221_v36 = vld [vmem:[#allocation0 + $0x420] sm:$0xff]  ;;  %v9542_v41 = vpack.c.bf16 %v8214_v34, %v8207_v33  ;;  %v8508_v33 = vld [vmem:[#allocation0 + $0x568] sm:$0xff] }
 0x32f   :  { %9736 = vst [vmem:[%s10376_s1 + $0x158] sm:$0xff] %v9432_v39   ;;  %v8235_v39 = vld [vmem:[#allocation0 + $0x430] sm:$0xff]  ;;  %v9547_v44 = vpack.c.bf16 %v8228_v37, %v8221_v36  ;;  %v8522_v36 = vld [vmem:[#allocation0 + $0x578] sm:$0xff] }
 0x330   :  { %9737 = vst [vmem:[%s10376_s1 + $0x160] sm:$0xff] %v9437_v42   ;;  %v8249_v42 = vld [vmem:[#allocation0 + $0x440] sm:$0xff]  ;;  %v9552_v47 = vpack.c.bf16 %v8242_v40, %v8235_v39  ;;  %v8536_v39 = vld [vmem:[#allocation0 + $0x588] sm:$0xff] }
 0x331   :  { %9738 = vst [vmem:[%s10376_s1 + $0x168] sm:$0xff] %v9442_v45   ;;  %v8263_v45 = vld [vmem:[#allocation0 + $0x450] sm:$0xff]  ;;  %v9557_v50 = vpack.c.bf16 %v8256_v43, %v8249_v42  ;;  %v8550_v42 = vld [vmem:[#allocation0 + $0x598] sm:$0xff] }
 0x332   :  { %9739 = vst [vmem:[%s10376_s1 + $0x170] sm:$0xff] %v9447_v48   ;;  %v8277_v48 = vld [vmem:[#allocation0 + $0x460] sm:$0xff]  ;;  %v9562_v53 = vpack.c.bf16 %v8270_v46, %v8263_v45  ;;  %v8564_v45 = vld [vmem:[#allocation0 + $0x5a8] sm:$0xff] }
 0x333   :  { %9740 = vst [vmem:[%s10376_s1 + $0x178] sm:$0xff] %v9452_v51   ;;  %v8291_v51 = vld [vmem:[#allocation0 + $0x470] sm:$0xff]  ;;  %v9567_v56 = vpack.c.bf16 %v8284_v49, %v8277_v48  ;;  %v8578_v48 = vld [vmem:[#allocation0 + $0x5b8] sm:$0xff] }
 0x334   :  { %9741 = vst [vmem:[%s10376_s1 + $0x180] sm:$0xff] %v9457_v54   ;;  %v8305_v54 = vld [vmem:[#allocation0 + $0x480] sm:$0xff]  ;;  %v9572_v59 = vpack.c.bf16 %v8298_v52, %v8291_v51  ;;  %v8592_v51 = vld [vmem:[#allocation0 + $0x5c8] sm:$0xff] }
 0x335   :  { %9742 = vst [vmem:[%s10376_s1 + $0x188] sm:$0xff] %v9462_v57   ;;  %v8319_v57 = vld [vmem:[#allocation0 + $0x490] sm:$0xff]  ;;  %v9577_v62 = vpack.c.bf16 %v8312_v55, %v8305_v54  ;;  %v8606_v54 = vld [vmem:[#allocation0 + $0x5d8] sm:$0xff] }
 0x336   :  { %9743 = vst [vmem:[%s10376_s1 + $0x190] sm:$0xff] %v9467_v60   ;;  %v8333_v60 = vld [vmem:[#allocation0 + $0x4a0] sm:$0xff]  ;;  %v9582_v1 = vpack.c.bf16 %v8326_v58, %v8319_v57  ;;  %v8620_v57 = vld [vmem:[#allocation0 + $0x5e8] sm:$0xff] }
 0x337   :  { %9744 = vst [vmem:[%s10376_s1 + $0x198] sm:$0xff] %v9472_v63   ;;  %v8347_v63 = vld [vmem:[#allocation0 + $0x4b0] sm:$0xff]  ;;  %v9587_v4 = vpack.c.bf16 %v8340_v61, %v8333_v60  ;;  %v8634_v60 = vld [vmem:[#allocation0 + $0x5f8] sm:$0xff] }
 0x338   :  { %9745 = vst [vmem:[%s10376_s1 + $0x1a0] sm:$0xff] %v9477_v2   ;;  %v8361_v2 = vld [vmem:[#allocation0 + $0x4c0] sm:$0xff]  ;;  %v9592_v7 = vpack.c.bf16 %v8354_v0, %v8347_v63 }
 0x339   :  { %9746 = vst [vmem:[%s10376_s1 + $0x1a8] sm:$0xff] %v9482_v5   ;;  %v8375_v5 = vld [vmem:[#allocation0 + $0x4d0] sm:$0xff]  ;;  %v9597_v10 = vpack.c.bf16 %v8368_v3, %v8361_v2 }
 0x33a   :  { %9747 = vst [vmem:[%s10376_s1 + $0x1b0] sm:$0xff] %v9487_v8   ;;  %v8389_v8 = vld [vmem:[#allocation0 + $0x4e0] sm:$0xff]  ;;  %v9602_v13 = vpack.c.bf16 %v8382_v6, %v8375_v5 }
 0x33b   :  { %9748 = vst [vmem:[%s10376_s1 + $0x1b8] sm:$0xff] %v9492_v11   ;;  %v8403_v11 = vld [vmem:[#allocation0 + $0x4f0] sm:$0xff]  ;;  %v9607_v16 = vpack.c.bf16 %v8396_v9, %v8389_v8 }
 0x33c   :  { %9749 = vst [vmem:[%s10376_s1 + $0x1c0] sm:$0xff] %v9497_v14   ;;  %v8417_v14 = vld [vmem:[#allocation0 + $0x500] sm:$0xff]  ;;  %v9612_v19 = vpack.c.bf16 %v8410_v12, %v8403_v11 }
 0x33d   :  { %9750 = vst [vmem:[%s10376_s1 + $0x1c8] sm:$0xff] %v9502_v17   ;;  %v8431_v17 = vld [vmem:[#allocation0 + $0x510] sm:$0xff]  ;;  %v9617_v22 = vpack.c.bf16 %v8424_v15, %v8417_v14 }
 0x33e   :  { %9751 = vst [vmem:[%s10376_s1 + $0x1d0] sm:$0xff] %v9507_v20   ;;  %v8445_v20 = vld [vmem:[#allocation0 + $0x520] sm:$0xff]  ;;  %v9622_v25 = vpack.c.bf16 %v8438_v18, %v8431_v17 }
 0x33f   :  { %9752 = vst [vmem:[%s10376_s1 + $0x1d8] sm:$0xff] %v9512_v23   ;;  %v8459_v23 = vld [vmem:[#allocation0 + $0x530] sm:$0xff]  ;;  %v9627_v28 = vpack.c.bf16 %v8452_v21, %v8445_v20 }
 0x340   :  { %9753 = vst [vmem:[%s10376_s1 + $0x1e0] sm:$0xff] %v9517_v26   ;;  %v8473_v26 = vld [vmem:[#allocation0 + $0x540] sm:$0xff]  ;;  %v9632_v31 = vpack.c.bf16 %v8466_v24, %v8459_v23 }
 0x341   :  { %9754 = vst [vmem:[%s10376_s1 + $0x1e8] sm:$0xff] %v9522_v29   ;;  %v8487_v29 = vld [vmem:[#allocation0 + $0x550] sm:$0xff]  ;;  %v9637_v34 = vpack.c.bf16 %v8480_v27, %v8473_v26 }
 0x342   :  { %9755 = vst [vmem:[%s10376_s1 + $0x1f0] sm:$0xff] %v9527_v32   ;;  %v8501_v32 = vld [vmem:[#allocation0 + $0x560] sm:$0xff]  ;;  %v9642_v37 = vpack.c.bf16 %v8494_v30, %v8487_v29 }
 0x343   :  { %9756 = vst [vmem:[%s10376_s1 + $0x1f8] sm:$0xff] %v9532_v35   ;;  %v8515_v35 = vld [vmem:[#allocation0 + $0x570] sm:$0xff]  ;;  %v9647_v40 = vpack.c.bf16 %v8508_v33, %v8501_v32 }
 0x344   :  { %9757 = vst [vmem:[%s10376_s1 + $0x200] sm:$0xff] %v9537_v38   ;;  %v8529_v38 = vld [vmem:[#allocation0 + $0x580] sm:$0xff]  ;;  %v9652_v43 = vpack.c.bf16 %v8522_v36, %v8515_v35 }
 0x345   :  { %9758 = vst [vmem:[%s10376_s1 + $0x208] sm:$0xff] %v9542_v41   ;;  %v8543_v41 = vld [vmem:[#allocation0 + $0x590] sm:$0xff]  ;;  %v9657_v46 = vpack.c.bf16 %v8536_v39, %v8529_v38 }
 0x346   :  { %9759 = vst [vmem:[%s10376_s1 + $0x210] sm:$0xff] %v9547_v44   ;;  %v8557_v44 = vld [vmem:[#allocation0 + $0x5a0] sm:$0xff]  ;;  %v9662_v49 = vpack.c.bf16 %v8550_v42, %v8543_v41 }
 0x347   :  { %9760 = vst [vmem:[%s10376_s1 + $0x218] sm:$0xff] %v9552_v47   ;;  %v8571_v47 = vld [vmem:[#allocation0 + $0x5b0] sm:$0xff]  ;;  %v9667_v52 = vpack.c.bf16 %v8564_v45, %v8557_v44 }
 0x348   :  { %9761 = vst [vmem:[%s10376_s1 + $0x220] sm:$0xff] %v9557_v50   ;;  %v8585_v50 = vld [vmem:[#allocation0 + $0x5c0] sm:$0xff]  ;;  %v9672_v55 = vpack.c.bf16 %v8578_v48, %v8571_v47 }
 0x349   :  { %9762 = vst [vmem:[%s10376_s1 + $0x228] sm:$0xff] %v9562_v53   ;;  %v8599_v53 = vld [vmem:[#allocation0 + $0x5d0] sm:$0xff]  ;;  %v9677_v58 = vpack.c.bf16 %v8592_v51, %v8585_v50 }
 0x34a   :  { %9763 = vst [vmem:[%s10376_s1 + $0x230] sm:$0xff] %v9567_v56   ;;  %v8613_v56 = vld [vmem:[#allocation0 + $0x5e0] sm:$0xff]  ;;  %v9682_v61 = vpack.c.bf16 %v8606_v54, %v8599_v53 }
 0x34b   :  { %9764 = vst [vmem:[%s10376_s1 + $0x238] sm:$0xff] %v9572_v59   ;;  %v8627_v59 = vld [vmem:[#allocation0 + $0x5f0] sm:$0xff] }
 0x34c   :  { %9765 = vst [vmem:[%s10376_s1 + $0x240] sm:$0xff] %v9577_v62   ;;  %v9687_v62 = vpack.c.bf16 %v8620_v57, %v8613_v56  ;;  %v9692_v63 = vpack.c.bf16 %v8634_v60, %v8627_v59 }
 0x34d   :  { %9766 = vst [vmem:[%s10376_s1 + $0x248] sm:$0xff] %v9582_v1  }
 0x34e   :  { %9767 = vst [vmem:[%s10376_s1 + $0x250] sm:$0xff] %v9587_v4  }
 0x34f   :  { %9768 = vst [vmem:[%s10376_s1 + $0x258] sm:$0xff] %v9592_v7  }
 0x350   :  { %9769 = vst [vmem:[%s10376_s1 + $0x260] sm:$0xff] %v9597_v10  }
 0x351   :  { %9770 = vst [vmem:[%s10376_s1 + $0x268] sm:$0xff] %v9602_v13  }
 0x352   :  { %9771 = vst [vmem:[%s10376_s1 + $0x270] sm:$0xff] %v9607_v16  }
 0x353   :  { %9772 = vst [vmem:[%s10376_s1 + $0x278] sm:$0xff] %v9612_v19  }
 0x354   :  { %9773 = vst [vmem:[%s10376_s1 + $0x280] sm:$0xff] %v9617_v22  }
 0x355   :  { %9774 = vst [vmem:[%s10376_s1 + $0x288] sm:$0xff] %v9622_v25  }
 0x356   :  { %9775 = vst [vmem:[%s10376_s1 + $0x290] sm:$0xff] %v9627_v28  }
 0x357   :  { %9776 = vst [vmem:[%s10376_s1 + $0x298] sm:$0xff] %v9632_v31  }
 0x358   :  { %9777 = vst [vmem:[%s10376_s1 + $0x2a0] sm:$0xff] %v9637_v34  }
 0x359   :  { %9778 = vst [vmem:[%s10376_s1 + $0x2a8] sm:$0xff] %v9642_v37  }
 0x35a   :  { %9779 = vst [vmem:[%s10376_s1 + $0x2b0] sm:$0xff] %v9647_v40  }
 0x35b   :  { %9780 = vst [vmem:[%s10376_s1 + $0x2b8] sm:$0xff] %v9652_v43  }
 0x35c   :  { %9781 = vst [vmem:[%s10376_s1 + $0x2c0] sm:$0xff] %v9657_v46  }
 0x35d   :  { %9782 = vst [vmem:[%s10376_s1 + $0x2c8] sm:$0xff] %v9662_v49  }
 0x35e   :  { %9783 = vst [vmem:[%s10376_s1 + $0x2d0] sm:$0xff] %v9667_v52  }
 0x35f   :  { %9784 = vst [vmem:[%s10376_s1 + $0x2d8] sm:$0xff] %v9672_v55  }
 0x360   :  { %9785 = vst [vmem:[%s10376_s1 + $0x2e0] sm:$0xff] %v9677_v58  }
 0x361   :  { %9786 = vst [vmem:[%s10376_s1 + $0x2e8] sm:$0xff] %v9682_v61  }
 0x362   :  { %9787 = vst [vmem:[%s10376_s1 + $0x2f0] sm:$0xff] %v9687_v62  }
 0x363   :  { %9788 = vst [vmem:[%s10376_s1 + $0x2f8] sm:$0xff] %v9692_v63  }

// kernel: _lambda_.1
= control target key start
LH: loop header
LB: loop body
LE: loop exit
PB: predicated region body
PF: predicated region fallthrough
CT: control target
= control target key end

     0   :  { %13 = vsyncpa [#allocation4], 0  ;;  %vm32_vm0 = vcmask 130048   ;;  %v4451_v6 = vmov 0.0   ;;  %s5770_s0 = inlined_call_operand.vmem [shape: f32[2,4,16,16], index: 0, kind: input, shape index: {}]   ;;  %s5771_s1 = inlined_call_operand.vmem [shape: bf16[4,4,16,768], index: 1, kind: input, shape index: {}]   ;;  %s5772_s2 = inlined_call_operand.vmem [shape: f32[1,768], index: 2, kind: input, shape index: {}, may-alias: {2,4}]   ;;  %s5773_s3 = inlined_call_operand.vmem [shape: f32[1,768], index: 3, kind: input, shape index: {}]   ;;  %s5774_s4 = inlined_call_operand.vmem [shape: f32[1,768], index: 4, kind: input, shape index: {}, may-alias: {2,4}]   ;;  %s5775_s5 = inlined_call_operand.vmem [shape: bf16[768,128], index: 5, kind: input, shape index: {}]   ;;  %s5776_s6 = inlined_call_operand.hbm [shape: f32[2,128], index: 6, kind: output, shape index: {0}]   ;;  %s5777_s7 = inlined_call_operand.hbm [shape: f32[2,768], index: 7, kind: output, shape index: {1}]  }
   0x1   :  { %v3477_v0 = vld [vmem:[%s5771_s1] sm:$0xf]  ;;  %v4240_v1 = vld [vmem:[%s5771_s1 + $0x14] sm:$0xf0]  ;;  %v4237_v2 = vld [vmem:[%s5771_s1 + $0x4] sm:$0xf] }
   0x2   :  { %v3478_v3 = vor.u32 %v4240_v1, %v3477_v0  ;;  %v3479_v4 = vld [vmem:[%s5771_s1 + $0x18] sm:$0xf0]  ;;  %33 = vst.msk [vmem:[#allocation2] sm:$0xff] %vm32_vm0, %v4451_v6 }
   0x3   :  { %v3482_v5 = vor.u32 %v4237_v2, %v3479_v4 }
   0x4   :  { %14 = vsyncpa [#allocation6], 0  ;;  %217 = vmatpush.bf16.msra.mxu2 %v3478_v3  ;;  %37 = vst.msk [vmem:[#allocation2 + $0x20] sm:$0xff] %vm32_vm0, %v4451_v6  ;;  %v49_v7 = vld [vmem:[%s5770_s0] sm:$0xff]  ;;  %v4238_v13 = vld [vmem:[%s5771_s1 + $0xc] sm:$0xf] }
   0x5   :  { %230 = vmatpush.bf16.msra.mxu3 %v3482_v5  ;;  %34 = vst.msk [vmem:[#allocation2 + $0x8] sm:$0xff] %vm32_vm0, %v4451_v6  ;;  %v53_v8 = vld [vmem:[%s5770_s0 + $0x40] sm:$0xff]  ;;  %v3485_v16 = vld [vmem:[%s5771_s1 + $0x8] sm:$0xf]  ;;  %v3493_v19 = vld [vmem:[%s5771_s1 + $0x10] sm:$0xf] }
   0x6   :  { %35 = vst.msk [vmem:[#allocation2 + $0x10] sm:$0xff] %vm32_vm0, %v4451_v6  ;;  %v3487_v14 = vld [vmem:[%s5771_s1 + $0x20] sm:$0xf0]  ;;  %v4241_v17 = vld [vmem:[%s5771_s1 + $0x1c] sm:$0xf0]  ;;  %v3467_v25 = vld [vmem:[%s5770_s0 + $0x8] sm:$0xff] }
   0x7   :  { %36 = vst.msk [vmem:[#allocation2 + $0x18] sm:$0xff] %vm32_vm0, %v4451_v6  ;;  %v3490_v15 = vor.u32 %v4238_v13, %v3487_v14  ;;  %v3486_v18 = vor.u32 %v4241_v17, %v3485_v16  ;;  %v4242_v20 = vld [vmem:[%s5771_s1 + $0x24] sm:$0xf0]  ;;  %v4239_v21 = vld [vmem:[%s5771_s1 + $0x14] sm:$0xf]  ;;  %vm174_vm1 = vcmask 1041409  }
   0x8   :  { %38 = vst.msk [vmem:[#allocation2 + $0x28] sm:$0xff] %vm32_vm0, %v4451_v6  ;;  %v3494_v22 = vor.u32 %v4242_v20, %v3493_v19  ;;  %v3495_v23 = vld [vmem:[%s5771_s1 + $0x28] sm:$0xf0]  ;;  %v3521_v36 = vld [vmem:[%s5771_s1 + $0x38] sm:$0xf]  ;;  %vm140_vm2 = vcmask 1041408  }
   0x9   :  { %39 = vst.msk [vmem:[#allocation2 + $0x30] sm:$0xff] %vm32_vm0, %v4451_v6  ;;  %v41_v9 = vld [vmem:[#allocation2] sm:$0xff]  ;;  %256 = vmatpush.bf16.msrb.mxu3 %v3490_v15  ;;  %243 = vmatpush.bf16.msrb.mxu2 %v3486_v18  ;;  %v3498_v24 = vor.u32 %v4239_v21, %v3495_v23  ;;  %v4247_v38 = vld [vmem:[%s5771_s1 + $0x4c] sm:$0xf0]  ;;  %v4244_v39 = vld [vmem:[%s5771_s1 + $0x3c] sm:$0xf] }
   0xa   :  { %40 = vst.msk [vmem:[#allocation2 + $0x38] sm:$0xff] %vm32_vm0, %v4451_v6  ;;  %v57_v11 = vadd.f32 %v49_v7, %v41_v9  ;;  %269 = vmatpush.bf16.msra.mxu0 %v3494_v22  ;;  %v3471_v26 = vld [vmem:[%s5770_s0 + $0x48] sm:$0xff]  ;;  %v3523_v40 = vld [vmem:[%s5771_s1 + $0x50] sm:$0xf0]  ;;  %v3522_v42 = vor.u32 %v4247_v38, %v3521_v36  ;;  %v3513_v59 = vld [vmem:[%s5771_s1 + $0x30] sm:$0xf] }
   0xb   :  { %v45_v10 = vld [vmem:[#allocation2 + $0x20] sm:$0xff]  ;;  %282 = vmatpush.bf16.msra.mxu1 %v3498_v24  ;;  %v3526_v43 = vor.u32 %v4244_v39, %v3523_v40  ;;  %v4243_v54 = vld [vmem:[%s5771_s1 + $0x34] sm:$0xf]  ;;  %v3549_v3 = vld [vmem:[%s5771_s1 + $0x60] sm:$0xf]  ;;  %vm142_vm3 = vcmask 1045508  }
   0xc   :  { %v61_v12 = vadd.f32 %v53_v8, %v45_v10  ;;  %66 = vst.msk [vmem:[#allocation2] sm:$0xff] %vm32_vm0, %v57_v11  ;;  %v3515_v55 = vld [vmem:[%s5771_s1 + $0x48] sm:$0xf0]  ;;  %v4246_v60 = vld [vmem:[%s5771_s1 + $0x44] sm:$0xf0]  ;;  %vm144_vm4 = vcmask 1043456  }
   0xd   :  { %v3518_v62 = vor.u32 %v4243_v54, %v3515_v55  ;;  %v3514_v0 = vor.u32 %v4246_v60, %v3513_v59  ;;  %v4252_v4 = vld [vmem:[%s5771_s1 + $0x74] sm:$0xf0]  ;;  %v4249_v8 = vld [vmem:[%s5771_s1 + $0x64] sm:$0xf]  ;;  %v3551_v9 = vld [vmem:[%s5771_s1 + $0x78] sm:$0xf0] }
   0xe   :  { %70 = vst.msk [vmem:[#allocation2 + $0x20] sm:$0xff] %vm32_vm0, %v61_v12  ;;  %400 = vmatpush.bf16.msrb.mxu0 %v3522_v42  ;;  %v3550_v7 = vor.u32 %v4252_v4, %v3549_v3  ;;  %v3554_v10 = vor.u32 %v4249_v8, %v3551_v9  ;;  %v4245_v19 = vld [vmem:[%s5771_s1 + $0x44] sm:$0xf]  ;;  %v3531_v22 = vld [vmem:[%s5771_s1 + $0x58] sm:$0xf0]  ;;  %v42_v59 = vld [vmem:[#allocation2 + $0x8] sm:$0xff] }
   0xf   :  { %413 = vmatpush.bf16.msrb.mxu1 %v3526_v43  ;;  %v3529_v23 = vld [vmem:[%s5771_s1 + $0x40] sm:$0xf]  ;;  %v4248_v24 = vld [vmem:[%s5771_s1 + $0x54] sm:$0xf0]  ;;  %v3567_v36 = vld [vmem:[%s5771_s1 + $0x88] sm:$0xf0] }
  0x10   :  { %v3559_v42 = vld [vmem:[%s5771_s1 + $0x80] sm:$0xf0]  ;;  %v3557_v43 = vld [vmem:[%s5771_s1 + $0x68] sm:$0xf]  ;;  %v4256_v54 = vld [vmem:[%s5771_s1 + $0x9c] sm:$0xf] }
  0x11   :  { %v3595_v55 = vld [vmem:[%s5771_s1 + $0xb0] sm:$0xf0]  ;;  %v3587_v3 = vld [vmem:[%s5771_s1 + $0xa8] sm:$0xf0]  ;;  %v3468_v9 = vld [vmem:[%s5770_s0 + $0x18] sm:$0xff] }
  0x12   :  { %v50_v60 = vld [vmem:[%s5770_s0 + $0x10] sm:$0xff] }
  0x13   :  { %v74_v27 = vld [vmem:[#allocation2] sm:$0xff] }
  0x14   :  { %v91_v29 = vadd.f32 %v3467_v25, %v74_v27  ;;  %v3530_v27 = vor.u32 %v4248_v24, %v3529_v23  ;;  %v3623_v23 = vld [vmem:[%s5771_s1 + $0xd8] sm:$0xf0] }
  0x15   :  { %v78_v28 = vld [vmem:[#allocation2 + $0x20] sm:$0xff] }
  0x16   :  { %v95_v30 = vadd.f32 %v3471_v26, %v78_v28  ;;  %99 = vst.msk [vmem:[#allocation2] sm:$0xff] %vm32_vm0, %v91_v29  ;;  %v3534_v26 = vor.u32 %v4245_v19, %v3531_v22  ;;  %v4261_v22 = vld [vmem:[%s5771_s1 + $0xc4] sm:$0xf] }
  0x17   :  { %v3626_v24 = vor.u32 %v4261_v22, %v3623_v23 }
  0x18   :  { %103 = vst.msk [vmem:[#allocation2 + $0x20] sm:$0xff] %vm32_vm0, %v95_v30  ;;  %v3565_v30 = vld [vmem:[%s5771_s1 + $0x70] sm:$0xf] }
  0x1d   :  { %v151_v31 = vld [vmem:[#allocation2] sm:$0x1]  ;;  %v153_v32 = vld [vmem:[#allocation2 + $0x4] sm:$0x1]  ;;  %v308_v50 = vld [vmem:[#allocation2 + $0x1] sm:$0x1] }
  0x1e   :  { %v155_v35 = vadd.f32 %v153_v32, %v151_v31  ;;  %v310_v51 = vld [vmem:[#allocation2 + $0x5] sm:$0x1]  ;;  %v465_v16 = vld [vmem:[#allocation2 + $0x2] sm:$0x1]  ;;  %v467_v17 = vld [vmem:[#allocation2 + $0x6] sm:$0x1] }
  0x1f   :  { %v152_v33 = vld [vmem:[#allocation2 + $0x20] sm:$0x1]  ;;  %v154_v34 = vld [vmem:[#allocation2 + $0x24] sm:$0x1]  ;;  %v309_v44 = vld [vmem:[#allocation2 + $0x21] sm:$0x1]  ;;  %v312_v56 = vadd.f32 %v310_v51, %v308_v50  ;;  %v469_v20 = vadd.f32 %v467_v17, %v465_v16 }
  0x20   :  { %v156_v37 = vadd.f32 %v154_v34, %v152_v33  ;;  %v157_v41 = vmul.f32 0.0625, %v155_v35  ;;  %v311_v46 = vld [vmem:[#allocation2 + $0x25] sm:$0x1]  ;;  %v466_v11 = vld [vmem:[#allocation2 + $0x22] sm:$0x1] }
  0x21   :  { %v313_v48 = vadd.f32 %v311_v46, %v309_v44  ;;  %v314_v1 = vmul.f32 0.0625, %v312_v56  ;;  %v468_v12 = vld [vmem:[#allocation2 + $0x26] sm:$0x1]  ;;  %v471_v28 = vmul.f32 0.0625, %v469_v20  ;;  %v4254_v31 = vld [vmem:[%s5771_s1 + $0x84] sm:$0xf0]  ;;  %v3598_v56 = vor.u32 %v4256_v54, %v3595_v55 }
  0x22   :  { %v158_v45 = vmul.f32 0.0625, %v156_v37  ;;  %v159_v47 = vpack.c.bf16 %v157_v41, %v157_v41  ;;  %v470_v15 = vadd.f32 %v468_v12, %v466_v11  ;;  %v3566_v34 = vor.u32 %v4254_v31, %v3565_v30  ;;  %v4251_v35 = vld [vmem:[%s5771_s1 + $0x74] sm:$0xf]  ;;  %v4250_v41 = vld [vmem:[%s5771_s1 + $0x6c] sm:$0xf] }
  0x23   :  { %v315_v57 = vmul.f32 0.0625, %v313_v48  ;;  %v316_v5 = vpack.c.bf16 %v314_v1, %v314_v1  ;;  %v473_v32 = vpack.c.bf16 %v471_v28, %v471_v28  ;;  %v3570_v37 = vor.u32 %v4251_v35, %v3567_v36  ;;  %v4253_v44 = vld [vmem:[%s5771_s1 + $0x7c] sm:$0xf0]  ;;  %v46_v48 = vld [vmem:[#allocation2 + $0x28] sm:$0xff]  ;;  %v3593_v51 = vld [vmem:[%s5771_s1 + $0x98] sm:$0xf] }
  0x24   :  { %v160_v49 = vpack.c.bf16 %v158_v45, %v158_v45  ;;  %v171_v52 = vunpack.c.l.b16 %v159_v47  ;;  %v472_v21 = vmul.f32 0.0625, %v470_v15  ;;  %v3562_v46 = vor.u32 %v4250_v41, %v3559_v42  ;;  %v3472_v1 = vld [vmem:[%s5770_s0 + $0x58] sm:$0xff]  ;;  %v3621_v17 = vld [vmem:[%s5771_s1 + $0xc0] sm:$0xf]  ;;  %v4262_v55 = vld [vmem:[%s5771_s1 + $0xcc] sm:$0xf] }
  0x25   :  { %v317_v2 = vpack.c.bf16 %v315_v57, %v315_v57  ;;  %v329_v13 = vunpack.c.l.b16 %v316_v5  ;;  %v486_v38 = vunpack.c.l.b16 %v473_v32  ;;  %v3558_v47 = vor.u32 %v4253_v44, %v3557_v43  ;;  %v623_v57 = vld [vmem:[#allocation2 + $0x23] sm:$0x1]  ;;  %v3603_v36 = vld [vmem:[%s5771_s1 + $0xb8] sm:$0xf0]  ;;  %v3637_v44 = vld [vmem:[%s5771_s1 + $0xd0] sm:$0xf] }
  0x26   :  { %v172_v53 = vunpack.c.l.b16 %v160_v49  ;;  %v474_v29 = vpack.c.bf16 %v472_v21, %v472_v21  ;;  %v54_v49 = vld [vmem:[%s5770_s0 + $0x50] sm:$0xff] }
  0x27   :  { %v330_v6 = vunpack.c.l.b16 %v317_v2  ;;  %v62_v50 = vadd.f32 %v54_v49, %v46_v48  ;;  %v4255_v2 = vld [vmem:[%s5771_s1 + $0x94] sm:$0xf] }
  0x28   :  { %v173_v58 = vrot.slane %v172_v53, 7  ;;  %v487_v33 = vunpack.c.l.b16 %v474_v29  ;;  %v3590_v11 = vor.u32 %v4255_v2, %v3587_v3  ;;  %v3667_v2 = vld [vmem:[%s5771_s1 + $0x110] sm:$0xf0] }
  0x29   :  { %v331_v14 = vrot.slane %v330_v6, 7  ;;  %71 = vst.msk [vmem:[#allocation2 + $0x28] sm:$0xff] %vm32_vm0, %v62_v50  ;;  %v3585_v6 = vld [vmem:[%s5771_s1 + $0x90] sm:$0xf]  ;;  %v3639_v50 = vld [vmem:[%s5771_s1 + $0xe8] sm:$0xf0] }
  0x2a   :  { %v175_v61 = vsel %vm174_vm1, %v173_v58, %v171_v52  ;;  %v488_v39 = vrot.slane %v487_v33, 7  ;;  %v4259_v52 = vld [vmem:[%s5771_s1 + $0xac] sm:$0xf0]  ;;  %v625_v58 = vld [vmem:[#allocation2 + $0x27] sm:$0x1] }
  0x2b   :  { %v176_v63 = vpack.c.b16 %v175_v61, %v175_v61  ;;  %v332_v18 = vsel %vm174_vm1, %v331_v14, %v329_v13  ;;  %v3594_v53 = vor.u32 %v4259_v52, %v3593_v51  ;;  %v58_v61 = vadd.f32 %v50_v60, %v42_v59  ;;  %v4257_v33 = vld [vmem:[%s5771_s1 + $0xa4] sm:$0xf] }
  0x2c   :  { %v4609_v25 = vpack.c.b16 %v332_v18, %v332_v18  ;;  %v489_v40 = vsel %vm174_vm1, %v488_v39, %v486_v38  ;;  %v4264_v18 = vld [vmem:[%s5771_s1 + $0xd4] sm:$0xf0] }
  0x2d   :  { %3499 = vmatmul.msk.bf16.vlgmr.msra.gmra.mxu2 %vm32_vm0, %v176_v63  ;;  %3500 = vmatmul.msk.bf16.vlgmr.msra.gmra.mxu3 %vm32_vm0, %v176_v63  ;;  %v4642_v45 = vpack.c.b16 %v489_v40, %v489_v40  ;;  %67 = vst.msk [vmem:[#allocation2 + $0x8] sm:$0xff] %vm32_vm0, %v58_v61  ;;  %v3622_v21 = vor.u32 %v4264_v18, %v3621_v17  ;;  %v4260_v38 = vld [vmem:[%s5771_s1 + $0xb4] sm:$0xf0] }
  0x2e   :  { %3503 = vmatmul.msk.bf16.vlgmr.msra.gmra.mxu0 %vm32_vm0, %v176_v63  ;;  %3504 = vmatmul.msk.bf16.vlgmr.msra.gmra.mxu1 %vm32_vm0, %v176_v63  ;;  %v3606_v40 = vor.u32 %v4257_v33, %v3603_v36  ;;  %v3675_v36 = vld [vmem:[%s5771_s1 + $0x118] sm:$0xf0] }
  0x2f   :  { %387 = vmatpush.bf16.msra.mxu3 %v3518_v62  ;;  %374 = vmatpush.bf16.msra.mxu2 %v3514_v0  ;;  %v627_v62 = vadd.f32 %v625_v58, %v623_v57  ;;  %v624_v0 = vld [vmem:[#allocation2 + $0x7] sm:$0x1]  ;;  %v3629_v57 = vld [vmem:[%s5771_s1 + $0xc8] sm:$0xf]  ;;  %v4265_v58 = vld [vmem:[%s5771_s1 + $0xdc] sm:$0xf0] }
  0x30   :  { %531 = vmatpush.bf16.msra.mxu0 %v3550_v7  ;;  %544 = vmatpush.bf16.msra.mxu1 %v3554_v10  ;;  %v4258_v7 = vld [vmem:[%s5771_s1 + $0xa4] sm:$0xf0]  ;;  %v79_v8 = vld [vmem:[#allocation2 + $0x28] sm:$0xff]  ;;  %v3630_v61 = vor.u32 %v4265_v58, %v3629_v57 }
  0x31   :  { %v629_v5 = vmul.f32 0.0625, %v627_v62  ;;  %v96_v10 = vadd.f32 %v3472_v1, %v79_v8  ;;  %v3586_v12 = vor.u32 %v4258_v7, %v3585_v6  ;;  %v3665_v62 = vld [vmem:[%s5771_s1 + $0xf8] sm:$0xf]  ;;  %v4268_v1 = vld [vmem:[%s5771_s1 + $0xfc] sm:$0xf] }
  0x32   :  { %v3670_v3 = vor.u32 %v4268_v1, %v3667_v2  ;;  %v4275_v58 = vld [vmem:[%s5771_s1 + $0x134] sm:$0xf]  ;;  %v4277_v1 = vld [vmem:[%s5771_s1 + $0x13c] sm:$0xf0] }
  0x33   :  { %v631_v14 = vpack.c.bf16 %v629_v5, %v629_v5  ;;  %104 = vst.msk [vmem:[#allocation2 + $0x28] sm:$0xff] %vm32_vm0, %v96_v10  ;;  %v4267_v10 = vld [vmem:[%s5771_s1 + $0xf4] sm:$0xf] }
  0x34   :  { %v75_v15 = vld [vmem:[#allocation2 + $0x8] sm:$0xff] }
  0x35   :  { %v92_v16 = vadd.f32 %v3468_v9, %v75_v15  ;;  %v644_v20 = vunpack.c.l.b16 %v631_v14  ;;  %v4270_v14 = vld [vmem:[%s5771_s1 + $0x104] sm:$0xf0] }
  0x37   :  { %100 = vst.msk [vmem:[#allocation2 + $0x8] sm:$0xff] %vm32_vm0, %v92_v16  ;;  %v645_v28 = vrot.slane %v644_v20, 7 }
  0x3a   :  { %v940_v5 = vld [vmem:[#allocation2 + $0x2d] sm:$0x1]  ;;  %v1097_v22 = vld [vmem:[#allocation2 + $0x2e] sm:$0x1] }
  0x3d   :  { %3501 = vmatmul.msk.bf16.vlgmr.msrb.gmra.mxu2 %vm32_vm0, %v176_v63  ;;  %3502 = vmatmul.msk.bf16.vlgmr.msrb.gmra.mxu3 %vm32_vm0, %v176_v63  ;;  %v622_v63 = vld [vmem:[#allocation2 + $0x3] sm:$0x1] }
  0x3e   :  { %3537 = vmatmul.msk.bf16.vlgmr.msrb.gmra.mxu0 %vm32_vm0, %v4609_v25  ;;  %3538 = vmatmul.msk.bf16.vlgmr.msrb.gmra.mxu1 %vm32_vm0, %v4609_v25  ;;  %v626_v4 = vadd.f32 %v624_v0, %v622_v63  ;;  %v780_v30 = vld [vmem:[#allocation2 + $0x8] sm:$0x1]  ;;  %v782_v31 = vld [vmem:[#allocation2 + $0xc] sm:$0x1]  ;;  %v937_v7 = vld [vmem:[#allocation2 + $0x9] sm:$0x1] }
  0x3f   :  { %439 = vmatpush.bf16.msrb.mxu3 %v3534_v26  ;;  %426 = vmatpush.bf16.msrb.mxu2 %v3530_v27  ;;  %v783_v26 = vld [vmem:[#allocation2 + $0x2c] sm:$0x1]  ;;  %v4271_v63 = vld [vmem:[%s5771_s1 + $0x10c] sm:$0xf0]  ;;  %v939_v8 = vld [vmem:[#allocation2 + $0xd] sm:$0x1] }
  0x40   :  { %583 = vmatpush.bf16.msrb.mxu0 %v3566_v34  ;;  %596 = vmatpush.bf16.msrb.mxu1 %v3570_v37  ;;  %v628_v13 = vmul.f32 0.0625, %v626_v4  ;;  %v784_v34 = vadd.f32 %v782_v31, %v780_v30  ;;  %v3601_v37 = vld [vmem:[%s5771_s1 + $0xa0] sm:$0xf]  ;;  %v3666_v0 = vor.u32 %v4271_v63, %v3665_v62  ;;  %v938_v4 = vld [vmem:[#allocation2 + $0x29] sm:$0x1] }
  0x41   :  { %v3602_v41 = vor.u32 %v4260_v38, %v3601_v37  ;;  %v942_v6 = vadd.f32 %v940_v5, %v938_v4  ;;  %v3695_v30 = vld [vmem:[%s5771_s1 + $0x138] sm:$0xf0]  ;;  %v1094_v31 = vld [vmem:[#allocation2 + $0xa] sm:$0x1]  ;;  %v3703_v63 = vld [vmem:[%s5771_s1 + $0x140] sm:$0xf0] }
  0x42   :  { %v630_v19 = vpack.c.bf16 %v628_v13, %v628_v13  ;;  %v786_v42 = vmul.f32 0.0625, %v784_v34  ;;  %v3657_v13 = vld [vmem:[%s5771_s1 + $0xf0] sm:$0xf] }
  0x43   :  { %v944_v9 = vmul.f32 0.0625, %v942_v6  ;;  %v3658_v17 = vor.u32 %v4270_v14, %v3657_v13  ;;  %v43_v13 = vld [vmem:[#allocation2 + $0x10] sm:$0xff]  ;;  %v51_v14 = vld [vmem:[%s5770_s0 + $0x20] sm:$0xff] }
  0x44   :  { %v643_v27 = vunpack.c.l.b16 %v630_v19 }
  0x45   :  { %v946_v15 = vpack.c.bf16 %v944_v9, %v944_v9 }
  0x46   :  { %v646_v32 = vsel %vm174_vm1, %v645_v28, %v643_v27  ;;  %v4273_v27 = vld [vmem:[%s5771_s1 + $0x124] sm:$0xf] }
  0x47   :  { %v647_v39 = vpack.c.b16 %v646_v32, %v646_v32  ;;  %v959_v19 = vunpack.c.l.b16 %v946_v15  ;;  %v1096_v32 = vld [vmem:[#allocation2 + $0xe] sm:$0x1]  ;;  %v3698_v33 = vor.u32 %v4273_v27, %v3695_v30  ;;  %v1251_v27 = vld [vmem:[#allocation2 + $0xb] sm:$0x1] }
  0x48   :  { %v1098_v37 = vadd.f32 %v1096_v32, %v1094_v31  ;;  %v4283_v30 = vld [vmem:[%s5771_s1 + $0x16c] sm:$0xf0]  ;;  %v4280_v31 = vld [vmem:[%s5771_s1 + $0x15c] sm:$0xf] }
  0x49   :  { %v960_v23 = vrot.slane %v959_v19, 7  ;;  %v1252_v19 = vld [vmem:[#allocation2 + $0x2b] sm:$0x1] }
  0x4d   :  { %3535 = vmatmul.msk.bf16.vlgmr.msra.gmra.mxu2 %vm32_vm0, %v4609_v25  ;;  %3536 = vmatmul.msk.bf16.vlgmr.msra.gmra.mxu3 %vm32_vm0, %v4609_v25 }
  0x4e   :  { %3571 = vmatmul.msk.bf16.vlgmr.msra.gmra.mxu0 %vm32_vm0, %v4642_v45  ;;  %3572 = vmatmul.msk.bf16.vlgmr.msra.gmra.mxu1 %vm32_vm0, %v4642_v45 }
  0x4f   :  { %570 = vmatpush.bf16.msra.mxu3 %v3562_v46  ;;  %557 = vmatpush.bf16.msra.mxu2 %v3558_v47  ;;  %v4266_v46 = vld [vmem:[%s5771_s1 + $0xe4] sm:$0xf0]  ;;  %v788_v47 = vpack.c.bf16 %v786_v42, %v786_v42 }
  0x50   :  { %714 = vmatpush.bf16.msra.mxu0 %v3594_v53  ;;  %727 = vmatpush.bf16.msra.mxu1 %v3598_v56  ;;  %v3638_v49 = vor.u32 %v4266_v46, %v3637_v44  ;;  %v3631_v56 = vld [vmem:[%s5771_s1 + $0xe0] sm:$0xf0] }
  0x51   :  { %v801_v52 = vunpack.c.l.b16 %v788_v47  ;;  %v3634_v60 = vor.u32 %v4262_v55, %v3631_v56  ;;  %v3709_v55 = vld [vmem:[%s5771_s1 + $0x130] sm:$0xf]  ;;  %v4278_v56 = vld [vmem:[%s5771_s1 + $0x144] sm:$0xf0] }
  0x52   :  { %v3710_v57 = vor.u32 %v4278_v56, %v3709_v55 }
  0x5d   :  { %3539 = vmatmul.msk.bf16.vlgmr.msrb.gmra.mxu2 %vm32_vm0, %v4609_v25  ;;  %3540 = vmatmul.msk.bf16.vlgmr.msrb.gmra.mxu3 %vm32_vm0, %v4609_v25  ;;  %v781_v25 = vld [vmem:[#allocation2 + $0x28] sm:$0x1] }
  0x5e   :  { %3575 = vmatmul.msk.bf16.vlgmr.msrb.gmra.mxu0 %vm32_vm0, %v4642_v45  ;;  %3576 = vmatmul.msk.bf16.vlgmr.msrb.gmra.mxu1 %vm32_vm0, %v4642_v45  ;;  %v785_v29 = vadd.f32 %v783_v26, %v781_v25  ;;  %v3693_v25 = vld [vmem:[%s5771_s1 + $0x120] sm:$0xf]  ;;  %v4276_v26 = vld [vmem:[%s5771_s1 + $0x134] sm:$0xf0] }
  0x5f   :  { %701 = vmatpush.bf16.msrb.mxu3 %v3590_v11  ;;  %688 = vmatpush.bf16.msrb.mxu2 %v3586_v12  ;;  %v941_v11 = vadd.f32 %v939_v8, %v937_v7  ;;  %v3659_v12 = vld [vmem:[%s5771_s1 + $0x108] sm:$0xf0]  ;;  %v47_v7 = vld [vmem:[#allocation2 + $0x30] sm:$0xff]  ;;  %v55_v8 = vld [vmem:[%s5770_s0 + $0x60] sm:$0xff] }
  0x60   :  { %846 = vmatpush.bf16.msrb.mxu0 %v3622_v21  ;;  %859 = vmatpush.bf16.msrb.mxu1 %v3626_v24  ;;  %v787_v35 = vmul.f32 0.0625, %v785_v29  ;;  %v3662_v16 = vor.u32 %v4267_v10, %v3659_v12  ;;  %v1095_v21 = vld [vmem:[#allocation2 + $0x2a] sm:$0x1]  ;;  %v3694_v29 = vor.u32 %v4276_v26, %v3693_v25 }
  0x61   :  { %v943_v18 = vmul.f32 0.0625, %v941_v11  ;;  %v1099_v28 = vadd.f32 %v1097_v22, %v1095_v21  ;;  %v63_v11 = vadd.f32 %v55_v8, %v47_v7 }
  0x62   :  { %v789_v43 = vpack.c.bf16 %v787_v35, %v787_v35  ;;  %v4269_v35 = vld [vmem:[%s5771_s1 + $0x104] sm:$0xf] }
  0x63   :  { %v945_v20 = vpack.c.bf16 %v943_v18, %v943_v18  ;;  %v1101_v38 = vmul.f32 0.0625, %v1099_v28  ;;  %v3678_v46 = vor.u32 %v4269_v35, %v3675_v36  ;;  %72 = vst.msk [vmem:[#allocation2 + $0x30] sm:$0xff] %vm32_vm0, %v63_v11  ;;  %v1253_v28 = vld [vmem:[#allocation2 + $0xf] sm:$0x1] }
  0x64   :  { %v802_v48 = vunpack.c.l.b16 %v789_v43  ;;  %v3739_v35 = vld [vmem:[%s5771_s1 + $0x170] sm:$0xf0] }
  0x65   :  { %v958_v24 = vunpack.c.l.b16 %v945_v20  ;;  %v1254_v20 = vld [vmem:[#allocation2 + $0x2f] sm:$0x1] }
  0x66   :  { %v803_v53 = vrot.slane %v802_v48, 7  ;;  %v1256_v25 = vadd.f32 %v1254_v20, %v1252_v19 }
  0x67   :  { %v961_v34 = vsel %vm174_vm1, %v960_v23, %v958_v24 }
  0x68   :  { %v804_v54 = vsel %vm174_vm1, %v803_v53, %v801_v52  ;;  %v4826_v44 = vpack.c.b16 %v961_v34, %v961_v34 }
  0x69   :  { %v4756_v59 = vpack.c.b16 %v804_v54, %v804_v54 }
  0x6a   :  { %v80_v36 = vld [vmem:[#allocation2 + $0x30] sm:$0xff] }
  0x6d   :  { %3573 = vmatmul.msk.bf16.vlgmr.msra.gmra.mxu2 %vm32_vm0, %v4642_v45  ;;  %3574 = vmatmul.msk.bf16.vlgmr.msra.gmra.mxu3 %vm32_vm0, %v4642_v45  ;;  %v4263_v45 = vld [vmem:[%s5771_s1 + $0xd4] sm:$0xf] }
  0x6e   :  { %3609 = vmatmul.msk.bf16.vlgmr.msra.gmra.mxu0 %vm32_vm0, %v647_v39  ;;  %3610 = vmatmul.msk.bf16.vlgmr.msra.gmra.mxu1 %vm32_vm0, %v647_v39  ;;  %v3642_v51 = vor.u32 %v4263_v45, %v3639_v50  ;;  %v1103_v45 = vpack.c.bf16 %v1101_v38, %v1101_v38  ;;  %v4279_v38 = vld [vmem:[%s5771_s1 + $0x154] sm:$0xf] }
  0x6f   :  { %753 = vmatpush.bf16.msra.mxu3 %v3606_v40  ;;  %740 = vmatpush.bf16.msra.mxu2 %v3602_v41  ;;  %v4272_v40 = vld [vmem:[%s5771_s1 + $0x114] sm:$0xf0]  ;;  %v4822_v41 = vld [vmem:[%s5772_s2] sm:$0x3f]  ;;  %s3453_s2 = sshll.u32 %s5777_s7, 4  ;;  %s3454_s2 = int_to_ptr.hbm [resolvable:$true] %s3453_s2 }
  0x70   :  { %898 = vmatpush.bf16.msra.mxu0 %v3638_v49  ;;  %911 = vmatpush.bf16.msra.mxu1 %v3642_v51  ;;  %v116_v42 = vperm.slane %v4822_v41, 4  ;;  %v117_v43 = vperm.slane %v4822_v41, 5  ;;  %v1100_v49 = vmul.f32 0.0625, %v1098_v37  ;;  %v1116_v52 = vunpack.c.l.b16 %v1103_v45  ;;  %v3473_v37 = vld [vmem:[%s5770_s0 + $0x68] sm:$0xff]  ;;  %v3729_v45 = vld [vmem:[%s5771_s1 + $0x150] sm:$0xf] }
  0x71   :  { %v113_v26 = vperm.slane %v4822_v41, 1  ;;  %v114_v32 = vperm.slane %v4822_v41, 2 }
  0x72   :  { %v139_v48 = vrot.slane %v117_v43, 6  ;;  %v1102_v51 = vpack.c.bf16 %v1100_v49, %v1100_v49  ;;  %v1117_v54 = vrot.slane %v1116_v52, 7  ;;  %v3469_v43 = vld [vmem:[%s5770_s0 + $0x28] sm:$0xff] }
  0x73   :  { %v3731_v49 = vld [vmem:[%s5771_s1 + $0x168] sm:$0xf0] }
  0x74   :  { %v146_v50 = vsel %vm140_vm2, %v116_v42, %v139_v48  ;;  %v1115_v53 = vunpack.c.l.b16 %v1102_v51  ;;  %v1258_v42 = vmul.f32 0.0625, %v1256_v25  ;;  %v112_v51 = vperm.slane %v4822_v41, 0  ;;  %v4285_v25 = vld [vmem:[%s5771_s1 + $0x184] sm:$0xf] }
  0x75   :  { %150 = vst [vmem:[#allocation5 + $0x8] sm:$0xf] %v146_v50  ;;  %v4282_v50 = vld [vmem:[%s5771_s1 + $0x164] sm:$0xf0] }
  0x7c   :  { %v162_v9 = vld [vmem:[#allocation5 + $0x8] sm:$0xf] }
  0x7d   :  { %3607 = vmatmul.msk.bf16.vlgmr.msrb.gmra.mxu2 %vm32_vm0, %v647_v39  ;;  %3608 = vmatmul.msk.bf16.vlgmr.msrb.gmra.mxu3 %vm32_vm0, %v647_v39 }
  0x7e   :  { %3643 = vmatmul.msk.bf16.vlgmr.msrb.gmra.mxu0 %vm32_vm0, %v4756_v59  ;;  %3644 = vmatmul.msk.bf16.vlgmr.msrb.gmra.mxu1 %vm32_vm0, %v4756_v59 }
  0x7f   :  { %885 = vmatpush.bf16.msrb.mxu3 %v3634_v60  ;;  %872 = vmatpush.bf16.msrb.mxu2 %v3630_v61  ;;  %v1118_v60 = vsel %vm174_vm1, %v1117_v54, %v1115_v53  ;;  %v4274_v61 = vld [vmem:[%s5771_s1 + $0x12c] sm:$0xf]  ;;  %v136_v53 = vrot.slane %v113_v26, 6  ;;  %v137_v54 = vrot.slane %v114_v32, 4  ;;  %v3767_v26 = vld [vmem:[%s5771_s1 + $0x198] sm:$0xf0] }
  0x80   :  { %1029 = vmatpush.bf16.msrb.mxu0 %v3666_v0  ;;  %1042 = vmatpush.bf16.msrb.mxu1 %v3670_v3  ;;  %v3701_v0 = vld [vmem:[%s5771_s1 + $0x128] sm:$0xf]  ;;  %v4862_v2 = vpack.c.b16 %v1118_v60, %v1118_v60  ;;  %v3706_v5 = vor.u32 %v4274_v61, %v3703_v63  ;;  %v3730_v60 = vor.u32 %v4282_v50, %v3729_v45  ;;  %v4284_v32 = vld [vmem:[%s5771_s1 + $0x174] sm:$0xf0] }
  0x81   :  { %v3702_v6 = vor.u32 %v4277_v1, %v3701_v0  ;;  %v141_v1 = vsel %vm140_vm2, %v112_v51, %v136_v53 }
  0x8d   :  { %3611 = vmatmul.msk.bf16.vlgmr.msra.gmra.mxu2 %vm32_vm0, %v647_v39  ;;  %3612 = vmatmul.msk.bf16.vlgmr.msra.gmra.mxu3 %vm32_vm0, %v647_v39  ;;  %v3673_v39 = vld [vmem:[%s5771_s1 + $0x100] sm:$0xf] }
  0x8e   :  { %3647 = vmatmul.msk.bf16.vlgmr.msra.gmra.mxu0 %vm32_vm0, %v4756_v59  ;;  %3648 = vmatmul.msk.bf16.vlgmr.msra.gmra.mxu1 %vm32_vm0, %v4756_v59  ;;  %v3674_v47 = vor.u32 %v4272_v40, %v3673_v39  ;;  %v3742_v39 = vor.u32 %v4280_v31, %v3739_v35  ;;  %v1255_v40 = vadd.f32 %v1253_v28, %v1251_v27  ;;  %v3745_v31 = vld [vmem:[%s5771_s1 + $0x160] sm:$0xf]  ;;  %v4288_v35 = vld [vmem:[%s5771_s1 + $0x194] sm:$0xf0] }
  0x8f   :  { %1016 = vmatpush.bf16.msra.mxu3 %v3662_v16  ;;  %1003 = vmatpush.bf16.msra.mxu2 %v3658_v17  ;;  %v59_v16 = vadd.f32 %v51_v14, %v43_v13 }
  0x90   :  { %1160 = vmatpush.bf16.msra.mxu0 %v3694_v29  ;;  %1173 = vmatpush.bf16.msra.mxu1 %v3698_v33  ;;  %v3737_v29 = vld [vmem:[%s5771_s1 + $0x158] sm:$0xf]  ;;  %v115_v33 = vperm.slane %v4822_v41, 3  ;;  %v1257_v61 = vmul.f32 0.0625, %v1255_v40 }
  0x91   :  { %68 = vst.msk [vmem:[#allocation2 + $0x10] sm:$0xff] %vm32_vm0, %v59_v16  ;;  %v3738_v34 = vor.u32 %v4283_v30, %v3737_v29  ;;  %v3747_v30 = vld [vmem:[%s5771_s1 + $0x178] sm:$0xf0] }
  0x92   :  { %v138_v55 = vrot.slane %v115_v33, 2  ;;  %v3770_v33 = vor.u32 %v4285_v25, %v3767_v26  ;;  %v3809_v26 = vld [vmem:[%s5771_s1 + $0x1b8] sm:$0xf] }
  0x98   :  { %v76_v52 = vld [vmem:[#allocation2 + $0x10] sm:$0xff] }
  0x99   :  { %v93_v56 = vadd.f32 %v3469_v43, %v76_v52 }
  0x9b   :  { %101 = vst.msk [vmem:[#allocation2 + $0x10] sm:$0xff] %vm32_vm0, %v93_v56 }
  0x9d   :  { %3645 = vmatmul.msk.bf16.vlgmr.msrb.gmra.mxu2 %vm32_vm0, %v4756_v59  ;;  %3646 = vmatmul.msk.bf16.vlgmr.msrb.gmra.mxu3 %vm32_vm0, %v4756_v59  ;;  %v3711_v59 = vld [vmem:[%s5771_s1 + $0x148] sm:$0xf0] }
  0x9e   :  { %3681 = vmatmul.msk.bf16.vlgmr.msrb.gmra.mxu0 %vm32_vm0, %v4826_v44  ;;  %3682 = vmatmul.msk.bf16.vlgmr.msrb.gmra.mxu1 %vm32_vm0, %v4826_v44  ;;  %v3714_v62 = vor.u32 %v4275_v58, %v3711_v59  ;;  %v3734_v59 = vor.u32 %v4279_v38, %v3731_v49 }
  0x9f   :  { %1068 = vmatpush.bf16.msrb.mxu3 %v3678_v46  ;;  %1055 = vmatpush.bf16.msrb.mxu2 %v3674_v47  ;;  %v97_v46 = vadd.f32 %v3473_v37, %v80_v36 }
  0xa0   :  { %1212 = vmatpush.bf16.msrb.mxu0 %v3710_v57  ;;  %1225 = vmatpush.bf16.msrb.mxu1 %v3714_v62  ;;  %v1260_v62 = vpack.c.bf16 %v1258_v42, %v1258_v42  ;;  %v3746_v42 = vor.u32 %v4284_v32, %v3745_v31  ;;  %v4291_v31 = vld [vmem:[%s5771_s1 + $0x1b4] sm:$0xf] }
  0xa1   :  { %105 = vst.msk [vmem:[#allocation2 + $0x30] sm:$0xff] %vm32_vm0, %v97_v46 }
  0xa2   :  { %v1409_v19 = vld [vmem:[#allocation2 + $0x10] sm:$0x1]  ;;  %v1411_v20 = vld [vmem:[#allocation2 + $0x14] sm:$0x1]  ;;  %v1568_v25 = vld [vmem:[#allocation2 + $0x15] sm:$0x1] }
  0xa3   :  { %v1413_v27 = vadd.f32 %v1411_v20, %v1409_v19 }
  0xa5   :  { %v1415_v43 = vmul.f32 0.0625, %v1413_v27  ;;  %v4295_v27 = vld [vmem:[%s5771_s1 + $0x1cc] sm:$0xf0] }
  0xa7   :  { %v1417_v49 = vpack.c.bf16 %v1415_v43, %v1415_v43 }
  0xa8   :  { %v1410_v7 = vld [vmem:[#allocation2 + $0x30] sm:$0x1]  ;;  %v1412_v8 = vld [vmem:[#allocation2 + $0x34] sm:$0x1] }
  0xab   :  { %v271_v3 = vpop.f32.mrf.mxu0  ;;  %v284_v4 = vpop.f32.mrf.mxu1 }
  0xac   :  { %v297_v10 = vrot.slane %v284_v4, 6  ;;  %v1259_v4 = vpack.c.bf16 %v1257_v61, %v1257_v61  ;;  %v3775_v61 = vld [vmem:[%s5771_s1 + $0x1a0] sm:$0xf0] }
  0xad   :  { %3679 = vmatmul.msk.bf16.vlgmr.msra.gmra.mxu2 %vm32_vm0, %v4826_v44  ;;  %3680 = vmatmul.msk.bf16.vlgmr.msra.gmra.mxu3 %vm32_vm0, %v4826_v44 }
  0xae   :  { %v301_v12 = vsel %vm140_vm2, %v271_v3, %v297_v10  ;;  %3715 = vmatmul.msk.bf16.vlgmr.msra.gmra.mxu0 %vm32_vm0, %v4862_v2  ;;  %3716 = vmatmul.msk.bf16.vlgmr.msra.gmra.mxu1 %vm32_vm0, %v4862_v2  ;;  %v143_v3 = vsel %vm142_vm3, %v137_v54, %v138_v55  ;;  %v1430_v55 = vunpack.c.l.b16 %v1417_v49 }
  0xaf   :  { %v305_v15 = vadd.f32 %v301_v12, %v162_v9  ;;  %1199 = vmatpush.bf16.msra.mxu3 %v3706_v5  ;;  %1186 = vmatpush.bf16.msra.mxu2 %v3702_v6  ;;  %v1273_v5 = vunpack.c.l.b16 %v1260_v62  ;;  %v145_v11 = vsel %vm144_vm4, %v141_v1, %v143_v3  ;;  %v3773_v62 = vld [vmem:[%s5771_s1 + $0x188] sm:$0xf]  ;;  %v3781_v1 = vld [vmem:[%s5771_s1 + $0x190] sm:$0xf] }
  0xb0   :  { %v219_v17 = vpop.f32.mrf.mxu2  ;;  %v232_v18 = vpop.f32.mrf.mxu3  ;;  %1343 = vmatpush.bf16.msra.mxu0 %v3738_v34  ;;  %1356 = vmatpush.bf16.msra.mxu1 %v3742_v39  ;;  %v3765_v34 = vld [vmem:[%s5771_s1 + $0x180] sm:$0xf]  ;;  %v4290_v3 = vld [vmem:[%s5771_s1 + $0x1a4] sm:$0xf0] }
  0xb1   :  { %v294_v21 = vrot.slane %v232_v18, 6  ;;  %307 = vst [vmem:[#allocation5 + $0x8] sm:$0xf] %v305_v15  ;;  %v1272_v15 = vunpack.c.l.b16 %v1259_v4  ;;  %v1274_v16 = vrot.slane %v1273_v5, 7  ;;  %v3766_v37 = vor.u32 %v4288_v35, %v3765_v34  ;;  %v4287_v5 = vld [vmem:[%s5771_s1 + $0x194] sm:$0xf] }
  0xb2   :  { %v3782_v4 = vor.u32 %v4290_v3, %v3781_v1 }
  0xb3   :  { %v4882_v22 = vsel %vm140_vm2, %v219_v17, %v294_v21  ;;  %v273_v23 = vpop.f32.mrf.mxu0  ;;  %v286_v24 = vpop.f32.mrf.mxu1  ;;  %v1414_v17 = vadd.f32 %v1412_v8, %v1410_v7 }
  0xb4   :  { %v4281_v23 = vld [vmem:[%s5771_s1 + $0x164] sm:$0xf]  ;;  %v1275_v24 = vsel %vm174_vm1, %v1274_v16, %v1272_v15  ;;  %v1569_v15 = vld [vmem:[#allocation2 + $0x35] sm:$0x1] }
  0xb5   :  { %v1416_v28 = vmul.f32 0.0625, %v1414_v17  ;;  %v4962_v36 = vpack.c.b16 %v1275_v24, %v1275_v24  ;;  %v3750_v40 = vor.u32 %v4281_v23, %v3747_v30  ;;  %v1566_v24 = vld [vmem:[#allocation2 + $0x11] sm:$0x1]  ;;  %v3811_v30 = vld [vmem:[%s5771_s1 + $0x1d0] sm:$0xf0] }
  0xb7   :  { %v1418_v46 = vpack.c.bf16 %v1416_v28, %v1416_v28  ;;  %v4292_v28 = vld [vmem:[%s5771_s1 + $0x1bc] sm:$0xf] }
  0xb8   :  { %v221_v47 = vpop.f32.mrf.mxu2  ;;  %v234_v48 = vpop.f32.mrf.mxu3  ;;  %v319_v17 = vld [vmem:[#allocation5 + $0x8] sm:$0xf]  ;;  %v3814_v32 = vor.u32 %v4292_v28, %v3811_v30 }
  0xb9   :  { %v1431_v45 = vunpack.c.l.b16 %v1418_v46 }
  0xbb   :  { %v402_v57 = vpop.f32.mrf.mxu0  ;;  %v415_v58 = vpop.f32.mrf.mxu1  ;;  %v1432_v56 = vrot.slane %v1431_v45, 7 }
  0xbc   :  { %v452_v63 = vrot.slane %v402_v57, 4  ;;  %v453_v0 = vrot.slane %v415_v58, 2 }
  0xbd   :  { %3683 = vmatmul.msk.bf16.vlgmr.msrb.gmra.mxu2 %vm32_vm0, %v4826_v44  ;;  %3684 = vmatmul.msk.bf16.vlgmr.msrb.gmra.mxu3 %vm32_vm0, %v4826_v44 }
  0xbe   :  { %v4925_v41 = vsel %vm142_vm3, %v452_v63, %v453_v0  ;;  %3719 = vmatmul.msk.bf16.vlgmr.msrb.gmra.mxu0 %vm32_vm0, %v4862_v2  ;;  %3720 = vmatmul.msk.bf16.vlgmr.msrb.gmra.mxu1 %vm32_vm0, %v4862_v2 }
  0xbf   :  { %1330 = vmatpush.bf16.msrb.mxu3 %v3734_v59  ;;  %1317 = vmatpush.bf16.msrb.mxu2 %v3730_v60  ;;  %v1433_v59 = vsel %vm174_vm1, %v1432_v56, %v1430_v55  ;;  %v4286_v60 = vld [vmem:[%s5771_s1 + $0x18c] sm:$0xf] }
  0xc0   :  { %v245_v6 = vpop.f32.mrf.mxu2  ;;  %v258_v44 = vpop.f32.mrf.mxu3  ;;  %1488 = vmatpush.bf16.msrb.mxu1 %v3770_v33  ;;  %1475 = vmatpush.bf16.msrb.mxu0 %v3766_v37  ;;  %v1570_v33 = vadd.f32 %v1568_v25, %v1566_v24 }
  0xc1   :  { %v295_v9 = vrot.slane %v245_v6, 4  ;;  %v296_v10 = vrot.slane %v258_v44, 2  ;;  %v3783_v6 = vld [vmem:[%s5771_s1 + $0x1a8] sm:$0xf0]  ;;  %v5005_v44 = vpack.c.b16 %v1433_v59, %v1433_v59 }
  0xc2   :  { %v3786_v7 = vor.u32 %v4287_v5, %v3783_v6  ;;  %v1572_v45 = vmul.f32 0.0625, %v1570_v33  ;;  %v1723_v6 = vld [vmem:[#allocation2 + $0x12] sm:$0x1] }
  0xc3   :  { %v299_v12 = vsel %vm142_vm3, %v295_v9, %v296_v10  ;;  %v404_v13 = vpop.f32.mrf.mxu0  ;;  %v417_v14 = vpop.f32.mrf.mxu1  ;;  %v3778_v10 = vor.u32 %v4286_v60, %v3775_v61  ;;  %v1724_v60 = vld [vmem:[#allocation2 + $0x32] sm:$0x1]  ;;  %v1726_v61 = vld [vmem:[#allocation2 + $0x36] sm:$0x1] }
  0xc4   :  { %v300_v18 = vsel %vm144_vm4, %v4882_v22, %v299_v12  ;;  %v1567_v14 = vld [vmem:[#allocation2 + $0x31] sm:$0x1]  ;;  %v1574_v55 = vpack.c.bf16 %v1572_v45, %v1572_v45 }
  0xc5   :  { %v304_v21 = vadd.f32 %v300_v18, %v145_v11 }
  0xc6   :  { %v1587_v1 = vunpack.c.l.b16 %v1574_v55  ;;  %v3847_v55 = vld [vmem:[%s5771_s1 + $0x200] sm:$0xf0] }
  0xc8   :  { %v247_v22 = vpop.f32.mrf.mxu2  ;;  %v260_v29 = vpop.f32.mrf.mxu3 }
  0xc9   :  { %v3810_v29 = vor.u32 %v4295_v27, %v3809_v26 }
  0xcb   :  { %v533_v38 = vpop.f32.mrf.mxu0  ;;  %v546_v39 = vpop.f32.mrf.mxu1 }
  0xcc   :  { %v608_v47 = vrot.slane %v546_v39, 6  ;;  %v3801_v39 = vld [vmem:[%s5771_s1 + $0x1b0] sm:$0xf] }
  0xcd   :  { %3717 = vmatmul.msk.bf16.vlgmr.msra.gmra.mxu2 %vm32_vm0, %v4862_v2  ;;  %3718 = vmatmul.msk.bf16.vlgmr.msra.gmra.mxu3 %vm32_vm0, %v4862_v2 }
  0xce   :  { %v4969_v48 = vsel %vm140_vm2, %v533_v38, %v608_v47  ;;  %3753 = vmatmul.msk.bf16.vlgmr.msra.gmra.mxu0 %vm32_vm0, %v4962_v36  ;;  %3754 = vmatmul.msk.bf16.vlgmr.msra.gmra.mxu1 %vm32_vm0, %v4962_v36  ;;  %v3803_v38 = vld [vmem:[%s5771_s1 + $0x1c8] sm:$0xf0] }
  0xcf   :  { %1382 = vmatpush.bf16.msra.mxu3 %v3750_v40  ;;  %1369 = vmatpush.bf16.msra.mxu2 %v3746_v42  ;;  %v4294_v40 = vld [vmem:[%s5771_s1 + $0x1c4] sm:$0xf0]  ;;  %v3806_v47 = vor.u32 %v4291_v31, %v3803_v38 }
  0xd0   :  { %v376_v50 = vpop.f32.mrf.mxu2  ;;  %v389_v51 = vpop.f32.mrf.mxu3  ;;  %1527 = vmatpush.bf16.msra.mxu0 %v3782_v4  ;;  %1540 = vmatpush.bf16.msra.mxu1 %v3786_v7  ;;  %v3802_v49 = vor.u32 %v4294_v40, %v3801_v39  ;;  %v1728_v4 = vadd.f32 %v1726_v61, %v1724_v60  ;;  %v1725_v7 = vld [vmem:[#allocation2 + $0x16] sm:$0x1] }
  0xd1   :  { %v451_v52 = vrot.slane %v389_v51, 6 }
  0xd3   :  { %v455_v53 = vsel %vm140_vm2, %v376_v50, %v451_v52  ;;  %v535_v54 = vpop.f32.mrf.mxu0  ;;  %v548_v2 = vpop.f32.mrf.mxu1 }
  0xd4   :  { %v457_v57 = vsel %vm144_vm4, %v455_v53, %v4925_v41  ;;  %v4289_v41 = vld [vmem:[%s5771_s1 + $0x19c] sm:$0xf0] }
  0xd5   :  { %v4978_v58 = vadd.f32 %v457_v57, %v304_v21  ;;  %v3774_v11 = vor.u32 %v4289_v41, %v3773_v62  ;;  %v1571_v21 = vadd.f32 %v1569_v15, %v1567_v14  ;;  %v1727_v14 = vadd.f32 %v1725_v7, %v1723_v6  ;;  %v1881_v7 = vld [vmem:[#allocation2 + $0x33] sm:$0x1] }
  0xd6   :  { %v1730_v15 = vmul.f32 0.0625, %v1728_v4 }
  0xd7   :  { %v1573_v34 = vmul.f32 0.0625, %v1571_v21  ;;  %v1729_v28 = vmul.f32 0.0625, %v1727_v14 }
  0xd8   :  { %v378_v63 = vpop.f32.mrf.mxu2  ;;  %v391_v0 = vpop.f32.mrf.mxu3 }
  0xd9   :  { %v1575_v50 = vpack.c.bf16 %v1573_v34, %v1573_v34  ;;  %v1731_v31 = vpack.c.bf16 %v1729_v28, %v1729_v28 }
  0xdb   :  { %v585_v8 = vpop.f32.mrf.mxu0  ;;  %v598_v9 = vpop.f32.mrf.mxu1  ;;  %v1588_v56 = vunpack.c.l.b16 %v1575_v50  ;;  %v1744_v39 = vunpack.c.l.b16 %v1731_v31  ;;  %v3855_v50 = vld [vmem:[%s5771_s1 + $0x208] sm:$0xf0]  ;;  %v3470_v31 = vld [vmem:[%s5770_s0 + $0x38] sm:$0xff] }
  0xdc   :  { %v611_v22 = vrot.slane %v598_v9, 6  ;;  %v3837_v9 = vld [vmem:[%s5771_s1 + $0x1e0] sm:$0xf] }
  0xdd   :  { %3751 = vmatmul.msk.bf16.vlgmr.msrb.gmra.mxu2 %vm32_vm0, %v4962_v36  ;;  %3752 = vmatmul.msk.bf16.vlgmr.msrb.gmra.mxu3 %vm32_vm0, %v4962_v36  ;;  %v1589_v3 = vrot.slane %v1588_v56, 7  ;;  %v3845_v56 = vld [vmem:[%s5771_s1 + $0x1e8] sm:$0xf] }
  0xde   :  { %3787 = vmatmul.msk.bf16.vlgmr.msrb.gmra.mxu0 %vm32_vm0, %v5005_v44  ;;  %3788 = vmatmul.msk.bf16.vlgmr.msrb.gmra.mxu1 %vm32_vm0, %v5005_v44  ;;  %v615_v42 = vsel %vm140_vm2, %v585_v8, %v611_v22  ;;  %v1732_v22 = vpack.c.bf16 %v1730_v15, %v1730_v15  ;;  %v1880_v15 = vld [vmem:[#allocation2 + $0x13] sm:$0x1] }
  0xdf   :  { %1514 = vmatpush.bf16.msrb.mxu3 %v3778_v10  ;;  %1501 = vmatpush.bf16.msrb.mxu2 %v3774_v11  ;;  %v4300_v10 = vld [vmem:[%s5771_s1 + $0x1f4] sm:$0xf0]  ;;  %v4297_v11 = vld [vmem:[%s5771_s1 + $0x1e4] sm:$0xf] }
  0xe0   :  { %v428_v12 = vpop.f32.mrf.mxu2  ;;  %v441_v13 = vpop.f32.mrf.mxu3  ;;  %1658 = vmatpush.bf16.msrb.mxu0 %v3810_v29  ;;  %1671 = vmatpush.bf16.msrb.mxu1 %v3814_v32  ;;  %v1745_v32 = vunpack.c.l.b16 %v1732_v22 }
  0xe1   :  { %v454_v16 = vrot.slane %v441_v13, 6  ;;  %v3838_v13 = vor.u32 %v4300_v10, %v3837_v9 }
  0xe2   :  { %v1746_v40 = vrot.slane %v1745_v32, 7 }
  0xe3   :  { %v458_v18 = vsel %vm140_vm2, %v428_v12, %v454_v16  ;;  %v587_v19 = vpop.f32.mrf.mxu0  ;;  %v600_v20 = vpop.f32.mrf.mxu1  ;;  %v1590_v12 = vsel %vm174_vm1, %v1589_v3, %v1587_v1  ;;  %v44_v1 = vld [vmem:[#allocation2 + $0x18] sm:$0xff]  ;;  %v52_v3 = vld [vmem:[%s5770_s0 + $0x30] sm:$0xff] }
  0xe4   :  { %v462_v23 = vadd.f32 %v458_v18, %v319_v17  ;;  %v3819_v18 = vld [vmem:[%s5771_s1 + $0x1d8] sm:$0xf0]  ;;  %v3817_v19 = vld [vmem:[%s5771_s1 + $0x1c0] sm:$0xf]  ;;  %v4296_v20 = vld [vmem:[%s5771_s1 + $0x1d4] sm:$0xf0]  ;;  %v60_v4 = vadd.f32 %v52_v3, %v44_v1 }
  0xe5   :  { %v3818_v27 = vor.u32 %v4296_v20, %v3817_v19  ;;  %v4304_v19 = vld [vmem:[%s5771_s1 + $0x21c] sm:$0xf] }
  0xe6   :  { %464 = vst [vmem:[#allocation5 + $0x8] sm:$0xf] %v462_v23  ;;  %v5081_v23 = vpack.c.b16 %v1590_v12, %v1590_v12 }
  0xe7   :  { %69 = vst.msk [vmem:[#allocation2 + $0x18] sm:$0xff] %vm32_vm0, %v60_v4 }
  0xe8   :  { %v430_v35 = vpop.f32.mrf.mxu2  ;;  %v443_v37 = vpop.f32.mrf.mxu3 }
  0xeb   :  { %v716_v43 = vpop.f32.mrf.mxu0  ;;  %v729_v46 = vpop.f32.mrf.mxu1 }
  0xec   :  { %v766_v51 = vrot.slane %v716_v43, 4  ;;  %v767_v52 = vrot.slane %v729_v46, 2  ;;  %v3853_v46 = vld [vmem:[%s5771_s1 + $0x1f0] sm:$0xf] }
  0xed   :  { %v476_v53 = vld [vmem:[#allocation5 + $0x8] sm:$0xf]  ;;  %3755 = vmatmul.msk.bf16.vlgmr.msra.gmra.mxu2 %vm32_vm0, %v4962_v36  ;;  %3756 = vmatmul.msk.bf16.vlgmr.msra.gmra.mxu3 %vm32_vm0, %v4962_v36 }
  0xee   :  { %v619_v54 = vadd.f32 %v615_v42, %v476_v53  ;;  %v5046_v2 = vsel %vm142_vm3, %v766_v51, %v767_v52  ;;  %3791 = vmatmul.msk.bf16.vlgmr.msra.gmra.mxu0 %vm32_vm0, %v5005_v44  ;;  %3792 = vmatmul.msk.bf16.vlgmr.msra.gmra.mxu1 %vm32_vm0, %v5005_v44  ;;  %v1747_v51 = vsel %vm174_vm1, %v1746_v40, %v1744_v39  ;;  %v4298_v52 = vld [vmem:[%s5771_s1 + $0x1ec] sm:$0xf] }
  0xef   :  { %1645 = vmatpush.bf16.msra.mxu3 %v3806_v47  ;;  %1632 = vmatpush.bf16.msra.mxu2 %v3802_v49  ;;  %v4302_v47 = vld [vmem:[%s5771_s1 + $0x204] sm:$0xf0]  ;;  %v4299_v49 = vld [vmem:[%s5771_s1 + $0x1f4] sm:$0xf] }
  0xf0   :  { %621 = vst [vmem:[#allocation5 + $0x8] sm:$0xf] %v619_v54  ;;  %v559_v57 = vpop.f32.mrf.mxu2  ;;  %v572_v59 = vpop.f32.mrf.mxu3  ;;  %1789 = vmatpush.bf16.msra.mxu0 %v3838_v13  ;;  %v3854_v45 = vor.u32 %v4302_v47, %v3853_v46  ;;  %v3858_v53 = vor.u32 %v4299_v49, %v3855_v50 }
  0xf1   :  { %v609_v36 = vrot.slane %v559_v57, 4  ;;  %v610_v62 = vrot.slane %v572_v59, 2  ;;  %v4301_v57 = vld [vmem:[%s5771_s1 + $0x1fc] sm:$0xf0]  ;;  %v5124_v59 = vpack.c.b16 %v1747_v51, %v1747_v51 }
  0xf3   :  { %v613_v63 = vsel %vm142_vm3, %v609_v36, %v610_v62  ;;  %v718_v0 = vpop.f32.mrf.mxu0  ;;  %v731_v41 = vpop.f32.mrf.mxu1  ;;  %v3850_v36 = vor.u32 %v4298_v52, %v3847_v55  ;;  %v3846_v62 = vor.u32 %v4301_v57, %v3845_v56 }
  0xf4   :  { %v614_v5 = vsel %vm144_vm4, %v4969_v48, %v613_v63  ;;  %v4293_v48 = vld [vmem:[%s5771_s1 + $0x1c4] sm:$0xf]  ;;  %v56_v0 = vld [vmem:[%s5770_s0 + $0x70] sm:$0xff] }
  0xf5   :  { %v618_v8 = vadd.f32 %v614_v5, %v4978_v58  ;;  %v3839_v58 = vld [vmem:[%s5771_s1 + $0x1f8] sm:$0xf0]  ;;  %v3822_v26 = vor.u32 %v4293_v48, %v3819_v18  ;;  %v48_v63 = vld [vmem:[#allocation2 + $0x38] sm:$0xff]  ;;  %v4307_v18 = vld [vmem:[%s5771_s1 + $0x22c] sm:$0xf0] }
  0xf6   :  { %v3842_v21 = vor.u32 %v4297_v11, %v3839_v58  ;;  %v64_v41 = vadd.f32 %v56_v0, %v48_v63 }
  0xf7   :  { %v633_v10 = vld [vmem:[#allocation5 + $0x8] sm:$0xf] }
  0xf8   :  { %v561_v16 = vpop.f32.mrf.mxu2  ;;  %v574_v17 = vpop.f32.mrf.mxu3  ;;  %1802 = vmatpush.bf16.msra.mxu1 %v3842_v21  ;;  %73 = vst.msk [vmem:[#allocation2 + $0x38] sm:$0xff] %vm32_vm0, %v64_v41  ;;  %v3883_v21 = vld [vmem:[%s5771_s1 + $0x230] sm:$0xf0] }
  0xf9   :  { %v1882_v16 = vld [vmem:[#allocation2 + $0x17] sm:$0x1]  ;;  %v3881_v17 = vld [vmem:[%s5771_s1 + $0x218] sm:$0xf]  ;;  %v3886_v28 = vor.u32 %v4304_v19, %v3883_v21 }
  0xfa   :  { %v3882_v20 = vor.u32 %v4307_v18, %v3881_v17  ;;  %v1884_v22 = vadd.f32 %v1882_v16, %v1880_v15  ;;  %v3891_v15 = vld [vmem:[%s5771_s1 + $0x238] sm:$0xf0]  ;;  %v3889_v16 = vld [vmem:[%s5771_s1 + $0x220] sm:$0xf]  ;;  %v4308_v17 = vld [vmem:[%s5771_s1 + $0x234] sm:$0xf0] }
  0xfb   :  { %v848_v24 = vpop.f32.mrf.mxu0  ;;  %v861_v25 = vpop.f32.mrf.mxu1 }
  0xfc   :  { %v923_v29 = vrot.slane %v861_v25, 6  ;;  %v3474_v25 = vld [vmem:[%s5770_s0 + $0x78] sm:$0xff]  ;;  %v1886_v49 = vmul.f32 0.0625, %v1884_v22 }
  0xfd   :  { %3789 = vmatmul.msk.bf16.vlgmr.msrb.gmra.mxu2 %vm32_vm0, %v5005_v44  ;;  %3790 = vmatmul.msk.bf16.vlgmr.msrb.gmra.mxu3 %vm32_vm0, %v5005_v44 }
  0xfe   :  { %v5088_v30 = vsel %vm140_vm2, %v848_v24, %v923_v29  ;;  %3825 = vmatmul.msk.bf16.vlgmr.msrb.gmra.mxu0 %vm32_vm0, %v5081_v23  ;;  %3826 = vmatmul.msk.bf16.vlgmr.msrb.gmra.mxu1 %vm32_vm0, %v5081_v23 }
  0xff   :  { %1697 = vmatpush.bf16.msrb.mxu3 %v3822_v26  ;;  %1684 = vmatpush.bf16.msrb.mxu2 %v3818_v27  ;;  %v81_v24 = vld [vmem:[#allocation2 + $0x38] sm:$0xff]  ;;  %v4303_v26 = vld [vmem:[%s5771_s1 + $0x214] sm:$0xf]  ;;  %v3875_v27 = vld [vmem:[%s5771_s1 + $0x228] sm:$0xf0] }
 0x100   :  { %v690_v33 = vpop.f32.mrf.mxu2  ;;  %v703_v34 = vpop.f32.mrf.mxu3  ;;  %1841 = vmatpush.bf16.msrb.mxu0 %v3854_v45  ;;  %1854 = vmatpush.bf16.msrb.mxu1 %v3858_v53  ;;  %v98_v32 = vadd.f32 %v3474_v25, %v81_v24  ;;  %v3878_v46 = vor.u32 %v4303_v26, %v3875_v27  ;;  %v3890_v25 = vor.u32 %v4308_v17, %v3889_v16 }
 0x101   :  { %v765_v35 = vrot.slane %v703_v34, 6 }
 0x102   :  { %106 = vst.msk [vmem:[#allocation2 + $0x38] sm:$0xff] %vm32_vm0, %v98_v32 }
 0x103   :  { %v769_v37 = vsel %vm140_vm2, %v690_v33, %v765_v35  ;;  %v850_v38 = vpop.f32.mrf.mxu0  ;;  %v863_v44 = vpop.f32.mrf.mxu1  ;;  %v3873_v35 = vld [vmem:[%s5771_s1 + $0x210] sm:$0xf] }
 0x104   :  { %v771_v42 = vsel %vm144_vm4, %v769_v37, %v5046_v2  ;;  %v4306_v37 = vld [vmem:[%s5771_s1 + $0x224] sm:$0xf0]  ;;  %v77_v38 = vld [vmem:[#allocation2 + $0x18] sm:$0xff] }
 0x105   :  { %v5097_v43 = vadd.f32 %v771_v42, %v618_v8  ;;  %v1883_v8 = vld [vmem:[#allocation2 + $0x37] sm:$0x1]  ;;  %v94_v44 = vadd.f32 %v3470_v31, %v77_v38  ;;  %v3874_v47 = vor.u32 %v4306_v37, %v3873_v35 }
 0x106   :  { %v1885_v13 = vadd.f32 %v1883_v8, %v1881_v7  ;;  %v3909_v8 = vld [vmem:[%s5771_s1 + $0x240] sm:$0xf] }
 0x107   :  { %102 = vst.msk [vmem:[#allocation2 + $0x18] sm:$0xff] %vm32_vm0, %v94_v44 }
 0x108   :  { %v692_v54 = vpop.f32.mrf.mxu2  ;;  %v705_v2 = vpop.f32.mrf.mxu3  ;;  %v1887_v29 = vmul.f32 0.0625, %v1885_v13 }
 0x109   :  { %v1888_v2 = vpack.c.bf16 %v1886_v49, %v1886_v49 }
 0x10a   :  { %v1889_v45 = vpack.c.bf16 %v1887_v29, %v1887_v29 }
 0x10b   :  { %v900_v60 = vpop.f32.mrf.mxu0  ;;  %v913_v61 = vpop.f32.mrf.mxu1  ;;  %v1901_v41 = vunpack.c.l.b16 %v1888_v2  ;;  %v3919_v2 = vld [vmem:[%s5771_s1 + $0x260] sm:$0xf0] }
 0x10c   :  { %v926_v14 = vrot.slane %v913_v61, 6  ;;  %v1902_v55 = vunpack.c.l.b16 %v1889_v45  ;;  %v2041_v61 = vld [vmem:[#allocation2 + $0x3c] sm:$0x1]  ;;  %v3927_v45 = vld [vmem:[%s5771_s1 + $0x268] sm:$0xf0] }
 0x10d   :  { %3823 = vmatmul.msk.bf16.vlgmr.msra.gmra.mxu2 %vm32_vm0, %v5081_v23  ;;  %3824 = vmatmul.msk.bf16.vlgmr.msra.gmra.mxu3 %vm32_vm0, %v5081_v23 }
 0x10e   :  { %3859 = vmatmul.msk.bf16.vlgmr.msra.gmra.mxu0 %vm32_vm0, %v5124_v59  ;;  %3860 = vmatmul.msk.bf16.vlgmr.msra.gmra.mxu1 %vm32_vm0, %v5124_v59  ;;  %v930_v39 = vsel %vm140_vm2, %v900_v60, %v926_v14  ;;  %v2039_v60 = vld [vmem:[#allocation2 + $0x38] sm:$0x1]  ;;  %v1903_v1 = vrot.slane %v1902_v55, 7  ;;  %v3917_v55 = vld [vmem:[%s5771_s1 + $0x248] sm:$0xf] }
 0x10f   :  { %1828 = vmatpush.bf16.msra.mxu3 %v3850_v36  ;;  %1815 = vmatpush.bf16.msra.mxu2 %v3846_v62  ;;  %v2043_v3 = vadd.f32 %v2041_v61, %v2039_v60 }
 0x110   :  { %v742_v5 = vpop.f32.mrf.mxu2  ;;  %v755_v6 = vpop.f32.mrf.mxu3  ;;  %1972 = vmatpush.bf16.msra.mxu0 %v3882_v20  ;;  %1985 = vmatpush.bf16.msra.mxu1 %v3886_v28 }
 0x111   :  { %v768_v9 = vrot.slane %v755_v6, 6  ;;  %v2040_v6 = vld [vmem:[#allocation2 + $0x1c] sm:$0x1]  ;;  %v2045_v13 = vmul.f32 0.0625, %v2043_v3 }
 0x113   :  { %v772_v11 = vsel %vm140_vm2, %v742_v5, %v768_v9  ;;  %v902_v12 = vpop.f32.mrf.mxu0  ;;  %v915_v48 = vpop.f32.mrf.mxu1  ;;  %v2038_v5 = vld [vmem:[#allocation2 + $0x18] sm:$0x1]  ;;  %v4312_v9 = vld [vmem:[%s5771_s1 + $0x254] sm:$0xf0]  ;;  %v2047_v27 = vpack.c.bf16 %v2045_v13, %v2045_v13  ;;  %v3955_v13 = vld [vmem:[%s5771_s1 + $0x290] sm:$0xf0] }
 0x114   :  { %v776_v58 = vadd.f32 %v772_v11, %v633_v10  ;;  %v4309_v10 = vld [vmem:[%s5771_s1 + $0x244] sm:$0xf]  ;;  %v1904_v11 = vsel %vm174_vm1, %v1903_v1, %v1901_v41  ;;  %v3910_v12 = vor.u32 %v4312_v9, %v3909_v8  ;;  %v2042_v48 = vadd.f32 %v2040_v6, %v2038_v5  ;;  %v2195_v9 = vld [vmem:[#allocation2 + $0x19] sm:$0x1] }
 0x115   :  { %v5216_v19 = vpack.c.b16 %v1904_v11, %v1904_v11  ;;  %v2060_v31 = vunpack.c.l.b16 %v2047_v27  ;;  %v2198_v41 = vld [vmem:[#allocation2 + $0x3d] sm:$0x1]  ;;  %v3953_v11 = vld [vmem:[%s5771_s1 + $0x278] sm:$0xf] }
 0x116   :  { %778 = vst [vmem:[#allocation5 + $0x8] sm:$0xf] %v776_v58  ;;  %v2044_v26 = vmul.f32 0.0625, %v2042_v48 }
 0x117   :  { %v2061_v44 = vrot.slane %v2060_v31, 7 }
 0x118   :  { %v744_v33 = vpop.f32.mrf.mxu2  ;;  %v757_v34 = vpop.f32.mrf.mxu3  ;;  %v2046_v29 = vpack.c.bf16 %v2044_v26, %v2044_v26 }
 0x11a   :  { %v2059_v38 = vunpack.c.l.b16 %v2046_v29 }
 0x11b   :  { %v1031_v40 = vpop.f32.mrf.mxu0  ;;  %v1044_v42 = vpop.f32.mrf.mxu1 }
 0x11c   :  { %v1081_v50 = vrot.slane %v1031_v40, 4  ;;  %v1082_v51 = vrot.slane %v1044_v42, 2  ;;  %v3925_v42 = vld [vmem:[%s5771_s1 + $0x250] sm:$0xf] }
 0x11d   :  { %v791_v52 = vld [vmem:[#allocation5 + $0x8] sm:$0xf]  ;;  %3827 = vmatmul.msk.bf16.vlgmr.msrb.gmra.mxu2 %vm32_vm0, %v5081_v23  ;;  %3828 = vmatmul.msk.bf16.vlgmr.msrb.gmra.mxu3 %vm32_vm0, %v5081_v23 }
 0x11e   :  { %v934_v53 = vadd.f32 %v930_v39, %v791_v52  ;;  %v5181_v54 = vsel %vm142_vm3, %v1081_v50, %v1082_v51  ;;  %3863 = vmatmul.msk.bf16.vlgmr.msrb.gmra.mxu0 %vm32_vm0, %v5124_v59  ;;  %3864 = vmatmul.msk.bf16.vlgmr.msrb.gmra.mxu1 %vm32_vm0, %v5124_v59  ;;  %v2062_v50 = vsel %vm174_vm1, %v2061_v44, %v2059_v38  ;;  %v4310_v51 = vld [vmem:[%s5771_s1 + $0x24c] sm:$0xf] }
 0x11f   :  { %1959 = vmatpush.bf16.msrb.mxu3 %v3878_v46  ;;  %1946 = vmatpush.bf16.msrb.mxu2 %v3874_v47  ;;  %v4314_v46 = vld [vmem:[%s5771_s1 + $0x264] sm:$0xf0]  ;;  %v4311_v47 = vld [vmem:[%s5771_s1 + $0x254] sm:$0xf] }
 0x120   :  { %936 = vst [vmem:[#allocation5 + $0x8] sm:$0xf] %v934_v53  ;;  %v874_v56 = vpop.f32.mrf.mxu2  ;;  %v887_v57 = vpop.f32.mrf.mxu3  ;;  %2104 = vmatpush.bf16.msrb.mxu0 %v3910_v12  ;;  %v3926_v49 = vor.u32 %v4314_v46, %v3925_v42  ;;  %v3930_v52 = vor.u32 %v4311_v47, %v3927_v45  ;;  %v4316_v12 = vld [vmem:[%s5771_s1 + $0x27c] sm:$0xf]  ;;  %v2353_v46 = vld [vmem:[#allocation2 + $0x3a] sm:$0x1] }
 0x121   :  { %v924_v23 = vrot.slane %v874_v56, 4  ;;  %v925_v36 = vrot.slane %v887_v57, 2  ;;  %v4313_v56 = vld [vmem:[%s5771_s1 + $0x25c] sm:$0xf0]  ;;  %v5259_v57 = vpack.c.b16 %v2062_v50, %v2062_v50  ;;  %v2355_v47 = vld [vmem:[#allocation2 + $0x3e] sm:$0x1] }
 0x123   :  { %v928_v62 = vsel %vm142_vm3, %v924_v23, %v925_v36  ;;  %v1033_v63 = vpop.f32.mrf.mxu0  ;;  %v1046_v0 = vpop.f32.mrf.mxu1  ;;  %v3922_v23 = vor.u32 %v4310_v51, %v3919_v2  ;;  %v3918_v36 = vor.u32 %v4313_v56, %v3917_v55  ;;  %v2352_v55 = vld [vmem:[#allocation2 + $0x1a] sm:$0x1]  ;;  %v2354_v56 = vld [vmem:[#allocation2 + $0x1e] sm:$0x1] }
 0x124   :  { %v929_v4 = vsel %vm144_vm4, %v5088_v30, %v928_v62  ;;  %v4305_v30 = vld [vmem:[%s5771_s1 + $0x224] sm:$0xf]  ;;  %v2196_v0 = vld [vmem:[#allocation2 + $0x39] sm:$0x1] }
 0x125   :  { %v933_v7 = vadd.f32 %v929_v4, %v5097_v43  ;;  %v3911_v43 = vld [vmem:[%s5771_s1 + $0x258] sm:$0xf0]  ;;  %v3894_v24 = vor.u32 %v4305_v30, %v3891_v15  ;;  %v4319_v30 = vld [vmem:[%s5771_s1 + $0x28c] sm:$0xf0] }
 0x126   :  { %v3914_v18 = vor.u32 %v4309_v10, %v3911_v43  ;;  %v2197_v10 = vld [vmem:[#allocation2 + $0x1d] sm:$0x1]  ;;  %v3954_v48 = vor.u32 %v4319_v30, %v3953_v11 }
 0x127   :  { %v948_v3 = vld [vmem:[#allocation5 + $0x8] sm:$0xf]  ;;  %v2199_v15 = vadd.f32 %v2197_v10, %v2195_v9 }
 0x128   :  { %v876_v58 = vpop.f32.mrf.mxu2  ;;  %v889_v14 = vpop.f32.mrf.mxu3  ;;  %2117 = vmatpush.bf16.msrb.mxu1 %v3914_v18 }
 0x129   :  { %v4315_v58 = vld [vmem:[%s5771_s1 + $0x274] sm:$0xf]  ;;  %v3958_v14 = vor.u32 %v4316_v12, %v3955_v13  ;;  %v2201_v31 = vmul.f32 0.0625, %v2199_v15 }
 0x12b   :  { %v1162_v20 = vpop.f32.mrf.mxu0  ;;  %v1175_v21 = vpop.f32.mrf.mxu1  ;;  %v2203_v38 = vpack.c.bf16 %v2201_v31, %v2201_v31 }
 0x12c   :  { %v1237_v28 = vrot.slane %v1175_v21, 6  ;;  %v3945_v21 = vld [vmem:[%s5771_s1 + $0x270] sm:$0xf] }
 0x12d   :  { %3861 = vmatmul.msk.bf16.vlgmr.msra.gmra.mxu2 %vm32_vm0, %v5124_v59  ;;  %3862 = vmatmul.msk.bf16.vlgmr.msra.gmra.mxu3 %vm32_vm0, %v5124_v59 }
 0x12e   :  { %v5223_v22 = vsel %vm140_vm2, %v1162_v20, %v1237_v28  ;;  %3897 = vmatmul.msk.bf16.vlgmr.msra.gmra.mxu0 %vm32_vm0, %v5216_v19  ;;  %3898 = vmatmul.msk.bf16.vlgmr.msra.gmra.mxu1 %vm32_vm0, %v5216_v19  ;;  %v3947_v20 = vld [vmem:[%s5771_s1 + $0x288] sm:$0xf0] }
 0x12f   :  { %2011 = vmatpush.bf16.msra.mxu3 %v3894_v24  ;;  %1998 = vmatpush.bf16.msra.mxu2 %v3890_v25  ;;  %v4318_v24 = vld [vmem:[%s5771_s1 + $0x284] sm:$0xf0]  ;;  %v3950_v28 = vor.u32 %v4315_v58, %v3947_v20 }
 0x130   :  { %v1005_v32 = vpop.f32.mrf.mxu2  ;;  %v1018_v33 = vpop.f32.mrf.mxu3  ;;  %2156 = vmatpush.bf16.msra.mxu0 %v3926_v49  ;;  %2169 = vmatpush.bf16.msra.mxu1 %v3930_v52  ;;  %v3946_v29 = vor.u32 %v4318_v24, %v3945_v21  ;;  %v2216_v52 = vunpack.c.l.b16 %v2203_v38  ;;  %v3991_v38 = vld [vmem:[%s5771_s1 + $0x2c0] sm:$0xf0] }
 0x131   :  { %v1080_v34 = vrot.slane %v1018_v33, 6 }
 0x133   :  { %v1084_v35 = vsel %vm140_vm2, %v1005_v32, %v1080_v34  ;;  %v1164_v37 = vpop.f32.mrf.mxu0  ;;  %v1177_v59 = vpop.f32.mrf.mxu1 }
 0x134   :  { %v1086_v39 = vsel %vm144_vm4, %v1084_v35, %v5181_v54 }
 0x135   :  { %v5232_v40 = vadd.f32 %v1086_v39, %v933_v7  ;;  %v2200_v7 = vadd.f32 %v2198_v41, %v2196_v0  ;;  %v2356_v0 = vadd.f32 %v2354_v56, %v2352_v55 }
 0x137   :  { %v2202_v16 = vmul.f32 0.0625, %v2200_v7  ;;  %v2358_v12 = vmul.f32 0.0625, %v2356_v0  ;;  %v2511_v0 = vld [vmem:[#allocation2 + $0x1f] sm:$0x1] }
 0x138   :  { %v1007_v53 = vpop.f32.mrf.mxu2  ;;  %v1020_v54 = vpop.f32.mrf.mxu3 }
 0x139   :  { %v2204_v32 = vpack.c.bf16 %v2202_v16, %v2202_v16  ;;  %v2357_v54 = vadd.f32 %v2355_v47, %v2353_v46  ;;  %v2360_v58 = vpack.c.bf16 %v2358_v12, %v2358_v12 }
 0x13b   :  { %v1214_v60 = vpop.f32.mrf.mxu0  ;;  %v1227_v61 = vpop.f32.mrf.mxu1  ;;  %v2217_v44 = vunpack.c.l.b16 %v2204_v32  ;;  %v2359_v41 = vmul.f32 0.0625, %v2357_v54  ;;  %v2373_v21 = vunpack.c.l.b16 %v2360_v58  ;;  %v3999_v32 = vld [vmem:[%s5771_s1 + $0x2c8] sm:$0xf0] }
 0x13c   :  { %v1240_v43 = vrot.slane %v1227_v61, 6  ;;  %v3981_v61 = vld [vmem:[%s5771_s1 + $0x2a0] sm:$0xf] }
 0x13d   :  { %3895 = vmatmul.msk.bf16.vlgmr.msrb.gmra.mxu2 %vm32_vm0, %v5216_v19  ;;  %3896 = vmatmul.msk.bf16.vlgmr.msrb.gmra.mxu3 %vm32_vm0, %v5216_v19  ;;  %v2218_v53 = vrot.slane %v2217_v44, 7  ;;  %v3989_v44 = vld [vmem:[%s5771_s1 + $0x2a8] sm:$0xf] }
 0x13e   :  { %3931 = vmatmul.msk.bf16.vlgmr.msrb.gmra.mxu0 %vm32_vm0, %v5259_v57  ;;  %3932 = vmatmul.msk.bf16.vlgmr.msrb.gmra.mxu1 %vm32_vm0, %v5259_v57  ;;  %v1244_v25 = vsel %vm140_vm2, %v1214_v60, %v1240_v43  ;;  %v2361_v43 = vpack.c.bf16 %v2359_v41, %v2359_v41 }
 0x13f   :  { %2143 = vmatpush.bf16.msrb.mxu3 %v3922_v23  ;;  %2130 = vmatpush.bf16.msrb.mxu2 %v3918_v36  ;;  %v4324_v23 = vld [vmem:[%s5771_s1 + $0x2b4] sm:$0xf0]  ;;  %v4321_v36 = vld [vmem:[%s5771_s1 + $0x2a4] sm:$0xf] }
 0x140   :  { %v1057_v62 = vpop.f32.mrf.mxu2  ;;  %v1070_v63 = vpop.f32.mrf.mxu3  ;;  %2287 = vmatpush.bf16.msrb.mxu0 %v3954_v48  ;;  %2300 = vmatpush.bf16.msrb.mxu1 %v3958_v14  ;;  %v2374_v14 = vunpack.c.l.b16 %v2361_v43 }
 0x141   :  { %v1083_v1 = vrot.slane %v1070_v63, 6  ;;  %v3982_v63 = vor.u32 %v4324_v23, %v3981_v61  ;;  %v2509_v61 = vld [vmem:[#allocation2 + $0x1b] sm:$0x1]  ;;  %v4025_v23 = vld [vmem:[%s5771_s1 + $0x2d8] sm:$0xf] }
 0x142   :  { %v2375_v24 = vrot.slane %v2374_v14, 7 }
 0x143   :  { %v1087_v4 = vsel %vm140_vm2, %v1057_v62, %v1083_v1  ;;  %v1216_v5 = vpop.f32.mrf.mxu0  ;;  %v1229_v6 = vpop.f32.mrf.mxu1  ;;  %v2219_v62 = vsel %vm174_vm1, %v2218_v53, %v2216_v52  ;;  %v2510_v52 = vld [vmem:[#allocation2 + $0x3b] sm:$0x1]  ;;  %v2512_v53 = vld [vmem:[#allocation2 + $0x3f] sm:$0x1] }
 0x144   :  { %v1091_v8 = vadd.f32 %v1087_v4, %v948_v3  ;;  %v3963_v4 = vld [vmem:[%s5771_s1 + $0x298] sm:$0xf0]  ;;  %v3961_v5 = vld [vmem:[%s5771_s1 + $0x280] sm:$0xf]  ;;  %v4320_v6 = vld [vmem:[%s5771_s1 + $0x294] sm:$0xf0] }
 0x145   :  { %v3962_v30 = vor.u32 %v4320_v6, %v3961_v5  ;;  %v4019_v6 = vld [vmem:[%s5771_s1 + $0x2e8] sm:$0xf0] }
 0x146   :  { %1093 = vst [vmem:[#allocation5 + $0x8] sm:$0xf] %v1091_v8  ;;  %v5335_v8 = vpack.c.b16 %v2219_v62, %v2219_v62  ;;  %v4328_v62 = vld [vmem:[%s5771_s1 + $0x2dc] sm:$0xf] }
 0x148   :  { %v1059_v17 = vpop.f32.mrf.mxu2  ;;  %v1072_v18 = vpop.f32.mrf.mxu3 }
 0x14b   :  { %v1345_v26 = vpop.f32.mrf.mxu0  ;;  %v1358_v27 = vpop.f32.mrf.mxu1 }
 0x14c   :  { %v1395_v33 = vrot.slane %v1345_v26, 4  ;;  %v1396_v34 = vrot.slane %v1358_v27, 2  ;;  %v3997_v27 = vld [vmem:[%s5771_s1 + $0x2b0] sm:$0xf] }
 0x14d   :  { %v1105_v35 = vld [vmem:[#allocation5 + $0x8] sm:$0xf]  ;;  %3899 = vmatmul.msk.bf16.vlgmr.msra.gmra.mxu2 %vm32_vm0, %v5216_v19  ;;  %3900 = vmatmul.msk.bf16.vlgmr.msra.gmra.mxu3 %vm32_vm0, %v5216_v19 }
 0x14e   :  { %v1248_v37 = vadd.f32 %v1244_v25, %v1105_v35  ;;  %v5300_v59 = vsel %vm142_vm3, %v1395_v33, %v1396_v34  ;;  %3935 = vmatmul.msk.bf16.vlgmr.msra.gmra.mxu0 %vm32_vm0, %v5259_v57  ;;  %3936 = vmatmul.msk.bf16.vlgmr.msra.gmra.mxu1 %vm32_vm0, %v5259_v57  ;;  %v2376_v33 = vsel %vm174_vm1, %v2375_v24, %v2373_v21  ;;  %v4322_v34 = vld [vmem:[%s5771_s1 + $0x2ac] sm:$0xf] }
 0x14f   :  { %2274 = vmatpush.bf16.msra.mxu3 %v3950_v28  ;;  %2261 = vmatpush.bf16.msra.mxu2 %v3946_v29  ;;  %v4326_v28 = vld [vmem:[%s5771_s1 + $0x2c4] sm:$0xf0]  ;;  %v4323_v29 = vld [vmem:[%s5771_s1 + $0x2b4] sm:$0xf] }
 0x150   :  { %1250 = vst [vmem:[#allocation5 + $0x8] sm:$0xf] %v1248_v37  ;;  %v1188_v39 = vpop.f32.mrf.mxu2  ;;  %v1201_v42 = vpop.f32.mrf.mxu3  ;;  %2418 = vmatpush.bf16.msra.mxu0 %v3982_v63  ;;  %v3998_v31 = vor.u32 %v4326_v28, %v3997_v27  ;;  %v4002_v35 = vor.u32 %v4323_v29, %v3999_v32 }
 0x151   :  { %v1238_v19 = vrot.slane %v1188_v39, 4  ;;  %v1239_v49 = vrot.slane %v1201_v42, 2  ;;  %v4325_v39 = vld [vmem:[%s5771_s1 + $0x2bc] sm:$0xf0]  ;;  %v5378_v42 = vpack.c.b16 %v2376_v33, %v2376_v33 }
 0x153   :  { %v1242_v45 = vsel %vm142_vm3, %v1238_v19, %v1239_v49  ;;  %v1347_v50 = vpop.f32.mrf.mxu0  ;;  %v1360_v51 = vpop.f32.mrf.mxu1  ;;  %v3994_v19 = vor.u32 %v4322_v34, %v3991_v38  ;;  %v3990_v49 = vor.u32 %v4325_v39, %v3989_v44  ;;  %v4035_v39 = vld [vmem:[%s5771_s1 + $0x2f8] sm:$0xf0] }
 0x154   :  { %v1243_v2 = vsel %vm144_vm4, %v5223_v22, %v1242_v45  ;;  %v4317_v22 = vld [vmem:[%s5771_s1 + $0x284] sm:$0xf] }
 0x155   :  { %v1247_v60 = vadd.f32 %v1243_v2, %v5232_v40  ;;  %v3983_v40 = vld [vmem:[%s5771_s1 + $0x2b8] sm:$0xf0]  ;;  %v3966_v11 = vor.u32 %v4317_v22, %v3963_v4  ;;  %v2514_v22 = vadd.f32 %v2512_v53, %v2510_v52 }
 0x156   :  { %v3986_v7 = vor.u32 %v4321_v36, %v3983_v40  ;;  %v4331_v36 = vld [vmem:[%s5771_s1 + $0x2ec] sm:$0xf0]  ;;  %v4027_v40 = vld [vmem:[%s5771_s1 + $0x2f0] sm:$0xf0] }
 0x157   :  { %v1262_v54 = vld [vmem:[#allocation5 + $0x8] sm:$0xf]  ;;  %v4026_v63 = vor.u32 %v4331_v36, %v4025_v23 }
 0x158   :  { %v1190_v1 = vpop.f32.mrf.mxu2  ;;  %v1203_v3 = vpop.f32.mrf.mxu3  ;;  %2431 = vmatpush.bf16.msra.mxu1 %v3986_v7  ;;  %v4017_v7 = vld [vmem:[%s5771_s1 + $0x2d0] sm:$0xf] }
 0x159   :  { %v4327_v1 = vld [vmem:[%s5771_s1 + $0x2d4] sm:$0xf]  ;;  %v4030_v3 = vor.u32 %v4328_v62, %v4027_v40 }
 0x15b   :  { %v1477_v9 = vpop.f32.mrf.mxu0  ;;  %v1490_v10 = vpop.f32.mrf.mxu1 }
 0x15c   :  { %v1552_v48 = vrot.slane %v1490_v10, 6  ;;  %v2513_v10 = vadd.f32 %v2511_v0, %v2509_v61 }
 0x15d   :  { %3933 = vmatmul.msk.bf16.vlgmr.msrb.gmra.mxu2 %vm32_vm0, %v5259_v57  ;;  %3934 = vmatmul.msk.bf16.vlgmr.msrb.gmra.mxu3 %vm32_vm0, %v5259_v57 }
 0x15e   :  { %v5342_v13 = vsel %vm140_vm2, %v1477_v9, %v1552_v48  ;;  %3969 = vmatmul.msk.bf16.vlgmr.msrb.gmra.mxu0 %vm32_vm0, %v5335_v8  ;;  %3970 = vmatmul.msk.bf16.vlgmr.msrb.gmra.mxu1 %vm32_vm0, %v5335_v8  ;;  %v4330_v9 = vld [vmem:[%s5771_s1 + $0x2e4] sm:$0xf0]  ;;  %v4022_v48 = vor.u32 %v4327_v1, %v4019_v6 }
 0x15f   :  { %2326 = vmatpush.bf16.msrb.mxu3 %v3966_v11  ;;  %2313 = vmatpush.bf16.msrb.mxu2 %v3962_v30  ;;  %v2516_v11 = vmul.f32 0.0625, %v2514_v22  ;;  %v4018_v58 = vor.u32 %v4330_v9, %v4017_v7 }
 0x160   :  { %v1319_v15 = vpop.f32.mrf.mxu2  ;;  %v1332_v16 = vpop.f32.mrf.mxu3  ;;  %2470 = vmatpush.bf16.msrb.mxu0 %v3998_v31  ;;  %2483 = vmatpush.bf16.msrb.mxu1 %v4002_v35 }
 0x161   :  { %v1394_v17 = vrot.slane %v1332_v16, 6 }
 0x163   :  { %v1398_v18 = vsel %vm140_vm2, %v1319_v15, %v1394_v17  ;;  %v1479_v20 = vpop.f32.mrf.mxu0  ;;  %v1492_v57 = vpop.f32.mrf.mxu1  ;;  %v2515_v17 = vmul.f32 0.0625, %v2513_v10 }
 0x164   :  { %v1400_v25 = vsel %vm144_vm4, %v1398_v18, %v5300_v59  ;;  %v2518_v18 = vpack.c.bf16 %v2516_v11, %v2516_v11 }
 0x165   :  { %v5351_v26 = vadd.f32 %v1400_v25, %v1247_v60  ;;  %v2517_v28 = vpack.c.bf16 %v2515_v17, %v2515_v17 }
 0x167   :  { %v2530_v35 = vunpack.c.l.b16 %v2517_v28 }
 0x168   :  { %v1321_v37 = vpop.f32.mrf.mxu2  ;;  %v1334_v59 = vpop.f32.mrf.mxu3 }
 0x169   :  { %v4329_v59 = vld [vmem:[%s5771_s1 + $0x2e4] sm:$0xf] }
 0x16b   :  { %v1529_v46 = vpop.f32.mrf.mxu0  ;;  %v1542_v47 = vpop.f32.mrf.mxu1 }
 0x16c   :  { %v1555_v41 = vrot.slane %v1542_v47, 6 }
 0x16d   :  { %3967 = vmatmul.msk.bf16.vlgmr.msra.gmra.mxu2 %vm32_vm0, %v5335_v8  ;;  %3968 = vmatmul.msk.bf16.vlgmr.msra.gmra.mxu3 %vm32_vm0, %v5335_v8 }
 0x16e   :  { %4003 = vmatmul.msk.bf16.vlgmr.msra.gmra.mxu0 %vm32_vm0, %v5378_v42  ;;  %4004 = vmatmul.msk.bf16.vlgmr.msra.gmra.mxu1 %vm32_vm0, %v5378_v42  ;;  %v1559_v30 = vsel %vm140_vm2, %v1529_v46, %v1555_v41  ;;  %v4033_v46 = vld [vmem:[%s5771_s1 + $0x2e0] sm:$0xf] }
 0x16f   :  { %2457 = vmatpush.bf16.msra.mxu3 %v3994_v19  ;;  %2444 = vmatpush.bf16.msra.mxu2 %v3990_v49  ;;  %v4038_v49 = vor.u32 %v4329_v59, %v4035_v39 }
 0x170   :  { %v1371_v45 = vpop.f32.mrf.mxu2  ;;  %v1384_v50 = vpop.f32.mrf.mxu3  ;;  %2601 = vmatpush.bf16.msra.mxu0 %v4026_v63  ;;  %2614 = vmatpush.bf16.msra.mxu1 %v4030_v3 }
 0x171   :  { %v1397_v51 = vrot.slane %v1384_v50, 6 }
 0x173   :  { %v1401_v2 = vsel %vm140_vm2, %v1371_v45, %v1397_v51  ;;  %v1531_v55 = vpop.f32.mrf.mxu0  ;;  %v1544_v56 = vpop.f32.mrf.mxu1 }
 0x174   :  { %v1405_v60 = vadd.f32 %v1401_v2, %v1262_v54 }
 0x176   :  { %1407 = vst [vmem:[#allocation5 + $0x8] sm:$0xf] %v1405_v60 }
 0x178   :  { %v1373_v4 = vpop.f32.mrf.mxu2  ;;  %v1386_v5 = vpop.f32.mrf.mxu3 }
 0x17b   :  { %v1660_v12 = vpop.f32.mrf.mxu0  ;;  %v1673_v43 = vpop.f32.mrf.mxu1 }
 0x17c   :  { %v1710_v14 = vrot.slane %v1660_v12, 4  ;;  %v1711_v15 = vrot.slane %v1673_v43, 2 }
 0x17d   :  { %v1420_v16 = vld [vmem:[#allocation5 + $0x8] sm:$0xf]  ;;  %3971 = vmatmul.msk.bf16.vlgmr.msrb.gmra.mxu2 %vm32_vm0, %v5335_v8  ;;  %3972 = vmatmul.msk.bf16.vlgmr.msrb.gmra.mxu3 %vm32_vm0, %v5335_v8  ;;  %v2531_v8 = vunpack.c.l.b16 %v2518_v18 }
 0x17e   :  { %v1563_v20 = vadd.f32 %v1559_v30, %v1420_v16  ;;  %v1714_v57 = vsel %vm142_vm3, %v1710_v14, %v1711_v15  ;;  %4007 = vmatmul.msk.bf16.vlgmr.msrb.gmra.mxu0 %vm32_vm0, %v5378_v42  ;;  %4008 = vmatmul.msk.bf16.vlgmr.msrb.gmra.mxu1 %vm32_vm0, %v5378_v42 }
 0x17f   :  { %2588 = vmatpush.bf16.msrb.mxu3 %v4022_v48  ;;  %2575 = vmatpush.bf16.msrb.mxu2 %v4018_v58  ;;  %v2532_v37 = vrot.slane %v2531_v8, 7 }
 0x180   :  { %1565 = vst [vmem:[#allocation5 + $0x8] sm:$0xf] %v1563_v20  ;;  %v1503_v21 = vpop.f32.mrf.mxu2  ;;  %v1516_v24 = vpop.f32.mrf.mxu3 }
 0x181   :  { %v1553_v25 = vrot.slane %v1503_v21, 4  ;;  %v1554_v27 = vrot.slane %v1516_v24, 2 }
 0x183   :  { %v1557_v29 = vsel %vm142_vm3, %v1553_v25, %v1554_v27  ;;  %v1662_v31 = vpop.f32.mrf.mxu0  ;;  %v1675_v32 = vpop.f32.mrf.mxu1 }
 0x184   :  { %v1558_v33 = vsel %vm144_vm4, %v5342_v13, %v1557_v29  ;;  %v4332_v13 = vld [vmem:[%s5771_s1 + $0x2f4] sm:$0xf0]  ;;  %s3442_s1 = sshll.u32 %s5776_s6, 4  ;;  %s3443_s1 = int_to_ptr.hbm [resolvable:$true] %s3442_s1 }
 0x185   :  { %v1562_v34 = vadd.f32 %v1558_v33, %v5351_v26  ;;  %v2533_v26 = vsel %vm174_vm1, %v2532_v37, %v2530_v35  ;;  %v4034_v45 = vor.u32 %v4332_v13, %v4033_v46 }
 0x186   :  { %v2534_v51 = vpack.c.b16 %v2533_v26, %v2533_v26 }
 0x187   :  { %v1577_v41 = vld [vmem:[#allocation5 + $0x8] sm:$0xf] }
 0x188   :  { %v1505_v38 = vpop.f32.mrf.mxu2  ;;  %v1518_v44 = vpop.f32.mrf.mxu3 }
 0x18b   :  { %v1791_v47 = vpop.f32.mrf.mxu0  ;;  %v1804_v19 = vpop.f32.mrf.mxu1 }
 0x18c   :  { %v1866_v50 = vrot.slane %v1804_v19, 6 }
 0x18d   :  { %4005 = vmatmul.msk.bf16.vlgmr.msra.gmra.mxu2 %vm32_vm0, %v5378_v42  ;;  %4006 = vmatmul.msk.bf16.vlgmr.msra.gmra.mxu3 %vm32_vm0, %v5378_v42 }
 0x18e   :  { %v1870_v52 = vsel %vm140_vm2, %v1791_v47, %v1866_v50  ;;  %4041 = vmatmul.msk.bf16.vlgmr.msra.gmra.mxu0 %vm32_vm0, %v2534_v51  ;;  %4042 = vmatmul.msk.bf16.vlgmr.msra.gmra.mxu1 %vm32_vm0, %v2534_v51 }
 0x18f   :  { %2640 = vmatpush.bf16.msra.mxu3 %v4038_v49  ;;  %2627 = vmatpush.bf16.msra.mxu2 %v4034_v45 }
 0x190   :  { %v1634_v53 = vpop.f32.mrf.mxu2  ;;  %v1647_v54 = vpop.f32.mrf.mxu3 }
 0x191   :  { %v1709_v2 = vrot.slane %v1647_v54, 6 }
 0x193   :  { %v1713_v55 = vsel %vm140_vm2, %v1634_v53, %v1709_v2  ;;  %v1793_v56 = vpop.f32.mrf.mxu0  ;;  %v1806_v60 = vpop.f32.mrf.mxu1 }
 0x194   :  { %v1715_v61 = vsel %vm144_vm4, %v1713_v55, %v1714_v57 }
 0x195   :  { %v1719_v23 = vadd.f32 %v1715_v61, %v1562_v34 }
 0x198   :  { %v1636_v36 = vpop.f32.mrf.mxu2  ;;  %v1649_v42 = vpop.f32.mrf.mxu3 }
 0x19b   :  { %v1843_v62 = vpop.f32.mrf.mxu0  ;;  %v1856_v22 = vpop.f32.mrf.mxu1 }
 0x19c   :  { %v1869_v6 = vrot.slane %v1856_v22, 6 }
 0x19d   :  { %4039 = vmatmul.msk.bf16.vlgmr.msrb.gmra.mxu2 %vm32_vm0, %v2534_v51  ;;  %4040 = vmatmul.msk.bf16.vlgmr.msrb.gmra.mxu3 %vm32_vm0, %v2534_v51 }
 0x19e   :  { %v1873_v10 = vsel %vm140_vm2, %v1843_v62, %v1869_v6 }
 0x1a0   :  { %v1686_v63 = vpop.f32.mrf.mxu2  ;;  %v1699_v40 = vpop.f32.mrf.mxu3 }
 0x1a1   :  { %v1712_v0 = vrot.slane %v1699_v40, 6 }
 0x1a3   :  { %v1716_v1 = vsel %vm140_vm2, %v1686_v63, %v1712_v0  ;;  %v1845_v3 = vpop.f32.mrf.mxu0  ;;  %v1858_v4 = vpop.f32.mrf.mxu1 }
 0x1a4   :  { %v1720_v5 = vadd.f32 %v1716_v1, %v1577_v41 }
 0x1a6   :  { %1722 = vst [vmem:[#allocation5 + $0x8] sm:$0xf] %v1720_v5 }
 0x1a8   :  { %v1688_v7 = vpop.f32.mrf.mxu2  ;;  %v1701_v9 = vpop.f32.mrf.mxu3 }
 0x1ab   :  { %v1974_v11 = vpop.f32.mrf.mxu0  ;;  %v1987_v30 = vpop.f32.mrf.mxu1 }
 0x1ac   :  { %v2024_v12 = vrot.slane %v1974_v11, 4  ;;  %v2025_v43 = vrot.slane %v1987_v30, 2 }
 0x1ad   :  { %v1734_v48 = vld [vmem:[#allocation5 + $0x8] sm:$0xf]  ;;  %4043 = vmatmul.msk.bf16.vlgmr.msra.gmra.mxu2 %vm32_vm0, %v2534_v51  ;;  %4044 = vmatmul.msk.bf16.vlgmr.msra.gmra.mxu3 %vm32_vm0, %v2534_v51 }
 0x1ae   :  { %v1877_v58 = vadd.f32 %v1873_v10, %v1734_v48  ;;  %v2028_v14 = vsel %vm142_vm3, %v2024_v12, %v2025_v43 }
 0x1b0   :  { %1879 = vst [vmem:[#allocation5 + $0x8] sm:$0xf] %v1877_v58  ;;  %v1817_v15 = vpop.f32.mrf.mxu2  ;;  %v1830_v16 = vpop.f32.mrf.mxu3 }
 0x1b1   :  { %v1867_v17 = vrot.slane %v1817_v15, 4  ;;  %v1868_v18 = vrot.slane %v1830_v16, 2 }
 0x1b3   :  { %v1871_v20 = vsel %vm142_vm3, %v1867_v17, %v1868_v18  ;;  %v1976_v57 = vpop.f32.mrf.mxu0  ;;  %v1989_v21 = vpop.f32.mrf.mxu1 }
 0x1b4   :  { %v1872_v24 = vsel %vm144_vm4, %v1870_v52, %v1871_v20 }
 0x1b5   :  { %v1876_v25 = vadd.f32 %v1872_v24, %v1719_v23 }
 0x1b7   :  { %v1891_v50 = vld [vmem:[#allocation5 + $0x8] sm:$0xf] }
 0x1b8   :  { %v1819_v27 = vpop.f32.mrf.mxu2  ;;  %v1832_v28 = vpop.f32.mrf.mxu3 }
 0x1bb   :  { %v2106_v8 = vpop.f32.mrf.mxu0  ;;  %v2119_v29 = vpop.f32.mrf.mxu1 }
 0x1bc   :  { %v2181_v31 = vrot.slane %v2119_v29, 6 }
 0x1be   :  { %v2185_v32 = vsel %vm140_vm2, %v2106_v8, %v2181_v31 }
 0x1c0   :  { %v1948_v33 = vpop.f32.mrf.mxu2  ;;  %v1961_v34 = vpop.f32.mrf.mxu3 }
 0x1c1   :  { %v2023_v35 = vrot.slane %v1961_v34, 6 }
 0x1c3   :  { %v2027_v37 = vsel %vm140_vm2, %v1948_v33, %v2023_v35  ;;  %v2108_v59 = vpop.f32.mrf.mxu0  ;;  %v2121_v38 = vpop.f32.mrf.mxu1 }
 0x1c4   :  { %v2029_v44 = vsel %vm144_vm4, %v2027_v37, %v2028_v14 }
 0x1c5   :  { %v2033_v39 = vadd.f32 %v2029_v44, %v1876_v25 }
 0x1c8   :  { %v1950_v46 = vpop.f32.mrf.mxu2  ;;  %v1963_v13 = vpop.f32.mrf.mxu3 }
 0x1cb   :  { %v2158_v26 = vpop.f32.mrf.mxu0  ;;  %v2171_v47 = vpop.f32.mrf.mxu1 }
 0x1cc   :  { %v2184_v2 = vrot.slane %v2171_v47, 6 }
 0x1ce   :  { %v2188_v60 = vsel %vm140_vm2, %v2158_v26, %v2184_v2 }
 0x1d0   :  { %v2000_v19 = vpop.f32.mrf.mxu2  ;;  %v2013_v49 = vpop.f32.mrf.mxu3 }
 0x1d1   :  { %v2026_v45 = vrot.slane %v2013_v49, 6 }
 0x1d3   :  { %v2030_v51 = vsel %vm140_vm2, %v2000_v19, %v2026_v45  ;;  %v2160_v52 = vpop.f32.mrf.mxu0  ;;  %v2173_v53 = vpop.f32.mrf.mxu1 }
 0x1d4   :  { %v2034_v54 = vadd.f32 %v2030_v51, %v1891_v50 }
 0x1d6   :  { %2036 = vst [vmem:[#allocation5 + $0x8] sm:$0xf] %v2034_v54 }
 0x1d8   :  { %v2002_v55 = vpop.f32.mrf.mxu2  ;;  %v2015_v56 = vpop.f32.mrf.mxu3 }
 0x1db   :  { %v2289_v61 = vpop.f32.mrf.mxu0  ;;  %v2302_v23 = vpop.f32.mrf.mxu1 }
 0x1dc   :  { %v2339_v36 = vrot.slane %v2289_v61, 4  ;;  %v2340_v42 = vrot.slane %v2302_v23, 2 }
 0x1dd   :  { %v2049_v62 = vld [vmem:[#allocation5 + $0x8] sm:$0xf] }
 0x1de   :  { %v2192_v22 = vadd.f32 %v2188_v60, %v2049_v62  ;;  %v2343_v63 = vsel %vm142_vm3, %v2339_v36, %v2340_v42  ;;  %v4452_v36 = vmov 2.0  }
 0x1df   :  { %4385 = vrcp.f32 %v4452_v36  ;;  %v4348_v36 = vld [vmem:[%s5775_s5 + $0x78] sm:$0xff] }
 0x1e0   :  { %2194 = vst [vmem:[#allocation5 + $0x8] sm:$0xf] %v2192_v22  ;;  %v2132_v40 = vpop.f32.mrf.mxu2  ;;  %v2145_v0 = vpop.f32.mrf.mxu3  ;;  %3369 = vmatpush.bf16.msrb.mxu1 %v4348_v36  ;;  %v4342_v36 = vld [vmem:[%s5775_s5 + $0x48] sm:$0xff] }
 0x1e1   :  { %v2182_v41 = vrot.slane %v2132_v40, 4  ;;  %v2183_v1 = vrot.slane %v2145_v0, 2 }
 0x1e3   :  { %v2186_v3 = vsel %vm142_vm3, %v2182_v41, %v2183_v1  ;;  %v2291_v4 = vpop.f32.mrf.mxu0  ;;  %v2304_v5 = vpop.f32.mrf.mxu1 }
 0x1e4   :  { %v2187_v6 = vsel %vm144_vm4, %v2185_v32, %v2186_v3 }
 0x1e5   :  { %v2191_v7 = vadd.f32 %v2187_v6, %v2033_v39  ;;  %v4386_v40 = vpop.eup %4385 }
 0x1e6   :  { %v2728_v1 = vmul.f32 2.0, %v4386_v40  ;;  %vm2732_vm5 = vweird.f32 %v4386_v40 }
 0x1e7   :  { %v2206_v28 = vld [vmem:[#allocation5 + $0x8] sm:$0xf] }
 0x1e8   :  { %v2134_v9 = vpop.f32.mrf.mxu2  ;;  %v2147_v10 = vpop.f32.mrf.mxu3  ;;  %v2729_v3 = vsub.f32 1.0, %v2728_v1 }
 0x1eb   :  { %v2420_v11 = vpop.f32.mrf.mxu0  ;;  %v2433_v30 = vpop.f32.mrf.mxu1 }
 0x1ec   :  { %v2495_v51 = vrot.slane %v2433_v30, 6 }
 0x1ee   :  { %v2499_v2 = vsel %vm140_vm2, %v2420_v11, %v2495_v51 }
 0x1f0   :  { %v2263_v12 = vpop.f32.mrf.mxu2  ;;  %v2276_v43 = vpop.f32.mrf.mxu3 }
 0x1f1   :  { %v2338_v48 = vrot.slane %v2276_v43, 6 }
 0x1f3   :  { %v2342_v58 = vsel %vm140_vm2, %v2263_v12, %v2338_v48  ;;  %v2422_v14 = vpop.f32.mrf.mxu0  ;;  %v2435_v15 = vpop.f32.mrf.mxu1 }
 0x1f4   :  { %v2344_v16 = vsel %vm144_vm4, %v2342_v58, %v2343_v63 }
 0x1f5   :  { %v2348_v17 = vadd.f32 %v2344_v16, %v2191_v7  ;;  %v2730_v16 = vmul.f32 %v4386_v40, %v2729_v3  ;;  %v4338_v3 = vld [vmem:[%s5775_s5 + $0x28] sm:$0xff] }
 0x1f8   :  { %v2265_v18 = vpop.f32.mrf.mxu2  ;;  %v2278_v20 = vpop.f32.mrf.mxu3 }
 0x1fb   :  { %v2472_v57 = vpop.f32.mrf.mxu0  ;;  %v2485_v21 = vpop.f32.mrf.mxu1 }
 0x1fc   :  { %v2498_v33 = vrot.slane %v2485_v21, 6 }
 0x1fe   :  { %v2502_v37 = vsel %vm140_vm2, %v2472_v57, %v2498_v33 }
 0x200   :  { %v2315_v24 = vpop.f32.mrf.mxu2  ;;  %v2328_v25 = vpop.f32.mrf.mxu3 }
 0x201   :  { %v2341_v27 = vrot.slane %v2328_v25, 6 }
 0x203   :  { %v2345_v8 = vsel %vm140_vm2, %v2315_v24, %v2341_v27  ;;  %v2474_v29 = vpop.f32.mrf.mxu0  ;;  %v2487_v31 = vpop.f32.mrf.mxu1 }
 0x204   :  { %v2349_v32 = vadd.f32 %v2345_v8, %v2206_v28  ;;  %v2731_v31 = vadd.f32 %v4386_v40, %v2730_v16 }
 0x206   :  { %2351 = vst [vmem:[#allocation5 + $0x8] sm:$0xf] %v2349_v32 }
 0x208   :  { %v2317_v34 = vpop.f32.mrf.mxu2  ;;  %v2330_v35 = vpop.f32.mrf.mxu3 }
 0x20b   :  { %v2603_v59 = vpop.f32.mrf.mxu0  ;;  %v2616_v38 = vpop.f32.mrf.mxu1 }
 0x20c   :  { %v2653_v53 = vrot.slane %v2603_v59, 4  ;;  %v2654_v54 = vrot.slane %v2616_v38, 2 }
 0x20d   :  { %v2363_v44 = vld [vmem:[#allocation5 + $0x8] sm:$0xf] }
 0x20e   :  { %v2506_v39 = vadd.f32 %v2502_v37, %v2363_v44  ;;  %v2657_v61 = vsel %vm142_vm3, %v2653_v53, %v2654_v54 }
 0x210   :  { %2508 = vst [vmem:[#allocation5 + $0x8] sm:$0xf] %v2506_v39  ;;  %v2446_v46 = vpop.f32.mrf.mxu2  ;;  %v2459_v13 = vpop.f32.mrf.mxu3 }
 0x211   :  { %v2496_v45 = vrot.slane %v2446_v46, 4  ;;  %v2497_v50 = vrot.slane %v2459_v13, 2 }
 0x213   :  { %v2605_v26 = vpop.f32.mrf.mxu0  ;;  %v2618_v47 = vpop.f32.mrf.mxu1  ;;  %v2500_v52 = vsel %vm142_vm3, %v2496_v45, %v2497_v50 }
 0x214   :  { %v2501_v55 = vsel %vm144_vm4, %v2499_v2, %v2500_v52  ;;  %v5485_v26 = vsel %vm2732_vm5, %v4386_v40, %v2731_v31  ;;  %v4339_v40 = vld [vmem:[%s5775_s5 + $0x30] sm:$0xff]  ;;  %v4362_v31 = vld [vmem:[%s5775_s5 + $0xe8] sm:$0xff] }
 0x215   :  { %v2505_v42 = vadd.f32 %v2501_v55, %v2348_v17 }
 0x217   :  { %v2520_v29 = vld [vmem:[#allocation5 + $0x8] sm:$0xf] }
 0x218   :  { %v2448_v19 = vpop.f32.mrf.mxu2  ;;  %v2461_v49 = vpop.f32.mrf.mxu3 }
 0x220   :  { %v2577_v56 = vpop.f32.mrf.mxu2  ;;  %v2590_v60 = vpop.f32.mrf.mxu3 }
 0x221   :  { %v2652_v23 = vrot.slane %v2590_v60, 6 }
 0x223   :  { %v2656_v62 = vsel %vm140_vm2, %v2577_v56, %v2652_v23  ;;  %v4340_v23 = vld [vmem:[%s5775_s5 + $0x38] sm:$0xff] }
 0x224   :  { %v2658_v22 = vsel %vm144_vm4, %v2656_v62, %v2657_v61  ;;  %3356 = vmatpush.bf16.msrb.mxu0 %v4340_v23  ;;  %v4334_v23 = vld [vmem:[%s5775_s5 + $0x8] sm:$0xff] }
 0x225   :  { %v5476_v63 = vadd.f32 %v2658_v22, %v2505_v42 }
 0x227   :  { %2664 = vst [vmem:[#allocation5] sm:$0xff] %v5476_v63 }
 0x228   :  { %2670 = vst [vmem:[#allocation1] ss:$4 sm:$0xff] %v5476_v63  ;;  %v2579_v0 = vpop.f32.mrf.mxu2  ;;  %v2592_v41 = vpop.f32.mrf.mxu3  ;;  %3357 = vmatpush.bf16.msrb.mxu0 %v4339_v40 }
 0x229   :  { %v4347_v0 = vld [vmem:[%s5775_s5 + $0x70] sm:$0xff] }
 0x22a   :  { %3370 = vmatpush.bf16.msrb.mxu1 %v4347_v0 }
 0x22c   :  { %3358 = vmatpush.bf16.msrb.mxu0 %v4338_v3 }
 0x22f   :  { %v2673_v4 = vld.sshfl [vmem:[#allocation1] sm:$0xff pattern:$0x73625140]  ;;  %v2674_v5 = vld.sshfl [vmem:[#allocation1 + $0x8] sm:$0xff pattern:$0x73625140] }
 0x230   :  { %v2675_v6 = vld.sshfl [vmem:[#allocation1 + $0x10] sm:$0xff pattern:$0x73625140]  ;;  %v2676_v7 = vld.sshfl [vmem:[#allocation1 + $0x18] sm:$0xff pattern:$0x73625140]  ;;  %v2629_v9 = vpop.f32.mrf.mxu2  ;;  %v2642_v10 = vpop.f32.mrf.mxu3 }
 0x231   :  { %v2685_v11 = vsel %vm140_vm2, %v2673_v4, 0.0  ;;  %v2692_v30 = vsel %vm140_vm2, %v2674_v5, 0.0  ;;  %v2699_v12 = vsel %vm140_vm2, %v2675_v6, 0.0  ;;  %v2706_v43 = vsel %vm140_vm2, %v2676_v7, 0.0  ;;  %v4346_v4 = vld [vmem:[%s5775_s5 + $0x68] sm:$0xff]  ;;  %v4356_v5 = vld [vmem:[%s5775_s5 + $0xb8] sm:$0xff] }
 0x232   :  { %v2686_v48 = vrot.slane %v2685_v11, 4  ;;  %v2693_v58 = vrot.slane %v2692_v30, 4  ;;  %v2700_v14 = vrot.slane %v2699_v12, 4  ;;  %v2707_v15 = vrot.slane %v2706_v43, 4  ;;  %v4364_v6 = vld [vmem:[%s5775_s5 + $0xf8] sm:$0xff]  ;;  %3371 = vmatpush.bf16.msrb.mxu1 %v4346_v4  ;;  %3382 = vmatpush.bf16.msrb.mxu2 %v4356_v5 }
 0x233   :  { %v2655_v17 = vrot.slane %v2642_v10, 6  ;;  %3395 = vmatpush.bf16.msrb.mxu3 %v4364_v6  ;;  %v4337_v10 = vld [vmem:[%s5775_s5 + $0x20] sm:$0xff] }
 0x234   :  { %v2687_v18 = vadd.f32 %v2686_v48, %v2685_v11  ;;  %v2694_v20 = vadd.f32 %v2693_v58, %v2692_v30  ;;  %v2701_v57 = vadd.f32 %v2700_v14, %v2699_v12  ;;  %v2708_v21 = vadd.f32 %v2707_v15, %v2706_v43  ;;  %v4345_v11 = vld [vmem:[%s5775_s5 + $0x60] sm:$0xff]  ;;  %v4355_v30 = vld [vmem:[%s5775_s5 + $0xb0] sm:$0xff]  ;;  %3359 = vmatpush.bf16.msrb.mxu0 %v4337_v10 }
 0x235   :  { %v2659_v24 = vsel %vm140_vm2, %v2629_v9, %v2655_v17  ;;  %v4341_v10 = vld [vmem:[%s5775_s5 + $0x40] sm:$0xff] }
 0x236   :  { %v2688_v25 = vrot.slane %v2687_v18, 2  ;;  %v2695_v27 = vrot.slane %v2694_v20, 2  ;;  %v2702_v28 = vrot.slane %v2701_v57, 2  ;;  %v2709_v8 = vrot.slane %v2708_v21, 2  ;;  %3372 = vmatpush.bf16.msrb.mxu1 %v4345_v11  ;;  %3383 = vmatpush.bf16.msrb.mxu2 %v4355_v30  ;;  %v4351_v11 = vld [vmem:[%s5775_s5 + $0x90] sm:$0xff]  ;;  %v4372_v30 = vld [vmem:[%s5775_s5 + $0x138] sm:$0xff] }
 0x237   :  { %v2663_v32 = vadd.f32 %v2659_v24, %v2520_v29  ;;  %v4354_v29 = vld [vmem:[%s5775_s5 + $0xa8] sm:$0xff] }
 0x238   :  { %v2689_v33 = vadd.f32 %v2688_v25, %v2687_v18  ;;  %v2696_v34 = vadd.f32 %v2695_v27, %v2694_v20  ;;  %v2703_v35 = vadd.f32 %v2702_v28, %v2701_v57  ;;  %v2710_v37 = vadd.f32 %v2709_v8, %v2708_v21  ;;  %v2631_v59 = vpop.f32.mrf.mxu2  ;;  %v2644_v38 = vpop.f32.mrf.mxu3  ;;  %v4363_v57 = vld [vmem:[%s5775_s5 + $0xf0] sm:$0xff]  ;;  %v4336_v28 = vld [vmem:[%s5775_s5 + $0x18] sm:$0xff] }
 0x239   :  { %2665 = vst [vmem:[#allocation5 + $0x8] sm:$0xf] %v2663_v32  ;;  %v4344_v8 = vld [vmem:[%s5775_s5 + $0x58] sm:$0xff]  ;;  %3396 = vmatpush.bf16.msrb.mxu3 %v4363_v57  ;;  %3360 = vmatpush.bf16.msrb.mxu0 %v4336_v28  ;;  %v4379_v57 = vld [vmem:[%s5775_s5 + $0x170] sm:$0xff] }
 0x23a   :  { %v2690_v44 = vrot.slane %v2689_v33, 1  ;;  %v2697_v39 = vrot.slane %v2696_v34, 1  ;;  %v2704_v46 = vrot.slane %v2703_v35, 1  ;;  %v2711_v13 = vrot.slane %v2710_v37, 1  ;;  %3373 = vmatpush.bf16.msrb.mxu1 %v4344_v8  ;;  %3384 = vmatpush.bf16.msrb.mxu2 %v4354_v29  ;;  %v4370_v29 = vld [vmem:[%s5775_s5 + $0x128] sm:$0xff] }
 0x23c   :  { %v2691_v47 = vadd.f32 %v2690_v44, %v2689_v33  ;;  %v2698_v19 = vadd.f32 %v2697_v39, %v2696_v34  ;;  %v2705_v49 = vadd.f32 %v2704_v46, %v2703_v35  ;;  %v2712_v45 = vadd.f32 %v2711_v13, %v2710_v37  ;;  %v4335_v13 = vld [vmem:[%s5775_s5 + $0x10] sm:$0xff] }
 0x23d   :  { %3397 = vmatpush.bf16.msrb.mxu3 %v4362_v31  ;;  %3361 = vmatpush.bf16.msrb.mxu0 %v4335_v13  ;;  %v4378_v31 = vld [vmem:[%s5775_s5 + $0x168] sm:$0xff] }
 0x23e   :  { %v2735_v50 = vmul.f32 %v5485_v26, %v2698_v19  ;;  %v2736_v51 = vmul.f32 %v5485_v26, %v2705_v49  ;;  %v2737_v52 = vmul.f32 %v5485_v26, %v2712_v45  ;;  %v2734_v53 = vmul.f32 %v5485_v26, %v2691_v47  ;;  %v4343_v47 = vld [vmem:[%s5775_s5 + $0x50] sm:$0xff]  ;;  %v4353_v19 = vld [vmem:[%s5775_s5 + $0xa0] sm:$0xff] }
 0x23f   :  { %3374 = vmatpush.bf16.msrb.mxu1 %v4343_v47  ;;  %3385 = vmatpush.bf16.msrb.mxu2 %v4353_v19 }
 0x240   :  { %v2746_v54 = vrot.slane %v2735_v50, 6  ;;  %v2747_v2 = vrot.slane %v2736_v51, 4  ;;  %v2748_v55 = vrot.slane %v2737_v52, 2  ;;  %v5491_v56 = vld [vmem:[#allocation5 + $0x8] sm:$0xf] }
 0x241   :  { %2672 = vst [vmem:[#allocation1 + $0x20] ss:$4 sm:$0xff] %v5491_v56  ;;  %3362 = vmatpush.bf16.msrb.mxu0 %v4334_v23 }
 0x242   :  { %v2750_v60 = vsel %vm140_vm2, %v2734_v53, %v2746_v54  ;;  %v2751_v61 = vsel %vm142_vm3, %v2747_v2, %v2748_v55  ;;  %v4361_v53 = vld [vmem:[%s5775_s5 + $0xe0] sm:$0xff] }
 0x243   :  { %v2752_v42 = vsel %vm144_vm4, %v2750_v60, %v2751_v61  ;;  %3398 = vmatpush.bf16.msrb.mxu3 %v4361_v53  ;;  %3375 = vmatpush.bf16.msrb.mxu1 %v4342_v36 }
 0x244   :  { %v5504_v62 = vsub.f32 %v5476_v63, %v2752_v42  ;;  %v4352_v42 = vld [vmem:[%s5775_s5 + $0x98] sm:$0xff] }
 0x245   :  { %3386 = vmatpush.bf16.msrb.mxu2 %v4352_v42 }
 0x246   :  { %v2758_v22 = vmul.f32 %v5504_v62, %v5504_v62 }
 0x247   :  { %3376 = vmatpush.bf16.msrb.mxu1 %v4341_v10 }
 0x248   :  { %2762 = vst [vmem:[#allocation1] ss:$4 sm:$0xff] %v2758_v22  ;;  %v2677_v41 = vld.sshfl [vmem:[#allocation1 + $0x20] sm:$0xff pattern:$0x73625140]  ;;  %v4360_v22 = vld [vmem:[%s5775_s5 + $0xd8] sm:$0xff] }
 0x249   :  { %v2678_v1 = vld.sshfl [vmem:[#allocation1 + $0x28] sm:$0xff pattern:$0x73625140]  ;;  %v2713_v63 = vsel %vm140_vm2, %v2677_v41, 0.0  ;;  %3399 = vmatpush.bf16.msrb.mxu3 %v4360_v22  ;;  %3387 = vmatpush.bf16.msrb.mxu2 %v4351_v11 }
 0x24a   :  { %v2720_v7 = vsel %vm140_vm2, %v2678_v1, 0.0  ;;  %v2714_v9 = vrot.slane %v2713_v63, 4 }
 0x24b   :  { %v2721_v12 = vrot.slane %v2720_v7, 4 }
 0x24c   :  { %v2715_v15 = vadd.f32 %v2714_v9, %v2713_v63  ;;  %v4333_v9 = vld [vmem:[%s5775_s5] sm:$0xff] }
 0x24d   :  { %v2722_v32 = vadd.f32 %v2721_v12, %v2720_v7  ;;  %v4380_v12 = vld [vmem:[%s5775_s5 + $0x178] sm:$0xff]  ;;  %3363 = vmatpush.bf16.msrb.mxu0 %v4333_v9 }
 0x24e   :  { %v2716_v59 = vrot.slane %v2715_v15, 2  ;;  %3421 = vmatpush.bf16.msra.mxu1 %v4380_v12 }
 0x24f   :  { %v2765_v43 = vld.sshfl [vmem:[#allocation1] sm:$0xff pattern:$0x73625140]  ;;  %v2766_v48 = vld.sshfl [vmem:[#allocation1 + $0x8] sm:$0xff pattern:$0x73625140] }
 0x250   :  { %v2767_v58 = vld.sshfl [vmem:[#allocation1 + $0x10] sm:$0xff pattern:$0x73625140]  ;;  %v2768_v14 = vld.sshfl [vmem:[#allocation1 + $0x18] sm:$0xff pattern:$0x73625140]  ;;  %v2717_v54 = vadd.f32 %v2716_v59, %v2715_v15 }
 0x251   :  { %v2777_v16 = vsel %vm140_vm2, %v2765_v43, 0.0  ;;  %v2784_v17 = vsel %vm140_vm2, %v2766_v48, 0.0  ;;  %v2791_v18 = vsel %vm140_vm2, %v2767_v58, 0.0  ;;  %v2798_v20 = vsel %vm140_vm2, %v2768_v14, 0.0  ;;  %v4359_v43 = vld [vmem:[%s5775_s5 + $0xd0] sm:$0xff]  ;;  %3408 = vmatpush.bf16.msra.mxu0 %v4372_v30 }
 0x252   :  { %v2778_v21 = vrot.slane %v2777_v16, 4  ;;  %v2785_v24 = vrot.slane %v2784_v17, 4  ;;  %v2792_v25 = vrot.slane %v2791_v18, 4  ;;  %v2799_v27 = vrot.slane %v2798_v20, 4  ;;  %3400 = vmatpush.bf16.msrb.mxu3 %v4359_v43  ;;  %3422 = vmatpush.bf16.msra.mxu1 %v4379_v57 }
 0x253   :  { %v2723_v49 = vrot.slane %v2722_v32, 2  ;;  %v2718_v3 = vrot.slane %v2717_v54, 1 }
 0x254   :  { %v2779_v33 = vadd.f32 %v2778_v21, %v2777_v16  ;;  %v2786_v34 = vadd.f32 %v2785_v24, %v2784_v17  ;;  %v2793_v35 = vadd.f32 %v2792_v25, %v2791_v18  ;;  %v2800_v37 = vadd.f32 %v2799_v27, %v2798_v20  ;;  %v4371_v20 = vld [vmem:[%s5775_s5 + $0x130] sm:$0xff]  ;;  %v4350_v21 = vld [vmem:[%s5775_s5 + $0x88] sm:$0xff]  ;;  %v5630_v27 = vld [vmem:[%s5773_s3] sm:$0x3f]  ;;  %s4454_s3 = smov [#allocation3]  }
 0x255   :  { %v2724_v40 = vadd.f32 %v2723_v49, %v2722_v32  ;;  %v2719_v17 = vadd.f32 %v2718_v3, %v2717_v54  ;;  %v4358_v24 = vld [vmem:[%s5775_s5 + $0xc8] sm:$0xff]  ;;  %3409 = vmatpush.bf16.msra.mxu0 %v4371_v20  ;;  %v5642_v32 = vld [vmem:[%s5774_s4] sm:$0x3f]  ;;  %3388 = vmatpush.bf16.msrb.mxu2 %v4350_v21  ;;  %v2912_v59 = vperm.slane %v5630_v27, 1  ;;  %v2914_v13 = vperm.slane %v5630_v27, 3  ;;  %v4368_v3 = vld [vmem:[%s5775_s5 + $0x118] sm:$0xff] }
 0x256   :  { %v2780_v38 = vrot.slane %v2779_v33, 2  ;;  %v2787_v44 = vrot.slane %v2786_v34, 2  ;;  %v2794_v39 = vrot.slane %v2793_v35, 2  ;;  %v2801_v46 = vrot.slane %v2800_v37, 2  ;;  %3401 = vmatpush.bf16.msrb.mxu3 %v4358_v24  ;;  %3423 = vmatpush.bf16.msra.mxu1 %v4378_v31  ;;  %s3440_s10 = sshll.u32 %s4454_s3, 4  ;;  %s3441_s10 = int_to_ptr.vmem [resolvable:$true] %s3440_s10 }
 0x257   :  { %v2725_v48 = vrot.slane %v2724_v40, 1  ;;  %v2738_v28 = vmul.f32 %v5485_v26, %v2719_v17  ;;  %v2932_v49 = vperm.slane %v5642_v32, 1  ;;  %v2911_v54 = vperm.slane %v5630_v27, 0 }
 0x258   :  { %v2781_v45 = vadd.f32 %v2780_v38, %v2779_v33  ;;  %v2788_v50 = vadd.f32 %v2787_v44, %v2786_v34  ;;  %v2795_v51 = vadd.f32 %v2794_v39, %v2793_v35  ;;  %v2802_v52 = vadd.f32 %v2801_v46, %v2800_v37  ;;  %v4349_v33 = vld [vmem:[%s5775_s5 + $0x80] sm:$0xff] }
 0x259   :  { %v2726_v18 = vadd.f32 %v2725_v48, %v2724_v40  ;;  %v4357_v34 = vld [vmem:[%s5775_s5 + $0xc0] sm:$0xff]  ;;  %v2913_v46 = vperm.slane %v5630_v27, 2  ;;  %3410 = vmatpush.bf16.msra.mxu0 %v4370_v29  ;;  %3389 = vmatpush.bf16.msrb.mxu2 %v4349_v33  ;;  %v2934_v23 = vperm.slane %v5642_v32, 3  ;;  %v2919_v40 = vrot.slane %v2914_v13, 2 }
 0x25a   :  { %v2782_v2 = vrot.slane %v2781_v45, 1  ;;  %v2789_v55 = vrot.slane %v2788_v50, 1  ;;  %v2796_v60 = vrot.slane %v2795_v51, 1  ;;  %v2803_v61 = vrot.slane %v2802_v52, 1  ;;  %3402 = vmatpush.bf16.msrb.mxu3 %v4357_v34 }
 0x25b   :  { %v2739_v25 = vmul.f32 %v5485_v26, %v2726_v18  ;;  %v2918_v22 = vrot.slane %v2913_v46, 4  ;;  %v2939_v11 = vrot.slane %v2934_v23, 2 }
 0x25c   :  { %v2783_v0 = vadd.f32 %v2782_v2, %v2781_v45  ;;  %v2790_v41 = vadd.f32 %v2789_v55, %v2788_v50  ;;  %v2797_v1 = vadd.f32 %v2796_v60, %v2795_v51  ;;  %v2804_v63 = vadd.f32 %v2803_v61, %v2802_v52  ;;  %v4377_v45 = vld [vmem:[%s5775_s5 + $0x160] sm:$0xff] }
 0x25d   :  { %v2749_v8 = vrot.slane %v2739_v25, 6  ;;  %v2933_v2 = vperm.slane %v5642_v32, 2  ;;  %v2917_v61 = vrot.slane %v2912_v59, 6  ;;  %3424 = vmatpush.bf16.msra.mxu1 %v4377_v45  ;;  %v2922_v59 = vsel %vm142_vm3, %v2918_v22, %v2919_v40 }
 0x25e   :  { %v2819_v4 = vmul.f32 %v2783_v0, %v5485_v26  ;;  %v2820_v5 = vmul.f32 %v2790_v41, %v5485_v26  ;;  %v2821_v6 = vmul.f32 %v2797_v1, %v5485_v26  ;;  %v2822_v7 = vmul.f32 %v2804_v63, %v5485_v26 }
 0x25f   :  { %v2753_v35 = vsel %vm140_vm2, %v2738_v28, %v2749_v8  ;;  %v2931_v1 = vperm.slane %v5642_v32, 0  ;;  %v2937_v63 = vrot.slane %v2932_v49, 6  ;;  %v2921_v20 = vsel %vm140_vm2, %v2911_v54, %v2917_v61  ;;  %v4373_v54 = vld [vmem:[%s5775_s5 + $0x140] sm:$0xff] }
 0x260   :  { %v5602_v58 = vadd.f32 1e-05, %v2819_v4  ;;  %v5604_v14 = vadd.f32 1e-05, %v2820_v5  ;;  %v5606_v15 = vadd.f32 1e-05, %v2821_v6  ;;  %v5655_v38 = vsub.f32 %v5491_v56, %v2753_v35 }
 0x261   :  { %v5608_v16 = vadd.f32 1e-05, %v2822_v7  ;;  %v4369_v56 = vld [vmem:[%s5775_s5 + $0x120] sm:$0xff]  ;;  %v4376_v4 = vld [vmem:[%s5775_s5 + $0x158] sm:$0xff]  ;;  %v2938_v7 = vrot.slane %v2933_v2, 4 }
 0x262   :  { %4387 = vrsqrt.f32 %v5602_v58  ;;  %v2759_v50 = vmul.f32 %v5655_v38, %v5655_v38  ;;  %3411 = vmatpush.bf16.msra.mxu0 %v4369_v56  ;;  %vm2837_vm8 = vweird.f32 %v5602_v58  ;;  %vm2847_vm9 = vweird.f32 %v5604_v14  ;;  %3425 = vmatpush.bf16.msra.mxu1 %v4376_v4 }
 0x263   :  { %4389 = vrsqrt.f32 %v5604_v14  ;;  %vm2857_vm14 = vweird.f32 %v5606_v15  ;;  %vm2867_vm15 = vweird.f32 %v5608_v16  ;;  %v2942_v56 = vsel %vm142_vm3, %v2938_v7, %v2939_v11 }
 0x264   :  { %4391 = vrsqrt.f32 %v5606_v15  ;;  %2764 = vst [vmem:[#allocation1 + $0x20] ss:$4 sm:$0xff] %v2759_v50 }
 0x265   :  { %4393 = vrsqrt.f32 %v5608_v16 }
 0x266   :  { %3412 = vmatpush.bf16.msra.mxu0 %v4368_v3 }
 0x268   :  { %v5651_v37 = vpop.eup %4387 }
 0x269   :  { %v5657_v44 = vpop.eup %4389  ;;  %v2832_v39 = vmul.f32 %v5651_v37, %v5602_v58  ;;  %vm2838_vm6 = vweird.f32 %v5651_v37  ;;  %v4367_v58 = vld [vmem:[%s5775_s5 + $0x110] sm:$0xff] }
 0x26a   :  { %v5663_v47 = vpop.eup %4391  ;;  %v2842_v19 = vmul.f32 %v5657_v44, %v5604_v14  ;;  %vm2848_vm7 = vweird.f32 %v5657_v44  ;;  %vm5702_vm11 = vmor %vm2837_vm8, %vm2838_vm6  ;;  %v4375_v14 = vld [vmem:[%s5775_s5 + $0x150] sm:$0xff]  ;;  %3413 = vmatpush.bf16.msra.mxu0 %v4367_v58 }
 0x26b   :  { %v5676_v51 = vpop.eup %4393  ;;  %v2833_v52 = vmul.f32 %v5651_v37, %v2832_v39  ;;  %v2852_v53 = vmul.f32 %v5663_v47, %v5606_v15  ;;  %vm2858_vm10 = vweird.f32 %v5663_v47  ;;  %vm2849_vm13 = vmor %vm2847_vm9, %vm2848_vm7  ;;  %v2769_v57 = vld.sshfl [vmem:[#allocation1 + $0x20] sm:$0xff pattern:$0x73625140]  ;;  %v2770_v21 = vld.sshfl [vmem:[#allocation1 + $0x28] sm:$0xff pattern:$0x73625140]  ;;  %3426 = vmatpush.bf16.msra.mxu1 %v4375_v14 }
 0x26c   :  { %v2843_v55 = vmul.f32 %v5657_v44, %v2842_v19  ;;  %v2862_v60 = vmul.f32 %v5676_v51, %v5608_v16  ;;  %vm2868_vm12 = vweird.f32 %v5676_v51  ;;  %vm2859_vm0 = vmor %vm2857_vm14, %vm2858_vm10  ;;  %v2805_v28 = vsel %vm140_vm2, %v2769_v57, 0.0  ;;  %v4374_v39 = vld [vmem:[%s5775_s5 + $0x148] sm:$0xff] }
 0x26d   :  { %v2834_v36 = vmul.f32 0.5, %v2833_v52  ;;  %v2853_v42 = vmul.f32 %v5663_v47, %v2852_v53  ;;  %v2812_v8 = vsel %vm140_vm2, %v2770_v21, 0.0  ;;  %vm2869_vm1 = vmor %vm2867_vm15, %vm2868_vm12  ;;  %v2806_v16 = vrot.slane %v2805_v28, 4  ;;  %v4365_v53 = vld [vmem:[%s5775_s5 + $0x100] sm:$0xff] }
 0x26e   :  { %v2844_v0 = vmul.f32 0.5, %v2843_v55  ;;  %v2863_v41 = vmul.f32 %v5676_v51, %v2862_v60  ;;  %v2813_v31 = vrot.slane %v2812_v8, 4  ;;  %v2941_v19 = vsel %vm140_vm2, %v2931_v1, %v2937_v63 }
 0x26f   :  { %v2835_v5 = vsub.f32 1.5, %v2834_v36  ;;  %v2854_v6 = vmul.f32 0.5, %v2853_v42  ;;  %v2923_v52 = vsel %vm144_vm4, %v2921_v20, %v2922_v59  ;;  %3427 = vmatpush.bf16.msra.mxu1 %v4374_v39  ;;  %v2943_v61 = vsel %vm144_vm4, %v2941_v19, %v2942_v56 }
 0x270   :  { %v2845_v9 = vsub.f32 1.5, %v2844_v0  ;;  %v2864_v10 = vmul.f32 0.5, %v2863_v41  ;;  %v2916_v20 = vperm.slane %v5630_v27, 5  ;;  %v2936_v21 = vperm.slane %v5642_v32, 5 }
 0x271   :  { %v2855_v30 = vsub.f32 1.5, %v2854_v6  ;;  %v2836_v12 = vmul.f32 %v5651_v37, %v2835_v5 }
 0x272   :  { %v2846_v48 = vmul.f32 %v5657_v44, %v2845_v9  ;;  %v2865_v17 = vsub.f32 1.5, %v2864_v10 }
 0x273   :  { %v2856_v18 = vmul.f32 %v5663_v47, %v2855_v30  ;;  %v2840_v33 = vsel %vm5702_vm11, %v5651_v37, %v2836_v12  ;;  %v2814_v37 = vadd.f32 %v2813_v31, %v2812_v8  ;;  %3428 = vmatpush.bf16.msra.mxu1 %v4373_v54  ;;  %v2920_v8 = vrot.slane %v2916_v20, 6 }
 0x274   :  { %v2850_v24 = vsel %vm2849_vm13, %v5657_v44, %v2846_v48  ;;  %v2866_v25 = vmul.f32 %v5676_v51, %v2865_v17  ;;  %v4366_v44 = vld [vmem:[%s5775_s5 + $0x108] sm:$0xff]  ;;  %v2940_v31 = vrot.slane %v2936_v21, 6  ;;  %s4453_s5 = smov [#allocation5]  }
 0x275   :  { %v2860_v29 = vsel %vm2859_vm0, %v5663_v47, %v2856_v18  ;;  %v2897_v15 = vrot.slane %v2850_v24, 6  ;;  %v2807_v47 = vadd.f32 %v2806_v16, %v2805_v28  ;;  %v2815_v50 = vrot.slane %v2814_v37, 2  ;;  %3414 = vmatpush.bf16.msra.mxu0 %v4366_v44  ;;  %s3451_s8 = sshll.u32 %s4453_s5, 4  ;;  %s3452_s8 = int_to_ptr.vmem [resolvable:$true] %s3451_s8 }
 0x276   :  { %v2870_v34 = vsel %vm2869_vm1, %v5676_v51, %v2866_v25  ;;  %v2898_v35 = vrot.slane %v2860_v29, 4  ;;  %v2915_v28 = vperm.slane %v5630_v27, 4  ;;  %v2935_v16 = vperm.slane %v5642_v32, 4  ;;  %3456 = dma.vmem_to_hbm [thread:$0]  %s3452_s8, 192, %s3454_s2, [#allocation6]  }
 0x277   :  { %v2899_v46 = vrot.slane %v2870_v34, 2  ;;  %v2901_v13 = vsel %vm140_vm2, %v2840_v33, %v2897_v15  ;;  %v2808_v45 = vrot.slane %v2807_v47, 2  ;;  %v2816_v60 = vadd.f32 %v2815_v50, %v2814_v37 }
 0x278   :  { %v2944_v44 = vsel %vm140_vm2, %v2935_v16, %v2940_v31 }
 0x279   :  { %v2902_v49 = vsel %vm142_vm3, %v2898_v35, %v2899_v46  ;;  %v2809_v55 = vadd.f32 %v2808_v45, %v2807_v47  ;;  %v2817_v42 = vrot.slane %v2816_v60, 1  ;;  %3415 = vmatpush.bf16.msra.mxu0 %v4365_v53  ;;  %v2924_v35 = vsel %vm140_vm2, %v2915_v28, %v2920_v8 }
 0x27a   :  { %v2903_v51 = vsel %vm144_vm4, %v2901_v13, %v2902_v49 }
 0x27b   :  { %v2907_v2 = vmul.f32 %v2903_v51, %v5504_v62  ;;  %v2810_v36 = vrot.slane %v2809_v55, 1  ;;  %v2818_v0 = vadd.f32 %v2817_v42, %v2816_v60 }
 0x27d   :  { %v2927_v23 = vmul.f32 %v2923_v52, %v2907_v2  ;;  %v2811_v40 = vadd.f32 %v2810_v36, %v2809_v55  ;;  %v2824_v1 = vmul.f32 %v2818_v0, %v5485_v26 }
 0x27f   :  { %v2947_v22 = vadd.f32 %v2943_v61, %v2927_v23  ;;  %v2823_v41 = vmul.f32 %v2811_v40, %v5485_v26  ;;  %v2830_v3 = vadd.f32 1e-05, %v2824_v1 }
 0x281   :  { %2951 = vst [vmem:[#allocation1] ss:$4 sm:$0xff] %v2947_v22  ;;  %v2829_v63 = vadd.f32 1e-05, %v2823_v41  ;;  %vm2887_vm5 = vweird.f32 %v2830_v3 }
 0x283   :  { %4395 = vrsqrt.f32 %v2829_v63  ;;  %vm2877_vm7 = vweird.f32 %v2829_v63 }
 0x284   :  { %4397 = vrsqrt.f32 %v2830_v3 }
 0x288   :  { %v2954_v62 = vld.sshfl [vmem:[#allocation1] sm:$0xff pattern:$0x73625140]  ;;  %v2955_v4 = vld.sshfl [vmem:[#allocation1 + $0x8] sm:$0xff pattern:$0x73625140] }
 0x289   :  { %v2966_v5 = vpack.c.bf16 %v2954_v62, %v2954_v62  ;;  %v2967_v6 = vpack.c.bf16 %v2955_v4, %v2955_v4  ;;  %v2956_v7 = vld.sshfl [vmem:[#allocation1 + $0x10] sm:$0xff pattern:$0x73625140]  ;;  %v2957_v9 = vld.sshfl [vmem:[#allocation1 + $0x18] sm:$0xff pattern:$0x73625140]  ;;  %v4396_v30 = vpop.eup %4395 }
 0x28a   :  { %v2968_v10 = vpack.c.bf16 %v2956_v7, %v2956_v7  ;;  %v2969_v11 = vpack.c.bf16 %v2957_v9, %v2957_v9  ;;  %v4398_v12 = vpop.eup %4397  ;;  %v2872_v43 = vmul.f32 %v4396_v30, %v2829_v63  ;;  %vm2878_vm4 = vweird.f32 %v4396_v30 }
 0x28b   :  { %3364 = vmatmul.bf16.vlgmr.msrb.gmra.mxu0 %v2966_v5  ;;  %3377 = vmatmul.bf16.vlgmr.msrb.gmra.mxu1 %v2967_v6  ;;  %v2882_v26 = vmul.f32 %v4398_v12, %v2830_v3  ;;  %vm2888_vm3 = vweird.f32 %v4398_v12  ;;  %vm2879_vm8 = vmor %vm2877_vm7, %vm2878_vm4 }
 0x28c   :  { %3390 = vmatmul.bf16.vlgmr.msrb.gmra.mxu2 %v2968_v10  ;;  %3403 = vmatmul.bf16.vlgmr.msrb.gmra.mxu3 %v2969_v11  ;;  %v2873_v48 = vmul.f32 %v4396_v30, %v2872_v43  ;;  %vm2889_vm6 = vmor %vm2887_vm5, %vm2888_vm3 }
 0x28d   :  { %v2883_v17 = vmul.f32 %v4398_v12, %v2882_v26 }
 0x28e   :  { %v2874_v58 = vmul.f32 0.5, %v2873_v48 }
 0x28f   :  { %v2884_v14 = vmul.f32 0.5, %v2883_v17 }
 0x290   :  { %v2875_v18 = vsub.f32 1.5, %v2874_v58 }
 0x291   :  { %v2885_v57 = vsub.f32 1.5, %v2884_v14 }
 0x292   :  { %v2876_v24 = vmul.f32 %v4396_v30, %v2875_v18 }
 0x293   :  { %v2886_v25 = vmul.f32 %v4398_v12, %v2885_v57 }
 0x294   :  { %v2880_v33 = vsel %vm2879_vm8, %v4396_v30, %v2876_v24 }
 0x295   :  { %v2890_v29 = vsel %vm2889_vm6, %v4398_v12, %v2886_v25 }
 0x296   :  { %v2900_v15 = vrot.slane %v2890_v29, 6 }
 0x298   :  { %v2904_v34 = vsel %vm140_vm2, %v2880_v33, %v2900_v15 }
 0x299   :  { %v2908_v59 = vmul.f32 %v2904_v34, %v5655_v38 }
 0x29b   :  { %v2928_v39 = vmul.f32 %v2924_v35, %v2908_v59 }
 0x29d   :  { %v2948_v46 = vadd.f32 %v2944_v44, %v2928_v39 }
 0x29f   :  { %2953 = vst [vmem:[#allocation1 + $0x20] ss:$4 sm:$0xff] %v2948_v46 }
 0x2a6   :  { %v2958_v27 = vld.sshfl [vmem:[#allocation1 + $0x20] sm:$0xff pattern:$0x73625140]  ;;  %v2959_v13 = vld.sshfl [vmem:[#allocation1 + $0x28] sm:$0xff pattern:$0x73625140] }
 0x2a7   :  { %v2970_v47 = vpack.c.bf16 %v2958_v27, %v2958_v27  ;;  %v2971_v37 = vpack.c.bf16 %v2959_v13, %v2959_v13 }
 0x2a9   :  { %3416 = vmatmul.bf16.vlgmr.msra.gmra.mxu0 %v2970_v47  ;;  %3429 = vmatmul.bf16.vlgmr.msra.gmra.mxu1 %v2971_v37 }
 0x308   :  { %v3365_v32 = vpop.f32.mrf.mxu0  ;;  %v3378_v38 = vpop.f32.mrf.mxu1 }
 0x309   :  { %v3379_v52 = vadd.f32 %v3378_v38, %v3365_v32 }
 0x30f   :  { %v3391_v19 = vpop.f32.mrf.mxu2  ;;  %v3404_v49 = vpop.f32.mrf.mxu3 }
 0x310   :  { %v3367_v56 = vpop.f32.mrf.mxu0  ;;  %v3380_v45 = vpop.f32.mrf.mxu1  ;;  %v3392_v53 = vadd.f32 %v3391_v19, %v3379_v52 }
 0x312   :  { %v3405_v54 = vadd.f32 %v3404_v49, %v3392_v53 }
 0x317   :  { %v3393_v50 = vpop.f32.mrf.mxu2  ;;  %v3406_v51 = vpop.f32.mrf.mxu3 }
 0x326   :  { %v3417_v2 = vpop.f32.mrf.mxu0  ;;  %v3430_v55 = vpop.f32.mrf.mxu1 }
 0x327   :  { %v3418_v60 = vadd.f32 %v3417_v2, %v3405_v54 }
 0x329   :  { %v3431_v61 = vadd.f32 %v3430_v55, %v3418_v60 }
 0x32b   :  { %3434 = vst [vmem:[#allocation3] sm:$0x3] %v3431_v61 }
 0x32c   :  { %3445 = dma.vmem_to_hbm [thread:$0]  %s3441_s10, 32, %s3443_s1, [#allocation4]  }
 0x32e   :  { %v3419_v23 = vpop.f32.mrf.mxu0  ;;  %v3432_v36 = vpop.f32.mrf.mxu1 }
 0x32f   :  { %4447 = dma.done.wait [#allocation4], 32  }
 0x330   :  { %4448 = vsyncadd [#allocation4], 4294967264 }
 0x331   :  { %4449 = dma.done.wait [#allocation6], 192  }
 0x332   :  { %4450 = vsyncadd [#allocation6], 4294967104 }
 0x333   :  { %3465 = vsyncpa [#allocation4], 1 }
 0x334   :  { %3466 = vsyncpa [#allocation6], 1 }

</bundles_post_ra>
